<compile_context>
chip_gen: v7x
topology: tpu7x:2x2x1
jax: 0.10.0
libtpu: 0.0.40
codegen_flags: <defaults>
</compile_context>

<pallas_src>
import jax
import jax.numpy as jnp
from jax import lax
from jax.experimental import pallas as pl
from jax.experimental.pallas import tpu as pltpu


def _round_up(x, m):
    return (x + m - 1) // m * m


def ffnn_kernel(tok_ref,   # VMEM (TB, L) int32      -- token ids (this batch tile)
                len_ref,   # VMEM (TB, 1) f32        -- true sentence lengths
                emb_ref,   # VMEM (V_pad, E_pad)     -- embedding table (resident)
                w1_ref,    # VMEM (E_pad, H_pad)     -- resident
                b1_ref,    # VMEM (1, H_pad)
                w2_ref,    # VMEM (H_pad, C_pad)
                b2_ref,    # VMEM (1, C_pad)
                out_ref):  # VMEM (TB, C_pad)
    tb = out_ref.shape[0]
    v_pad = emb_ref.shape[0]
    seq_len = tok_ref.shape[1]

    toks = tok_ref[...]                                   # (TB, L) int32, loaded once
    lengths = len_ref[...]                                # (TB, 1) f32, hoisted
    vocab_ids = lax.broadcasted_iota(jnp.int32, (tb, v_pad), 1)

    # counts[b, v] = #{ l < length_b : tok[b, l] == v }.  Pure VPU compare+add, no DMAs.
    # L is a small static constant here; for long sequences bound the loop by the tile's
    # max length instead of fully unrolling.
    counts = jnp.zeros((tb, v_pad), jnp.float32)
    for l in range(seq_len):
        tok_l = toks[:, l:l + 1]                          # (TB, 1)
        valid = lengths > jnp.float32(l)                  # mask positions past true length
        counts = counts + ((vocab_ids == tok_l) & valid).astype(jnp.float32)

    # Mean pooling fused onto the MXU: sum_l emb[tok[b,l]] == counts @ emb, then exact /len.
    x = jnp.dot(counts, emb_ref[...], preferred_element_type=jnp.float32) / lengths
    h = jnp.dot(x, w1_ref[...], preferred_element_type=jnp.float32) + b1_ref[...]
    h = jnp.maximum(h, 0.0)
    logits = jnp.dot(h, w2_ref[...], preferred_element_type=jnp.float32) + b2_ref[...]
    out_ref[...] = logits.astype(out_ref.dtype)           # lane-dense store (C_pad = 128)


def _vmem_limit_bytes():
    # ~3/4 of physical VMEM (v5e/v6e: 128 MiB, v7x: 64 MiB), capped at 100 MiB,
    # floored at 32 MiB.  Falls back to a safe value if the query is unavailable.
    try:
        cap = pltpu.get_tpu_info().vmem_capacity_bytes
    except Exception:
        cap = 64 * 1024 * 1024
    return max(32 * 1024 * 1024, min((cap * 3) // 4, 100 * 1024 * 1024))


def ffnn_forward(tokens, lengths, emb, w1, b1, w2, b2, *, batch_tile=128):
    """tokens: (B, L) int32, lengths: (B,). Returns logits (B, n_classes) f32.

    batch_tile: 128 fills the v5e MXU; 256 is preferred on v6e/v7x.
    """
    B, L = tokens.shape
    V, E = emb.shape
    H = w1.shape[1]
    C = w2.shape[1]

    TB = batch_tile
    assert TB % 8 == 0, "batch tile must be sublane-aligned (multiple of 8)"
    B_pad = _round_up(max(B, TB), TB)
    V_pad = _round_up(V, 128)
    E_pad = _round_up(E, 128)
    H_pad = _round_up(H, 128)
    C_pad = _round_up(C, 128)

    f32 = jnp.float32
    # Zero-padding contributes exactly 0 to the result (padded vocab rows are zero,
    # padded batch rows use length 1 and are sliced off).
    tok_p = jnp.zeros((B_pad, L), jnp.int32).at[:B, :].set(tokens.astype(jnp.int32))
    len_p = jnp.ones((B_pad, 1), f32).at[:B, 0].set(lengths.astype(f32))
    emb_p = jnp.zeros((V_pad, E_pad), f32).at[:V, :E].set(emb.astype(f32))
    w1_p = jnp.zeros((E_pad, H_pad), f32).at[:E, :H].set(w1.astype(f32))
    b1_p = jnp.zeros((1, H_pad), f32).at[0, :H].set(b1.astype(f32))
    w2_p = jnp.zeros((H_pad, C_pad), f32).at[:H, :C].set(w2.astype(f32))
    b2_p = jnp.zeros((1, C_pad), f32).at[0, :C].set(b2.astype(f32))

    grid = (B_pad // TB,)

    def make_call(single_buffer_weights):
        # Constant-index resident operands: single-buffer to halve their VMEM footprint.
        wkw = dict(pipeline_mode=pl.Buffered(1)) if single_buffer_weights else {}
        grid_spec = pltpu.PrefetchScalarGridSpec(
            num_scalar_prefetch=0,
            grid=grid,
            in_specs=[
                pl.BlockSpec((TB, L), lambda i: (i, 0)),                   # tokens (tiled)
                pl.BlockSpec((TB, 1), lambda i: (i, 0)),                   # lengths (tiled)
                pl.BlockSpec((V_pad, E_pad), lambda i: (0, 0), **wkw),     # emb (resident)
                pl.BlockSpec((E_pad, H_pad), lambda i: (0, 0), **wkw),     # W1
                pl.BlockSpec((1, H_pad), lambda i: (0, 0), **wkw),         # b1
                pl.BlockSpec((H_pad, C_pad), lambda i: (0, 0), **wkw),     # W2
                pl.BlockSpec((1, C_pad), lambda i: (0, 0), **wkw),         # b2
            ],
            out_specs=pl.BlockSpec((TB, C_pad), lambda i: (i, 0)),
        )
        return pl.pallas_call(
            ffnn_kernel,
            out_shape=jax.ShapeDtypeStruct((B_pad, C_pad), jnp.float32),
            grid_spec=grid_spec,
            compiler_params=pltpu.CompilerParams(
                dimension_semantics=("parallel",),        # batch tiles are independent
                vmem_limit_bytes=_vmem_limit_bytes(),
            ),
        )

    args = (tok_p, len_p, emb_p, w1_p, b1_p, w2_p, b2_p)
    try:
        out = jax.block_until_ready(make_call(True)(*args))
    except Exception:
        # This JAX/libtpu build rejects pipeline_mode=pl.Buffered(1); default buffering.
        out = jax.block_until_ready(make_call(False)(*args))

    return out[:B, :C]


if __name__ == "__main__":
    # Module hyper-parameters (small, consistent with the PyTorch __init__)
    n_classes, vocab_size, emb_dim, n_hidden = 2, 50, 32, 32
    B, L = 200, 8        # pads to 256 rows -> 2 batch tiles of 128 (exercises the grid)

    key = jax.random.PRNGKey(0)
    k_emb, k_w1, k_b1, k_w2, k_b2, k_tok, k_len = jax.random.split(key, 7)

    # Xavier-normal embedding table, row 0 (PAD) zeroed out
    xavier_std = (2.0 / (vocab_size + emb_dim)) ** 0.5
    emb = xavier_std * jax.random.normal(k_emb, (vocab_size, emb_dim), jnp.float32)
    emb = emb.at[0, :].set(0.0)

    # Linear layers stored as (in, out): y = x @ W + b
    lim1 = 1.0 / (emb_dim ** 0.5)
    w1 = jax.random.uniform(k_w1, (emb_dim, n_hidden), jnp.float32, -lim1, lim1)
    b1 = jax.random.uniform(k_b1, (n_hidden,), jnp.float32, -lim1, lim1)
    lim2 = 1.0 / (n_hidden ** 0.5)
    w2 = jax.random.uniform(k_w2, (n_hidden, n_classes), jnp.float32, -lim2, lim2)
    b2 = jax.random.uniform(k_b2, (n_classes,), jnp.float32, -lim2, lim2)

    # Synthetic batch: token ids in [1, vocab), PAD (=0) after each true length
    lengths = jax.random.randint(k_len, (B,), 1, L + 1, dtype=jnp.int32)
    tokens = jax.random.randint(k_tok, (B, L), 1, vocab_size, dtype=jnp.int32)
    pad_mask = jnp.arange(L)[None, :] < lengths[:, None]
    tokens = jnp.where(pad_mask, tokens, 0)

    logits = ffnn_forward(tokens, lengths, emb, w1, b1, w2, b2, batch_tile=128)
    logits = jax.block_until_ready(logits)

    # Pure-JAX reference of the PyTorch forward
    x_ref = emb[tokens].sum(axis=1) / lengths.astype(jnp.float32)[:, None]
    h_ref = jnp.maximum(x_ref @ w1 + b1, 0.0)
    logits_ref = h_ref @ w2 + b2

    assert logits.shape == (B, n_classes)
    max_abs_err = jnp.max(jnp.abs(logits - logits_ref))
    # tolerance covers TPU default-precision f32 matmuls on both sides
    assert jnp.allclose(logits, logits_ref, rtol=1e-2, atol=5e-3), max_abs_err
    print("KERNEL_OK")
</pallas_src>

<mosaic_0001>
module attributes {stable_mosaic.version = 11 : i64} {
  func.func @ffnn_kernel(%arg0: i32, %arg1: memref<128x8xi32, #tpu.memory_space<vmem>>, %arg2: memref<128x1xf32, #tpu.memory_space<vmem>>, %arg3: memref<128x128xf32, #tpu.memory_space<vmem>>, %arg4: memref<128x128xf32, #tpu.memory_space<vmem>>, %arg5: memref<1x128xf32, #tpu.memory_space<vmem>>, %arg6: memref<128x128xf32, #tpu.memory_space<vmem>>, %arg7: memref<1x128xf32, #tpu.memory_space<vmem>>, %arg8: memref<128x128xf32, #tpu.memory_space<vmem>>) attributes {dimension_semantics = [#tpu.dimension_semantics<parallel>], iteration_bounds = array<i64: 2>, scalar_prefetch = 0 : i64, scratch_operands = 0 : i64, tpu.core_type = #tpu.core_type<tc>, window_params = [{transform_indices = @transform_0, window_bounds = array<i64: 128, 8>}, {transform_indices = @transform_1, window_bounds = array<i64: 128, 1>}, {pipeline_mode = #tpu.pipeline_mode<synchronous>, transform_indices = @transform_2, window_bounds = array<i64: 128, 128>}, {pipeline_mode = #tpu.pipeline_mode<synchronous>, transform_indices = @transform_3, window_bounds = array<i64: 128, 128>}, {pipeline_mode = #tpu.pipeline_mode<synchronous>, transform_indices = @transform_4, window_bounds = array<i64: 1, 128>}, {pipeline_mode = #tpu.pipeline_mode<synchronous>, transform_indices = @transform_5, window_bounds = array<i64: 128, 128>}, {pipeline_mode = #tpu.pipeline_mode<synchronous>, transform_indices = @transform_6, window_bounds = array<i64: 1, 128>}, {transform_indices = @transform_7, window_bounds = array<i64: 128, 128>}]} {
    %c0 = arith.constant 0 : index
    %c0_0 = arith.constant 0 : index
    %0 = vector.load %arg1[%c0, %c0_0] : memref<128x8xi32, #tpu.memory_space<vmem>>, vector<128x8xi32>
    %c0_1 = arith.constant 0 : index
    %c0_2 = arith.constant 0 : index
    %1 = vector.load %arg2[%c0_1, %c0_2] : memref<128x1xf32, #tpu.memory_space<vmem>>, vector<128x1xf32>
    %2 = tpu.iota {dimensions = array<i32: 1>} : vector<128x128xi32>
    %cst = arith.constant 0.000000e+00 : f32
    %3 = vector.broadcast %cst : f32 to vector<128x128xf32>
    %4 = vector.extract_strided_slice %0 {offsets = [0, 0], sizes = [128, 1], strides = [1, 1]} : vector<128x8xi32> to vector<128x1xi32>
    %cst_3 = arith.constant 0.000000e+00 : f32
    %5 = vector.broadcast %cst_3 : f32 to vector<128x1xf32>
    %6 = arith.cmpf ogt, %1, %5 : vector<128x1xf32>
    %7 = vector.broadcast %4 : vector<128x1xi32> to vector<128x128xi32>
    %8 = arith.cmpi eq, %2, %7 : vector<128x128xi32>
    %9 = vector.broadcast %6 : vector<128x1xi1> to vector<128x128xi1>
    %10 = arith.andi %8, %9 : vector<128x128xi1>
    %11 = arith.extui %10 : vector<128x128xi1> to vector<128x128xi32>
    %12 = arith.sitofp %11 : vector<128x128xi32> to vector<128x128xf32>
    %13 = arith.addf %3, %12 : vector<128x128xf32>
    %14 = vector.extract_strided_slice %0 {offsets = [0, 1], sizes = [128, 1], strides = [1, 1]} : vector<128x8xi32> to vector<128x1xi32>
    %cst_4 = arith.constant 1.000000e+00 : f32
    %15 = vector.broadcast %cst_4 : f32 to vector<128x1xf32>
    %16 = arith.cmpf ogt, %1, %15 : vector<128x1xf32>
    %17 = vector.broadcast %14 : vector<128x1xi32> to vector<128x128xi32>
    %18 = arith.cmpi eq, %2, %17 : vector<128x128xi32>
    %19 = vector.broadcast %16 : vector<128x1xi1> to vector<128x128xi1>
    %20 = arith.andi %18, %19 : vector<128x128xi1>
    %21 = arith.extui %20 : vector<128x128xi1> to vector<128x128xi32>
    %22 = arith.sitofp %21 : vector<128x128xi32> to vector<128x128xf32>
    %23 = arith.addf %13, %22 : vector<128x128xf32>
    %24 = vector.extract_strided_slice %0 {offsets = [0, 2], sizes = [128, 1], strides = [1, 1]} : vector<128x8xi32> to vector<128x1xi32>
    %cst_5 = arith.constant 2.000000e+00 : f32
    %25 = vector.broadcast %cst_5 : f32 to vector<128x1xf32>
    %26 = arith.cmpf ogt, %1, %25 : vector<128x1xf32>
    %27 = vector.broadcast %24 : vector<128x1xi32> to vector<128x128xi32>
    %28 = arith.cmpi eq, %2, %27 : vector<128x128xi32>
    %29 = vector.broadcast %26 : vector<128x1xi1> to vector<128x128xi1>
    %30 = arith.andi %28, %29 : vector<128x128xi1>
    %31 = arith.extui %30 : vector<128x128xi1> to vector<128x128xi32>
    %32 = arith.sitofp %31 : vector<128x128xi32> to vector<128x128xf32>
    %33 = arith.addf %23, %32 : vector<128x128xf32>
    %34 = vector.extract_strided_slice %0 {offsets = [0, 3], sizes = [128, 1], strides = [1, 1]} : vector<128x8xi32> to vector<128x1xi32>
    %cst_6 = arith.constant 3.000000e+00 : f32
    %35 = vector.broadcast %cst_6 : f32 to vector<128x1xf32>
    %36 = arith.cmpf ogt, %1, %35 : vector<128x1xf32>
    %37 = vector.broadcast %34 : vector<128x1xi32> to vector<128x128xi32>
    %38 = arith.cmpi eq, %2, %37 : vector<128x128xi32>
    %39 = vector.broadcast %36 : vector<128x1xi1> to vector<128x128xi1>
    %40 = arith.andi %38, %39 : vector<128x128xi1>
    %41 = arith.extui %40 : vector<128x128xi1> to vector<128x128xi32>
    %42 = arith.sitofp %41 : vector<128x128xi32> to vector<128x128xf32>
    %43 = arith.addf %33, %42 : vector<128x128xf32>
    %44 = vector.extract_strided_slice %0 {offsets = [0, 4], sizes = [128, 1], strides = [1, 1]} : vector<128x8xi32> to vector<128x1xi32>
    %cst_7 = arith.constant 4.000000e+00 : f32
    %45 = vector.broadcast %cst_7 : f32 to vector<128x1xf32>
    %46 = arith.cmpf ogt, %1, %45 : vector<128x1xf32>
    %47 = vector.broadcast %44 : vector<128x1xi32> to vector<128x128xi32>
    %48 = arith.cmpi eq, %2, %47 : vector<128x128xi32>
    %49 = vector.broadcast %46 : vector<128x1xi1> to vector<128x128xi1>
    %50 = arith.andi %48, %49 : vector<128x128xi1>
    %51 = arith.extui %50 : vector<128x128xi1> to vector<128x128xi32>
    %52 = arith.sitofp %51 : vector<128x128xi32> to vector<128x128xf32>
    %53 = arith.addf %43, %52 : vector<128x128xf32>
    %54 = vector.extract_strided_slice %0 {offsets = [0, 5], sizes = [128, 1], strides = [1, 1]} : vector<128x8xi32> to vector<128x1xi32>
    %cst_8 = arith.constant 5.000000e+00 : f32
    %55 = vector.broadcast %cst_8 : f32 to vector<128x1xf32>
    %56 = arith.cmpf ogt, %1, %55 : vector<128x1xf32>
    %57 = vector.broadcast %54 : vector<128x1xi32> to vector<128x128xi32>
    %58 = arith.cmpi eq, %2, %57 : vector<128x128xi32>
    %59 = vector.broadcast %56 : vector<128x1xi1> to vector<128x128xi1>
    %60 = arith.andi %58, %59 : vector<128x128xi1>
    %61 = arith.extui %60 : vector<128x128xi1> to vector<128x128xi32>
    %62 = arith.sitofp %61 : vector<128x128xi32> to vector<128x128xf32>
    %63 = arith.addf %53, %62 : vector<128x128xf32>
    %64 = vector.extract_strided_slice %0 {offsets = [0, 6], sizes = [128, 1], strides = [1, 1]} : vector<128x8xi32> to vector<128x1xi32>
    %cst_9 = arith.constant 6.000000e+00 : f32
    %65 = vector.broadcast %cst_9 : f32 to vector<128x1xf32>
    %66 = arith.cmpf ogt, %1, %65 : vector<128x1xf32>
    %67 = vector.broadcast %64 : vector<128x1xi32> to vector<128x128xi32>
    %68 = arith.cmpi eq, %2, %67 : vector<128x128xi32>
    %69 = vector.broadcast %66 : vector<128x1xi1> to vector<128x128xi1>
    %70 = arith.andi %68, %69 : vector<128x128xi1>
    %71 = arith.extui %70 : vector<128x128xi1> to vector<128x128xi32>
    %72 = arith.sitofp %71 : vector<128x128xi32> to vector<128x128xf32>
    %73 = arith.addf %63, %72 : vector<128x128xf32>
    %74 = vector.extract_strided_slice %0 {offsets = [0, 7], sizes = [128, 1], strides = [1, 1]} : vector<128x8xi32> to vector<128x1xi32>
    %cst_10 = arith.constant 7.000000e+00 : f32
    %75 = vector.broadcast %cst_10 : f32 to vector<128x1xf32>
    %76 = arith.cmpf ogt, %1, %75 : vector<128x1xf32>
    %77 = vector.broadcast %74 : vector<128x1xi32> to vector<128x128xi32>
    %78 = arith.cmpi eq, %2, %77 : vector<128x128xi32>
    %79 = vector.broadcast %76 : vector<128x1xi1> to vector<128x128xi1>
    %80 = arith.andi %78, %79 : vector<128x128xi1>
    %81 = arith.extui %80 : vector<128x128xi1> to vector<128x128xi32>
    %82 = arith.sitofp %81 : vector<128x128xi32> to vector<128x128xf32>
    %83 = arith.addf %73, %82 : vector<128x128xf32>
    %c0_11 = arith.constant 0 : index
    %c0_12 = arith.constant 0 : index
    %84 = vector.load %arg3[%c0_11, %c0_12] : memref<128x128xf32, #tpu.memory_space<vmem>>, vector<128x128xf32>
    %cst_13 = arith.constant dense<0.000000e+00> : vector<128x128xf32>
    %85 = tpu.matmul %83, %84, %cst_13 {dimension_numbers = #tpu.dot_dimension_numbers<[1], [0], [0], [1], [0, 0, 1, 1], [], []>} : vector<128x128xf32>, vector<128x128xf32>, vector<128x128xf32> -> vector<128x128xf32>
    %86 = vector.broadcast %1 : vector<128x1xf32> to vector<128x128xf32>
    %87 = arith.divf %85, %86 : vector<128x128xf32>
    %c0_14 = arith.constant 0 : index
    %c0_15 = arith.constant 0 : index
    %88 = vector.load %arg4[%c0_14, %c0_15] : memref<128x128xf32, #tpu.memory_space<vmem>>, vector<128x128xf32>
    %cst_16 = arith.constant dense<0.000000e+00> : vector<128x128xf32>
    %89 = tpu.matmul %87, %88, %cst_16 {dimension_numbers = #tpu.dot_dimension_numbers<[1], [0], [0], [1], [0, 0, 1, 1], [], []>} : vector<128x128xf32>, vector<128x128xf32>, vector<128x128xf32> -> vector<128x128xf32>
    %c0_17 = arith.constant 0 : index
    %c0_18 = arith.constant 0 : index
    %90 = vector.load %arg5[%c0_17, %c0_18] : memref<1x128xf32, #tpu.memory_space<vmem>>, vector<1x128xf32>
    %91 = vector.broadcast %90 : vector<1x128xf32> to vector<128x128xf32>
    %92 = arith.addf %89, %91 : vector<128x128xf32>
    %cst_19 = arith.constant 0.000000e+00 : f32
    %93 = vector.broadcast %cst_19 : f32 to vector<128x128xf32>
    %94 = arith.maximumf %92, %93 : vector<128x128xf32>
    %c0_20 = arith.constant 0 : index
    %c0_21 = arith.constant 0 : index
    %95 = vector.load %arg6[%c0_20, %c0_21] : memref<128x128xf32, #tpu.memory_space<vmem>>, vector<128x128xf32>
    %cst_22 = arith.constant dense<0.000000e+00> : vector<128x128xf32>
    %96 = tpu.matmul %94, %95, %cst_22 {dimension_numbers = #tpu.dot_dimension_numbers<[1], [0], [0], [1], [0, 0, 1, 1], [], []>} : vector<128x128xf32>, vector<128x128xf32>, vector<128x128xf32> -> vector<128x128xf32>
    %c0_23 = arith.constant 0 : index
    %c0_24 = arith.constant 0 : index
    %97 = vector.load %arg7[%c0_23, %c0_24] : memref<1x128xf32, #tpu.memory_space<vmem>>, vector<1x128xf32>
    %98 = vector.broadcast %97 : vector<1x128xf32> to vector<128x128xf32>
    %99 = arith.addf %96, %98 : vector<128x128xf32>
    %c0_25 = arith.constant 0 : index
    %c0_26 = arith.constant 0 : index
    %100 = vector.load %arg8[%c0_25, %c0_26] : memref<128x128xf32, #tpu.memory_space<vmem>>, vector<128x128xf32>
    tpu.vector_store %arg8[%c0_25, %c0_26], %99 {strides = array<i32>} : memref<128x128xf32, #tpu.memory_space<vmem>>, vector<128x128xf32>,
    return
  }
  func.func @transform_0(%arg0: i32) -> (i32, i32) {
    %c0_i32 = arith.constant 0 : i32
    %c0_i32_0 = arith.constant 0 : i32
    return %arg0, %c0_i32 : i32, i32
  }
  func.func @transform_1(%arg0: i32) -> (i32, i32) {
    %c0_i32 = arith.constant 0 : i32
    %c0_i32_0 = arith.constant 0 : i32
    return %arg0, %c0_i32 : i32, i32
  }
  func.func @transform_2(%arg0: i32) -> (i32, i32) {
    %c0_i32 = arith.constant 0 : i32
    %c0_i32_0 = arith.constant 0 : i32
    %c0_i32_1 = arith.constant 0 : i32
    return %c0_i32, %c0_i32_0 : i32, i32
  }
  func.func @transform_3(%arg0: i32) -> (i32, i32) {
    %c0_i32 = arith.constant 0 : i32
    %c0_i32_0 = arith.constant 0 : i32
    %c0_i32_1 = arith.constant 0 : i32
    return %c0_i32, %c0_i32_0 : i32, i32
  }
  func.func @transform_4(%arg0: i32) -> (i32, i32) {
    %c0_i32 = arith.constant 0 : i32
    %c0_i32_0 = arith.constant 0 : i32
    %c0_i32_1 = arith.constant 0 : i32
    return %c0_i32, %c0_i32_0 : i32, i32
  }
  func.func @transform_5(%arg0: i32) -> (i32, i32) {
    %c0_i32 = arith.constant 0 : i32
    %c0_i32_0 = arith.constant 0 : i32
    %c0_i32_1 = arith.constant 0 : i32
    return %c0_i32, %c0_i32_0 : i32, i32
  }
  func.func @transform_6(%arg0: i32) -> (i32, i32) {
    %c0_i32 = arith.constant 0 : i32
    %c0_i32_0 = arith.constant 0 : i32
    %c0_i32_1 = arith.constant 0 : i32
    return %c0_i32, %c0_i32_0 : i32, i32
  }
  func.func @transform_7(%arg0: i32) -> (i32, i32) {
    %c0_i32 = arith.constant 0 : i32
    %c0_i32_0 = arith.constant 0 : i32
    return %arg0, %c0_i32 : i32, i32
  }
}

module attributes {stable_mosaic.version = 11 : i64} {
  func.func @ffnn_kernel(%arg0: i32, %arg1: memref<128x8xi32, #tpu.memory_space<vmem>>, %arg2: memref<128x1xf32, #tpu.memory_space<vmem>>, %arg3: memref<128x128xf32, #tpu.memory_space<vmem>>, %arg4: memref<128x128xf32, #tpu.memory_space<vmem>>, %arg5: memref<1x128xf32, #tpu.memory_space<vmem>>, %arg6: memref<128x128xf32, #tpu.memory_space<vmem>>, %arg7: memref<1x128xf32, #tpu.memory_space<vmem>>, %arg8: memref<128x128xf32, #tpu.memory_space<vmem>>) attributes {dimension_semantics = [#tpu.dimension_semantics<parallel>], iteration_bounds = array<i64: 2>, scalar_prefetch = 0 : i64, scratch_operands = 0 : i64, tpu.core_type = #tpu.core_type<tc>, window_params = [{transform_indices = @transform_0, window_bounds = array<i64: 128, 8>}, {transform_indices = @transform_1, window_bounds = array<i64: 128, 1>}, {pipeline_mode = #tpu.pipeline_mode<synchronous>, transform_indices = @transform_2, window_bounds = array<i64: 128, 128>}, {pipeline_mode = #tpu.pipeline_mode<synchronous>, transform_indices = @transform_3, window_bounds = array<i64: 128, 128>}, {pipeline_mode = #tpu.pipeline_mode<synchronous>, transform_indices = @transform_4, window_bounds = array<i64: 1, 128>}, {pipeline_mode = #tpu.pipeline_mode<synchronous>, transform_indices = @transform_5, window_bounds = array<i64: 128, 128>}, {pipeline_mode = #tpu.pipeline_mode<synchronous>, transform_indices = @transform_6, window_bounds = array<i64: 1, 128>}, {transform_indices = @transform_7, window_bounds = array<i64: 128, 128>}]} {
    %c0 = arith.constant 0 : index
    %c0_0 = arith.constant 0 : index
    %0 = vector.load %arg1[%c0, %c0_0] : memref<128x8xi32, #tpu.memory_space<vmem>>, vector<128x8xi32>
    %c0_1 = arith.constant 0 : index
    %c0_2 = arith.constant 0 : index
    %1 = vector.load %arg2[%c0_1, %c0_2] : memref<128x1xf32, #tpu.memory_space<vmem>>, vector<128x1xf32>
    %2 = tpu.iota {dimensions = array<i32: 1>} : vector<128x128xi32>
    %cst = arith.constant 0.000000e+00 : f32
    %3 = vector.broadcast %cst : f32 to vector<128x128xf32>
    %4 = vector.extract_strided_slice %0 {offsets = [0, 0], sizes = [128, 1], strides = [1, 1]} : vector<128x8xi32> to vector<128x1xi32>
    %cst_3 = arith.constant 0.000000e+00 : f32
    %5 = vector.broadcast %cst_3 : f32 to vector<128x1xf32>
    %6 = arith.cmpf ogt, %1, %5 : vector<128x1xf32>
    %7 = vector.broadcast %4 : vector<128x1xi32> to vector<128x128xi32>
    %8 = arith.cmpi eq, %2, %7 : vector<128x128xi32>
    %9 = vector.broadcast %6 : vector<128x1xi1> to vector<128x128xi1>
    %10 = arith.andi %8, %9 : vector<128x128xi1>
    %11 = arith.extui %10 : vector<128x128xi1> to vector<128x128xi32>
    %12 = arith.sitofp %11 : vector<128x128xi32> to vector<128x128xf32>
    %13 = arith.addf %3, %12 : vector<128x128xf32>
    %14 = vector.extract_strided_slice %0 {offsets = [0, 1], sizes = [128, 1], strides = [1, 1]} : vector<128x8xi32> to vector<128x1xi32>
    %cst_4 = arith.constant 1.000000e+00 : f32
    %15 = vector.broadcast %cst_4 : f32 to vector<128x1xf32>
    %16 = arith.cmpf ogt, %1, %15 : vector<128x1xf32>
    %17 = vector.broadcast %14 : vector<128x1xi32> to vector<128x128xi32>
    %18 = arith.cmpi eq, %2, %17 : vector<128x128xi32>
    %19 = vector.broadcast %16 : vector<128x1xi1> to vector<128x128xi1>
    %20 = arith.andi %18, %19 : vector<128x128xi1>
    %21 = arith.extui %20 : vector<128x128xi1> to vector<128x128xi32>
    %22 = arith.sitofp %21 : vector<128x128xi32> to vector<128x128xf32>
    %23 = arith.addf %13, %22 : vector<128x128xf32>
    %24 = vector.extract_strided_slice %0 {offsets = [0, 2], sizes = [128, 1], strides = [1, 1]} : vector<128x8xi32> to vector<128x1xi32>
    %cst_5 = arith.constant 2.000000e+00 : f32
    %25 = vector.broadcast %cst_5 : f32 to vector<128x1xf32>
    %26 = arith.cmpf ogt, %1, %25 : vector<128x1xf32>
    %27 = vector.broadcast %24 : vector<128x1xi32> to vector<128x128xi32>
    %28 = arith.cmpi eq, %2, %27 : vector<128x128xi32>
    %29 = vector.broadcast %26 : vector<128x1xi1> to vector<128x128xi1>
    %30 = arith.andi %28, %29 : vector<128x128xi1>
    %31 = arith.extui %30 : vector<128x128xi1> to vector<128x128xi32>
    %32 = arith.sitofp %31 : vector<128x128xi32> to vector<128x128xf32>
    %33 = arith.addf %23, %32 : vector<128x128xf32>
    %34 = vector.extract_strided_slice %0 {offsets = [0, 3], sizes = [128, 1], strides = [1, 1]} : vector<128x8xi32> to vector<128x1xi32>
    %cst_6 = arith.constant 3.000000e+00 : f32
    %35 = vector.broadcast %cst_6 : f32 to vector<128x1xf32>
    %36 = arith.cmpf ogt, %1, %35 : vector<128x1xf32>
    %37 = vector.broadcast %34 : vector<128x1xi32> to vector<128x128xi32>
    %38 = arith.cmpi eq, %2, %37 : vector<128x128xi32>
    %39 = vector.broadcast %36 : vector<128x1xi1> to vector<128x128xi1>
    %40 = arith.andi %38, %39 : vector<128x128xi1>
    %41 = arith.extui %40 : vector<128x128xi1> to vector<128x128xi32>
    %42 = arith.sitofp %41 : vector<128x128xi32> to vector<128x128xf32>
    %43 = arith.addf %33, %42 : vector<128x128xf32>
    %44 = vector.extract_strided_slice %0 {offsets = [0, 4], sizes = [128, 1], strides = [1, 1]} : vector<128x8xi32> to vector<128x1xi32>
    %cst_7 = arith.constant 4.000000e+00 : f32
    %45 = vector.broadcast %cst_7 : f32 to vector<128x1xf32>
    %46 = arith.cmpf ogt, %1, %45 : vector<128x1xf32>
    %47 = vector.broadcast %44 : vector<128x1xi32> to vector<128x128xi32>
    %48 = arith.cmpi eq, %2, %47 : vector<128x128xi32>
    %49 = vector.broadcast %46 : vector<128x1xi1> to vector<128x128xi1>
    %50 = arith.andi %48, %49 : vector<128x128xi1>
    %51 = arith.extui %50 : vector<128x128xi1> to vector<128x128xi32>
    %52 = arith.sitofp %51 : vector<128x128xi32> to vector<128x128xf32>
    %53 = arith.addf %43, %52 : vector<128x128xf32>
    %54 = vector.extract_strided_slice %0 {offsets = [0, 5], sizes = [128, 1], strides = [1, 1]} : vector<128x8xi32> to vector<128x1xi32>
    %cst_8 = arith.constant 5.000000e+00 : f32
    %55 = vector.broadcast %cst_8 : f32 to vector<128x1xf32>
    %56 = arith.cmpf ogt, %1, %55 : vector<128x1xf32>
    %57 = vector.broadcast %54 : vector<128x1xi32> to vector<128x128xi32>
    %58 = arith.cmpi eq, %2, %57 : vector<128x128xi32>
    %59 = vector.broadcast %56 : vector<128x1xi1> to vector<128x128xi1>
    %60 = arith.andi %58, %59 : vector<128x128xi1>
    %61 = arith.extui %60 : vector<128x128xi1> to vector<128x128xi32>
    %62 = arith.sitofp %61 : vector<128x128xi32> to vector<128x128xf32>
    %63 = arith.addf %53, %62 : vector<128x128xf32>
    %64 = vector.extract_strided_slice %0 {offsets = [0, 6], sizes = [128, 1], strides = [1, 1]} : vector<128x8xi32> to vector<128x1xi32>
    %cst_9 = arith.constant 6.000000e+00 : f32
    %65 = vector.broadcast %cst_9 : f32 to vector<128x1xf32>
    %66 = arith.cmpf ogt, %1, %65 : vector<128x1xf32>
    %67 = vector.broadcast %64 : vector<128x1xi32> to vector<128x128xi32>
    %68 = arith.cmpi eq, %2, %67 : vector<128x128xi32>
    %69 = vector.broadcast %66 : vector<128x1xi1> to vector<128x128xi1>
    %70 = arith.andi %68, %69 : vector<128x128xi1>
    %71 = arith.extui %70 : vector<128x128xi1> to vector<128x128xi32>
    %72 = arith.sitofp %71 : vector<128x128xi32> to vector<128x128xf32>
    %73 = arith.addf %63, %72 : vector<128x128xf32>
    %74 = vector.extract_strided_slice %0 {offsets = [0, 7], sizes = [128, 1], strides = [1, 1]} : vector<128x8xi32> to vector<128x1xi32>
    %cst_10 = arith.constant 7.000000e+00 : f32
    %75 = vector.broadcast %cst_10 : f32 to vector<128x1xf32>
    %76 = arith.cmpf ogt, %1, %75 : vector<128x1xf32>
    %77 = vector.broadcast %74 : vector<128x1xi32> to vector<128x128xi32>
    %78 = arith.cmpi eq, %2, %77 : vector<128x128xi32>
    %79 = vector.broadcast %76 : vector<128x1xi1> to vector<128x128xi1>
    %80 = arith.andi %78, %79 : vector<128x128xi1>
    %81 = arith.extui %80 : vector<128x128xi1> to vector<128x128xi32>
    %82 = arith.sitofp %81 : vector<128x128xi32> to vector<128x128xf32>
    %83 = arith.addf %73, %82 : vector<128x128xf32>
    %c0_11 = arith.constant 0 : index
    %c0_12 = arith.constant 0 : index
    %84 = vector.load %arg3[%c0_11, %c0_12] : memref<128x128xf32, #tpu.memory_space<vmem>>, vector<128x128xf32>
    %cst_13 = arith.constant dense<0.000000e+00> : vector<128x128xf32>
    %85 = tpu.matmul %83, %84, %cst_13 {dimension_numbers = #tpu.dot_dimension_numbers<[1], [0], [0], [1], [0, 0, 1, 1], [], []>} : vector<128x128xf32>, vector<128x128xf32>, vector<128x128xf32> -> vector<128x128xf32>
    %86 = vector.broadcast %1 : vector<128x1xf32> to vector<128x128xf32>
    %87 = arith.divf %85, %86 : vector<128x128xf32>
    %c0_14 = arith.constant 0 : index
    %c0_15 = arith.constant 0 : index
    %88 = vector.load %arg4[%c0_14, %c0_15] : memref<128x128xf32, #tpu.memory_space<vmem>>, vector<128x128xf32>
    %cst_16 = arith.constant dense<0.000000e+00> : vector<128x128xf32>
    %89 = tpu.matmul %87, %88, %cst_16 {dimension_numbers = #tpu.dot_dimension_numbers<[1], [0], [0], [1], [0, 0, 1, 1], [], []>} : vector<128x128xf32>, vector<128x128xf32>, vector<128x128xf32> -> vector<128x128xf32>
    %c0_17 = arith.constant 0 : index
    %c0_18 = arith.constant 0 : index
    %90 = vector.load %arg5[%c0_17, %c0_18] : memref<1x128xf32, #tpu.memory_space<vmem>>, vector<1x128xf32>
    %91 = vector.broadcast %90 : vector<1x128xf32> to vector<128x128xf32>
    %92 = arith.addf %89, %91 : vector<128x128xf32>
    %cst_19 = arith.constant 0.000000e+00 : f32
    %93 = vector.broadcast %cst_19 : f32 to vector<128x128xf32>
    %94 = arith.maximumf %92, %93 : vector<128x128xf32>
    %c0_20 = arith.constant 0 : index
    %c0_21 = arith.constant 0 : index
    %95 = vector.load %arg6[%c0_20, %c0_21] : memref<128x128xf32, #tpu.memory_space<vmem>>, vector<128x128xf32>
    %cst_22 = arith.constant dense<0.000000e+00> : vector<128x128xf32>
    %96 = tpu.matmul %94, %95, %cst_22 {dimension_numbers = #tpu.dot_dimension_numbers<[1], [0], [0], [1], [0, 0, 1, 1], [], []>} : vector<128x128xf32>, vector<128x128xf32>, vector<128x128xf32> -> vector<128x128xf32>
    %c0_23 = arith.constant 0 : index
    %c0_24 = arith.constant 0 : index
    %97 = vector.load %arg7[%c0_23, %c0_24] : memref<1x128xf32, #tpu.memory_space<vmem>>, vector<1x128xf32>
    %98 = vector.broadcast %97 : vector<1x128xf32> to vector<128x128xf32>
    %99 = arith.addf %96, %98 : vector<128x128xf32>
    %c0_25 = arith.constant 0 : index
    %c0_26 = arith.constant 0 : index
    %100 = vector.load %arg8[%c0_25, %c0_26] : memref<128x128xf32, #tpu.memory_space<vmem>>, vector<128x128xf32>
    tpu.vector_store %arg8[%c0_25, %c0_26], %99 {strides = array<i32>} : memref<128x128xf32, #tpu.memory_space<vmem>>, vector<128x128xf32>,
    return
  }
  func.func @transform_0(%arg0: i32) -> (i32, i32) {
    %c0_i32 = arith.constant 0 : i32
    %c0_i32_0 = arith.constant 0 : i32
    return %arg0, %c0_i32 : i32, i32
  }
  func.func @transform_1(%arg0: i32) -> (i32, i32) {
    %c0_i32 = arith.constant 0 : i32
    %c0_i32_0 = arith.constant 0 : i32
    return %arg0, %c0_i32 : i32, i32
  }
  func.func @transform_2(%arg0: i32) -> (i32, i32) {
    %c0_i32 = arith.constant 0 : i32
    %c0_i32_0 = arith.constant 0 : i32
    %c0_i32_1 = arith.constant 0 : i32
    return %c0_i32, %c0_i32_0 : i32, i32
  }
  func.func @transform_3(%arg0: i32) -> (i32, i32) {
    %c0_i32 = arith.constant 0 : i32
    %c0_i32_0 = arith.constant 0 : i32
    %c0_i32_1 = arith.constant 0 : i32
    return %c0_i32, %c0_i32_0 : i32, i32
  }
  func.func @transform_4(%arg0: i32) -> (i32, i32) {
    %c0_i32 = arith.constant 0 : i32
    %c0_i32_0 = arith.constant 0 : i32
    %c0_i32_1 = arith.constant 0 : i32
    return %c0_i32, %c0_i32_0 : i32, i32
  }
  func.func @transform_5(%arg0: i32) -> (i32, i32) {
    %c0_i32 = arith.constant 0 : i32
    %c0_i32_0 = arith.constant 0 : i32
    %c0_i32_1 = arith.constant 0 : i32
    return %c0_i32, %c0_i32_0 : i32, i32
  }
  func.func @transform_6(%arg0: i32) -> (i32, i32) {
    %c0_i32 = arith.constant 0 : i32
    %c0_i32_0 = arith.constant 0 : i32
    %c0_i32_1 = arith.constant 0 : i32
    return %c0_i32, %c0_i32_0 : i32, i32
  }
  func.func @transform_7(%arg0: i32) -> (i32, i32) {
    %c0_i32 = arith.constant 0 : i32
    %c0_i32_0 = arith.constant 0 : i32
    return %arg0, %c0_i32 : i32, i32
  }
}

</mosaic_0001>

<bundles_post_ra>
// kernel: tpu_custom_call.1
= control target key start
LH: loop header
LB: loop body
LE: loop exit
PB: predicated region body
PF: predicated region fallthrough
CT: control target
= control target key end

     0   :  { %12 = vsyncpa [#allocation3], 0  ;;  %s5740_s0 = inlined_call_operand.vmem [shape: s32[256,8], index: 0, kind: input, shape index: {}]   ;;  %s5741_s1 = inlined_call_operand.vmem [shape: f32[256,1], index: 1, kind: input, shape index: {}]   ;;  %s5742_s2 = inlined_call_operand.vmem [shape: f32[128,128], index: 2, kind: input, shape index: {}]   ;;  %s5743_s3 = inlined_call_operand.vmem [shape: f32[128,128], index: 3, kind: input, shape index: {}]   ;;  %s5744_s4 = inlined_call_operand.vmem [shape: f32[1,128], index: 4, kind: input, shape index: {}]   ;;  %s5745_s5 = inlined_call_operand.vmem [shape: f32[128,128], index: 5, kind: input, shape index: {}]   ;;  %s5746_s6 = inlined_call_operand.vmem [shape: f32[1,128], index: 6, kind: input, shape index: {}]   ;;  %s5747_s7 = inlined_call_operand.hbm [shape: f32[256,128], index: 7, kind: output, shape index: {}]  }
   0x1   :  { %14 = vsyncpa [#allocation3 + $0x1], 0  ;;  %s3710_s24 = smov 0   ;;  %s3712_s25 = smov 0  }
   0x2   :  { %s3714_s26 = smov 0   ;;  %s3716_s27 = smov 0  }
   0x3 LB: > { %s3731_s28 = sadd.s32 4294967295, %s3656_s27   ;;  %s2857_s29 = sadd.s32 4294967294, %s3656_s27   ;;  %s3656_s27 = sphi %s3716_s27, %s6008_s27   ;;  %s3652_s26 = sphi %s3714_s26, %s6007_s26   ;;  %s3648_s25 = sphi %s3712_s25, %s6006_s25   ;;  %s3644_s24 = sphi %s3710_s24, %s6005_s24  }
   0x4   : > { %s3735_s30 = sadd.s32 1, %s3656_s27   ;;  %s184_s8 = sadd.s32 1, %s3652_s26 }
   0x5   : > { %s181_s9 = ssub.s32 %s3656_s27, %s3735_s30  ;;  %p194_p0 = scmp.ne.s32.totalorder %s3652_s26, %s3648_s25 }
   0x6   : > { %p182_p1 = scmp.eq.s32.totalorder %s181_s9, 0  ;;  %p195_p2 = scmp.eq.s32.totalorder %s3731_s28, 1 }
   0x7   : > { %p200_p3 = scmp.ne.s32.totalorder %s3648_s25, %s3644_s24  ;;  %p201_p4 = scmp.eq.s32.totalorder %s2857_s29, 1 }
   0x8   : > { %s3746_s10 = scalar_select %p182_p1, %s3652_s26, %s184_s8  }
   0x9   : > { %p3748_p5 = por %p195_p2, %p194_p0  ;;  %p3752_p6 = por %p201_p4, %p200_p3 }
   0xa   : > { %p2860_p7 = scmp.ge.s32.totalorder %s3656_s27, 1  ;;  %p252_p8 = scmp.lt.s32.totalorder %s3656_s27, 3 }
   0xc   : > { %p253_p9 = pnand %p2860_p7, %p252_p8 }
   0xe   : > { %256 = sbr.rel (%p253_p9) target bundleno = 1521 (0x5f1), region = 48 }
  0x15   : > { %s2862_s13 = sshll.u32 %s3731_s28, 4  ;;  %v3658_v0 = vmov 1   ;;  %v3659_v1 = vmov 0   ;;  %v3660_v15 = vmov 2   ;;  %v5750_v29 = vmov 3   ;;  %s3001_s18 = sshll.u32 %s3731_s28, 11 }
  0x16   : > { %3429 = vset.pattern.permute.xlu0 %v3658_v0  ;;  %3428 = vset.pattern.permute.xlu1 %v3659_v1  ;;  %p290_p10 = scmp.lt.s32.totalorder %s2862_s13, 31  ;;  %v5754_v30 = vmov 4   ;;  %v5752_v40 = vmov 6   ;;  %v5756_v43 = vmov 5   ;;  %s5691_s22 = scalar_lea.hbm %s5747_s7, %s3001_s18 }
  0x17   : > { %s3667_s29 = smov [#allocation2]  }
  0x18   : > { %s6010_s13 = smov (!%p290_p10, %s2862_s13), 31  ;;  %s3598_s8 = sshll.u32 %s3667_s29, 4  ;;  %s3599_s8 = int_to_ptr.vmem [resolvable:$false] %s3598_s8 }
  0x19   : > { %s2863_s14 = sshll.u32 %s6010_s13, 3  ;;  %s286_s13 = sand.u32 1, %s3648_s25  }
  0x1a   : > { %s3764_s17 = scalar_lea.vmem %s5740_s0, %s2863_s14  ;;  %s3800_s20 = scalar_lea.vmem %s5741_s1, %s2863_s14 }
  0x1b   : > { %v3767_v2 = vld [vmem:[%s3764_s17 + $0x10] sm:$0xff]  ;;  %v3770_v3 = vld [vmem:[%s3764_s17] sm:$0xff]  ;;  %v3775_v4 = vld [vmem:[%s3764_s17 + $0x18] sm:$0xff]  ;;  %s2861_s14 = sshll.u32 %s286_s13, 7  ;;  %s5699_s23 = scalar_lea.sflag [#allocation3], %s286_s13 }
  0x1c   : > { %359 = vperm.xlu1 %3428, %v3767_v2   ;;  %577 = vperm.xlu0 %3429, %v3770_v3   ;;  %v3780_v5 = vld [vmem:[%s3764_s17 + $0x28] sm:$0xff]  ;;  %v3785_v6 = vld [vmem:[%s3764_s17 + $0x38] sm:$0xff]  ;;  %v3868_v31 = vld [vmem:[%s3764_s17 + $0x20] sm:$0xff]  ;;  %s5670_s16 = scalar_lea.vmem [#allocation2], %s2861_s14  ;;  %s3600_s9 = scalar_lea.vmem %s3599_s8, 4096 }
  0x1d   : > { %v3790_v7 = vld [vmem:[%s3764_s17 + $0x48] sm:$0xff]  ;;  %v3795_v8 = vld [vmem:[%s3764_s17 + $0x58] sm:$0xff]  ;;  %v3873_v32 = vld [vmem:[%s3764_s17 + $0x30] sm:$0xff]  ;;  %s2783_s19 = sshll.u32 %s5670_s16, 4  ;;  %s5693_s19 = int_to_ptr.vmem [resolvable:$true] %s2783_s19 }
  0x1e   : > { %v3805_v9 = vld [vmem:[%s3764_s17 + $0x68] sm:$0xff]  ;;  %v317_v11 = vld [vmem:[%s3764_s17 + $0x78] sm:$0xff]  ;;  %v3878_v33 = vld [vmem:[%s3764_s17 + $0x40] sm:$0xff]  ;;  %s3594_s28 = scalar_lea.vmem %s5693_s19, 2048  ;;  %p3601_p0 = scmp.lt.s32.totalorder %s5693_s19, %s3599_s8 }
  0x1f   : > { %v3808_v10 = vld [vmem:[%s3800_s20 + $0x8] sm:$0xff]  ;;  %v3815_v12 = vld [vmem:[%s3800_s20 + $0x18] sm:$0xff]  ;;  %v3883_v34 = vld [vmem:[%s3764_s17 + $0x50] sm:$0xff]  ;;  %p3595_p11 = scmp.ne.s32.totalorder %s5693_s19, %s3594_s28  ;;  %p3602_p1 = scmp.lt.s32.totalorder %s3600_s9, %s3594_s28 }
  0x20   : > { %362 = vperm.xlu1 %3428, %v3775_v4   ;;  %586 = vperm.xlu0 %3429, %v3775_v4   ;;  %vm337_vm0 = vcmp.gt.f32.partialorder %v3808_v10, 0.0  ;;  %vm339_vm1 = vcmp.gt.f32.partialorder %v3815_v12, 0.0  ;;  %v3820_v14 = vld [vmem:[%s3800_s20 + $0x28] sm:$0xff]  ;;  %v3827_v17 = vld [vmem:[%s3800_s20 + $0x38] sm:$0xff]  ;;  %v3888_v35 = vld [vmem:[%s3764_s17 + $0x60] sm:$0xff]  ;;  %vm563_vm10 = vcmp.gt.f32.partialorder %v3815_v12, 1.0 }
  0x21   : > { %v417_v13 = vsel %vm337_vm0, 1, %v3659_v1  ;;  %v419_v16 = vsel %vm339_vm1, 1, %v3659_v1  ;;  %vm341_vm2 = vcmp.gt.f32.partialorder %v3820_v14, 0.0  ;;  %vm343_vm3 = vcmp.gt.f32.partialorder %v3827_v17, 0.0  ;;  %v3833_v19 = vld [vmem:[%s3800_s20 + $0x48] sm:$0xff]  ;;  %v3839_v21 = vld [vmem:[%s3800_s20 + $0x58] sm:$0xff]  ;;  %p3596_p12 = pnand %p3595_p11, %p3748_p5  ;;  %p3603_p2 = por %p3602_p1, %p3601_p0 }
  0x22   : > { %v421_v18 = vsel %vm341_vm2, 1, %v3659_v1  ;;  %v423_v20 = vsel %vm343_vm3, 1, %v3659_v1  ;;  %vm345_vm4 = vcmp.gt.f32.partialorder %v3833_v19, 0.0  ;;  %vm347_vm5 = vcmp.gt.f32.partialorder %v3839_v21, 0.0  ;;  %v3845_v23 = vld [vmem:[%s3800_s20 + $0x68] sm:$0xff]  ;;  %v3851_v25 = vld [vmem:[%s3800_s20 + $0x78] sm:$0xff] }
  0x23   : > { %v425_v22 = vsel %vm345_vm4, 1, %v3659_v1  ;;  %v427_v24 = vsel %vm347_vm5, 1, %v3659_v1  ;;  %vm349_vm6 = vcmp.gt.f32.partialorder %v3845_v23, 0.0  ;;  %vm351_vm7 = vcmp.gt.f32.partialorder %v3851_v25, 0.0  ;;  %v3859_v28 = vld [vmem:[%s3764_s17 + $0x8] sm:$0xff]  ;;  %v3893_v36 = vld [vmem:[%s3800_s20] sm:$0xff]  ;;  %p3597_p13 = pneg %p3596_p12 }
  0x24   : > { %368 = vperm.xlu1 %3428, %v3780_v5   ;;  %592 = vperm.xlu0 %3429, %v3780_v5   ;;  %v429_v26 = vsel %vm349_vm6, 1, %v3659_v1  ;;  %v431_v27 = vsel %vm351_vm7, 1, %v3659_v1  ;;  %v3896_v37 = vld [vmem:[%s3764_s17 + $0x70] sm:$0xff]  ;;  %vm560_vm8 = vcmp.gt.f32.partialorder %v3893_v36, 1.0  ;;  %v643_v42 = vsel %vm563_vm10, 1, %v3659_v1 }
  0x25   : > { %v3902_v38 = vld [vmem:[%s3800_s20 + $0x10] sm:$0xff]  ;;  %v640_v39 = vsel %vm560_vm8, 1, %v3659_v1  ;;  %vm565_vm11 = vcmp.gt.f32.partialorder %v3820_v14, 1.0  ;;  %vm567_vm12 = vcmp.gt.f32.partialorder %v3827_v17, 1.0  ;;  %vm569_vm13 = vcmp.gt.f32.partialorder %v3833_v19, 1.0  ;;  %p3604_p3 = pnand %p3603_p2, %p3597_p13 }
  0x26   : > { %vm562_vm9 = vcmp.gt.f32.partialorder %v3902_v38, 1.0  ;;  %v645_v44 = vsel %vm565_vm11, 1, %v3659_v1  ;;  %v647_v45 = vsel %vm567_vm12, 1, %v3659_v1  ;;  %v649_v46 = vsel %vm569_vm13, 1, %v3659_v1 }
  0x27   : > { %v642_v41 = vsel %vm562_vm9, 1, %v3659_v1  ;;  %vm571_vm14 = vcmp.gt.f32.partialorder %v3839_v21, 1.0  ;;  %vm573_vm15 = vcmp.gt.f32.partialorder %v3845_v23, 1.0  ;;  %vm575_vm0 = vcmp.gt.f32.partialorder %v3851_v25, 1.0 }
  0x28   : > { %374 = vperm.xlu1 %3428, %v3785_v6   ;;  %598 = vperm.xlu0 %3429, %v3785_v6   ;;  %v651_v47 = vsel %vm571_vm14, 1, %v3659_v1  ;;  %v653_v48 = vsel %vm573_vm15, 1, %v3659_v1  ;;  %v655_v50 = vsel %vm575_vm0, 1, %v3659_v1  ;;  %vm784_vm1 = vcmp.gt.f32.partialorder %v3893_v36, 2.0 }
  0x29   : > { %vm786_vm2 = vcmp.gt.f32.partialorder %v3902_v38, 2.0  ;;  %vm787_vm3 = vcmp.gt.f32.partialorder %v3815_v12, 2.0  ;;  %vm1233_vm4 = vcmp.gt.f32.partialorder %v3808_v10, 4.0  ;;  %vm336_vm5 = vcmp.gt.f32.partialorder %v3893_v36, 0.0 }
  0x2a   : > { %v866_v19 = vsel %vm786_vm2, 1, %v3659_v1  ;;  %vm338_vm6 = vcmp.gt.f32.partialorder %v3902_v38, 0.0  ;;  %vm1456_vm8 = vcmp.gt.f32.partialorder %v3893_v36, 5.0  ;;  %vm1011_vm10 = vcmp.gt.f32.partialorder %v3815_v12, 3.0 }
  0x2b   : > { %vm561_vm0 = vcmp.gt.f32.partialorder %v3808_v10, 1.0  ;;  %vm789_vm2 = vcmp.gt.f32.partialorder %v3820_v14, 2.0 }
  0x2c   : > { %380 = vperm.xlu1 %3428, %v3790_v7   ;;  %604 = vperm.xlu0 %3429, %v3790_v7  }
  0x30   : > { %386 = vperm.xlu1 %3428, %v3795_v8   ;;  %610 = vperm.xlu0 %3429, %v3795_v8  }
  0x34   : > { %392 = vperm.xlu1 %3428, %v3805_v9   ;;  %616 = vperm.xlu0 %3429, %v3805_v9  }
  0x38   : > { %398 = vperm.xlu1 %3428, %v317_v11   ;;  %622 = vperm.xlu0 %3429, %v317_v11  }
  0x3c   : > { %436 = vperm.xlu1 %3428, %v417_v13   ;;  %3432 = vset.pattern.permute.xlu0 %v3660_v15 }
  0x3d   : > { %801 = vperm.xlu0 %3432, %v3770_v3  }
  0x40   : > { %442 = vperm.xlu1 %3428, %v419_v16   ;;  %v864_v16 = vsel %vm784_vm1, 1, %v3659_v1 }
  0x41   : > { %810 = vperm.xlu0 %3432, %v3775_v4  }
  0x44   : > { %448 = vperm.xlu1 %3428, %v421_v18  }
  0x45   : > { %816 = vperm.xlu0 %3432, %v3780_v5  }
  0x48   : > { %454 = vperm.xlu1 %3428, %v423_v20  }
  0x49   : > { %822 = vperm.xlu0 %3432, %v3785_v6  }
  0x4c   : > { %460 = vperm.xlu1 %3428, %v425_v22  }
  0x4d   : > { %828 = vperm.xlu0 %3432, %v3790_v7  }
  0x50   : > { %466 = vperm.xlu1 %3428, %v427_v24  }
  0x51   : > { %834 = vperm.xlu0 %3432, %v3795_v8  }
  0x54   : > { %472 = vperm.xlu1 %3428, %v429_v26  }
  0x55   : > { %840 = vperm.xlu0 %3432, %v3805_v9  }
  0x58   : > { %478 = vperm.xlu1 %3428, %v431_v27  }
  0x59   : > { %846 = vperm.xlu0 %3432, %v317_v11  }
  0x5c   : > { %3430 = vset.pattern.permute.xlu1 %v3658_v0 }
  0x5d   : > { %580 = vperm.xlu1 %3430, %v3859_v28   ;;  %3441 = vset.pattern.permute.xlu0 %v5750_v29 }
  0x5e   : > { %1034 = vperm.xlu0 %3441, %v3775_v4  }
  0x61   : > { %583 = vperm.xlu1 %3430, %v3767_v2  }
  0x62   : > { %3442 = vset.pattern.permute.xlu0 %v5754_v30 }
  0x63   : > { %1252 = vperm.xlu0 %3442, %v3859_v28  }
  0x65   : > { %589 = vperm.xlu1 %3430, %v3868_v31  }
  0x67   : > { %1258 = vperm.xlu0 %3442, %v3775_v4  }
  0x69   : > { %595 = vperm.xlu1 %3430, %v3873_v32  }
  0x6b   : > { %1264 = vperm.xlu0 %3442, %v3780_v5  }
  0x6d   : > { %601 = vperm.xlu1 %3430, %v3878_v33  }
  0x6f   : > { %1270 = vperm.xlu0 %3442, %v3785_v6  }
  0x71   : > { %607 = vperm.xlu1 %3430, %v3883_v34  }
  0x73   : > { %1276 = vperm.xlu0 %3442, %v3790_v7  }
  0x75   : > { %613 = vperm.xlu1 %3430, %v3888_v35  }
  0x77   : > { %1282 = vperm.xlu0 %3442, %v3795_v8  }
  0x79   : > { %619 = vperm.xlu1 %3430, %v3896_v37  }
  0x7b   : > { %1288 = vperm.xlu0 %3442, %v3805_v9  }
  0x7d   : > { %3431 = vset.pattern.permute.xlu1 %v3659_v1 }
  0x7e   : > { %657 = vperm.xlu1 %3431, %v640_v39  }
  0x7f   : > { %3512 = vset.pattern.permute.xlu0 %v5752_v40 }
  0x80   : > { %1733 = vperm.xlu0 %3512, %v3888_v35  }
  0x82   : > { %663 = vperm.xlu1 %3431, %v642_v41   ;;  %v867_v41 = vsel %vm787_vm3, 1, %v3659_v1 }
  0x84   : > { %3513 = vset.pattern.permute.xlu0 %v5756_v43 }
  0x85   : > { %1479 = vperm.xlu0 %3513, %v3767_v2  }
  0x86   : > { %666 = vperm.xlu1 %3431, %v643_v42  }
  0x89   : > { %1482 = vperm.xlu0 %3513, %v3775_v4  }
  0x8a   : > { %672 = vperm.xlu1 %3431, %v645_v44   ;;  %v1313_v44 = vsel %vm1233_vm4, 1, %v3659_v1  ;;  %vm1235_vm4 = vcmp.gt.f32.partialorder %v3815_v12, 4.0 }
  0x8d   : > { %1485 = vperm.xlu0 %3513, %v3868_v31  }
  0x8e   : > { %678 = vperm.xlu1 %3431, %v647_v45  }
  0x91   : > { %1488 = vperm.xlu0 %3513, %v3780_v5  }
  0x92   : > { %684 = vperm.xlu1 %3431, %v649_v46   ;;  %v416_v46 = vsel %vm336_vm5, 1, %v3659_v1 }
  0x95   : > { %1491 = vperm.xlu0 %3513, %v3873_v32  }
  0x96   : > { %690 = vperm.xlu1 %3431, %v651_v47  }
  0x99   : > { %1494 = vperm.xlu0 %3513, %v3785_v6  }
  0x9a   : > { %696 = vperm.xlu1 %3431, %v653_v48  }
  0x9b   : > { %v3931_v49 = vpop.permute.xlu1 %359  ;;  %v3934_v51 = vpop.permute.xlu0 %577 }
  0x9d   : > { %1497 = vperm.xlu0 %3513, %v3878_v33  }
  0x9e   : > { %702 = vperm.xlu1 %3431, %v655_v50  }
  0x9f   : > { %v3937_v52 = vpop.permute.xlu1 %362  ;;  %v3939_v53 = vpop.permute.xlu0 %586 }
  0xa1   : > { %1500 = vperm.xlu0 %3513, %v3790_v7   ;;  %v5748_v7 = vmov 7  }
  0xa2   : > { %3433 = vset.pattern.permute.xlu1 %v3660_v15 }
  0xa3   : > { %v3943_v54 = vpop.permute.xlu1 %368  ;;  %804 = vperm.xlu1 %3433, %v3859_v28   ;;  %v3946_v55 = vpop.permute.xlu0 %592 }
  0xa4   : > { %5767 = vst [vmem:[#allocation5_spill] sm:$0xff] %v3943_v54  ;;  %5768 = vst [vmem:[#allocation6_spill] sm:$0xff] %v3946_v55 }
  0xa5   : > { %1503 = vperm.xlu0 %3513, %v3883_v34  }
  0xa7   : > { %v3949_v56 = vpop.permute.xlu1 %374  ;;  %807 = vperm.xlu1 %3433, %v3767_v2   ;;  %v3952_v57 = vpop.permute.xlu0 %598 }
  0xa8   : > { %5769 = vst [vmem:[#allocation7_spill] sm:$0xff] %v3949_v56  ;;  %5770 = vst [vmem:[#allocation8_spill] sm:$0xff] %v3952_v57 }
  0xa9   : > { %1506 = vperm.xlu0 %3513, %v3795_v8  }
  0xab   : > { %v3955_v58 = vpop.permute.xlu1 %380  ;;  %813 = vperm.xlu1 %3433, %v3868_v31   ;;  %v3958_v59 = vpop.permute.xlu0 %604 }
  0xac   : > { %5771 = vst [vmem:[#allocation9_spill] sm:$0xff] %v3955_v58  ;;  %5772 = vst [vmem:[#allocation10_spill] sm:$0xff] %v3958_v59  ;;  %v869_v59 = vsel %vm789_vm2, 1, %v3659_v1  ;;  %vm1459_vm2 = vcmp.gt.f32.partialorder %v3815_v12, 5.0 }
  0xad   : > { %1509 = vperm.xlu0 %3513, %v3888_v35   ;;  %v1539_v57 = vsel %vm1459_vm2, 1, %v3659_v1 }
  0xaf   : > { %v3961_v60 = vpop.permute.xlu1 %386  ;;  %819 = vperm.xlu1 %3433, %v3873_v32   ;;  %v3964_v61 = vpop.permute.xlu0 %610 }
  0xb0   : > { %5773 = vst [vmem:[#allocation11_spill] sm:$0xff] %v3961_v60  ;;  %5774 = vst [vmem:[#allocation12_spill] sm:$0xff] %v3964_v61 }
  0xb1   : > { %1512 = vperm.xlu0 %3513, %v3805_v9  }
  0xb3   : > { %v3967_v62 = vpop.permute.xlu1 %392  ;;  %825 = vperm.xlu1 %3433, %v3878_v33   ;;  %v3970_v63 = vpop.permute.xlu0 %616 }
  0xb4   : > { %5775 = vst [vmem:[#allocation13_spill] sm:$0xff] %v3967_v62  ;;  %5776 = vst [vmem:[#allocation14_spill] sm:$0xff] %v3970_v63  ;;  %v4107_v62 = vld [vmem:[%s3800_s20 + $0x70] sm:$0xff] }
  0xb5   : > { %1515 = vperm.xlu0 %3513, %v3896_v37   ;;  %vm350_vm15 = vcmp.gt.f32.partialorder %v4107_v62, 0.0 }
  0xb7   : > { %v3973_v0 = vpop.permute.xlu1 %398  ;;  %831 = vperm.xlu1 %3433, %v3883_v34   ;;  %v3976_v6 = vpop.permute.xlu0 %622 }
  0xb8   : > { %5777 = vst [vmem:[#allocation15_spill] sm:$0xff] %v3973_v0  ;;  %5778 = vst [vmem:[#allocation16_spill] sm:$0xff] %v3976_v6 }
  0xb9   : > { %3520 = vset.pattern.permute.xlu0 %v5748_v7 }
  0xba   : > { %1960 = vperm.xlu0 %3520, %v3805_v9  }
  0xbb   : > { %v3980_v8 = vpop.permute.xlu1 %436  ;;  %837 = vperm.xlu1 %3433, %v3888_v35  }
  0xbc   : > { %v3983_v11 = vpop.permute.xlu0 %801 }
  0xbe   : > { %1963 = vperm.xlu0 %3520, %v3896_v37  }
  0xbf   : > { %v3987_v13 = vpop.permute.xlu1 %442  ;;  %843 = vperm.xlu1 %3433, %v3896_v37  }
  0xc0   : > { %v3990_v15 = vpop.permute.xlu0 %810 }
  0xc2   : > { %3523 = vset.pattern.permute.xlu0 %v3659_v1 }
  0xc3   : > { %v3995_v9 = vpop.permute.xlu1 %448  ;;  %3434 = vset.pattern.permute.xlu1 %v3659_v1  ;;  %353 = vperm.xlu0 %3523, %v3770_v3  }
  0xc4   : > { %5779 = vst [vmem:[#allocation17_spill] sm:$0xff] %v3995_v9  ;;  %881 = vperm.xlu1 %3434, %v864_v16   ;;  %v3999_v18 = vpop.permute.xlu0 %816  ;;  %v4062_v16 = vld [vmem:[%s3800_s20 + $0x30] sm:$0xff] }
  0xc5   : > { %5780 = vst [vmem:[#allocation18_spill] sm:$0xff] %v3999_v18  ;;  %vm342_vm9 = vcmp.gt.f32.partialorder %v4062_v16, 0.0  ;;  %vm566_vm3 = vcmp.gt.f32.partialorder %v4062_v16, 1.0 }
  0xc7   : > { %v4002_v20 = vpop.permute.xlu1 %454  ;;  %356 = vperm.xlu0 %3523, %v3859_v28  }
  0xc8   : > { %5781 = vst [vmem:[#allocation19_spill] sm:$0xff] %v4002_v20  ;;  %887 = vperm.xlu1 %3434, %v866_v19   ;;  %v4005_v21 = vpop.permute.xlu0 %822 }
  0xc9   : > { %5782 = vst [vmem:[#allocation20_spill] sm:$0xff] %v4005_v21 }
  0xcb   : > { %v4007_v22 = vpop.permute.xlu1 %460  ;;  %365 = vperm.xlu0 %3523, %v3868_v31  }
  0xcc   : > { %5783 = vst [vmem:[#allocation21_spill] sm:$0xff] %v4007_v22  ;;  %3435 = vset.pattern.permute.xlu1 %v5750_v29  ;;  %v4011_v23 = vpop.permute.xlu0 %828 }
  0xcd   : > { %5784 = vst [vmem:[#allocation22_spill] sm:$0xff] %v4011_v23  ;;  %1025 = vperm.xlu1 %3435, %v3770_v3   ;;  %v641_v23 = vsel %vm561_vm0, 1, %v3659_v1  ;;  %vm1013_vm0 = vcmp.gt.f32.partialorder %v3820_v14, 3.0 }
  0xcf   : > { %v4014_v24 = vpop.permute.xlu1 %466  ;;  %371 = vperm.xlu0 %3523, %v3873_v32  }
  0xd0   : > { %5785 = vst [vmem:[#allocation23_spill] sm:$0xff] %v4014_v24  ;;  %v4017_v25 = vpop.permute.xlu0 %834 }
  0xd1   : > { %5786 = vst [vmem:[#allocation24_spill] sm:$0xff] %v4017_v25  ;;  %1028 = vperm.xlu1 %3435, %v3859_v28  }
  0xd3   : > { %v4020_v26 = vpop.permute.xlu1 %472  ;;  %377 = vperm.xlu0 %3523, %v3878_v33  }
  0xd4   : > { %5787 = vst [vmem:[#allocation25_spill] sm:$0xff] %v4020_v26  ;;  %v4023_v27 = vpop.permute.xlu0 %840 }
  0xd5   : > { %5788 = vst [vmem:[#allocation26_spill] sm:$0xff] %v4023_v27  ;;  %3436 = vset.pattern.permute.xlu1 %v5754_v30  ;;  %v4086_v30 = vld [vmem:[%s3800_s20 + $0x50] sm:$0xff] }
  0xd6   : > { %1249 = vperm.xlu1 %3436, %v3770_v3   ;;  %vm346_vm12 = vcmp.gt.f32.partialorder %v4086_v30, 0.0 }
  0xd7   : > { %v4028_v39 = vpop.permute.xlu1 %478  ;;  %383 = vperm.xlu0 %3523, %v3883_v34   ;;  %v426_v6 = vsel %vm346_vm12, 1, %v3659_v1  ;;  %vm1008_vm12 = vcmp.gt.f32.partialorder %v3893_v36, 3.0 }
  0xd8   : > { %5789 = vst [vmem:[#allocation27_spill] sm:$0xff] %v4028_v39  ;;  %v4032_v42 = vpop.permute.xlu0 %846  ;;  %v4096_v39 = vld [vmem:[%s3800_s20 + $0x60] sm:$0xff] }
  0xd9   : > { %5790 = vst [vmem:[#allocation28_spill] sm:$0xff] %v4032_v42  ;;  %vm348_vm13 = vcmp.gt.f32.partialorder %v4096_v39, 0.0 }
  0xda   : > { %3437 = vset.pattern.permute.xlu1 %v3659_v1 }
  0xdb   : > { %890 = vperm.xlu1 %3437, %v867_v41   ;;  %389 = vperm.xlu0 %3523, %v3888_v35   ;;  %v4051_v35 = vld [vmem:[%s3800_s20 + $0x20] sm:$0xff] }
  0xdc   : > { %v4037_v33 = vpop.permute.xlu1 %580  ;;  %vm340_vm7 = vcmp.gt.f32.partialorder %v4051_v35, 0.0  ;;  %vm788_vm14 = vcmp.gt.f32.partialorder %v4051_v35, 2.0  ;;  %vm564_vm1 = vcmp.gt.f32.partialorder %v4051_v35, 1.0  ;;  %vm1684_vm2 = vcmp.gt.f32.partialorder %v4051_v35, 6.0 }
  0xdd   : > { %v4040_v45 = vpop.permute.xlu0 %1034  ;;  %v420_v41 = vsel %vm340_vm7, 1, %v3659_v1  ;;  %v868_v26 = vsel %vm788_vm14, 1, %v3659_v1  ;;  %vm572_vm7 = vcmp.gt.f32.partialorder %v4096_v39, 1.0  ;;  %vm1232_vm14 = vcmp.gt.f32.partialorder %v3893_v36, 4.0 }
  0xde   : > { %5791 = vst [vmem:[#allocation29_spill] sm:$0xff] %v4040_v45  ;;  %v1312_v21 = vsel %vm1232_vm14, 1, %v3659_v1  ;;  %vm1906_vm14 = vcmp.gt.f32.partialorder %v3902_v38, 7.0 }
  0xdf   : > { %1332 = vperm.xlu1 %3437, %v1313_v44   ;;  %395 = vperm.xlu0 %3523, %v3896_v37   ;;  %v418_v37 = vsel %vm338_vm6, 1, %v3659_v1  ;;  %vm570_vm6 = vcmp.gt.f32.partialorder %v4086_v30, 1.0 }
  0xe0   : > { %v4044_v34 = vpop.permute.xlu1 %583  ;;  %v650_v22 = vsel %vm570_vm6, 1, %v3659_v1  ;;  %vm1681_vm6 = vcmp.gt.f32.partialorder %v3808_v10, 6.0 }
  0xe2   : > { %v4048_v47 = vpop.permute.xlu0 %1252 }
  0xe3   : > { %3438 = vset.pattern.permute.xlu1 %v5750_v29  ;;  %433 = vperm.xlu0 %3523, %v416_v46   ;;  %v4074_v46 = vld [vmem:[%s3800_s20 + $0x40] sm:$0xff]  ;;  %v422_v29 = vsel %vm342_vm9, 1, %v3659_v1  ;;  %vm1012_vm9 = vcmp.gt.f32.partialorder %v4051_v35, 3.0 }
  0xe4   : > { %v4054_v48 = vpop.permute.xlu1 %589  ;;  %1031 = vperm.xlu1 %3438, %v3767_v2   ;;  %vm344_vm11 = vcmp.gt.f32.partialorder %v4074_v46, 0.0  ;;  %vm568_vm5 = vcmp.gt.f32.partialorder %v4074_v46, 1.0 }
  0xe5   : > { %5792 = vst [vmem:[#allocation30_spill] sm:$0xff] %v4054_v48  ;;  %v424_v42 = vsel %vm344_vm11, 1, %v3659_v1  ;;  %v648_v24 = vsel %vm568_vm5, 1, %v3659_v1  ;;  %vm1458_vm11 = vcmp.gt.f32.partialorder %v3902_v38, 5.0  ;;  %vm790_vm5 = vcmp.gt.f32.partialorder %v4062_v16, 2.0 }
  0xe6   : > { %v4059_v50 = vpop.permute.xlu0 %1258 }
  0xe7   : > { %5793 = vst [vmem:[#allocation31_spill] sm:$0xff] %v4059_v50  ;;  %439 = vperm.xlu0 %3523, %v418_v37   ;;  %v1536_v37 = vsel %vm1456_vm8, 1, %v3659_v1  ;;  %vm574_vm8 = vcmp.gt.f32.partialorder %v4107_v62, 1.0  ;;  %v4516_v50 = vld [vmem:[%s3800_s20 + $0x78] sm:$0xff] }
  0xe8   : > { %v4064_v19 = vpop.permute.xlu1 %595  ;;  %3439 = vset.pattern.permute.xlu1 %v5756_v43 }
  0xe9   : > { %5794 = vst [vmem:[#allocation32_spill] sm:$0xff] %v4064_v19  ;;  %1473 = vperm.xlu1 %3439, %v3770_v3  }
  0xea   : > { %v4071_v44 = vpop.permute.xlu0 %1264 }
  0xeb   : > { %5795 = vst [vmem:[#allocation33_spill] sm:$0xff] %v4071_v44  ;;  %445 = vperm.xlu0 %3523, %v420_v41   ;;  %v1091_v41 = vsel %vm1011_vm10, 1, %v3659_v1  ;;  %vm785_vm10 = vcmp.gt.f32.partialorder %v3808_v10, 2.0 }
  0xec   : > { %v4077_v7 = vpop.permute.xlu1 %601 }
  0xed   : > { %5796 = vst [vmem:[#allocation34_spill] sm:$0xff] %v4077_v7  ;;  %3440 = vset.pattern.permute.xlu1 %v3659_v1 }
  0xee   : > { %1553 = vperm.xlu1 %3440, %v1536_v37   ;;  %v4083_v40 = vpop.permute.xlu0 %1270 }
  0xef   : > { %5797 = vst [vmem:[#allocation35_spill] sm:$0xff] %v4083_v40  ;;  %451 = vperm.xlu0 %3523, %v422_v29   ;;  %v5801_v29 = vmov 5  }
  0xf0   : > { %v4089_v43 = vpop.permute.xlu1 %607 }
  0xf1   : > { %5798 = vst [vmem:[#allocation36_spill] sm:$0xff] %v4089_v43 }
  0xf2   : > { %1114 = vperm.xlu1 %3440, %v1091_v41   ;;  %v4093_v0 = vpop.permute.xlu0 %1276 }
  0xf3   : > { %5799 = vst [vmem:[#allocation37_spill] sm:$0xff] %v4093_v0  ;;  %457 = vperm.xlu0 %3523, %v424_v42   ;;  %v428_v42 = vsel %vm348_vm13, 1, %v3659_v1  ;;  %v430_v0 = vsel %vm350_vm15, 1, %v3659_v1  ;;  %vm1009_vm13 = vcmp.gt.f32.partialorder %v3808_v10, 3.0  ;;  %vm1010_vm15 = vcmp.gt.f32.partialorder %v3902_v38, 3.0 }
  0xf4   : > { %v4098_v37 = vpop.permute.xlu1 %613 }
  0xf5   : > { %5800 = vst [vmem:[#allocation38_spill] sm:$0xff] %v4098_v37 }
  0xf6   : > { %3443 = vset.pattern.permute.xlu1 %v5801_v29  ;;  %v4103_v27 = vpop.permute.xlu0 %1282 }
  0xf7   : > { %5802 = vst [vmem:[#allocation39_spill] sm:$0xff] %v4103_v27  ;;  %1476 = vperm.xlu1 %3443, %v3859_v28   ;;  %463 = vperm.xlu0 %3523, %v426_v6  }
  0xf8   : > { %v4110_v41 = vpop.permute.xlu1 %619 }
  0xf9   : > { %5803 = vst [vmem:[#allocation40_spill] sm:$0xff] %v4110_v41  ;;  %v5806_v41 = vmov 4  }
  0xfa   : > { %v4115_v63 = vpop.permute.xlu0 %1288 }
  0xfb   : > { %5804 = vst [vmem:[#allocation41_spill] sm:$0xff] %v4115_v63  ;;  %3444 = vset.pattern.permute.xlu1 %v3659_v1  ;;  %469 = vperm.xlu0 %3523, %v428_v42   ;;  %v644_v42 = vsel %vm564_vm1, 1, %v3659_v1  ;;  %vm1457_vm1 = vcmp.gt.f32.partialorder %v3808_v10, 5.0 }
  0xfc   : > { %893 = vperm.xlu1 %3444, %v868_v26  }
  0xfd   : > { %v4119_v27 = vpop.permute.xlu1 %657 }
  0xff   : > { %475 = vperm.xlu0 %3523, %v430_v0   ;;  %v4122_v6 = vpop.permute.xlu0 %1733  ;;  %v5807_v0 = vmov 6  }
 0x100   : > { %5805 = vst [vmem:[#allocation42_spill] sm:$0xff] %v4122_v6  ;;  %3445 = vset.pattern.permute.xlu1 %v5806_v41 }
 0x101   : > { %v4126_v25 = vpop.permute.xlu1 %663  ;;  %1255 = vperm.xlu1 %3445, %v3767_v2  }
 0x103   : > { %660 = vperm.xlu0 %3523, %v641_v23   ;;  %v646_v23 = vsel %vm566_vm3, 1, %v3659_v1  ;;  %vm1234_vm3 = vcmp.gt.f32.partialorder %v3902_v38, 4.0 }
 0x104   : > { %v4130_v26 = vpop.permute.xlu0 %1479 }
 0x105   : > { %v4133_v63 = vpop.permute.xlu1 %666  ;;  %3446 = vset.pattern.permute.xlu1 %v5807_v0 }
 0x106   : > { %1697 = vperm.xlu1 %3446, %v3770_v3  }
 0x107   : > { %669 = vperm.xlu0 %3523, %v644_v42   ;;  %v1315_v42 = vsel %vm1235_vm4, 1, %v3659_v1  ;;  %vm1680_vm4 = vcmp.gt.f32.partialorder %v3893_v36, 6.0 }
 0x108   : > { %v4139_v6 = vpop.permute.xlu0 %1482 }
 0x109   : > { %5808 = vst [vmem:[#allocation43_spill] sm:$0xff] %v4139_v6  ;;  %v4143_v60 = vpop.permute.xlu1 %672 }
 0x10a   : > { %5809 = vst [vmem:[#allocation44_spill] sm:$0xff] %v4143_v60  ;;  %3447 = vset.pattern.permute.xlu1 %v3659_v1 }
 0x10b   : > { %896 = vperm.xlu1 %3447, %v869_v59   ;;  %675 = vperm.xlu0 %3523, %v646_v23   ;;  %v652_v23 = vsel %vm572_vm7, 1, %v3659_v1  ;;  %vm1904_vm7 = vcmp.gt.f32.partialorder %v3893_v36, 7.0 }
 0x10c   : > { %v4148_v29 = vpop.permute.xlu0 %1485 }
 0x10d   : > { %5810 = vst [vmem:[#allocation45_spill] sm:$0xff] %v4148_v29  ;;  %v4152_v61 = vpop.permute.xlu1 %678  ;;  %v4442_v29 = vld [vmem:[%s3800_s20 + $0x48] sm:$0xff] }
 0x10e   : > { %5811 = vst [vmem:[#allocation46_spill] sm:$0xff] %v4152_v61  ;;  %v1093_v61 = vsel %vm1013_vm0, 1, %v3659_v1  ;;  %vm1238_vm0 = vcmp.gt.f32.partialorder %v4062_v16, 4.0 }
 0x10f   : > { %1338 = vperm.xlu1 %3447, %v1315_v42   ;;  %681 = vperm.xlu0 %3523, %v648_v24   ;;  %v5816_v24 = vmov 3  }
 0x110   : > { %v4155_v58 = vpop.permute.xlu0 %1488 }
 0x111   : > { %5812 = vst [vmem:[#allocation47_spill] sm:$0xff] %v4155_v58  ;;  %v4158_v37 = vpop.permute.xlu1 %684  ;;  %v4389_v58 = vld [vmem:[%s3764_s17 + $0x38] sm:$0xff] }
 0x112   : > { %5813 = vst [vmem:[#allocation48_spill] sm:$0xff] %v4158_v37  ;;  %v654_v37 = vsel %vm574_vm8, 1, %v3659_v1  ;;  %vm1905_vm8 = vcmp.gt.f32.partialorder %v3808_v10, 7.0 }
 0x113   : > { %3448 = vset.pattern.permute.xlu1 %v5807_v0  ;;  %687 = vperm.xlu0 %3523, %v650_v22   ;;  %v1985_v10 = vsel %vm1905_vm8, 1, %v3659_v1  ;;  %vm1015_vm8 = vcmp.gt.f32.partialorder %v3827_v17, 3.0 }
 0x114   : > { %1700 = vperm.xlu1 %3448, %v3859_v28   ;;  %v4163_v59 = vpop.permute.xlu0 %1491  ;;  %v1095_v44 = vsel %vm1015_vm8, 1, %v3659_v1 }
 0x115   : > { %5814 = vst [vmem:[#allocation49_spill] sm:$0xff] %v4163_v59  ;;  %v4166_v43 = vpop.permute.xlu1 %690  ;;  %v1986_v59 = vsel %vm1906_vm14, 1, %v3659_v1 }
 0x116   : > { %5815 = vst [vmem:[#allocation50_spill] sm:$0xff] %v4166_v43  ;;  %v1092_v43 = vsel %vm1012_vm9, 1, %v3659_v1  ;;  %vm1236_vm9 = vcmp.gt.f32.partialorder %v4051_v35, 4.0 }
 0x117   : > { %693 = vperm.xlu0 %3523, %v652_v23   ;;  %v865_v23 = vsel %vm785_vm10, 1, %v3659_v1  ;;  %vm791_vm10 = vcmp.gt.f32.partialorder %v3827_v17, 2.0 }
 0x118   : > { %3449 = vset.pattern.permute.xlu1 %v5816_v24  ;;  %v4170_v42 = vpop.permute.xlu0 %1494 }
 0x119   : > { %5817 = vst [vmem:[#allocation51_spill] sm:$0xff] %v4170_v42  ;;  %v4174_v22 = vpop.permute.xlu1 %696  ;;  %1037 = vperm.xlu1 %3449, %v3868_v31  }
 0x11a   : > { %5818 = vst [vmem:[#allocation52_spill] sm:$0xff] %v4174_v22  ;;  %v1538_v22 = vsel %vm1458_vm11, 1, %v3659_v1  ;;  %vm1682_vm11 = vcmp.gt.f32.partialorder %v3902_v38, 6.0 }
 0x11b   : > { %699 = vperm.xlu0 %3523, %v654_v37   ;;  %v1088_v37 = vsel %vm1008_vm12, 1, %v3659_v1  ;;  %vm1237_vm12 = vcmp.gt.f32.partialorder %v3820_v14, 4.0 }
 0x11c   : > { %v4179_v7 = vpop.permute.xlu0 %1497 }
 0x11d   : > { %5819 = vst [vmem:[#allocation53_spill] sm:$0xff] %v4179_v7  ;;  %v4183_v42 = vpop.permute.xlu1 %702  ;;  %3450 = vset.pattern.permute.xlu1 %v3659_v1 }
 0x11e   : > { %5820 = vst [vmem:[#allocation54_spill] sm:$0xff] %v4183_v42  ;;  %1117 = vperm.xlu1 %3450, %v1092_v43   ;;  %v1089_v42 = vsel %vm1009_vm13, 1, %v3659_v1  ;;  %vm1683_vm13 = vcmp.gt.f32.partialorder %v3815_v12, 6.0 }
 0x11f   : > { %884 = vperm.xlu0 %3523, %v865_v23   ;;  %v5823_v23 = vmov 7  }
 0x120   : > { %v4188_v40 = vpop.permute.xlu0 %1500 }
 0x121   : > { %5821 = vst [vmem:[#allocation55_spill] sm:$0xff] %v4188_v40 }
 0x122   : > { %v4192_v7 = vpop.permute.xlu1 %804  ;;  %1559 = vperm.xlu1 %3450, %v1538_v22  }
 0x123   : > { %1105 = vperm.xlu0 %3523, %v1088_v37   ;;  %v2128_v37 = vld [vmem:[%s5742_s2] sm:$0xff] }
 0x124   : > { %v4194_v56 = vpop.permute.xlu0 %1503 }
 0x125   : > { %5822 = vst [vmem:[#allocation56_spill] sm:$0xff] %v4194_v56  ;;  %v2129_v56 = vld [vmem:[%s5742_s2 + $0x8] sm:$0xff] }
 0x126   : > { %v4198_v43 = vpop.permute.xlu1 %807  ;;  %3451 = vset.pattern.permute.xlu1 %v5823_v23 }
 0x127   : > { %1921 = vperm.xlu1 %3451, %v3770_v3   ;;  %1108 = vperm.xlu0 %3523, %v1089_v42   ;;  %v3266_v3 = vpack.c.bf16 %v2129_v56, %v2128_v37 }
 0x128   : > { %v4202_v40 = vpop.permute.xlu0 %1506 }
 0x129   : > { %5824 = vst [vmem:[#allocation57_spill] sm:$0xff] %v4202_v40  ;;  %v1090_v40 = vsel %vm1010_vm15, 1, %v3659_v1  ;;  %3267 = vmatprep.subr.bf16.mxu0 %v3266_v3  ;;  %vm1907_vm15 = vcmp.gt.f32.partialorder %v3815_v12, 7.0  ;;  %v1318_v12 = vsel %vm1238_vm0, 1, %v3659_v1  ;;  %vm1688_vm0 = vcmp.gt.f32.partialorder %v4074_v46, 6.0 }
 0x12a   : > { %v4206_v22 = vpop.permute.xlu1 %813  ;;  %3269 = vmatpush3.bf16.msra.mxu0 %v3266_v3 }
 0x12b   : > { %5825 = vst [vmem:[#allocation58_spill] sm:$0xff] %v4206_v22  ;;  %3452 = vset.pattern.permute.xlu1 %v5816_v24  ;;  %1329 = vperm.xlu0 %3523, %v1312_v21   ;;  %v2130_v21 = vld [vmem:[%s5742_s2 + $0x10] sm:$0xff] }
 0x12c   : > { %1040 = vperm.xlu1 %3452, %v3780_v5   ;;  %v4217_v42 = vpop.permute.xlu0 %1509  ;;  %v2131_v5 = vld [vmem:[%s5742_s2 + $0x18] sm:$0xff] }
 0x12d   : > { %5826 = vst [vmem:[#allocation59_spill] sm:$0xff] %v4217_v42  ;;  %v3270_v56 = vpack.c.bf16 %v2131_v5, %v2130_v21  ;;  %v1537_v42 = vsel %vm1457_vm1, 1, %v3659_v1  ;;  %v2133_v21 = vld [vmem:[%s5742_s2 + $0x28] sm:$0xff]  ;;  %vm1014_vm1 = vcmp.gt.f32.partialorder %v4062_v16, 3.0 }
 0x12e   : > { %v4221_v20 = vpop.permute.xlu1 %819 }
 0x12f   : > { %5827 = vst [vmem:[#allocation60_spill] sm:$0xff] %v4221_v20  ;;  %1111 = vperm.xlu0 %3523, %v1090_v40   ;;  %3271 = vmatprep.subr.bf16.mxu0 %v3270_v56  ;;  %v2132_v40 = vld [vmem:[%s5742_s2 + $0x20] sm:$0xff] }
 0x130   : > { %3453 = vset.pattern.permute.xlu1 %v3659_v1  ;;  %v4232_v37 = vpop.permute.xlu0 %1512  ;;  %3273 = vmatpush3.bf16.msra.mxu0 %v3270_v56  ;;  %v3274_v5 = vpack.c.bf16 %v2133_v21, %v2132_v40  ;;  %v2134_v56 = vld [vmem:[%s5742_s2 + $0x30] sm:$0xff]  ;;  %v1760_v21 = vsel %vm1680_vm4, 1, %v3659_v1  ;;  %vm1685_vm4 = vcmp.gt.f32.partialorder %v3820_v14, 6.0 }
 0x131   : > { %5828 = vst [vmem:[#allocation61_spill] sm:$0xff] %v4232_v37  ;;  %1120 = vperm.xlu1 %3453, %v1093_v61   ;;  %v1314_v61 = vsel %vm1234_vm3, 1, %v3659_v1  ;;  %vm1460_vm3 = vcmp.gt.f32.partialorder %v4051_v35, 5.0 }
 0x132   : > { %v4236_v3 = vpop.permute.xlu1 %825  ;;  %3275 = vmatprep.subr.bf16.mxu0 %v3274_v5 }
 0x133   : > { %5829 = vst [vmem:[#allocation62_spill] sm:$0xff] %v4236_v3  ;;  %1556 = vperm.xlu0 %3523, %v1537_v42   ;;  %v2135_v42 = vld [vmem:[%s5742_s2 + $0x38] sm:$0xff] }
 0x134   : > { %v4245_v37 = vpop.permute.xlu0 %1515  ;;  %3277 = vmatpush3.bf16.msra.mxu0 %v3274_v5  ;;  %v3278_v40 = vpack.c.bf16 %v2135_v42, %v2134_v56  ;;  %v2137_v56 = vld [vmem:[%s5742_s2 + $0x48] sm:$0xff] }
 0x135   : > { %5830 = vst [vmem:[#allocation63_spill] sm:$0xff] %v4245_v37  ;;  %1562 = vperm.xlu1 %3453, %v1539_v57   ;;  %v870_v37 = vsel %vm790_vm5, 1, %v3659_v1  ;;  %vm1908_vm5 = vcmp.gt.f32.partialorder %v4051_v35, 7.0 }
 0x136   : > { %v4249_v3 = vpop.permute.xlu1 %831  ;;  %3279 = vmatprep.subr.bf16.mxu0 %v3278_v40 }
 0x137   : > { %5831 = vst [vmem:[#allocation64_spill] sm:$0xff] %v4249_v3  ;;  %1335 = vperm.xlu0 %3523, %v1314_v61   ;;  %v2136_v61 = vld [vmem:[%s5742_s2 + $0x40] sm:$0xff] }
 0x138   : > { %3281 = vmatpush3.bf16.msra.mxu0 %v3278_v40  ;;  %v3282_v42 = vpack.c.bf16 %v2137_v56, %v2136_v61  ;;  %v2138_v40 = vld [vmem:[%s5742_s2 + $0x50] sm:$0xff]  ;;  %v1984_v56 = vsel %vm1904_vm7, 1, %v3659_v1  ;;  %vm1240_vm7 = vcmp.gt.f32.partialorder %v4074_v46, 4.0 }
 0x139   : > { %3454 = vset.pattern.permute.xlu1 %v5823_v23  ;;  %v4259_v57 = vpop.permute.xlu0 %1960 }
 0x13a   : > { %5832 = vst [vmem:[#allocation65_spill] sm:$0xff] %v4259_v57  ;;  %v4263_v5 = vpop.permute.xlu1 %837  ;;  %1924 = vperm.xlu1 %3454, %v3859_v28   ;;  %v1761_v57 = vsel %vm1681_vm6, 1, %v3659_v1  ;;  %3283 = vmatprep.subr.bf16.mxu0 %v3282_v42  ;;  %vm1909_vm6 = vcmp.gt.f32.partialorder %v3820_v14, 7.0 }
 0x13b   : > { %5833 = vst [vmem:[#allocation66_spill] sm:$0xff] %v4263_v5  ;;  %1777 = vperm.xlu0 %3523, %v1760_v21   ;;  %v2139_v21 = vld [vmem:[%s5742_s2 + $0x58] sm:$0xff] }
 0x13c   : > { %3285 = vmatpush3.bf16.msra.mxu0 %v3282_v42  ;;  %v3286_v61 = vpack.c.bf16 %v2139_v21, %v2138_v40  ;;  %v2140_v42 = vld [vmem:[%s5742_s2 + $0x60] sm:$0xff]  ;;  %v2142_v40 = vld [vmem:[%s5742_s2 + $0x70] sm:$0xff]  ;;  %v2143_v21 = vld [vmem:[%s5742_s2 + $0x78] sm:$0xff] }
 0x13d   : > { %v4274_v3 = vpop.permute.xlu0 %1963 }
 0x13e   : > { %5834 = vst [vmem:[#allocation67_spill] sm:$0xff] %v4274_v3  ;;  %v4277_v28 = vpop.permute.xlu1 %843  ;;  %3455 = vset.pattern.permute.xlu1 %v3659_v1  ;;  %3287 = vmatprep.subr.bf16.mxu0 %v3286_v61  ;;  %v2141_v3 = vld [vmem:[%s5742_s2 + $0x68] sm:$0xff] }
 0x13f   : > { %5835 = vst [vmem:[#allocation68_spill] sm:$0xff] %v4277_v28  ;;  %899 = vperm.xlu1 %3455, %v870_v37   ;;  %1780 = vperm.xlu0 %3523, %v1761_v57   ;;  %v3290_v37 = vpack.c.bf16 %v2141_v3, %v2140_v42  ;;  %v3294_v3 = vpack.c.bf16 %v2143_v21, %v2142_v40  ;;  %v1317_v40 = vsel %vm1237_vm12, 1, %v3659_v1  ;;  %vm1910_vm12 = vcmp.gt.f32.partialorder %v4062_v16, 7.0 }
 0x140   : > { %3289 = vmatpush3.bf16.msra.mxu0 %v3286_v61 }
 0x141   : > { %3291 = vmatprep.subr.bf16.mxu0 %v3290_v37 }
 0x142   : > { %v4288_v36 = vpop.permute.xlu0 %353 }
 0x143   : > { %v4296_v28 = vpop.permute.xlu1 %881  ;;  %3456 = vset.pattern.permute.xlu1 %v5806_v41  ;;  %2001 = vperm.xlu0 %3523, %v1984_v56   ;;  %v1316_v56 = vsel %vm1236_vm9, 1, %v3659_v1  ;;  %vm1686_vm9 = vcmp.gt.f32.partialorder %v4062_v16, 6.0 }
 0x144   : > { %1261 = vperm.xlu1 %3456, %v3868_v31   ;;  %3293 = vmatpush3.bf16.msra.mxu0 %v3290_v37  ;;  %v871_v37 = vsel %vm791_vm10, 1, %v3659_v1  ;;  %vm1461_vm10 = vcmp.gt.f32.partialorder %v3820_v14, 5.0 }
 0x145   : > { %3295 = vmatprep.subr.bf16.mxu0 %v3294_v3 }
 0x146   : > { %v4302_v57 = vpop.permute.xlu0 %356 }
 0x147   : > { %v4310_v61 = vpop.permute.xlu1 %887  ;;  %2004 = vperm.xlu0 %3523, %v1985_v10   ;;  %v1762_v10 = vsel %vm1682_vm11, 1, %v3659_v1  ;;  %vm1687_vm11 = vcmp.gt.f32.partialorder %v3827_v17, 6.0  ;;  %v1990_v17 = vsel %vm1910_vm12, 1, %v3659_v1 }
 0x148   : > { %3457 = vset.pattern.permute.xlu1 %v5807_v0  ;;  %3297 = vmatpush3.bf16.msra.mxu0 %v3294_v3  ;;  %v1763_v3 = vsel %vm1683_vm13, 1, %v3659_v1  ;;  %v1767_v14 = vsel %vm1687_vm11, 1, %v3659_v1  ;;  %vm792_vm13 = vcmp.gt.f32.partialorder %v4074_v46, 2.0  ;;  %vm1462_vm11 = vcmp.gt.f32.partialorder %v4062_v16, 5.0 }
 0x149   : > { %1703 = vperm.xlu1 %3457, %v3767_v2  }
 0x14a   : > { %v4317_v42 = vpop.permute.xlu0 %365 }
 0x14b   : > { %5836 = vst [vmem:[#allocation69_spill] sm:$0xff] %v4317_v42  ;;  %1341 = vperm.xlu0 %3523, %v1316_v56  }
 0x14c   : > { %v4320_v5 = vpop.permute.xlu1 %1025 }
 0x14d   : > { %3458 = vset.pattern.permute.xlu1 %v3659_v1 }
 0x14e   : > { %902 = vperm.xlu1 %3458, %v871_v37   ;;  %v4326_v2 = vpop.permute.xlu0 %371 }
 0x14f   : > { %5837 = vst [vmem:[#allocation70_spill] sm:$0xff] %v4326_v2  ;;  %1783 = vperm.xlu0 %3523, %v1762_v10   ;;  %v1987_v10 = vsel %vm1907_vm15, 1, %v3659_v1  ;;  %v3558_v2 = vld [vmem:[%s3764_s17 + $0x10] sm:$0xff]  ;;  %vm1242_vm15 = vcmp.gt.f32.partialorder %v4086_v30, 4.0 }
 0x150   : > { %v4329_v21 = vpop.permute.xlu1 %1028  ;;  %v1322_v60 = vsel %vm1242_vm15, 1, %v3659_v1 }
 0x152   : > { %1344 = vperm.xlu1 %3458, %v1317_v40   ;;  %v4333_v56 = vpop.permute.xlu0 %377 }
 0x153   : > { %5838 = vst [vmem:[#allocation71_spill] sm:$0xff] %v4333_v56  ;;  %1786 = vperm.xlu0 %3523, %v1763_v3   ;;  %v1094_v3 = vsel %vm1014_vm1, 1, %v3659_v1  ;;  %vm1689_vm1 = vcmp.gt.f32.partialorder %v4442_v29, 6.0 }
 0x155   : > { %v4336_v20 = vpop.permute.xlu1 %1249 }
 0x156   : > { %3459 = vset.pattern.permute.xlu1 %v5807_v0  ;;  %v4340_v37 = vpop.permute.xlu0 %383 }
 0x157   : > { %5839 = vst [vmem:[#allocation72_spill] sm:$0xff] %v4340_v37  ;;  %1706 = vperm.xlu1 %3459, %v3775_v4   ;;  %2007 = vperm.xlu0 %3523, %v1986_v59   ;;  %v1540_v37 = vsel %vm1460_vm3, 1, %v3659_v1  ;;  %vm1912_vm3 = vcmp.gt.f32.partialorder %v4074_v46, 7.0 }
 0x15a   : > { %v4345_v38 = vpop.permute.xlu1 %890  ;;  %v4347_v40 = vpop.permute.xlu0 %389 }
 0x15b   : > { %5840 = vst [vmem:[#allocation73_spill] sm:$0xff] %v4347_v40  ;;  %3460 = vset.pattern.permute.xlu1 %v5816_v24  ;;  %2010 = vperm.xlu0 %3523, %v1987_v10   ;;  %v1764_v10 = vsel %vm1684_vm2, 1, %v3659_v1  ;;  %vm793_vm2 = vcmp.gt.f32.partialorder %v4442_v29, 2.0 }
 0x15c   : > { %1043 = vperm.xlu1 %3460, %v3873_v32  }
 0x15e   : > { %v4354_v4 = vpop.permute.xlu1 %1332  ;;  %v4356_v59 = vpop.permute.xlu0 %395 }
 0x15f   : > { %5841 = vst [vmem:[#allocation74_spill] sm:$0xff] %v4356_v59  ;;  %1347 = vperm.xlu0 %3523, %v1318_v12   ;;  %v1765_v59 = vsel %vm1685_vm4, 1, %v3659_v1 }
 0x160   : > { %3461 = vset.pattern.permute.xlu1 %v3659_v1 }
 0x161   : > { %1123 = vperm.xlu1 %3461, %v1094_v3   ;;  %v1988_v3 = vsel %vm1908_vm5, 1, %v3659_v1  ;;  %vm1913_vm5 = vcmp.gt.f32.partialorder %v4442_v29, 7.0 }
 0x162   : > { %v4363_v40 = vpop.permute.xlu0 %433 }
 0x163   : > { %v4366_v56 = vpop.permute.xlu1 %1031  ;;  %1789 = vperm.xlu0 %3523, %v1764_v10   ;;  %vm480_vm15 = vcmp.eq.s32.totalorder %v4363_v40, 1 }
 0x165   : > { %1565 = vperm.xlu1 %3461, %v1540_v37   ;;  %v1989_v37 = vsel %vm1909_vm6, 1, %v3659_v1  ;;  %vm1244_vm6 = vcmp.gt.f32.partialorder %v4096_v39, 4.0 }
 0x166   : > { %v4370_v12 = vpop.permute.xlu0 %439  ;;  %v1324_v48 = vsel %vm1244_vm6, 1, %v3659_v1 }
 0x167   : > { %1792 = vperm.xlu0 %3523, %v1765_v59  }
 0x168   : > { %v4372_v19 = vpop.permute.xlu1 %1473 }
 0x169   : > { %3462 = vset.pattern.permute.xlu1 %v5823_v23 }
 0x16a   : > { %1927 = vperm.xlu1 %3462, %v3558_v2   ;;  %v4378_v10 = vpop.permute.xlu0 %445  ;;  %v1320_v2 = vsel %vm1240_vm7, 1, %v3659_v1  ;;  %vm1690_vm7 = vcmp.gt.f32.partialorder %v4086_v30, 6.0 }
 0x16b   : > { %5842 = vst [vmem:[#allocation75_spill] sm:$0xff] %v4378_v10  ;;  %2013 = vperm.xlu0 %3523, %v1988_v3  }
 0x16d   : > { %v4381_v35 = vpop.permute.xlu1 %1553 }
 0x16e   : > { %3463 = vset.pattern.permute.xlu1 %v5816_v24  ;;  %v4385_v59 = vpop.permute.xlu0 %451 }
 0x16f   : > { %5843 = vst [vmem:[#allocation76_spill] sm:$0xff] %v4385_v59  ;;  %1046 = vperm.xlu1 %3463, %v4389_v58   ;;  %2016 = vperm.xlu0 %3523, %v1989_v37   ;;  %v1766_v59 = vsel %vm1686_vm9, 1, %v3659_v1  ;;  %v1541_v37 = vsel %vm1461_vm10, 1, %v3659_v1  ;;  %vm1016_vm9 = vcmp.gt.f32.partialorder %v4074_v46, 3.0  ;;  %vm1914_vm10 = vcmp.gt.f32.partialorder %v4086_v30, 7.0 }
 0x170   : > { %v1994_v46 = vsel %vm1914_vm10, 1, %v3659_v1 }
 0x171   : > { %v4393_v3 = vpop.permute.xlu1 %1114 }
 0x172   : > { %5844 = vst [vmem:[#allocation77_spill] sm:$0xff] %v4393_v3  ;;  %v4397_v54 = vpop.permute.xlu0 %457 }
 0x173   : > { %5845 = vst [vmem:[#allocation78_spill] sm:$0xff] %v4397_v54  ;;  %3464 = vset.pattern.permute.xlu1 %v3659_v1  ;;  %1353 = vperm.xlu0 %3523, %v1320_v2   ;;  %v3560_v54 = vld [vmem:[%s3764_s17 + $0x18] sm:$0xff] }
 0x174   : > { %1126 = vperm.xlu1 %3464, %v1095_v44  }
 0x176   : > { %v4404_v18 = vpop.permute.xlu1 %1476  ;;  %v4406_v9 = vpop.permute.xlu0 %463 }
 0x177   : > { %5846 = vst [vmem:[#allocation79_spill] sm:$0xff] %v4406_v9  ;;  %1795 = vperm.xlu0 %3523, %v1766_v59   ;;  %v4419_v9 = vld [vmem:[%s3800_s20 + $0x38] sm:$0xff] }
 0x178   : > { %1568 = vperm.xlu1 %3464, %v1541_v37   ;;  %vm1911_vm14 = vcmp.gt.f32.partialorder %v4419_v9, 7.0  ;;  %v872_v37 = vsel %vm792_vm13, 1, %v3659_v1  ;;  %vm1239_vm4 = vcmp.gt.f32.partialorder %v4419_v9, 4.0  ;;  %vm1247_vm13 = vcmp.gt.f32.partialorder %v4516_v50, 4.0 }
 0x179   : > { %v1327_v45 = vsel %vm1247_vm13, 1, %v3659_v1 }
 0x17a   : > { %v4410_v2 = vpop.permute.xlu0 %469 }
 0x17b   : > { %5847 = vst [vmem:[#allocation80_spill] sm:$0xff] %v4410_v2  ;;  %v4412_v44 = vpop.permute.xlu1 %893  ;;  %1798 = vperm.xlu0 %3523, %v1767_v14   ;;  %v1991_v14 = vsel %vm1911_vm14, 1, %v3659_v1 }
 0x17c   : > { %5848 = vst [vmem:[#allocation81_spill] sm:$0xff] %v4412_v44  ;;  %3465 = vset.pattern.permute.xlu1 %v5823_v23  ;;  %v873_v44 = vsel %vm793_vm2, 1, %v3659_v1  ;;  %vm704_vm2 = vcmp.eq.s32.totalorder %v4119_v27, 1  ;;  %v4556_v27 = vld [vmem:[%s3764_s17 + $0x48] sm:$0xff] }
 0x17d   : > { %1930 = vperm.xlu1 %3465, %v3560_v54  }
 0x17e   : > { %v4422_v59 = vpop.permute.xlu0 %475 }
 0x17f   : > { %5849 = vst [vmem:[#allocation82_spill] sm:$0xff] %v4422_v59  ;;  %2019 = vperm.xlu0 %3523, %v1990_v17   ;;  %v1768_v59 = vsel %vm1688_vm0, 1, %v3659_v1  ;;  %vm1916_vm0 = vcmp.gt.f32.partialorder %v4096_v39, 7.0 }
 0x180   : > { %v4425_v2 = vpop.permute.xlu1 %1255  ;;  %v1996_v39 = vsel %vm1916_vm0, 1, %v3659_v1 }
 0x181   : > { %3466 = vset.pattern.permute.xlu1 %v3659_v1 }
 0x182   : > { %905 = vperm.xlu1 %3466, %v872_v37   ;;  %v4430_v54 = vpop.permute.xlu0 %660 }
 0x183   : > { %2022 = vperm.xlu0 %3523, %v1991_v14   ;;  %vm705_vm10 = vcmp.eq.s32.totalorder %v4430_v54, 1 }
 0x185   : > { %v4433_v55 = vpop.permute.xlu1 %1697 }
 0x186   : > { %3467 = vset.pattern.permute.xlu1 %v5806_v41  ;;  %v4437_v17 = vpop.permute.xlu0 %669 }
 0x187   : > { %5850 = vst [vmem:[#allocation83_spill] sm:$0xff] %v4437_v17  ;;  %1267 = vperm.xlu1 %3467, %v3873_v32   ;;  %1359 = vperm.xlu0 %3523, %v1322_v60   ;;  %v1769_v32 = vsel %vm1689_vm1, 1, %v3659_v1  ;;  %v4495_v17 = vld [vmem:[%s3764_s17 + $0x40] sm:$0xff] }
 0x18a   : > { %v4445_v37 = vpop.permute.xlu1 %896  ;;  %v4447_v14 = vpop.permute.xlu0 %675 }
 0x18b   : > { %5851 = vst [vmem:[#allocation84_spill] sm:$0xff] %v4445_v37  ;;  %5852 = vst [vmem:[#allocation85_spill] sm:$0xff] %v4447_v14  ;;  %3468 = vset.pattern.permute.xlu1 %v5807_v0  ;;  %1801 = vperm.xlu0 %3523, %v1768_v59   ;;  %v1992_v59 = vsel %vm1912_vm3, 1, %v3659_v1  ;;  %v1319_v14 = vsel %vm1239_vm4, 1, %v3659_v1  ;;  %vm928_vm4 = vcmp.eq.s32.totalorder %v4296_v28, 1 }
 0x18c   : > { %1709 = vperm.xlu1 %3468, %v3868_v31  }
 0x18e   : > { %v4454_v60 = vpop.permute.xlu1 %1338  ;;  %v4456_v22 = vpop.permute.xlu0 %681 }
 0x18f   : > { %5853 = vst [vmem:[#allocation86_spill] sm:$0xff] %v4454_v60  ;;  %5854 = vst [vmem:[#allocation87_spill] sm:$0xff] %v4456_v22  ;;  %1804 = vperm.xlu0 %3523, %v1769_v32   ;;  %v1993_v32 = vsel %vm1913_vm5, 1, %v3659_v1  ;;  %v334_v60 = vlaneseq }
 0x190   : > { %3469 = vset.pattern.permute.xlu1 %v3659_v1 }
 0x191   : > { %908 = vperm.xlu1 %3469, %v873_v44  }
 0x192   : > { %v4463_v31 = vpop.permute.xlu0 %687 }
 0x193   : > { %5855 = vst [vmem:[#allocation88_spill] sm:$0xff] %v4463_v31  ;;  %v4466_v37 = vpop.permute.xlu1 %1700  ;;  %2025 = vperm.xlu0 %3523, %v1992_v59   ;;  %v4478_v31 = vld [vmem:[%s3764_s17 + $0x28] sm:$0xff] }
 0x195   : > { %1350 = vperm.xlu1 %3469, %v1319_v14   ;;  %v1770_v14 = vsel %vm1690_vm7, 1, %v3659_v1 }
 0x196   : > { %v4470_v22 = vpop.permute.xlu0 %693 }
 0x197   : > { %5856 = vst [vmem:[#allocation89_spill] sm:$0xff] %v4470_v22  ;;  %2028 = vperm.xlu0 %3523, %v1993_v32   ;;  %v4487_v32 = vld [vmem:[%s3800_s20 + $0x58] sm:$0xff] }
 0x198   : > { %v4472_v44 = vpop.permute.xlu1 %1037  ;;  %vm1691_vm8 = vcmp.gt.f32.partialorder %v4487_v32, 6.0  ;;  %vm1915_vm12 = vcmp.gt.f32.partialorder %v4487_v32, 7.0 }
 0x199   : > { %5857 = vst [vmem:[#allocation90_spill] sm:$0xff] %v4472_v44  ;;  %3470 = vset.pattern.permute.xlu1 %v5807_v0  ;;  %v1995_v16 = vsel %vm1915_vm12, 1, %v3659_v1 }
 0x19a   : > { %1712 = vperm.xlu1 %3470, %v4478_v31   ;;  %v4481_v59 = vpop.permute.xlu0 %699 }
 0x19b   : > { %5858 = vst [vmem:[#allocation91_spill] sm:$0xff] %v4481_v59  ;;  %1365 = vperm.xlu0 %3523, %v1324_v48   ;;  %v1771_v48 = vsel %vm1691_vm8, 1, %v3659_v1  ;;  %vm1017_vm8 = vcmp.gt.f32.partialorder %v4442_v29, 3.0 }
 0x19c   : > { %v1097_v28 = vsel %vm1017_vm8, 1, %v3659_v1 }
 0x19d   : > { %v4484_v22 = vpop.permute.xlu1 %1117 }
 0x19e   : > { %5859 = vst [vmem:[#allocation92_spill] sm:$0xff] %v4484_v22  ;;  %3471 = vset.pattern.permute.xlu1 %v5816_v24  ;;  %v4491_v44 = vpop.permute.xlu0 %884  ;;  %v1096_v22 = vsel %vm1016_vm9, 1, %v3659_v1  ;;  %vm1694_vm9 = vcmp.gt.f32.partialorder %v4107_v62, 6.0 }
 0x19f   : > { %1049 = vperm.xlu1 %3471, %v4495_v17   ;;  %1807 = vperm.xlu0 %3523, %v1770_v14   ;;  %v1542_v14 = vsel %vm1462_vm11, 1, %v3659_v1  ;;  %vm481_vm11 = vcmp.eq.s32.totalorder %v3980_v8, 1  ;;  %vm929_vm0 = vcmp.eq.s32.totalorder %v4491_v44, 1 }
 0x1a1   : > { %v4499_v59 = vpop.permute.xlu1 %1559 }
 0x1a2   : > { %v4503_v10 = vpop.permute.xlu0 %1105 }
 0x1a3   : > { %3472 = vset.pattern.permute.xlu1 %v3659_v1  ;;  %1810 = vperm.xlu0 %3523, %v1771_v48   ;;  %v4519_v48 = vand.u32 127, %v334_v60 }
 0x1a4   : > { %1129 = vperm.xlu1 %3472, %v1096_v22  }
 0x1a5   : > { %vm400_vm14 = vcmp.eq.s32.totalorder %v4519_v48, %v4288_v36  ;;  %vm624_vm1 = vcmp.eq.s32.totalorder %v4519_v48, %v3934_v51  ;;  %vm848_vm3 = vcmp.eq.s32.totalorder %v4519_v48, %v3983_v11  ;;  %vm401_vm7 = vcmp.eq.s32.totalorder %v4519_v48, %v4302_v57 }
 0x1a6   : > { %v4510_v42 = vpop.permute.xlu1 %1921  ;;  %v4512_v6 = vpop.permute.xlu0 %1108  ;;  %vm4538_vm5 = vmand %vm400_vm14, %vm480_vm15  ;;  %vm625_vm12 = vcmp.eq.s32.totalorder %v4519_v48, %v4037_v33  ;;  %vm1152_vm14 = vcmp.eq.s32.totalorder %v4503_v10, 1  ;;  %v1774_v36 = vsel %vm1694_vm9, 1, %v3659_v1  ;;  %vm1296_vm8 = vcmp.eq.s32.totalorder %v4519_v48, %v4336_v20 }
 0x1a7   : > { %2031 = vperm.xlu0 %3523, %v1994_v46   ;;  %v3567_v46 = vld [vmem:[%s3764_s17 + $0x20] sm:$0xff]  ;;  %vm4545_vm6 = vmand %vm624_vm1, %vm704_vm2  ;;  %vm1072_vm1 = vcmp.eq.s32.totalorder %v4519_v48, %v4320_v5 }
 0x1a8   : > { %1571 = vperm.xlu1 %3472, %v1542_v14   ;;  %vm4569_vm13 = vmand %vm848_vm3, %vm928_vm4  ;;  %vm1463_vm4 = vcmp.gt.f32.partialorder %v4419_v9, 5.0 }
 0x1a9   : > { %vm4583_vm15 = vmand %vm401_vm7, %vm481_vm11 }
 0x1aa   : > { %v1330_v22 = vpop.permute.xlu0 %1329  ;;  %vm4600_vm2 = vmand %vm625_vm12, %vm705_vm10  ;;  %vm1153_vm10 = vcmp.eq.s32.totalorder %v4512_v6, 1  ;;  %vm1073_vm12 = vcmp.eq.s32.totalorder %v4519_v48, %v4329_v21 }
 0x1ab   : > { %v4521_v3 = vpop.permute.xlu1 %1040  ;;  %2034 = vperm.xlu0 %3523, %v1995_v16   ;;  %v3666_v16 = vmov 0.0   ;;  %vm1376_vm3 = vcmp.eq.s32.totalorder %v1330_v22, 1  ;;  %vm1168_vm7 = vmand %vm1072_vm1, %vm1152_vm14  ;;  %vm1297_vm14 = vcmp.eq.s32.totalorder %v4519_v48, %v4048_v47 }
 0x1ac   : > { %3473 = vset.pattern.permute.xlu1 %v5823_v23  ;;  %v2882_v8 = vsel %vm4545_vm6, 1.0, %v3666_v16  ;;  %vm849_vm6 = vcmp.eq.s32.totalorder %v4519_v48, %v4192_v7  ;;  %vm1392_vm11 = vmand %vm1296_vm8, %vm1376_vm3  ;;  %v1543_v7 = vsel %vm1463_vm4, 1, %v3659_v1  ;;  %v2898_v10 = vsel %vm4569_vm13, 1.0, %v3666_v16 }
 0x1ad   : > { %1933 = vperm.xlu1 %3473, %v3567_v46   ;;  %v2866_v46 = vsel %vm4538_vm5, 1.0, %v3666_v16  ;;  %vm1919_vm5 = vcmp.gt.f32.partialorder %v4516_v50, 7.0  ;;  %vm4617_vm9 = vmand %vm849_vm6, %vm929_vm0  ;;  %v2883_v20 = vsel %vm4600_vm2, 1.0, %v3666_v16  ;;  %v2914_v6 = vsel %vm1168_vm7, 1.0, %v3666_v16 }
 0x1ae   : > { %v4533_v60 = vpop.permute.xlu0 %1111  ;;  %v1999_v5 = vsel %vm1919_vm5, 1, %v3659_v1  ;;  %vm1600_vm0 = vcmp.eq.s32.totalorder %v4381_v35, 1  ;;  %vm1169_vm1 = vmand %vm1073_vm12, %vm1153_vm10  ;;  %v2867_v21 = vsel %vm4583_vm15, 1.0, %v3666_v16  ;;  %v2899_v51 = vsel %vm4617_vm9, 1.0, %v3666_v16 }
 0x1af   : > { %1374 = vperm.xlu0 %3523, %v1327_v45   ;;  %v2930_v14 = vsel %vm1392_vm11, 1.0, %v3666_v16  ;;  %vm1377_vm2 = vcmp.eq.s32.totalorder %v4354_v4, 1  ;;  %vm1520_vm3 = vcmp.eq.s32.totalorder %v4519_v48, %v4372_v19  ;;  %v769_v35 = vadd.f32 %v2883_v20, %v2867_v21 }
 0x1b0   : > { %v4542_v40 = vpop.permute.xlu1 %1120  ;;  %vm4648_vm4 = vmand %vm1520_vm3, %vm1600_vm0  ;;  %vm1744_vm15 = vcmp.eq.s32.totalorder %v4519_v48, %v4433_v55  ;;  %v2915_v11 = vsel %vm1169_vm1, 1.0, %v3666_v16  ;;  %vm1521_vm8 = vcmp.eq.s32.totalorder %v4519_v48, %v4404_v18  ;;  %v3569_v55 = vld [vmem:[%s3800_s20 + $0x10] sm:$0xff]  ;;  %vm794_vm10 = vcmp.gt.f32.partialorder %v4086_v30, 2.0 }
 0x1b1   : > { %3474 = vset.pattern.permute.xlu1 %v5816_v24  ;;  %vm4661_vm7 = vmand %vm1297_vm14, %vm1377_vm2  ;;  %v2946_v47 = vsel %vm4648_vm4, 1.0, %v3666_v16  ;;  %vm1745_vm12 = vcmp.eq.s32.totalorder %v4519_v48, %v4466_v37  ;;  %v874_v9 = vsel %vm794_vm10, 1, %v3659_v1  ;;  %vm1968_vm0 = vcmp.eq.s32.totalorder %v4519_v48, %v4510_v42  ;;  %v3570_v37 = vld [vmem:[%s3800_s20 + $0x20] sm:$0xff] }
 0x1b2   : > { %1052 = vperm.xlu1 %3474, %v4556_v27   ;;  %v4559_v45 = vpop.permute.xlu0 %1556  ;;  %v2931_v30 = vsel %vm4661_vm7, 1.0, %v3666_v16  ;;  %vm402_vm7 = vcmp.eq.s32.totalorder %v4519_v48, %v3931_v49  ;;  %vm626_vm10 = vcmp.eq.s32.totalorder %v4519_v48, %v4044_v34 }
 0x1b3   : > { %2037 = vperm.xlu0 %3523, %v1996_v39   ;;  %v768_v39 = vadd.f32 %v2882_v8, %v2866_v46  ;;  %vm1601_vm5 = vcmp.eq.s32.totalorder %v4559_v45, 1 }
 0x1b4   : > { %v4588_v33 = vpop.permute.xlu1 %1562  ;;  %vm1617_vm11 = vmand %vm1521_vm8, %vm1601_vm5  ;;  %vm1241_vm5 = vcmp.gt.f32.partialorder %v4442_v29, 4.0  ;;  %vm706_vm8 = vcmp.eq.s32.totalorder %v4126_v25, 1 }
 0x1b5   : > { %v992_v44 = vadd.f32 %v2898_v10, %v768_v39 }
 0x1b6   : > { %3475 = vset.pattern.permute.xlu1 %v3659_v1  ;;  %v4611_v62 = vpop.permute.xlu0 %1335 }
 0x1b7   : > { %1132 = vperm.xlu1 %3475, %v1097_v28   ;;  %1819 = vperm.xlu0 %3523, %v1774_v36   ;;  %v1216_v46 = vadd.f32 %v2914_v6, %v992_v44  ;;  %v993_v28 = vadd.f32 %v2899_v51, %v769_v35  ;;  %v3571_v51 = vld [vmem:[%s3800_s20 + $0x30] sm:$0xff] }
 0x1b9   : > { %v4633_v54 = vpop.permute.xlu1 %1924  ;;  %v1440_v36 = vadd.f32 %v2930_v14, %v1216_v46  ;;  %v1217_v45 = vadd.f32 %v2915_v11, %v993_v28  ;;  %v4699_v11 = vld [vmem:[%s3800_s20 + $0x40] sm:$0xff]  ;;  %v4707_v28 = vld [vmem:[%s3764_s17 + $0x30] sm:$0xff] }
 0x1ba   : > { %v1778_v22 = vpop.permute.xlu0 %1777  ;;  %vm1969_vm2 = vcmp.eq.s32.totalorder %v4519_v48, %v4633_v54 }
 0x1bb   : > { %vm1824_vm13 = vcmp.eq.s32.totalorder %v1778_v22, 1  ;;  %1574 = vperm.xlu1 %3475, %v1543_v7   ;;  %2046 = vperm.xlu0 %3523, %v1999_v5   ;;  %v1664_v7 = vadd.f32 %v2946_v47, %v1440_v36  ;;  %v1441_v10 = vadd.f32 %v2931_v30, %v1217_v45  ;;  %v4711_v36 = vld [vmem:[%s3800_s20 + $0x50] sm:$0xff]  ;;  %v1321_v45 = vsel %vm1241_vm5, 1, %v3659_v1 }
 0x1bc   : > { %vm1840_vm6 = vmand %vm1744_vm15, %vm1824_vm13  ;;  %vm795_vm15 = vcmp.gt.f32.partialorder %v4487_v32, 2.0  ;;  %vm1522_vm5 = vcmp.eq.s32.totalorder %v4519_v48, %v4130_v26 }
 0x1bd   : > { %v2962_v18 = vsel %vm1840_vm6, 1.0, %v3666_v16  ;;  %v875_v57 = vsel %vm795_vm15, 1, %v3659_v1  ;;  %vm482_vm6 = vcmp.eq.s32.totalorder %v4370_v12, 1 }
 0x1be   : > { %v4656_v4 = vpop.permute.xlu1 %899  ;;  %v1781_v19 = vpop.permute.xlu0 %1780  ;;  %v1888_v20 = vadd.f32 %v2962_v18, %v1664_v7  ;;  %v4766_v7 = vld [vmem:[%s3764_s17 + $0x50] sm:$0xff] }
 0x1bf   : > { %vm1825_vm9 = vcmp.eq.s32.totalorder %v1781_v19, 1  ;;  %3476 = vset.pattern.permute.xlu1 %v5823_v23  ;;  %2301 = vperm.xlu0 %3523, %v3569_v55   ;;  %v4720_v55 = vld [vmem:[%s3800_s20 + $0x60] sm:$0xff] }
 0x1c0   : > { %1936 = vperm.xlu1 %3476, %v4478_v31   ;;  %vm1841_vm14 = vmand %vm1745_vm12, %vm1825_vm9  ;;  %v2947_v31 = vsel %vm1617_vm11, 1.0, %v3666_v16  ;;  %vm930_vm12 = vcmp.eq.s32.totalorder %v4310_v61, 1 }
 0x1c1   : > { %v2963_v6 = vsel %vm1841_vm14, 1.0, %v3666_v16  ;;  %v1665_v42 = vadd.f32 %v2947_v31, %v1441_v10  ;;  %vm498_vm9 = vmand %vm402_vm7, %vm482_vm6  ;;  %vm1154_vm14 = vcmp.eq.s32.totalorder %v4533_v60, 1  ;;  %vm1602_vm6 = vcmp.eq.s32.totalorder %v4499_v59, 1 }
 0x1c2   : > { %v2002_v39 = vpop.permute.xlu0 %2001  ;;  %vm722_vm11 = vmand %vm626_vm10, %vm706_vm8  ;;  %v2868_v49 = vsel %vm498_vm9, 1.0, %v3666_v16  ;;  %vm1018_vm7 = vcmp.gt.f32.partialorder %v4711_v36, 3.0 }
 0x1c3   : > { %vm2048_vm1 = vcmp.eq.s32.totalorder %v2002_v39, 1  ;;  %v4684_v5 = vpop.permute.xlu1 %1261  ;;  %2311 = vperm.xlu0 %3523, %v3570_v37   ;;  %v1889_v14 = vadd.f32 %v2963_v6, %v1665_v42  ;;  %v4733_v39 = vld [vmem:[%s3800_s20 + $0x70] sm:$0xff]  ;;  %v2884_v12 = vsel %vm722_vm11, 1.0, %v3666_v16  ;;  %vm1618_vm9 = vmand %vm1522_vm5, %vm1602_vm6  ;;  %v1098_v59 = vsel %vm1018_vm7, 1, %v3659_v1 }
 0x1c4   : > { %vm2064_vm13 = vmand %vm1968_vm0, %vm2048_vm1  ;;  %3477 = vset.pattern.permute.xlu1 %v3659_v1  ;;  %vm850_vm0 = vcmp.eq.s32.totalorder %v4519_v48, %v4198_v43  ;;  %v770_v34 = vadd.f32 %v2884_v12, %v2868_v49  ;;  %v2948_v10 = vsel %vm1618_vm9, 1.0, %v3666_v16  ;;  %vm403_vm5 = vcmp.eq.s32.totalorder %v4519_v48, %v3937_v52 }
 0x1c5   : > { %911 = vperm.xlu1 %3477, %v874_v9   ;;  %v2978_v44 = vsel %vm2064_vm13, 1.0, %v3666_v16  ;;  %vm946_vm1 = vmand %vm850_vm0, %vm930_vm12  ;;  %vm1074_vm13 = vcmp.eq.s32.totalorder %v4519_v48, %v4366_v56  ;;  %vm1464_vm12 = vcmp.gt.f32.partialorder %v4699_v11, 5.0 }
 0x1c6   : > { %v2005_v22 = vpop.permute.xlu0 %2004  ;;  %v2112_v21 = vadd.f32 %v2978_v44, %v1888_v20  ;;  %v2900_v43 = vsel %vm946_vm1, 1.0, %v3666_v16  ;;  %v1544_v6 = vsel %vm1464_vm12, 1, %v3659_v1  ;;  %vm627_vm1 = vcmp.eq.s32.totalorder %v4519_v48, %v3939_v53 }
 0x1c7   : > { %vm2049_vm3 = vcmp.eq.s32.totalorder %v2005_v22, 1  ;;  %2321 = vperm.xlu0 %3523, %v3571_v51   ;;  %v994_v56 = vadd.f32 %v2900_v43, %v770_v34 }
 0x1c8   : > { %vm2065_vm4 = vmand %vm1969_vm2, %vm2049_vm3  ;;  %v4693_v35 = vpop.permute.xlu1 %1703  ;;  %3130 = vmatprep.mubr.f32.mxu0 %v2112_v21  ;;  %vm1378_vm2 = vcmp.eq.s32.totalorder %v4611_v62, 1 }
 0x1c9   : > { %v2979_v46 = vsel %vm2065_vm4, 1.0, %v3666_v16  ;;  %3478 = vset.pattern.permute.xlu1 %v5806_v41  ;;  %vm1170_vm3 = vmand %vm1074_vm13, %vm1154_vm14  ;;  %vm1298_vm4 = vcmp.eq.s32.totalorder %v4519_v48, %v4425_v2  ;;  %vm1746_vm10 = vcmp.eq.s32.totalorder %v4519_v48, %v4693_v35  ;;  %vm707_vm13 = vcmp.eq.s32.totalorder %v4133_v63, 1  ;;  %v5876_v63 = vld [vmem:[#allocation29_spill] sm:$0xff]  ;;  %v5880_v35 = vld [vmem:[#allocation43_spill] sm:$0xff] }
 0x1ca   : > { %v2113_v8 = vadd.f32 %v2979_v46, %v1889_v14  ;;  %1273 = vperm.xlu1 %3478, %v4495_v17   ;;  %v4730_v18 = vpop.permute.xlu0 %1341  ;;  %vm1394_vm15 = vmand %vm1298_vm4, %vm1378_vm2  ;;  %v2916_v60 = vsel %vm1170_vm3, 1.0, %v3666_v16  ;;  %vm483_vm3 = vcmp.eq.s32.totalorder %v3987_v13, 1  ;;  %vm851_vm4 = vcmp.eq.s32.totalorder %v4519_v48, %v3990_v15  ;;  %v5877_v14 = vld [vmem:[#allocation77_spill] sm:$0xff]  ;;  %v5878_v13 = vld [vmem:[#allocation31_spill] sm:$0xff] }
 0x1cb   : > { %2331 = vperm.xlu0 %3523, %v4699_v11   ;;  %v2932_v2 = vsel %vm1394_vm15, 1.0, %v3666_v16  ;;  %v1218_v30 = vadd.f32 %v2916_v60, %v994_v56  ;;  %vm931_vm15 = vcmp.eq.s32.totalorder %v4345_v38, 1  ;;  %vm723_vm6 = vmand %vm627_vm1, %vm707_vm13  ;;  %vm1155_vm9 = vcmp.eq.s32.totalorder %v5877_v14, 1  ;;  %v5879_v15 = vld [vmem:[#allocation86_spill] sm:$0xff]  ;;  %v5883_v14 = vld [vmem:[#allocation83_spill] sm:$0xff] }
 0x1cc   : > { %3131 = vmatmul.mubr.f32.vlgmr.msra.gmra.mrb[0].mxu0 %v2113_v8  ;;  %vm499_vm7 = vmand %vm403_vm5, %vm483_vm3  ;;  %v2885_v52 = vsel %vm723_vm6, 1.0, %v3666_v16  ;;  %vm1379_vm12 = vcmp.eq.s32.totalorder %v5879_v15, 1  ;;  %vm1603_vm1 = vcmp.eq.s32.totalorder %v4588_v33, 1  ;;  %vm1465_vm6 = vcmp.gt.f32.partialorder %v4442_v29, 5.0  ;;  %v5885_v15 = vld [vmem:[#allocation81_spill] sm:$0xff] }
 0x1cd   : > { %v4702_v54 = vpop.permute.xlu1 %902  ;;  %v1442_v31 = vadd.f32 %v2932_v2, %v1218_v30  ;;  %v2869_v38 = vsel %vm499_vm7, 1.0, %v3666_v16  ;;  %v1545_v56 = vsel %vm1465_vm6, 1, %v3659_v1 }
 0x1ce   : > { %3479 = vset.pattern.permute.xlu1 %v5807_v0  ;;  %v1784_v61 = vpop.permute.xlu0 %1783  ;;  %v771_v11 = vadd.f32 %v2885_v52, %v2869_v38  ;;  %v5884_v52 = vld [vmem:[#allocation30_spill] sm:$0xff] }
 0x1cf   : > { %1715 = vperm.xlu1 %3479, %v4707_v28   ;;  %2341 = vperm.xlu0 %3523, %v4711_v36   ;;  %vm1826_vm8 = vcmp.eq.s32.totalorder %v1784_v61, 1  ;;  %v1666_v44 = vadd.f32 %v2948_v10, %v1442_v31 }
 0x1d0   : > { %vm1842_vm11 = vmand %vm1746_vm10, %vm1826_vm8  ;;  %vm1075_vm8 = vcmp.eq.s32.totalorder %v4519_v48, %v5876_v63 }
 0x1d1   : > { %v4714_v19 = vpop.permute.xlu1 %1344  ;;  %v2964_v20 = vsel %vm1842_vm11, 1.0, %v3666_v16  ;;  %vm947_vm10 = vmand %vm851_vm4, %vm931_vm15  ;;  %vm1299_vm11 = vcmp.eq.s32.totalorder %v4519_v48, %v5878_v13 }
 0x1d2   : > { %v4760_v62 = vpop.permute.xlu0 %1786  ;;  %v1890_v22 = vadd.f32 %v2964_v20, %v1666_v44  ;;  %v2901_v46 = vsel %vm947_vm10, 1.0, %v3666_v16  ;;  %vm1395_vm13 = vmand %vm1299_vm11, %vm1379_vm12  ;;  %vm796_vm10 = vcmp.gt.f32.partialorder %v4720_v55, 2.0  ;;  %v4844_v44 = vld [vmem:[%s3800_s20 + $0x68] sm:$0xff]  ;;  %vm1243_vm12 = vcmp.gt.f32.partialorder %v4487_v32, 4.0 }
 0x1d3   : > { %3480 = vset.pattern.permute.xlu1 %v3659_v1  ;;  %2351 = vperm.xlu0 %3523, %v4720_v55   ;;  %vm1827_vm4 = vcmp.eq.s32.totalorder %v4760_v62, 1  ;;  %v995_v33 = vadd.f32 %v2901_v46, %v771_v11  ;;  %vm797_vm11 = vcmp.gt.f32.partialorder %v4844_v44, 2.0  ;;  %v1323_v63 = vsel %vm1243_vm12, 1, %v3659_v1 }
 0x1d4   : > { %914 = vperm.xlu1 %3480, %v875_v57   ;;  %v4815_v57 = vld [vmem:[%s3764_s17 + $0x58] sm:$0xff] }
 0x1d6   : > { %v4728_v47 = vpop.permute.xlu1 %1706  ;;  %v2008_v37 = vpop.permute.xlu0 %2007 }
 0x1d7   : > { %2361 = vperm.xlu0 %3523, %v4733_v39   ;;  %vm2050_vm14 = vcmp.eq.s32.totalorder %v2008_v37, 1  ;;  %vm1747_vm3 = vcmp.eq.s32.totalorder %v4519_v48, %v4728_v47  ;;  %v876_v37 = vsel %vm796_vm10, 1, %v3659_v1 }
 0x1d8   : > { %1356 = vperm.xlu1 %3480, %v1321_v45   ;;  %v2933_v45 = vsel %vm1395_vm13, 1.0, %v3666_v16  ;;  %vm1843_vm5 = vmand %vm1747_vm3, %vm1827_vm4  ;;  %vm628_vm13 = vcmp.eq.s32.totalorder %v4519_v48, %v5884_v52  ;;  %vm932_vm4 = vcmp.eq.s32.totalorder %v5885_v15, 1  ;;  %v5893_v15 = vld [vmem:[#allocation18_spill] sm:$0xff] }
 0x1d9   : > { %v2965_v60 = vsel %vm1843_vm5, 1.0, %v3666_v16 }
 0x1da   : > { %v2011_v43 = vpop.permute.xlu0 %2010 }
 0x1db   : > { %v4743_v25 = vpop.permute.xlu1 %1043  ;;  %vm2051_vm7 = vcmp.eq.s32.totalorder %v2011_v43, 1 }
 0x1dc   : > { %3481 = vset.pattern.permute.xlu1 %v5807_v0 }
 0x1dd   : > { %1718 = vperm.xlu1 %3481, %v4389_v58  }
 0x1e0   : > { %v4755_v9 = vpop.permute.xlu1 %1123 }
 0x1e1   : > { %3482 = vset.pattern.permute.xlu1 %v5816_v24 }
 0x1e2   : > { %1055 = vperm.xlu1 %3482, %v4766_v7  }
 0x1e4   : > { %v4771_v26 = vpop.permute.xlu1 %1565 }
 0x1e5   : > { %vm1604_vm12 = vcmp.eq.s32.totalorder %v4771_v26, 1 }
 0x1e6   : > { %3483 = vset.pattern.permute.xlu1 %v3659_v1 }
 0x1e7   : > { %1135 = vperm.xlu1 %3483, %v1098_v59  }
 0x1e9   : > { %v1928_v42 = vpop.permute.xlu1 %1927 }
 0x1ea   : > { %vm1970_vm0 = vcmp.eq.s32.totalorder %v4519_v48, %v1928_v42  ;;  %v877_v42 = vsel %vm797_vm11, 1, %v3659_v1  ;;  %vm1300_vm11 = vcmp.eq.s32.totalorder %v4519_v48, %v4684_v5 }
 0x1eb   : > { %vm2066_vm2 = vmand %vm1970_vm0, %vm2050_vm14  ;;  %1577 = vperm.xlu1 %3483, %v1544_v6   ;;  %vm1523_vm0 = vcmp.eq.s32.totalorder %v4519_v48, %v5880_v35 }
 0x1ec   : > { %v2980_v21 = vsel %vm2066_vm2, 1.0, %v3666_v16  ;;  %vm1171_vm14 = vmand %vm1075_vm8, %vm1155_vm9  ;;  %vm1019_vm2 = vcmp.gt.f32.partialorder %v4487_v32, 3.0 }
 0x1ed   : > { %v2114_v51 = vadd.f32 %v2980_v21, %v1890_v22  ;;  %vm1619_vm15 = vmand %vm1523_vm0, %vm1603_vm1  ;;  %v1099_v12 = vsel %vm1019_vm2, 1, %v3659_v1  ;;  %v5881_v22 = vld [vmem:[#allocation69_spill] sm:$0xff]  ;;  %v5882_v21 = vld [vmem:[#allocation75_spill] sm:$0xff]  ;;  %vm708_vm1 = vcmp.eq.s32.totalorder %v5883_v14, 1 }
 0x1ee   : > { %v4790_v53 = vpop.permute.xlu1 %1046  ;;  %v2949_v47 = vsel %vm1619_vm15, 1.0, %v3666_v16  ;;  %vm484_vm0 = vcmp.eq.s32.totalorder %v5882_v21, 1  ;;  %vm724_vm3 = vmand %vm628_vm13, %vm708_vm1  ;;  %v5890_v21 = vld [vmem:[#allocation6_spill] sm:$0xff]  ;;  %v5892_v14 = vld [vmem:[#allocation17_spill] sm:$0xff] }
 0x1ef   : > { %3484 = vset.pattern.permute.xlu1 %v5823_v23  ;;  %3133 = vmatprep.mubr.f32.mxu0 %v2114_v51  ;;  %v4856_v51 = vpop.permute.xlu0 %1347  ;;  %v2886_v11 = vsel %vm724_vm3, 1.0, %v3666_v16 }
 0x1f0   : > { %1939 = vperm.xlu1 %3484, %v4707_v28   ;;  %v2917_v28 = vsel %vm1171_vm14, 1.0, %v3666_v16  ;;  %vm404_vm14 = vcmp.eq.s32.totalorder %v4519_v48, %v5881_v22 }
 0x1f1   : > { %v1219_v34 = vadd.f32 %v2917_v28, %v995_v33  ;;  %vm500_vm2 = vmand %vm404_vm14, %vm484_vm0  ;;  %v5886_v28 = vld [vmem:[#allocation92_spill] sm:$0xff]  ;;  %v5887_v33 = vld [vmem:[#allocation58_spill] sm:$0xff]  ;;  %vm1020_vm0 = vcmp.gt.f32.partialorder %v4720_v55, 3.0 }
 0x1f2   : > { %v2870_v46 = vsel %vm500_vm2, 1.0, %v3666_v16  ;;  %vm1156_vm15 = vcmp.eq.s32.totalorder %v5886_v28, 1  ;;  %vm852_vm5 = vcmp.eq.s32.totalorder %v4519_v48, %v5887_v33  ;;  %v5896_v33 = vld [vmem:[#allocation33_spill] sm:$0xff] }
 0x1f3   : > { %v4806_v8 = vpop.permute.xlu1 %1126  ;;  %v1443_v61 = vadd.f32 %v2933_v45, %v1219_v34  ;;  %v1790_v38 = vpop.permute.xlu0 %1789  ;;  %vm948_vm6 = vmand %vm852_vm5, %vm932_vm4  ;;  %v5888_v45 = vld [vmem:[#allocation90_spill] sm:$0xff]  ;;  %v5889_v34 = vld [vmem:[#allocation45_spill] sm:$0xff]  ;;  %vm1466_vm4 = vcmp.gt.f32.partialorder %v4711_v36, 5.0 }
 0x1f4   : > { %3485 = vset.pattern.permute.xlu1 %v5816_v24  ;;  %vm1524_vm10 = vcmp.eq.s32.totalorder %v4519_v48, %v5889_v34  ;;  %vm1828_vm1 = vcmp.eq.s32.totalorder %v1790_v38, 1  ;;  %v5891_v36 = vld [vmem:[#allocation44_spill] sm:$0xff] }
 0x1f5   : > { %1058 = vperm.xlu1 %3485, %v4815_v57   ;;  %v1667_v62 = vadd.f32 %v2949_v47, %v1443_v61  ;;  %vm1620_vm2 = vmand %vm1524_vm10, %vm1604_vm12  ;;  %vm853_vm10 = vcmp.eq.s32.totalorder %v4519_v48, %v5893_v15  ;;  %v5894_v38 = vld [vmem:[#allocation84_spill] sm:$0xff] }
 0x1f7   : > { %v4819_v49 = vpop.permute.xlu1 %1568  ;;  %v1891_v30 = vadd.f32 %v2965_v60, %v1667_v62  ;;  %v4884_v61 = vpop.permute.xlu0 %1792  ;;  %v4892_v60 = vld [vmem:[%s3764_s17 + $0x60] sm:$0xff]  ;;  %v1100_v62 = vsel %vm1020_vm0, 1, %v3659_v1 }
 0x1f9   : > { %3486 = vset.pattern.permute.xlu1 %v3659_v1 }
 0x1fa   : > { %1138 = vperm.xlu1 %3486, %v1099_v12   ;;  %v772_v12 = vadd.f32 %v2886_v11, %v2870_v46  ;;  %v5895_v11 = vld [vmem:[#allocation5_spill] sm:$0xff] }
 0x1fb   : > { %vm405_vm12 = vcmp.eq.s32.totalorder %v4519_v48, %v5895_v11  ;;  %v5899_v11 = vld [vmem:[#allocation76_spill] sm:$0xff] }
 0x1fc   : > { %v1931_v2 = vpop.permute.xlu1 %1930 }
 0x1fd   : > { %vm1971_vm8 = vcmp.eq.s32.totalorder %v4519_v48, %v1931_v2 }
 0x1fe   : > { %vm2067_vm9 = vmand %vm1971_vm8, %vm2051_vm7  ;;  %1580 = vperm.xlu1 %3486, %v1545_v56   ;;  %vm1076_vm7 = vcmp.eq.s32.totalorder %v4519_v48, %v5888_v45  ;;  %vm1380_vm8 = vcmp.eq.s32.totalorder %v4730_v18, 1  ;;  %v2902_v18 = vsel %vm948_vm6, 1.0, %v3666_v16  ;;  %vm629_vm6 = vcmp.eq.s32.totalorder %v4519_v48, %v5890_v21 }
 0x1ff   : > { %v2981_v29 = vsel %vm2067_vm9, 1.0, %v3666_v16  ;;  %vm1172_vm9 = vmand %vm1076_vm7, %vm1156_vm15  ;;  %v996_v5 = vadd.f32 %v2902_v18, %v772_v12  ;;  %vm709_vm7 = vcmp.eq.s32.totalorder %v5891_v36, 1  ;;  %v5897_v12 = vld [vmem:[#allocation47_spill] sm:$0xff] }
 0x200   : > { %v2115_v59 = vadd.f32 %v2981_v29, %v1891_v30  ;;  %vm1396_vm14 = vmand %vm1300_vm11, %vm1380_vm8  ;;  %v2918_v43 = vsel %vm1172_vm9, 1.0, %v3666_v16  ;;  %v2950_v30 = vsel %vm1620_vm2, 1.0, %v3666_v16  ;;  %vm485_vm9 = vcmp.eq.s32.totalorder %v5892_v14, 1 }
 0x201   : > { %v4829_v31 = vpop.permute.xlu1 %905  ;;  %v2934_v26 = vsel %vm1396_vm14, 1.0, %v3666_v16  ;;  %v1220_v2 = vadd.f32 %v2918_v43, %v996_v5  ;;  %vm933_vm11 = vcmp.eq.s32.totalorder %v5894_v38, 1  ;;  %vm725_vm14 = vmand %vm629_vm6, %vm709_vm7  ;;  %vm1301_vm2 = vcmp.eq.s32.totalorder %v4519_v48, %v5896_v33 }
 0x202   : > { %3487 = vset.pattern.permute.xlu1 %v5823_v23  ;;  %3134 = vmatmul.mubr.f32.gmra.mrb[2].mxu0 %v2115_v59  ;;  %v2014_v59 = vpop.permute.xlu0 %2013  ;;  %vm501_vm0 = vmand %vm405_vm12, %vm485_vm9  ;;  %v2887_v45 = vsel %vm725_vm14, 1.0, %v3666_v16  ;;  %vm1605_vm6 = vcmp.eq.s32.totalorder %v4819_v49, 1  ;;  %vm1829_vm9 = vcmp.eq.s32.totalorder %v4884_v61, 1  ;;  %vm1467_vm14 = vcmp.gt.f32.partialorder %v4487_v32, 5.0 }
 0x203   : > { %1942 = vperm.xlu1 %3487, %v4389_v58   ;;  %v1444_v29 = vadd.f32 %v2934_v26, %v1220_v2  ;;  %vm2052_vm15 = vcmp.eq.s32.totalorder %v2014_v59, 1 }
 0x206   : > { %v4835_v10 = vpop.permute.xlu1 %1267  ;;  %v2017_v2 = vpop.permute.xlu0 %2016 }
 0x207   : > { %3488 = vset.pattern.permute.xlu1 %v3659_v1 }
 0x208   : > { %917 = vperm.xlu1 %3488, %v876_v37  }
 0x20a   : > { %v4984_v33 = vpop.permute.xlu0 %1353 }
 0x20b   : > { %v1710_v20 = vpop.permute.xlu1 %1709 }
 0x20c   : > { %3489 = vset.pattern.permute.xlu1 %v5806_v41  ;;  %vm1748_vm13 = vcmp.eq.s32.totalorder %v4519_v48, %v1710_v20  ;;  %v1546_v20 = vsel %vm1466_vm4, 1, %v3659_v1  ;;  %vm1381_vm4 = vcmp.eq.s32.totalorder %v4714_v19, 1  ;;  %v4943_v19 = vld [vmem:[%s3764_s17 + $0x68] sm:$0xff] }
 0x20d   : > { %1279 = vperm.xlu1 %3489, %v4766_v7   ;;  %vm1844_vm3 = vmand %vm1748_vm13, %vm1828_vm1  ;;  %vm1157_vm1 = vcmp.eq.s32.totalorder %v4542_v40, 1  ;;  %v2871_v40 = vsel %vm501_vm0, 1.0, %v3666_v16  ;;  %vm2053_vm0 = vcmp.eq.s32.totalorder %v2017_v2, 1 }
 0x20e   : > { %v2966_v37 = vsel %vm1844_vm3, 1.0, %v3666_v16  ;;  %vm949_vm13 = vmand %vm853_vm10, %vm933_vm11  ;;  %vm1077_vm3 = vcmp.eq.s32.totalorder %v4519_v48, %v4521_v3  ;;  %v773_v18 = vadd.f32 %v2887_v45, %v2871_v40  ;;  %v5900_v45 = vld [vmem:[#allocation85_spill] sm:$0xff]  ;;  %v5901_v40 = vld [vmem:[#allocation32_spill] sm:$0xff] }
 0x20f   : > { %v2903_v34 = vsel %vm949_vm13, 1.0, %v3666_v16  ;;  %vm1397_vm7 = vmand %vm1301_vm2, %vm1381_vm4  ;;  %vm798_vm2 = vcmp.gt.f32.partialorder %v4733_v39, 2.0  ;;  %vm1245_vm4 = vcmp.gt.f32.partialorder %v4844_v44, 4.0 }
 0x210   : > { %v4840_v6 = vpop.permute.xlu1 %908  ;;  %v997_v49 = vadd.f32 %v2903_v34, %v773_v18  ;;  %v2935_v43 = vsel %vm1397_vm7, 1.0, %v3666_v16  ;;  %v878_v21 = vsel %vm798_vm2, 1, %v3659_v1  ;;  %v1325_v15 = vsel %vm1245_vm4, 1, %v3659_v1  ;;  %v5902_v34 = vld [vmem:[#allocation60_spill] sm:$0xff] }
 0x211   : > { %3490 = vset.pattern.permute.xlu1 %v5807_v0  ;;  %vm630_vm7 = vcmp.eq.s32.totalorder %v4519_v48, %v5901_v40  ;;  %v5908_v40 = vld [vmem:[#allocation7_spill] sm:$0xff] }
 0x212   : > { %1721 = vperm.xlu1 %3490, %v4495_v17  }
 0x214   : > { %v4848_v58 = vpop.permute.xlu1 %1350 }
 0x216   : > { %3491 = vset.pattern.permute.xlu1 %v3659_v1 }
 0x217   : > { %920 = vperm.xlu1 %3491, %v877_v42   ;;  %v1668_v42 = vadd.f32 %v2950_v30, %v1444_v29  ;;  %v1547_v29 = vsel %vm1467_vm14, 1, %v3659_v1 }
 0x219   : > { %v4860_v13 = vpop.permute.xlu1 %1712 }
 0x21a   : > { %vm1749_vm10 = vcmp.eq.s32.totalorder %v4519_v48, %v4860_v13 }
 0x21b   : > { %1362 = vperm.xlu1 %3491, %v1323_v63   ;;  %v1892_v63 = vadd.f32 %v2966_v37, %v1668_v42  ;;  %vm1845_vm12 = vmand %vm1749_vm10, %vm1829_vm9  ;;  %vm934_vm9 = vcmp.eq.s32.totalorder %v4656_v4, 1 }
 0x21c   : > { %v2967_v30 = vsel %vm1845_vm12, 1.0, %v3666_v16  ;;  %vm1158_vm12 = vcmp.eq.s32.totalorder %v4755_v9, 1 }
 0x21e   : > { %v4865_v35 = vpop.permute.xlu1 %1049 }
 0x21f   : > { %3492 = vset.pattern.permute.xlu1 %v5807_v0 }
 0x220   : > { %1724 = vperm.xlu1 %3492, %v4556_v27  }
 0x223   : > { %v4882_v47 = vpop.permute.xlu1 %1129 }
 0x224   : > { %3493 = vset.pattern.permute.xlu1 %v5816_v24 }
 0x225   : > { %1061 = vperm.xlu1 %3493, %v4892_v60  }
 0x227   : > { %v4899_v56 = vpop.permute.xlu1 %1571 }
 0x229   : > { %3494 = vset.pattern.permute.xlu1 %v3659_v1 }
 0x22a   : > { %1141 = vperm.xlu1 %3494, %v1100_v62  }
 0x22c   : > { %v1934_v22 = vpop.permute.xlu1 %1933 }
 0x22d   : > { %vm1972_vm5 = vcmp.eq.s32.totalorder %v4519_v48, %v1934_v22 }
 0x22e   : > { %vm2068_vm8 = vmand %vm1972_vm5, %vm2052_vm15  ;;  %1583 = vperm.xlu1 %3494, %v1546_v20   ;;  %vm1525_vm5 = vcmp.eq.s32.totalorder %v4519_v48, %v5897_v12 }
 0x22f   : > { %v2982_v52 = vsel %vm2068_vm8, 1.0, %v3666_v16  ;;  %vm1173_vm15 = vmand %vm1077_vm3, %vm1157_vm1  ;;  %vm1021_vm8 = vcmp.gt.f32.partialorder %v4844_v44, 3.0  ;;  %vm799_vm3 = vcmp.gt.f32.partialorder %v4516_v50, 2.0 }
 0x230   : > { %v2116_v46 = vadd.f32 %v2982_v52, %v1892_v63  ;;  %v2919_v3 = vsel %vm1173_vm15, 1.0, %v3666_v16  ;;  %vm1621_vm11 = vmand %vm1525_vm5, %vm1605_vm6  ;;  %v1101_v26 = vsel %vm1021_vm8, 1, %v3659_v1  ;;  %v879_v52 = vsel %vm799_vm3, 1, %v3659_v1 }
 0x231   : > { %v4918_v28 = vpop.permute.xlu1 %1052  ;;  %v1221_v62 = vadd.f32 %v2919_v3, %v997_v49  ;;  %v2951_v61 = vsel %vm1621_vm11, 1.0, %v3666_v16  ;;  %vm486_vm5 = vcmp.eq.s32.totalorder %v5899_v11, 1  ;;  %vm710_vm6 = vcmp.eq.s32.totalorder %v5900_v45, 1  ;;  %v1796_v3 = vpop.permute.xlu0 %1795  ;;  %v5907_v11 = vld [vmem:[#allocation20_spill] sm:$0xff] }
 0x232   : > { %3495 = vset.pattern.permute.xlu1 %v5823_v23  ;;  %3136 = vmatprep.mubr.f32.mxu0 %v2116_v46  ;;  %v5898_v46 = vld [vmem:[#allocation70_spill] sm:$0xff]  ;;  %vm726_vm10 = vmand %vm630_vm7, %vm710_vm6  ;;  %vm854_vm11 = vcmp.eq.s32.totalorder %v4519_v48, %v5902_v34  ;;  %vm1606_vm3 = vcmp.eq.s32.totalorder %v4899_v56, 1  ;;  %vm1830_vm6 = vcmp.eq.s32.totalorder %v1796_v3, 1  ;;  %v5909_v3 = vld [vmem:[#allocation35_spill] sm:$0xff] }
 0x233   : > { %1945 = vperm.xlu1 %3495, %v4495_v17   ;;  %v1445_v13 = vadd.f32 %v2935_v43, %v1221_v62  ;;  %vm406_vm15 = vcmp.eq.s32.totalorder %v4519_v48, %v5898_v46  ;;  %vm950_vm14 = vmand %vm854_vm11, %vm934_vm9  ;;  %v2888_v49 = vsel %vm726_vm10, 1.0, %v3666_v16  ;;  %vm1468_vm10 = vcmp.gt.f32.partialorder %v4720_v55, 5.0 }
 0x234   : > { %vm502_vm8 = vmand %vm406_vm15, %vm486_vm5  ;;  %v2904_v4 = vsel %vm950_vm14, 1.0, %v3666_v16  ;;  %vm1022_vm15 = vcmp.gt.f32.partialorder %v4733_v39, 3.0 }
 0x235   : > { %v1669_v59 = vadd.f32 %v2951_v61, %v1445_v13  ;;  %v2872_v18 = vsel %vm502_vm8, 1.0, %v3666_v16  ;;  %v5018_v56 = vpop.permute.xlu0 %1798  ;;  %v1102_v13 = vsel %vm1022_vm15, 1, %v3659_v1 }
 0x236   : > { %v4934_v17 = vpop.permute.xlu1 %1132  ;;  %v774_v43 = vadd.f32 %v2888_v49, %v2872_v18 }
 0x237   : > { %3496 = vset.pattern.permute.xlu1 %v5816_v24  ;;  %v1893_v20 = vadd.f32 %v2967_v30, %v1669_v59 }
 0x238   : > { %1064 = vperm.xlu1 %3496, %v4943_v19  }
 0x23a   : > { %v4947_v5 = vpop.permute.xlu1 %1574 }
 0x23c   : > { %3497 = vset.pattern.permute.xlu1 %v3659_v1 }
 0x23d   : > { %1144 = vperm.xlu1 %3497, %v1101_v26   ;;  %v5903_v26 = vld [vmem:[#allocation49_spill] sm:$0xff] }
 0x23e   : > { %vm1526_vm5 = vcmp.eq.s32.totalorder %v4519_v48, %v5903_v26 }
 0x23f   : > { %v1937_v37 = vpop.permute.xlu1 %1936  ;;  %vm1622_vm8 = vmand %vm1526_vm5, %vm1606_vm3  ;;  %vm935_vm3 = vcmp.eq.s32.totalorder %v4702_v54, 1 }
 0x240   : > { %vm1973_vm1 = vcmp.eq.s32.totalorder %v4519_v48, %v1937_v37  ;;  %v2952_v30 = vsel %vm1622_vm8, 1.0, %v3666_v16  ;;  %v1548_v37 = vsel %vm1468_vm10, 1, %v3659_v1  ;;  %vm1079_vm8 = vcmp.eq.s32.totalorder %v4519_v48, %v4790_v53  ;;  %v5910_v53 = vld [vmem:[#allocation51_spill] sm:$0xff] }
 0x241   : > { %vm2069_vm13 = vmand %vm1973_vm1, %vm2053_vm0  ;;  %1586 = vperm.xlu1 %3497, %v1547_v29   ;;  %vm1078_vm0 = vcmp.eq.s32.totalorder %v4519_v48, %v4743_v25  ;;  %vm1382_vm1 = vcmp.eq.s32.totalorder %v4856_v51, 1  ;;  %v998_v51 = vadd.f32 %v2904_v4, %v774_v43  ;;  %v5065_v4 = vld [vmem:[%s3764_s17 + $0x78] sm:$0xff] }
 0x242   : > { %v2983_v32 = vsel %vm2069_vm13, 1.0, %v3666_v16  ;;  %vm1302_vm13 = vcmp.eq.s32.totalorder %v4519_v48, %v4835_v10  ;;  %vm1174_vm2 = vmand %vm1078_vm0, %vm1158_vm12  ;;  %v5015_v10 = vld [vmem:[%s3764_s17 + $0x70] sm:$0xff] }
 0x243   : > { %v2117_v42 = vadd.f32 %v2983_v32, %v1893_v20  ;;  %vm1398_vm4 = vmand %vm1302_vm13, %vm1382_vm1  ;;  %v2920_v25 = vsel %vm1174_vm2, 1.0, %v3666_v16  ;;  %v2020_v20 = vpop.permute.xlu0 %2019  ;;  %vm855_vm2 = vcmp.eq.s32.totalorder %v4519_v48, %v5907_v11  ;;  %v5915_v11 = vld [vmem:[#allocation73_spill] sm:$0xff] }
 0x244   : > { %v4957_v22 = vpop.permute.xlu1 %911  ;;  %v2936_v62 = vsel %vm1398_vm4, 1.0, %v3666_v16  ;;  %v1222_v2 = vadd.f32 %v2920_v25, %v998_v51  ;;  %vm2054_vm11 = vcmp.eq.s32.totalorder %v2020_v20, 1  ;;  %vm407_vm4 = vcmp.eq.s32.totalorder %v4519_v48, %v5908_v40 }
 0x245   : > { %3498 = vset.pattern.permute.xlu1 %v5823_v23  ;;  %3137 = vmatmul.mubr.f32.gmra.mrb[4].mxu0 %v2117_v42 }
 0x246   : > { %1948 = vperm.xlu1 %3498, %v4556_v27   ;;  %v1446_v29 = vadd.f32 %v2936_v62, %v1222_v2 }
 0x247   : > { %v2023_v62 = vpop.permute.xlu0 %2022 }
 0x248   : > { %v1670_v32 = vadd.f32 %v2952_v30, %v1446_v29 }
 0x249   : > { %v4963_v36 = vpop.permute.xlu1 %1273 }
 0x24a   : > { %3499 = vset.pattern.permute.xlu1 %v3659_v1 }
 0x24b   : > { %923 = vperm.xlu1 %3499, %v878_v21   ;;  %v5904_v21 = vld [vmem:[#allocation8_spill] sm:$0xff] }
 0x24c   : > { %vm631_vm14 = vcmp.eq.s32.totalorder %v4519_v48, %v5904_v21 }
 0x24e   : > { %v1716_v63 = vpop.permute.xlu1 %1715 }
 0x24f   : > { %3500 = vset.pattern.permute.xlu1 %v5806_v41  ;;  %vm1750_vm7 = vcmp.eq.s32.totalorder %v4519_v48, %v1716_v63  ;;  %v5905_v63 = vld [vmem:[#allocation46_spill] sm:$0xff] }
 0x250   : > { %1285 = vperm.xlu1 %3500, %v4892_v60   ;;  %vm1846_vm9 = vmand %vm1750_vm7, %vm1830_vm6  ;;  %vm711_vm0 = vcmp.eq.s32.totalorder %v5905_v63, 1  ;;  %vm1159_vm6 = vcmp.eq.s32.totalorder %v4806_v8, 1 }
 0x251   : > { %v2968_v59 = vsel %vm1846_vm9, 1.0, %v3666_v16  ;;  %vm727_vm15 = vmand %vm631_vm14, %vm711_vm0  ;;  %vm1383_vm9 = vcmp.eq.s32.totalorder %v4848_v58, 1  ;;  %vm1023_vm0 = vcmp.gt.f32.partialorder %v4516_v50, 3.0 }
 0x252   : > { %vm951_vm7 = vmand %vm855_vm2, %vm935_vm3  ;;  %v2889_v18 = vsel %vm727_vm15, 1.0, %v3666_v16  ;;  %v1103_v50 = vsel %vm1023_vm0, 1, %v3659_v1  ;;  %vm1469_vm15 = vcmp.gt.f32.partialorder %v4844_v44, 5.0  ;;  %vm412_vm0 = vcmp.eq.s32.totalorder %v4519_v48, %v5915_v11 }
 0x253   : > { %v4968_v14 = vpop.permute.xlu1 %914  ;;  %vm1175_vm10 = vmand %vm1079_vm8, %vm1159_vm6  ;;  %v2905_v8 = vsel %vm951_vm7, 1.0, %v3666_v16  ;;  %vm1246_vm8 = vcmp.gt.f32.partialorder %v4733_v39, 4.0 }
 0x254   : > { %3501 = vset.pattern.permute.xlu1 %v5807_v0  ;;  %v2921_v58 = vsel %vm1175_vm10, 1.0, %v3666_v16 }
 0x255   : > { %1727 = vperm.xlu1 %3501, %v4766_v7  }
 0x257   : > { %v4973_v27 = vpop.permute.xlu1 %1356 }
 0x259   : > { %3502 = vset.pattern.permute.xlu1 %v3659_v1 }
 0x25a   : > { %926 = vperm.xlu1 %3502, %v879_v52   ;;  %v1894_v52 = vadd.f32 %v2968_v59, %v1670_v32  ;;  %v1326_v32 = vsel %vm1246_vm8, 1, %v3659_v1 }
 0x25c   : > { %v4979_v38 = vpop.permute.xlu1 %1718 }
 0x25d   : > { %vm1751_vm2 = vcmp.eq.s32.totalorder %v4519_v48, %v4979_v38 }
 0x25e   : > { %1368 = vperm.xlu1 %3502, %v1325_v15   ;;  %v5906_v15 = vld [vmem:[#allocation19_spill] sm:$0xff] }
 0x25f   : > { %vm487_vm13 = vcmp.eq.s32.totalorder %v5906_v15, 1  ;;  %v5912_v15 = vld [vmem:[#allocation78_spill] sm:$0xff] }
 0x260   : > { %vm503_vm5 = vmand %vm407_vm4, %vm487_vm13  ;;  %vm1831_vm13 = vcmp.eq.s32.totalorder %v5018_v56, 1  ;;  %v1549_v56 = vsel %vm1469_vm15, 1, %v3659_v1 }
 0x261   : > { %v4990_v12 = vpop.permute.xlu1 %1055  ;;  %v2873_v54 = vsel %vm503_vm5, 1.0, %v3666_v16  ;;  %vm1847_vm4 = vmand %vm1751_vm2, %vm1831_vm13  ;;  %vm2055_vm5 = vcmp.eq.s32.totalorder %v2023_v62, 1  ;;  %v5937_v62 = vld [vmem:[#allocation66_spill] sm:$0xff] }
 0x262   : > { %3503 = vset.pattern.permute.xlu1 %v5807_v0  ;;  %v2969_v51 = vsel %vm1847_vm4, 1.0, %v3666_v16 }
 0x263   : > { %1730 = vperm.xlu1 %3503, %v4815_v57  }
 0x266   : > { %v5006_v9 = vpop.permute.xlu1 %1135 }
 0x267   : > { %3504 = vset.pattern.permute.xlu1 %v5816_v24 }
 0x268   : > { %1067 = vperm.xlu1 %3504, %v5015_v10  }
 0x26a   : > { %v5021_v61 = vpop.permute.xlu1 %1577 }
 0x26c   : > { %3505 = vset.pattern.permute.xlu1 %v3659_v1 }
 0x26d   : > { %1147 = vperm.xlu1 %3505, %v1102_v13  }
 0x26f   : > { %v1940_v42 = vpop.permute.xlu1 %1939 }
 0x270   : > { %vm1974_vm12 = vcmp.eq.s32.totalorder %v4519_v48, %v1940_v42 }
 0x271   : > { %vm2070_vm1 = vmand %vm1974_vm12, %vm2054_vm11  ;;  %1589 = vperm.xlu1 %3505, %v1548_v37   ;;  %vm1303_vm11 = vcmp.eq.s32.totalorder %v4519_v48, %v5909_v3  ;;  %vm1607_vm12 = vcmp.eq.s32.totalorder %v4947_v5, 1 }
 0x272   : > { %v2984_v46 = vsel %vm2070_vm1, 1.0, %v3666_v16  ;;  %vm1399_vm14 = vmand %vm1303_vm11, %vm1383_vm9  ;;  %vm1527_vm1 = vcmp.eq.s32.totalorder %v4519_v48, %v5910_v53  ;;  %vm1692_vm9 = vcmp.gt.f32.partialorder %v4720_v55, 6.0  ;;  %vm488_vm11 = vcmp.eq.s32.totalorder %v5912_v15, 1  ;;  %v5914_v55 = vld [vmem:[#allocation79_spill] sm:$0xff] }
 0x273   : > { %v2118_v45 = vadd.f32 %v2984_v46, %v1894_v52  ;;  %vm1623_vm3 = vmand %vm1527_vm1, %vm1607_vm12  ;;  %v1772_v21 = vsel %vm1692_vm9, 1, %v3659_v1  ;;  %v5911_v52 = vld [vmem:[#allocation71_spill] sm:$0xff]  ;;  %v5913_v46 = vld [vmem:[#allocation72_spill] sm:$0xff] }
 0x274   : > { %v5040_v34 = vpop.permute.xlu1 %1058  ;;  %v2953_v25 = vsel %vm1623_vm3, 1.0, %v3666_v16  ;;  %vm408_vm10 = vcmp.eq.s32.totalorder %v4519_v48, %v5911_v52  ;;  %vm410_vm12 = vcmp.eq.s32.totalorder %v4519_v48, %v5913_v46 }
 0x275   : > { %3506 = vset.pattern.permute.xlu1 %v5823_v23  ;;  %3139 = vmatprep.mubr.f32.mxu0 %v2118_v45  ;;  %v5916_v45 = vld [vmem:[#allocation80_spill] sm:$0xff]  ;;  %vm5107_vm13 = vmand %vm408_vm10, %vm488_vm11  ;;  %vm938_vm10 = vcmp.eq.s32.totalorder %v4957_v22, 1  ;;  %v5952_v22 = vld [vmem:[#allocation21_spill] sm:$0xff] }
 0x276   : > { %1951 = vperm.xlu1 %3506, %v4766_v7   ;;  %v775_v7 = vadd.f32 %v2889_v18, %v2873_v54  ;;  %vm492_vm1 = vcmp.eq.s32.totalorder %v5916_v45, 1  ;;  %v5919_v18 = vld [vmem:[#allocation87_spill] sm:$0xff]  ;;  %v5922_v54 = vld [vmem:[#allocation88_spill] sm:$0xff] }
 0x277   : > { %vm712_vm2 = vcmp.eq.s32.totalorder %v5919_v18, 1  ;;  %vm714_vm4 = vcmp.eq.s32.totalorder %v5922_v54, 1 }
 0x278   : > { %v999_v5 = vadd.f32 %v2905_v8, %v775_v7  ;;  %v5923_v7 = vld [vmem:[#allocation34_spill] sm:$0xff] }
 0x279   : > { %v5054_v49 = vpop.permute.xlu1 %1138  ;;  %vm632_vm15 = vcmp.eq.s32.totalorder %v4519_v48, %v5923_v7 }
 0x27a   : > { %3507 = vset.pattern.permute.xlu1 %v5816_v24  ;;  %v2937_v24 = vsel %vm1399_vm14, 1.0, %v3666_v16  ;;  %v1223_v26 = vadd.f32 %v2921_v58, %v999_v5  ;;  %vm490_vm14 = vcmp.eq.s32.totalorder %v5914_v55, 1  ;;  %v5926_v58 = vld [vmem:[#allocation89_spill] sm:$0xff]  ;;  %v1360_v5 = vpop.permute.xlu0 %1359  ;;  %vm5134_vm9 = vmand %vm632_vm15, %vm712_vm2  ;;  %vm936_vm15 = vcmp.eq.s32.totalorder %v4829_v31, 1  ;;  %v5960_v31 = vld [vmem:[#allocation11_spill] sm:$0xff] }
 0x27b   : > { %1070 = vperm.xlu1 %3507, %v5065_v4   ;;  %vm5112_vm3 = vmand %vm410_vm12, %vm490_vm14  ;;  %v5946_v55 = vld [vmem:[#allocation53_spill] sm:$0xff] }
 0x27c   : > { %v1447_v38 = vadd.f32 %v2937_v24, %v1223_v26 }
 0x27d   : > { %v5069_v43 = vpop.permute.xlu1 %1580 }
 0x27e   : > { %v1671_v13 = vadd.f32 %v2953_v25, %v1447_v38  ;;  %v5930_v25 = vld [vmem:[#allocation38_spill] sm:$0xff]  ;;  %v1802_v46 = vpop.permute.xlu0 %1801 }
 0x27f   : > { %3508 = vset.pattern.permute.xlu1 %v3659_v1  ;;  %vm636_vm11 = vcmp.eq.s32.totalorder %v4519_v48, %v5930_v25 }
 0x280   : > { %1150 = vperm.xlu1 %3508, %v1103_v50   ;;  %v1895_v30 = vadd.f32 %v2969_v51, %v1671_v13  ;;  %v5927_v50 = vld [vmem:[#allocation36_spill] sm:$0xff]  ;;  %v5933_v51 = vld [vmem:[#allocation62_spill] sm:$0xff]  ;;  %v2874_v13 = vsel %vm5107_vm13, 1.0, %v3666_v16  ;;  %vm1160_vm13 = vcmp.eq.s32.totalorder %v4882_v47, 1 }
 0x281   : > { %vm634_vm8 = vcmp.eq.s32.totalorder %v4519_v48, %v5927_v50  ;;  %v5965_v47 = vld [vmem:[#allocation24_spill] sm:$0xff] }
 0x282   : > { %v1943_v2 = vpop.permute.xlu1 %1942  ;;  %vm5144_vm12 = vmand %vm634_vm8, %vm714_vm4  ;;  %vm860_vm4 = vcmp.eq.s32.totalorder %v4519_v48, %v5937_v62 }
 0x283   : > { %vm1975_vm6 = vcmp.eq.s32.totalorder %v4519_v48, %v1943_v2  ;;  %v2892_v52 = vsel %vm5144_vm12, 1.0, %v3666_v16  ;;  %vm1080_vm12 = vcmp.eq.s32.totalorder %v4519_v48, %v4865_v35 }
 0x284   : > { %vm2071_vm7 = vmand %vm1975_vm6, %vm2055_vm5  ;;  %1592 = vperm.xlu1 %3508, %v1549_v56   ;;  %vm716_vm6 = vcmp.eq.s32.totalorder %v5926_v58, 1  ;;  %v5934_v56 = vld [vmem:[#allocation64_spill] sm:$0xff] }
 0x285   : > { %v2985_v29 = vsel %vm2071_vm7, 1.0, %v3666_v16  ;;  %vm5123_vm5 = vmand %vm412_vm0, %vm492_vm1  ;;  %vm1693_vm7 = vcmp.gt.f32.partialorder %v4844_v44, 6.0  ;;  %vm856_vm0 = vcmp.eq.s32.totalorder %v4519_v48, %v5933_v51  ;;  %vm858_vm1 = vcmp.eq.s32.totalorder %v4519_v48, %v5934_v56 }
 0x286   : > { %v2119_v59 = vadd.f32 %v2985_v29, %v1895_v30  ;;  %vm5152_vm2 = vmand %vm636_vm11, %vm716_vm6  ;;  %vm1162_vm6 = vcmp.eq.s32.totalorder %v5006_v9, 1  ;;  %vm1470_vm11 = vcmp.gt.f32.partialorder %v4733_v39, 5.0  ;;  %v2876_v29 = vsel %vm5112_vm3, 1.0, %v3666_v16 }
 0x287   : > { %v918_v37 = vpop.permute.xlu1 %917  ;;  %vm5163_vm8 = vmand %vm858_vm1, %vm938_vm10  ;;  %v2894_v15 = vsel %vm5152_vm2, 1.0, %v3666_v16  ;;  %vm1384_vm10 = vcmp.eq.s32.totalorder %v4984_v33, 1  ;;  %vm1528_vm1 = vcmp.eq.s32.totalorder %v4519_v48, %v5946_v55  ;;  %vm1386_vm2 = vcmp.eq.s32.totalorder %v1360_v5, 1  ;;  %v5255_v33 = vpop.permute.xlu0 %1804  ;;  %v5962_v55 = vld [vmem:[#allocation48_spill] sm:$0xff] }
 0x288   : > { %3509 = vset.pattern.permute.xlu1 %v5823_v23  ;;  %3140 = vmatmul.mubr.f32.gmra.mrb[6].mxu0 %v2119_v59  ;;  %vm940_vm14 = vcmp.eq.s32.totalorder %v918_v37, 1  ;;  %v2878_v59 = vsel %vm5123_vm5, 1.0, %v3666_v16  ;;  %vm5196_vm3 = vmand %vm856_vm0, %vm936_vm15  ;;  %vm1082_vm5 = vcmp.eq.s32.totalorder %v4519_v48, %v4990_v12  ;;  %v1550_v12 = vsel %vm1470_vm11, 1, %v3659_v1 }
 0x289   : > { %1954 = vperm.xlu1 %3509, %v4815_v57   ;;  %vm5211_vm0 = vmand %vm1082_vm5, %vm1162_vm6  ;;  %v2908_v35 = vsel %vm5163_vm8, 1.0, %v3666_v16  ;;  %v778_v11 = vadd.f32 %v2892_v52, %v2876_v29  ;;  %v780_v45 = vadd.f32 %v2894_v15, %v2878_v59  ;;  %v2906_v39 = vsel %vm5196_vm3, 1.0, %v3666_v16  ;;  %v5954_v29 = vld [vmem:[#allocation12_spill] sm:$0xff]  ;;  %v5955_v59 = vld [vmem:[#allocation23_spill] sm:$0xff] }
 0x28a   : > { %vm1176_vm15 = vmand %vm1080_vm12, %vm1160_vm13  ;;  %v2924_v54 = vsel %vm5211_vm0, 1.0, %v3666_v16  ;;  %v5958_v15 = vld [vmem:[#allocation50_spill] sm:$0xff]  ;;  %v5959_v37 = vmov 5  }
 0x28b   : > { %v1002_v7 = vadd.f32 %v2908_v35, %v778_v11 }
 0x28c   : > { %v5081_v20 = vpop.permute.xlu1 %1279 }
 0x28d   : > { %3510 = vset.pattern.permute.xlu1 %v5806_v41  ;;  %v1226_v50 = vadd.f32 %v2924_v54, %v1002_v7 }
 0x28e   : > { %1291 = vperm.xlu1 %3510, %v5015_v10  }
 0x291   : > { %v5087_v42 = vpop.permute.xlu1 %1721 }
 0x292   : > { %3511 = vset.pattern.permute.xlu1 %v3659_v1 }
 0x293   : > { %1371 = vperm.xlu1 %3511, %v1326_v32   ;;  %v2890_v32 = vsel %vm5134_vm9, 1.0, %v3666_v16  ;;  %vm1306_vm9 = vcmp.eq.s32.totalorder %v4519_v48, %v5081_v20  ;;  %v2922_v20 = vsel %vm1176_vm15, 1.0, %v3666_v16  ;;  %vm635_vm15 = vcmp.eq.s32.totalorder %v4519_v48, %v5954_v29  ;;  %v5983_v29 = vld [vmem:[#allocation91_spill] sm:$0xff] }
 0x294   : > { %vm5235_vm6 = vmand %vm1306_vm9, %vm1386_vm2  ;;  %v776_v18 = vadd.f32 %v2890_v32, %v2874_v13  ;;  %vm1832_vm9 = vcmp.eq.s32.totalorder %v1802_v46, 1  ;;  %v2026_v32 = vpop.permute.xlu0 %2025  ;;  %v5294_v46 = vld [vmem:[%s3800_s20 + $0x78] sm:$0xff] }
 0x295   : > { %v2940_v58 = vsel %vm5235_vm6, 1.0, %v3666_v16 }
 0x296   : > { %v5092_v57 = vpop.permute.xlu1 %920  ;;  %v1450_v56 = vadd.f32 %v2940_v58, %v1226_v50 }
 0x297   : > { %1813 = vperm.xlu1 %3511, %v1772_v21  }
 0x29a   : > { %v5094_v63 = vpop.permute.xlu1 %1362 }
 0x29b   : > { %3514 = vset.pattern.permute.xlu1 %v5806_v41 }
 0x29c   : > { %1294 = vperm.xlu1 %3514, %v5065_v4  }
 0x29f   : > { %v5117_v3 = vpop.permute.xlu1 %1724  ;;  %v5119_v8 = vpop.f32.mrb[0].mxu0 }
 0x2a0   : > { %3515 = vset.pattern.permute.xlu1 %v5807_v0  ;;  %v5129_v24 = vpop.f32.mrb[1].mxu0 }
 0x2a1   : > { %1736 = vperm.xlu1 %3515, %v4943_v19   ;;  %v1773_v19 = vsel %vm1693_vm7, 1, %v3659_v1  ;;  %vm5180_vm7 = vmand %vm860_vm4, %vm940_vm14  ;;  %vm1304_vm14 = vcmp.eq.s32.totalorder %v4519_v48, %v4963_v36  ;;  %vm1608_vm4 = vcmp.eq.s32.totalorder %v5021_v61, 1  ;;  %v1000_v36 = vadd.f32 %v2906_v39, %v776_v18  ;;  %v5951_v61 = vld [vmem:[#allocation56_spill] sm:$0xff] }
 0x2a2   : > { %v2910_v9 = vsel %vm5180_vm7, 1.0, %v3666_v16  ;;  %vm5244_vm8 = vmand %vm1304_vm14, %vm1384_vm10  ;;  %vm1752_vm7 = vcmp.eq.s32.totalorder %v4519_v48, %v5087_v42  ;;  %vm1530_vm10 = vcmp.eq.s32.totalorder %v4519_v48, %v5951_v61  ;;  %v5987_v18 = vld [vmem:[#allocation68_spill] sm:$0xff] }
 0x2a3   : > { %v1004_v53 = vadd.f32 %v2910_v9, %v780_v45  ;;  %vm1624_vm5 = vmand %vm1528_vm1, %vm1608_vm4  ;;  %v2938_v42 = vsel %vm5244_vm8, 1.0, %v3666_v16  ;;  %v1224_v38 = vadd.f32 %v2922_v20, %v1000_v36  ;;  %vm489_vm1 = vcmp.eq.s32.totalorder %v5952_v22, 1  ;;  %v2404_v20 = vld [vmem:[%s5743_s3 + $0x18] sm:$0xff] }
 0x2a4   : > { %v1062_v30 = vpop.permute.xlu1 %1061  ;;  %vm1848_vm12 = vmand %vm1752_vm7, %vm1832_vm9  ;;  %v2954_v51 = vsel %vm1624_vm5, 1.0, %v3666_v16  ;;  %vm491_vm4 = vcmp.eq.s32.totalorder %v5955_v59, 1  ;;  %vm715_vm8 = vcmp.eq.s32.totalorder %v5958_v15, 1  ;;  %vm1471_vm7 = vcmp.gt.f32.partialorder %v5294_v46, 5.0  ;;  %v2029_v15 = vpop.permute.xlu0 %2028 }
 0x2a5   : > { %3516 = vset.pattern.permute.xlu1 %v3659_v1  ;;  %vm1084_vm11 = vcmp.eq.s32.totalorder %v4519_v48, %v1062_v30  ;;  %v2970_v13 = vsel %vm1848_vm12, 1.0, %v3666_v16  ;;  %v5953_v30 = vld [vmem:[#allocation9_spill] sm:$0xff]  ;;  %vm713_vm9 = vcmp.eq.s32.totalorder %v5962_v55, 1  ;;  %v1551_v39 = vsel %vm1471_vm7, 1, %v3659_v1 }
 0x2a6   : > { %1816 = vperm.xlu1 %3516, %v1773_v19   ;;  %v1448_v19 = vadd.f32 %v2938_v42, %v1224_v38  ;;  %vm409_vm2 = vcmp.eq.s32.totalorder %v4519_v48, %v5953_v30  ;;  %vm1083_vm7 = vcmp.eq.s32.totalorder %v4519_v48, %v5040_v34 }
 0x2a7   : > { %vm5286_vm6 = vmand %vm409_vm2, %vm489_vm1  ;;  %vm937_vm1 = vcmp.eq.s32.totalorder %v4840_v6, 1  ;;  %vm859_vm2 = vcmp.eq.s32.totalorder %v4519_v48, %v5965_v47 }
 0x2a8   : > { %v2875_v7 = vsel %vm5286_vm6, 1.0, %v3666_v16  ;;  %vm1609_vm6 = vcmp.eq.s32.totalorder %v5069_v43, 1  ;;  %v5981_v43 = vld [vmem:[#allocation74_spill] sm:$0xff] }
 0x2a9   : > { %v1142_v40 = vpop.permute.xlu1 %1141 }
 0x2aa   : > { %vm1164_vm13 = vcmp.eq.s32.totalorder %v1142_v40, 1  ;;  %1595 = vperm.xlu1 %3516, %v1550_v12   ;;  %v5961_v12 = vld [vmem:[#allocation10_spill] sm:$0xff] }
 0x2ab   : > { %vm1180_vm3 = vmand %vm1084_vm11, %vm1164_vm13  ;;  %vm2056_vm11 = vcmp.eq.s32.totalorder %v2026_v32, 1  ;;  %vm633_vm5 = vcmp.eq.s32.totalorder %v4519_v48, %v5961_v12  ;;  %v5966_v40 = vld [vmem:[#allocation22_spill] sm:$0xff] }
 0x2ac   : > { %v2926_v5 = vsel %vm1180_vm3, 1.0, %v3666_v16  ;;  %vm411_vm3 = vcmp.eq.s32.totalorder %v4519_v48, %v5960_v31  ;;  %v2402_v12 = vld [vmem:[%s5743_s3 + $0x8] sm:$0xff] }
 0x2ad   : > { %v5269_v26 = vadd.f32 %v2926_v5, %v1004_v53  ;;  %v1584_v25 = vpop.permute.xlu1 %1583  ;;  %vm5305_vm12 = vmand %vm411_vm3, %vm491_vm4  ;;  %vm857_vm3 = vcmp.eq.s32.totalorder %v4519_v48, %v5966_v40  ;;  %v5973_v53 = vld [vmem:[#allocation39_spill] sm:$0xff]  ;;  %v5988_v5 = vld [vmem:[#allocation14_spill] sm:$0xff] }
 0x2ae   : > { %vm1610_vm14 = vcmp.eq.s32.totalorder %v1584_v25, 1  ;;  %3517 = vset.pattern.permute.xlu1 %v5823_v23  ;;  %vm729_vm4 = vmand %vm633_vm5, %vm713_vm9  ;;  %vm1387_vm5 = vcmp.eq.s32.totalorder %v5094_v63, 1  ;;  %vm1081_vm9 = vcmp.eq.s32.totalorder %v4519_v48, %v4918_v28  ;;  %v2877_v28 = vsel %vm5305_vm12, 1.0, %v3666_v16  ;;  %v5977_v25 = vld [vmem:[#allocation55_spill] sm:$0xff] }
 0x2af   : > { %vm1626_vm0 = vmand %vm1530_vm10, %vm1610_vm14  ;;  %1957 = vperm.xlu1 %3517, %v4892_v60   ;;  %v1672_v60 = vadd.f32 %v2954_v51, %v1448_v19  ;;  %vm939_vm14 = vcmp.eq.s32.totalorder %v4968_v14, 1  ;;  %v2891_v54 = vsel %vm729_vm4, 1.0, %v3666_v16 }
 0x2b0   : > { %v2956_v62 = vsel %vm1626_vm0, 1.0, %v3666_v16  ;;  %vm731_vm0 = vmand %vm635_vm15, %vm715_vm8  ;;  %v777_v42 = vadd.f32 %v2891_v54, %v2875_v7  ;;  %v2403_v54 = vld [vmem:[%s5743_s3 + $0x10] sm:$0xff] }
 0x2b1   : > { %v5279_v2 = vadd.f32 %v2956_v62, %v1450_v56  ;;  %v1896_v35 = vadd.f32 %v2970_v13, %v1672_v60  ;;  %vm5325_vm15 = vmand %vm859_vm2, %vm939_vm14  ;;  %v2893_v6 = vsel %vm731_vm0, 1.0, %v3666_v16  ;;  %vm1385_vm14 = vcmp.eq.s32.totalorder %v4973_v27, 1  ;;  %v5980_v62 = vld [vmem:[#allocation57_spill] sm:$0xff]  ;;  %v5982_v13 = vld [vmem:[#allocation82_spill] sm:$0xff] }
 0x2b2   : > { %v1946_v21 = vpop.permute.xlu1 %1945  ;;  %vm5331_vm8 = vmand %vm857_vm3, %vm937_vm1  ;;  %vm1307_vm1 = vcmp.eq.s32.totalorder %v4519_v48, %v5973_v53  ;;  %v779_v36 = vadd.f32 %v2893_v6, %v2877_v28  ;;  %v3302_v7 = vpack.c.bf16 %v2404_v20, %v2403_v54  ;;  %v1366_v53 = vpop.permute.xlu0 %1365 }
 0x2b3   : > { %vm1976_vm13 = vcmp.eq.s32.totalorder %v4519_v48, %v1946_v21  ;;  %3518 = vset.pattern.permute.xlu1 %v5959_v37  ;;  %v2907_v58 = vsel %vm5331_vm8, 1.0, %v3666_v16  ;;  %vm5372_vm12 = vmand %vm1307_vm1, %vm1387_vm5  ;;  %vm1833_vm5 = vcmp.eq.s32.totalorder %v5255_v33, 1  ;;  %vm414_vm1 = vcmp.eq.s32.totalorder %v4519_v48, %v5981_v43 }
 0x2b4   : > { %vm2072_vm10 = vmand %vm1976_vm13, %vm2056_vm11  ;;  %1518 = vperm.xlu1 %3518, %v5065_v4   ;;  %vm1163_vm11 = vcmp.eq.s32.totalorder %v5054_v49, 1  ;;  %vm1917_vm13 = vcmp.gt.f32.partialorder %v4844_v44, 7.0  ;;  %v2909_v49 = vsel %vm5325_vm15, 1.0, %v3666_v16  ;;  %v5974_v44 = vld [vmem:[#allocation37_spill] sm:$0xff]  ;;  %vm1753_vm15 = vcmp.eq.s32.totalorder %v4519_v48, %v5117_v3 }
 0x2b5   : > { %v2986_v11 = vsel %vm2072_vm10, 1.0, %v3666_v16  ;;  %vm1161_vm10 = vcmp.eq.s32.totalorder %v4934_v17, 1  ;;  %vm5344_vm0 = vmand %vm1083_vm7, %vm1163_vm11  ;;  %v1997_v34 = vsel %vm1917_vm13, 1, %v3659_v1  ;;  %vm1305_vm4 = vcmp.eq.s32.totalorder %v4519_v48, %v5974_v44  ;;  %v2405_v44 = vld [vmem:[%s5743_s3 + $0x20] sm:$0xff] }
 0x2b6   : > { %v2120_v45 = vadd.f32 %v2986_v11, %v1896_v35  ;;  %vm1177_vm2 = vmand %vm1081_vm9, %vm1161_vm10  ;;  %v2925_v50 = vsel %vm5344_vm0, 1.0, %v3666_v16  ;;  %vm1529_vm10 = vcmp.eq.s32.totalorder %v4519_v48, %v5977_v25  ;;  %v1003_v61 = vadd.f32 %v2909_v49, %v779_v36  ;;  %v2406_v36 = vld [vmem:[%s5743_s3 + $0x28] sm:$0xff] }
 0x2b7   : > { %v1065_v14 = vpop.permute.xlu1 %1064  ;;  %vm1401_vm11 = vmand %vm1305_vm4, %vm1385_vm14  ;;  %v2923_v63 = vsel %vm1177_vm2, 1.0, %v3666_v16  ;;  %v1001_v38 = vadd.f32 %v2907_v58, %v777_v42  ;;  %v2941_v51 = vsel %vm5372_vm12, 1.0, %v3666_v16  ;;  %vm1531_vm9 = vcmp.eq.s32.totalorder %v4519_v48, %v5980_v62  ;;  %v3586_v62 = vld [vmem:[%s3800_s20] sm:$0xff] }
 0x2b8   : > { %3519 = vset.pattern.permute.xlu1 %v3659_v1  ;;  %3142 = vmatprep.mubr.f32.mxu0 %v2120_v45  ;;  %vm1085_vm13 = vcmp.eq.s32.totalorder %v4519_v48, %v1065_v14  ;;  %vm1625_vm7 = vmand %vm1529_vm10, %vm1609_vm6  ;;  %v2939_v56 = vsel %vm1401_vm11, 1.0, %v3666_v16  ;;  %v1227_v22 = vadd.f32 %v2925_v50, %v1003_v61  ;;  %vm494_vm2 = vcmp.eq.s32.totalorder %v5982_v13, 1  ;;  %v3585_v14 = vld [vmem:[%s3800_s20 + $0x70] sm:$0xff]  ;;  %v5990_v50 = vld [vmem:[#allocation25_spill] sm:$0xff] }
 0x2b9   : > { %1598 = vperm.xlu1 %3519, %v1551_v39   ;;  %v1225_v3 = vadd.f32 %v2923_v63, %v1001_v38  ;;  %vm1849_vm14 = vmand %vm1753_vm15, %vm1833_vm5  ;;  %v2955_v30 = vsel %vm1625_vm7, 1.0, %v3666_v16  ;;  %vm718_vm6 = vcmp.eq.s32.totalorder %v5983_v29, 1  ;;  %vm2057_vm10 = vcmp.eq.s32.totalorder %v2029_v15, 1  ;;  %v2407_v61 = vld [vmem:[%s5743_s3 + $0x30] sm:$0xff]  ;;  %v5991_v38 = vld [vmem:[#allocation13_spill] sm:$0xff] }
 0x2ba   : > { %v1451_v33 = vadd.f32 %v2941_v51, %v1227_v22  ;;  %v2971_v60 = vsel %vm1849_vm14, 1.0, %v3666_v16  ;;  %vm5413_vm11 = vmand %vm414_vm1, %vm494_vm2  ;;  %vm1918_vm5 = vcmp.gt.f32.partialorder %v3585_v14, 7.0  ;;  %vm1388_vm1 = vcmp.eq.s32.totalorder %v1366_v53, 1  ;;  %v2409_v22 = vld [vmem:[%s5743_s3 + $0x40] sm:$0xff]  ;;  %v2411_v29 = vld [vmem:[%s5743_s3 + $0x50] sm:$0xff] }
 0x2bb   : > { %v1449_v59 = vadd.f32 %v2939_v56, %v1225_v3  ;;  %v2880_v45 = vsel %vm5413_vm11, 1.0, %v3666_v16  ;;  %v1998_v41 = vsel %vm1918_vm5, 1, %v3659_v1  ;;  %v3306_v58 = vpack.c.bf16 %v2406_v36, %v2405_v44  ;;  %v5993_v15 = vld [vmem:[#allocation41_spill] sm:$0xff]  ;;  %v3592_v53 = vld [vmem:[%s3800_s20 + $0x58] sm:$0xff] }
 0x2bc   : > { %v1145_v17 = vpop.permute.xlu1 %1144  ;;  %vm493_vm11 = vcmp.eq.s32.totalorder %v5990_v50, 1 }
 0x2bd   : > { %vm1165_vm3 = vcmp.eq.s32.totalorder %v1145_v17, 1  ;;  %2040 = vperm.xlu1 %3519, %v1997_v34   ;;  %v1673_v37 = vadd.f32 %v2955_v30, %v1449_v59  ;;  %v5989_v17 = vld [vmem:[#allocation52_spill] sm:$0xff] }
 0x2be   : > { %vm5387_vm8 = vmand %vm1085_vm13, %vm1165_vm3  ;;  %vm1695_vm13 = vcmp.gt.f32.partialorder %v5294_v46, 6.0  ;;  %v2412_v59 = vld [vmem:[%s5743_s3 + $0x58] sm:$0xff] }
 0x2bf   : > { %v1897_v55 = vadd.f32 %v2971_v60, %v1673_v37  ;;  %v1775_v11 = vsel %vm1695_vm13, 1, %v3659_v1  ;;  %vm941_vm13 = vcmp.eq.s32.totalorder %v5092_v57, 1  ;;  %v3587_v60 = vld [vmem:[%s3800_s20 + $0x8] sm:$0xff]  ;;  %v3318_v52 = vpack.c.bf16 %v2412_v59, %v2411_v29 }
 0x2c0   : > { %v1587_v19 = vpop.permute.xlu1 %1586 }
 0x2c1   : > { %vm1611_vm0 = vcmp.eq.s32.totalorder %v1587_v19, 1  ;;  %3521 = vset.pattern.permute.xlu1 %v5807_v0  ;;  %v5984_v0 = vld [vmem:[#allocation40_spill] sm:$0xff]  ;;  %v2410_v19 = vld [vmem:[%s5743_s3 + $0x48] sm:$0xff] }
 0x2c2   : > { %vm1627_vm4 = vmand %vm1531_vm9, %vm1611_vm0  ;;  %1739 = vperm.xlu1 %3521, %v5015_v10   ;;  %vm638_vm12 = vcmp.eq.s32.totalorder %v4519_v48, %v5984_v0  ;;  %v2401_v10 = vld [vmem:[%s5743_s3] sm:$0xff]  ;;  %vm862_vm9 = vcmp.eq.s32.totalorder %v4519_v48, %v5987_v18  ;;  %v3314_v43 = vpack.c.bf16 %v2410_v19, %v2409_v22  ;;  %v3590_v18 = vld [vmem:[%s3800_s20 + $0x38] sm:$0xff] }
 0x2c3   : > { %v2957_v32 = vsel %vm1627_vm4, 1.0, %v3666_v16  ;;  %vm734_vm3 = vmand %vm638_vm12, %vm718_vm6  ;;  %v3298_v35 = vpack.c.bf16 %v2402_v12, %v2401_v10  ;;  %vm637_vm6 = vcmp.eq.s32.totalorder %v4519_v48, %v5988_v5  ;;  %vm717_vm12 = vcmp.eq.s32.totalorder %v5989_v17, 1  ;;  %v2414_v10 = vld [vmem:[%s5743_s3 + $0x68] sm:$0xff]  ;;  %v5994_v5 = vld [vmem:[#allocation16_spill] sm:$0xff] }
 0x2c4   : > { %v5409_v21 = vadd.f32 %v2957_v32, %v1451_v33  ;;  %v2896_v39 = vsel %vm734_vm3, 1.0, %v3666_v16  ;;  %vm413_vm3 = vcmp.eq.s32.totalorder %v4519_v48, %v5991_v38  ;;  %v2927_v33 = vsel %vm5387_vm8, 1.0, %v3666_v16  ;;  %v5995_v17 = vld [vmem:[#allocation54_spill] sm:$0xff] }
 0x2c5   : > { %v1949_v31 = vpop.permute.xlu1 %1948  ;;  %3299 = vmatprep.subr.bf16.mxu1 %v3298_v35  ;;  %v782_v6 = vadd.f32 %v2896_v39, %v2880_v45  ;;  %v2416_v45 = vld [vmem:[%s5743_s3 + $0x78] sm:$0xff]  ;;  %v3589_v39 = vld [vmem:[%s3800_s20 + $0x28] sm:$0xff] }
 0x2c6   : > { %vm1977_vm15 = vcmp.eq.s32.totalorder %v4519_v48, %v1949_v31  ;;  %1742 = vperm.xlu1 %3521, %v5065_v4   ;;  %3301 = vmatpush3.bf16.msra.mxu1 %v3298_v35  ;;  %v2413_v31 = vld [vmem:[%s5743_s3 + $0x60] sm:$0xff] }
 0x2c7   : > { %vm2073_vm7 = vmand %vm1977_vm15, %vm2057_vm10  ;;  %3303 = vmatprep.subr.bf16.mxu1 %v3302_v7  ;;  %v3322_v35 = vpack.c.bf16 %v2414_v10, %v2413_v31  ;;  %v5999_v31 = vld [vmem:[#allocation59_spill] sm:$0xff]  ;;  %v6000_v10 = vld [vmem:[#allocation42_spill] sm:$0xff] }
 0x2c8   : > { %v2987_v9 = vsel %vm2073_vm7, 1.0, %v3666_v16  ;;  %vm733_vm10 = vmand %vm637_vm6, %vm717_vm12 }
 0x2c9   : > { %v2121_v47 = vadd.f32 %v2987_v9, %v1897_v55  ;;  %vm509_vm15 = vmand %vm413_vm3, %vm493_vm11  ;;  %v2895_v56 = vsel %vm733_vm10, 1.0, %v3666_v16  ;;  %v3588_v55 = vld [vmem:[%s3800_s20 + $0x18] sm:$0xff]  ;;  %vm639_vm11 = vcmp.eq.s32.totalorder %v4519_v48, %v5994_v5 }
 0x2ca   : > { %3522 = vset.pattern.permute.xlu1 %v3659_v1  ;;  %v924_v40 = vpop.permute.xlu1 %923  ;;  %3305 = vmatpush3.bf16.msra.mxu1 %v3302_v7  ;;  %v2879_v13 = vsel %vm509_vm15, 1.0, %v3666_v16 }
 0x2cb   : > { %vm942_vm14 = vcmp.eq.s32.totalorder %v924_v40, 1  ;;  %1822 = vperm.xlu1 %3522, %v1775_v11   ;;  %3143 = vmatmul.mubr.f32.gmra.mrb[8].mxu0 %v2121_v47  ;;  %v2415_v11 = vld [vmem:[%s5743_s3 + $0x70] sm:$0xff]  ;;  %v1808_v40 = vpop.permute.xlu0 %1807 }
 0x2cc   : > { %vm958_vm0 = vmand %vm862_vm9, %vm942_vm14  ;;  %3307 = vmatprep.subr.bf16.mxu1 %v3306_v58  ;;  %vm1309_vm9 = vcmp.eq.s32.totalorder %v4519_v48, %v5993_v15  ;;  %v3326_v47 = vpack.c.bf16 %v2416_v45, %v2415_v11  ;;  %vm1834_vm6 = vcmp.eq.s32.totalorder %v1808_v40, 1 }
 0x2cd   : > { %v2912_v34 = vsel %vm958_vm0, 1.0, %v3666_v16 }
 0x2ce   : > { %v5444_v28 = vadd.f32 %v2912_v34, %v782_v6  ;;  %3309 = vmatpush3.bf16.msra.mxu1 %v3306_v58  ;;  %v3593_v58 = vld [vmem:[%s3800_s20 + $0x68] sm:$0xff] }
 0x2cf   : > { %2043 = vperm.xlu1 %3522, %v1998_v41   ;;  %v1286_v49 = vpop.permute.xlu1 %1285  ;;  %v3591_v41 = vld [vmem:[%s3800_s20 + $0x48] sm:$0xff]  ;;  %v1811_v54 = vpop.permute.xlu0 %1810 }
 0x2d0   : > { %vm1308_vm2 = vcmp.eq.s32.totalorder %v4519_v48, %v1286_v49 }
 0x2d1   : > { %vm1404_vm4 = vmand %vm1308_vm2, %vm1388_vm1 }
 0x2d2   : > { %v2942_v42 = vsel %vm1404_vm4, 1.0, %v3666_v16 }
 0x2d3   : > { %v5459_v25 = vadd.f32 %v2942_v42, %v5269_v26  ;;  %3524 = vset.pattern.permute.xlu1 %v5823_v23  ;;  %v2408_v26 = vld [vmem:[%s5743_s3 + $0x38] sm:$0xff]  ;;  %v2032_v44 = vpop.permute.xlu0 %2031 }
 0x2d4   : > { %1966 = vperm.xlu1 %3524, %v5065_v4   ;;  %v5464_v63 = vpop.permute.xlu1 %1727  ;;  %v3310_v57 = vpack.c.bf16 %v2408_v26, %v2407_v61  ;;  %v5992_v4 = vld [vmem:[#allocation26_spill] sm:$0xff]  ;;  %vm2058_vm3 = vcmp.eq.s32.totalorder %v2032_v44, 1  ;;  %v5998_v26 = vld [vmem:[#allocation28_spill] sm:$0xff] }
 0x2d5   : > { %v5474_v23 = vpop.f32.mrb[2].mxu0  ;;  %vm861_vm7 = vcmp.eq.s32.totalorder %v4519_v48, %v5992_v4  ;;  %vm1754_vm2 = vcmp.eq.s32.totalorder %v4519_v48, %v5464_v63  ;;  %v5997_v63 = vld [vmem:[#allocation15_spill] sm:$0xff] }
 0x2d6   : > { %v5478_v51 = vpop.f32.mrb[3].mxu0  ;;  %vm957_vm5 = vmand %vm861_vm7, %vm941_vm13  ;;  %3311 = vmatprep.subr.bf16.mxu1 %v3310_v57  ;;  %vm719_vm13 = vcmp.eq.s32.totalorder %v5995_v17, 1  ;;  %v6003_v17 = vld [vmem:[#allocation63_spill] sm:$0xff] }
 0x2d7   : > { %3313 = vmatpush3.bf16.msra.mxu1 %v3310_v57  ;;  %v2911_v30 = vsel %vm957_vm5, 1.0, %v3666_v16  ;;  %vm1850_vm12 = vmand %vm1754_vm2, %vm1834_vm6 }
 0x2d8   : > { %3525 = vset.pattern.permute.xlu1 %v3659_v1  ;;  %v781_v1 = vadd.f32 %v2895_v56, %v2879_v13  ;;  %3315 = vmatprep.subr.bf16.mxu1 %v3314_v43  ;;  %v2972_v49 = vsel %vm1850_vm12, 1.0, %v3666_v16  ;;  %v2035_v13 = vpop.permute.xlu0 %2034 }
 0x2d9   : > { %2291 = vperm.xlu1 %3525, %v3586_v62   ;;  %v5489_v3 = vpop.permute.xlu1 %926  ;;  %v1898_v42 = vadd.f32 %v2972_v49, %v5279_v2 }
 0x2da   : > { %v1005_v32 = vadd.f32 %v2911_v30, %v781_v1  ;;  %vm943_vm5 = vcmp.eq.s32.totalorder %v5489_v3, 1 }
 0x2db   : > { %3317 = vmatpush3.bf16.msra.mxu1 %v3314_v43 }
 0x2dc   : > { %v1229_v27 = vadd.f32 %v2927_v33, %v1005_v32  ;;  %3319 = vmatprep.subr.bf16.mxu1 %v3318_v52 }
 0x2dd   : > { %2296 = vperm.xlu1 %3525, %v3587_v60   ;;  %v1369_v0 = vpop.permute.xlu1 %1368 }
 0x2de   : > { %vm1389_vm14 = vcmp.eq.s32.totalorder %v1369_v0, 1 }
 0x2df   : > { %vm1405_vm8 = vmand %vm1309_vm9, %vm1389_vm14  ;;  %3321 = vmatpush3.bf16.msra.mxu1 %v3318_v52  ;;  %vm415_vm9 = vcmp.eq.s32.totalorder %v4519_v48, %v5997_v63 }
 0x2e0   : > { %v2943_v37 = vsel %vm1405_vm8, 1.0, %v3666_v16  ;;  %3323 = vmatprep.subr.bf16.mxu1 %v3322_v35  ;;  %vm735_vm14 = vmand %vm639_vm11, %vm719_vm13  ;;  %vm1835_vm11 = vcmp.eq.s32.totalorder %v1811_v54, 1 }
 0x2e1   : > { %v5512_v12 = vadd.f32 %v2943_v37, %v1229_v27  ;;  %2306 = vperm.xlu1 %3525, %v3588_v55   ;;  %v2897_v2 = vsel %vm735_vm14, 1.0, %v3666_v16 }
 0x2e2   : > { %v5515_v9 = vpop.permute.xlu1 %1730 }
 0x2e3   : > { %3325 = vmatpush3.bf16.msra.mxu1 %v3322_v35  ;;  %vm1755_vm6 = vcmp.eq.s32.totalorder %v4519_v48, %v5515_v9 }
 0x2e4   : > { %3327 = vmatprep.subr.bf16.mxu1 %v3326_v47  ;;  %vm1851_vm13 = vmand %vm1755_vm6, %vm1835_vm11 }
 0x2e5   : > { %2316 = vperm.xlu1 %3525, %v3589_v39   ;;  %v2973_v43 = vsel %vm1851_vm13, 1.0, %v3666_v16 }
 0x2e6   : > { %v1899_v1 = vadd.f32 %v2973_v43, %v5409_v21  ;;  %v1375_v21 = vpop.permute.xlu0 %1374 }
 0x2e7   : > { %v1068_v14 = vpop.permute.xlu1 %1067  ;;  %3329 = vmatpush3.bf16.msra.mxu1 %v3326_v47 }
 0x2e8   : > { %vm1086_vm0 = vcmp.eq.s32.totalorder %v4519_v48, %v1068_v14 }
 0x2e9   : > { %2326 = vperm.xlu1 %3525, %v3590_v18  }
 0x2ea   : > { %v2038_v11 = vpop.permute.xlu0 %2037 }
 0x2ec   : > { %v1148_v6 = vpop.permute.xlu1 %1147 }
 0x2ed   : > { %vm1166_vm1 = vcmp.eq.s32.totalorder %v1148_v6, 1  ;;  %2336 = vperm.xlu1 %3525, %v3591_v41   ;;  %v6001_v6 = vld [vmem:[#allocation61_spill] sm:$0xff] }
 0x2ee   : > { %vm1182_vm4 = vmand %vm1086_vm0, %vm1166_vm1  ;;  %vm863_vm0 = vcmp.eq.s32.totalorder %v4519_v48, %v5998_v26 }
 0x2ef   : > { %v2928_v20 = vsel %vm1182_vm4, 1.0, %v3666_v16  ;;  %vm959_vm1 = vmand %vm863_vm0, %vm943_vm5  ;;  %vm1532_vm5 = vcmp.eq.s32.totalorder %v4519_v48, %v5999_v31 }
 0x2f0   : > { %v5531_v34 = vadd.f32 %v2928_v20, %v5444_v28  ;;  %v5533_v7 = vpop.permute.xlu1 %1589  ;;  %v5996_v28 = vld [vmem:[#allocation27_spill] sm:$0xff]  ;;  %v2913_v4 = vsel %vm959_vm1, 1.0, %v3666_v16  ;;  %vm2060_vm1 = vcmp.eq.s32.totalorder %v2038_v11, 1 }
 0x2f1   : > { %2346 = vperm.xlu1 %3525, %v3592_v53   ;;  %vm495_vm15 = vcmp.eq.s32.totalorder %v5996_v28, 1  ;;  %v6002_v53 = vld [vmem:[#allocation65_spill] sm:$0xff] }
 0x2f2   : > { %vm511_vm8 = vmand %vm415_vm9, %vm495_vm15 }
 0x2f3   : > { %v2881_v57 = vsel %vm511_vm8, 1.0, %v3666_v16  ;;  %vm1756_vm8 = vcmp.eq.s32.totalorder %v4519_v48, %v6000_v10 }
 0x2f4   : > { %v783_v56 = vadd.f32 %v2897_v2, %v2881_v57  ;;  %v6004_v57 = vld [vmem:[#allocation67_spill] sm:$0xff] }
 0x2f5   : > { %v1952_v36 = vpop.permute.xlu1 %1951  ;;  %2356 = vperm.xlu1 %3525, %v3593_v58  }
 0x2f6   : > { %vm1978_vm10 = vcmp.eq.s32.totalorder %v4519_v48, %v1952_v36  ;;  %v1007_v19 = vadd.f32 %v2913_v4, %v783_v56 }
 0x2f7   : > { %vm2074_vm7 = vmand %vm1978_vm10, %vm2058_vm3  ;;  %vm2059_vm3 = vcmp.eq.s32.totalorder %v2035_v13, 1 }
 0x2f8   : > { %v2988_v50 = vsel %vm2074_vm7, 1.0, %v3666_v16  ;;  %vm1612_vm7 = vcmp.eq.s32.totalorder %v5533_v7, 1 }
 0x2f9   : > { %v2122_v61 = vadd.f32 %v2988_v50, %v1898_v42  ;;  %2366 = vperm.xlu1 %3525, %v5294_v46   ;;  %vm1628_vm14 = vmand %vm1532_vm5, %vm1612_vm7 }
 0x2fa   : > { %v1071_v38 = vpop.permute.xlu1 %1070  ;;  %v2958_v35 = vsel %vm1628_vm14, 1.0, %v3666_v16 }
 0x2fb   : > { %3145 = vmatprep.mubr.f32.mxu0 %v2122_v61  ;;  %vm1087_vm2 = vcmp.eq.s32.totalorder %v4519_v48, %v1071_v38  ;;  %v1676_v45 = vadd.f32 %v2958_v35, %v5459_v25 }
 0x2ff   : > { %v1151_v22 = vpop.permute.xlu1 %1150 }
 0x300   : > { %vm1167_vm4 = vcmp.eq.s32.totalorder %v1151_v22, 1 }
 0x301   : > { %vm1183_vm12 = vmand %vm1087_vm2, %vm1167_vm4 }
 0x302   : > { %v2929_v46 = vsel %vm1183_vm12, 1.0, %v3666_v16  ;;  %vm1533_vm12 = vcmp.eq.s32.totalorder %v4519_v48, %v6001_v6 }
 0x303   : > { %v5558_v62 = vadd.f32 %v2929_v46, %v1007_v19  ;;  %v1593_v3 = vpop.permute.xlu1 %1592 }
 0x304   : > { %vm1613_vm6 = vcmp.eq.s32.totalorder %v1593_v3, 1 }
 0x305   : > { %vm1629_vm13 = vmand %vm1533_vm12, %vm1613_vm6 }
 0x306   : > { %v2959_v41 = vsel %vm1629_vm13, 1.0, %v3666_v16 }
 0x307   : > { %v1677_v20 = vadd.f32 %v2959_v41, %v5512_v12  ;;  %v1820_v12 = vpop.permute.xlu0 %1819 }
 0x308   : > { %v1955_v30 = vpop.permute.xlu1 %1954  ;;  %vm1838_vm12 = vcmp.eq.s32.totalorder %v1820_v12, 1 }
 0x309   : > { %vm1979_vm10 = vcmp.eq.s32.totalorder %v4519_v48, %v1955_v30 }
 0x30a   : > { %vm2075_vm15 = vmand %vm1979_vm10, %vm2059_vm3 }
 0x30b   : > { %v2989_v33 = vsel %vm2075_vm15, 1.0, %v3666_v16  ;;  %vm1981_vm15 = vcmp.eq.s32.totalorder %v4519_v48, %v6002_v53  ;;  %v2047_v3 = vpop.permute.xlu0 %2046 }
 0x30c   : > { %v2123_v29 = vadd.f32 %v2989_v33, %v1899_v1 }
 0x30d   : > { %v1292_v59 = vpop.permute.xlu1 %1291 }
 0x30e   : > { %3146 = vmatmul.mubr.f32.gmra.mrb[10].mxu0 %v2123_v29  ;;  %vm1310_vm14 = vcmp.eq.s32.totalorder %v4519_v48, %v1292_v59 }
 0x30f   : > { %v2302_v59 = vpop.permute.xlu0 %2301 }
 0x312   : > { %v1372_v32 = vpop.permute.xlu1 %1371 }
 0x316   : > { %v1814_v60 = vpop.permute.xlu1 %1813 }
 0x317   : > { %vm1836_vm9 = vcmp.eq.s32.totalorder %v1814_v60, 1 }
 0x318   : > { %v5564_v0 = vpop.f32.mrb[4].mxu0  ;;  %vm1852_vm0 = vmand %vm1756_vm8, %vm1836_vm9  ;;  %vm1390_vm9 = vcmp.eq.s32.totalorder %v1372_v32, 1 }
 0x319   : > { %v5566_v52 = vpop.f32.mrb[5].mxu0  ;;  %v2974_v9 = vsel %vm1852_vm0, 1.0, %v3666_v16  ;;  %vm1406_vm0 = vmand %vm1310_vm14, %vm1390_vm9  ;;  %vm1982_vm14 = vcmp.eq.s32.totalorder %v4519_v48, %v6004_v57 }
 0x31a   : > { %v1900_v47 = vadd.f32 %v2974_v9, %v1676_v45  ;;  %v2944_v28 = vsel %vm1406_vm0, 1.0, %v3666_v16 }
 0x31b   : > { %v1295_v15 = vpop.permute.xlu1 %1294  ;;  %v1454_v63 = vadd.f32 %v2944_v28, %v5531_v34  ;;  %v2591_v28 = vld [vmem:[%s5745_s5 + $0x30] sm:$0xff] }
 0x320   : > { %v1737_v27 = vpop.permute.xlu1 %1736 }
 0x321   : > { %vm1757_vm3 = vcmp.eq.s32.totalorder %v4519_v48, %v1737_v27 }
 0x325   : > { %v1817_v37 = vpop.permute.xlu1 %1816 }
 0x326   : > { %vm1837_vm11 = vcmp.eq.s32.totalorder %v1817_v37, 1 }
 0x327   : > { %vm1853_vm10 = vmand %vm1757_vm3, %vm1837_vm11  ;;  %vm1391_vm11 = vcmp.eq.s32.totalorder %v1375_v21, 1 }
 0x328   : > { %v2975_v54 = vsel %vm1853_vm10, 1.0, %v3666_v16 }
 0x329   : > { %v1596_v55 = vpop.permute.xlu1 %1595  ;;  %v1901_v49 = vadd.f32 %v2975_v54, %v1677_v20  ;;  %v2588_v54 = vld [vmem:[%s5745_s5 + $0x18] sm:$0xff] }
 0x32a   : > { %vm1614_vm8 = vcmp.eq.s32.totalorder %v1596_v55, 1 }
 0x32e   : > { %v1958_v39 = vpop.permute.xlu1 %1957 }
 0x32f   : > { %vm1980_vm2 = vcmp.eq.s32.totalorder %v4519_v48, %v1958_v39 }
 0x330   : > { %vm2076_vm4 = vmand %vm1980_vm2, %vm2060_vm1  ;;  %vm1534_vm1 = vcmp.eq.s32.totalorder %v4519_v48, %v6003_v17  ;;  %v2590_v17 = vld [vmem:[%s5745_s5 + $0x28] sm:$0xff] }
 0x331   : > { %v2990_v14 = vsel %vm2076_vm4, 1.0, %v3666_v16  ;;  %vm1311_vm4 = vcmp.eq.s32.totalorder %v4519_v48, %v1295_v15  ;;  %vm1630_vm6 = vmand %vm1534_vm1, %vm1614_vm8  ;;  %v2312_v15 = vpop.permute.xlu0 %2311 }
 0x332   : > { %v2124_v40 = vadd.f32 %v2990_v14, %v1900_v47  ;;  %vm1407_vm10 = vmand %vm1311_vm4, %vm1391_vm11  ;;  %v2960_v50 = vsel %vm1630_vm6, 1.0, %v3666_v16 }
 0x333   : > { %v1519_v18 = vpop.permute.xlu1 %1518  ;;  %v2945_v26 = vsel %vm1407_vm10, 1.0, %v3666_v16  ;;  %v1678_v38 = vadd.f32 %v2960_v50, %v1454_v63  ;;  %v2593_v63 = vld [vmem:[%s5745_s5 + $0x40] sm:$0xff] }
 0x334   : > { %3148 = vmatprep.mubr.f32.mxu0 %v2124_v40  ;;  %v1455_v56 = vadd.f32 %v2945_v26, %v5558_v62  ;;  %v2595_v26 = vld [vmem:[%s5745_s5 + $0x50] sm:$0xff] }
 0x335   : > { %v2322_v21 = vpop.permute.xlu0 %2321 }
 0x338   : > { %v1599_v25 = vpop.permute.xlu1 %1598 }
 0x339   : > { %vm1615_vm13 = vcmp.eq.s32.totalorder %v1599_v25, 1  ;;  %v2332_v25 = vpop.permute.xlu0 %2331 }
 0x33c   : > { %v2041_v7 = vpop.permute.xlu1 %2040 }
 0x33d   : > { %vm2061_vm7 = vcmp.eq.s32.totalorder %v2041_v7, 1 }
 0x33e   : > { %vm2077_vm5 = vmand %vm1981_vm15, %vm2061_vm7  ;;  %vm1535_vm15 = vcmp.eq.s32.totalorder %v4519_v48, %v1519_v18 }
 0x33f   : > { %v2991_v44 = vsel %vm2077_vm5, 1.0, %v3666_v16  ;;  %vm1631_vm5 = vmand %vm1535_vm15, %vm1615_vm13 }
 0x340   : > { %v2125_v36 = vadd.f32 %v2991_v44, %v1901_v49  ;;  %v2961_v4 = vsel %vm1631_vm5, 1.0, %v3666_v16 }
 0x341   : > { %v1740_v58 = vpop.permute.xlu1 %1739  ;;  %v1679_v43 = vadd.f32 %v2961_v4, %v1455_v56  ;;  %v2597_v4 = vld [vmem:[%s5745_s5 + $0x60] sm:$0xff] }
 0x342   : > { %3149 = vmatmul.mubr.f32.gmra.mrb[12].mxu0 %v2125_v36  ;;  %vm1758_vm2 = vcmp.eq.s32.totalorder %v4519_v48, %v1740_v58 }
 0x343   : > { %vm1854_vm3 = vmand %vm1758_vm2, %vm1838_vm12  ;;  %vm2063_vm2 = vcmp.eq.s32.totalorder %v2047_v3, 1 }
 0x344   : > { %v2976_v61 = vsel %vm1854_vm3, 1.0, %v3666_v16 }
 0x345   : > { %v1743_v5 = vpop.permute.xlu1 %1742  ;;  %v1902_v34 = vadd.f32 %v2976_v61, %v1678_v38  ;;  %v2594_v61 = vld [vmem:[%s5745_s5 + $0x48] sm:$0xff] }
 0x346   : > { %vm1759_vm9 = vcmp.eq.s32.totalorder %v4519_v48, %v1743_v5  ;;  %v2589_v5 = vld [vmem:[%s5745_s5 + $0x20] sm:$0xff]  ;;  %v3346_v38 = vpack.c.bf16 %v2594_v61, %v2593_v63 }
 0x347   : > { %v3338_v12 = vpack.c.bf16 %v2590_v17, %v2589_v5 }
 0x34a   : > { %v1823_v42 = vpop.permute.xlu1 %1822 }
 0x34b   : > { %vm1839_vm7 = vcmp.eq.s32.totalorder %v1823_v42, 1  ;;  %v2592_v42 = vld [vmem:[%s5745_s5 + $0x38] sm:$0xff] }
 0x34c   : > { %vm1855_vm8 = vmand %vm1759_vm9, %vm1839_vm7  ;;  %v3342_v50 = vpack.c.bf16 %v2592_v42, %v2591_v28 }
 0x34d   : > { %v2977_v19 = vsel %vm1855_vm8, 1.0, %v3666_v16 }
 0x34e   : > { %v2044_v2 = vpop.permute.xlu1 %2043  ;;  %v1903_v30 = vadd.f32 %v2977_v19, %v1679_v43  ;;  %v2600_v19 = vld [vmem:[%s5745_s5 + $0x78] sm:$0xff]  ;;  %v2342_v43 = vpop.permute.xlu0 %2341 }
 0x34f   : > { %vm2062_vm0 = vcmp.eq.s32.totalorder %v2044_v2, 1  ;;  %v2596_v2 = vld [vmem:[%s5745_s5 + $0x58] sm:$0xff] }
 0x350   : > { %vm2078_vm1 = vmand %vm1982_vm14, %vm2062_vm0  ;;  %v3350_v57 = vpack.c.bf16 %v2596_v2, %v2595_v26 }
 0x351   : > { %v2992_v22 = vsel %vm2078_vm1, 1.0, %v3666_v16 }
 0x352   : > { %v2126_v46 = vadd.f32 %v2992_v22, %v1902_v34  ;;  %v2598_v34 = vld [vmem:[%s5745_s5 + $0x68] sm:$0xff]  ;;  %v2599_v22 = vld [vmem:[%s5745_s5 + $0x70] sm:$0xff] }
 0x353   : > { %v1967_v13 = vpop.permute.xlu1 %1966  ;;  %v3354_v56 = vpack.c.bf16 %v2598_v34, %v2597_v4 }
 0x354   : > { %vm1983_vm4 = vcmp.eq.s32.totalorder %v4519_v48, %v1967_v13  ;;  %3151 = vmatprep.mubr.f32.mxu0 %v2126_v46  ;;  %v3358_v46 = vpack.c.bf16 %v2600_v19, %v2599_v22 }
 0x355   : > { %vm2079_vm6 = vmand %vm1983_vm4, %vm2063_vm2 }
 0x356   : > { %v2993_v1 = vsel %vm2079_vm6, 1.0, %v3666_v16 }
 0x357   : > { %v2127_v33 = vadd.f32 %v2993_v1, %v1903_v30 }
 0x358   : > { %v2292_v29 = vpop.permute.xlu1 %2291 }
 0x359   : > { %3526 = vrcp.f32 %v2292_v29  ;;  %3152 = vmatmul.mubr.f32.gmra.mrb[14].mxu0 %v2127_v33 }
 0x35b   : > { %v3141_v62 = vpop.f32.mrb[6].mxu0 }
 0x35c   : > { %v2297_v32 = vpop.permute.xlu1 %2296  ;;  %v2240_v60 = vpop.f32.mrb[7].mxu0 }
 0x35d   : > { %3528 = vrcp.f32 %v2297_v32 }
 0x35e   : > { %3530 = vrcp.f32 %v2302_v59 }
 0x360   : > { %v2307_v27 = vpop.permute.xlu1 %2306 }
 0x361   : > { %3532 = vrcp.f32 %v2307_v27 }
 0x362   : > { %3534 = vrcp.f32 %v2312_v15 }
 0x363   : > { %v3527_v48 = vpop.eup %3526 }
 0x364   : > { %v2317_v37 = vpop.permute.xlu1 %2316  ;;  %v2370_v31 = vmul.f32 %v3527_v48, %v5129_v24 }
 0x365   : > { %3536 = vrcp.f32 %v2317_v37 }
 0x366   : > { %3538 = vrcp.f32 %v2322_v21  ;;  %3186 = vmatprep.mubr.f32.mxu1 %v2370_v31 }
 0x367   : > { %v3529_v16 = vpop.eup %3528 }
 0x368   : > { %v3531_v10 = vpop.eup %3530  ;;  %v2327_v55 = vpop.permute.xlu1 %2326  ;;  %v2372_v35 = vmul.f32 %v3529_v16, %v5119_v8 }
 0x369   : > { %v2374_v9 = vmul.f32 %v3531_v10, %v5478_v51  ;;  %3540 = vrcp.f32 %v2327_v55 }
 0x36a   : > { %3187 = vmatmul.mubr.f32.vlgmr.msra.gmra.mrb[0].mxu1 %v2372_v35 }
 0x36b   : > { %v3533_v11 = vpop.eup %3532  ;;  %3189 = vmatprep.mubr.f32.mxu1 %v2374_v9 }
 0x36c   : > { %v3535_v45 = vpop.eup %3534  ;;  %v2376_v39 = vmul.f32 %v3533_v11, %v5474_v23  ;;  %v2337_v6 = vpop.permute.xlu1 %2336  ;;  %v2585_v23 = vld [vmem:[%s5745_s5] sm:$0xff] }
 0x36d   : > { %v2378_v24 = vmul.f32 %v3535_v45, %v5566_v52  ;;  %3542 = vrcp.f32 %v2337_v6  ;;  %v2586_v52 = vld [vmem:[%s5745_s5 + $0x8] sm:$0xff] }
 0x36e   : > { %3190 = vmatmul.mubr.f32.gmra.mrb[2].mxu1 %v2376_v39  ;;  %3544 = vrcp.f32 %v2332_v25  ;;  %v3330_v41 = vpack.c.bf16 %v2586_v52, %v2585_v23  ;;  %v2994_v39 = vld [vmem:[%s5744_s4] ss:$0 sm:$0xff] }
 0x36f   : > { %v3537_v47 = vpop.eup %3536  ;;  %3192 = vmatprep.mubr.f32.mxu1 %v2378_v24 }
 0x370   : > { %v3539_v14 = vpop.eup %3538  ;;  %v2380_v40 = vmul.f32 %v3537_v47, %v5564_v0  ;;  %v2587_v0 = vld [vmem:[%s5745_s5 + $0x10] sm:$0xff]  ;;  %3331 = vmatprep.subr.bf16.mxu0 %v3330_v41  ;;  %3362 = vmatprep.subr.bf16.mxu1 %v3330_v41  ;;  %v2347_v3 = vpop.permute.xlu1 %2346 }
 0x371   : > { %v2382_v18 = vmul.f32 %v3539_v14, %v2240_v60  ;;  %v3334_v20 = vpack.c.bf16 %v2588_v54, %v2587_v0  ;;  %3333 = vmatpush3.bf16.msra.mxu0 %v3330_v41  ;;  %3370 = vmatpush3.bf16.msra.mxu1 %v3330_v41  ;;  %3546 = vrcp.f32 %v2347_v3 }
 0x372   : > { %3193 = vmatmul.mubr.f32.gmra.mrb[4].mxu1 %v2380_v40  ;;  %3548 = vrcp.f32 %v2342_v43 }
 0x373   : > { %v3541_v8 = vpop.eup %3540  ;;  %3195 = vmatprep.mubr.f32.mxu1 %v2382_v18  ;;  %3335 = vmatprep.subr.bf16.mxu0 %v3334_v20 }
 0x374   : > { %v2384_v51 = vmul.f32 %v3541_v8, %v3141_v62  ;;  %3363 = vmatprep.subr.bf16.mxu1 %v3334_v20  ;;  %v2352_v62 = vpop.permute.xlu0 %2351  ;;  %v2357_v32 = vpop.permute.xlu1 %2356 }
 0x375   : > { %3337 = vmatpush3.bf16.msra.mxu0 %v3334_v20  ;;  %3371 = vmatpush3.bf16.msra.mxu1 %v3334_v20  ;;  %3550 = vrcp.f32 %v2352_v62 }
 0x376   : > { %3196 = vmatmul.mubr.f32.gmra.mrb[6].mxu1 %v2384_v51  ;;  %3339 = vmatprep.subr.bf16.mxu0 %v3338_v12  ;;  %3552 = vrcp.f32 %v2357_v32  ;;  %v2995_v32 = vld [vmem:[%s5746_s6] ss:$0 sm:$0xff] }
 0x377   : > { %v3543_v7 = vpop.eup %3542  ;;  %3364 = vmatprep.subr.bf16.mxu1 %v3338_v12 }
 0x378   : > { %v3545_v49 = vpop.eup %3544  ;;  %v2362_v21 = vpop.permute.xlu0 %2361 }
 0x379   : > { %3341 = vmatpush3.bf16.msra.mxu0 %v3338_v12  ;;  %3372 = vmatpush3.bf16.msra.mxu1 %v3338_v12  ;;  %v2367_v16 = vpop.permute.xlu1 %2366  ;;  %3554 = vrcp.f32 %v2362_v21 }
 0x37a   : > { %3343 = vmatprep.subr.bf16.mxu0 %v3342_v50  ;;  %3365 = vmatprep.subr.bf16.mxu1 %v3342_v50  ;;  %3556 = vrcp.f32 %v2367_v16 }
 0x37b   : > { %v3547_v13 = vpop.eup %3546 }
 0x37c   : > { %v3549_v1 = vpop.eup %3548 }
 0x37d   : > { %3345 = vmatpush3.bf16.msra.mxu0 %v3342_v50  ;;  %3373 = vmatpush3.bf16.msra.mxu1 %v3342_v50 }
 0x37e   : > { %3347 = vmatprep.subr.bf16.mxu0 %v3346_v38  ;;  %3366 = vmatprep.subr.bf16.mxu1 %v3346_v38 }
 0x37f   : > { %v3551_v15 = vpop.eup %3550 }
 0x380   : > { %v3553_v48 = vpop.eup %3552 }
 0x381   : > { %3349 = vmatpush3.bf16.msra.mxu0 %v3346_v38  ;;  %3374 = vmatpush3.bf16.msra.mxu1 %v3346_v38 }
 0x382   : > { %3351 = vmatprep.subr.bf16.mxu0 %v3350_v57  ;;  %3367 = vmatprep.subr.bf16.mxu1 %v3350_v57 }
 0x383   : > { %v3555_v55 = vpop.eup %3554 }
 0x384   : > { %v3557_v9 = vpop.eup %3556 }
 0x385   : > { %3353 = vmatpush3.bf16.msra.mxu0 %v3350_v57  ;;  %3375 = vmatpush3.bf16.msra.mxu1 %v3350_v57 }
 0x386   : > { %3355 = vmatprep.subr.bf16.mxu0 %v3354_v56  ;;  %3368 = vmatprep.subr.bf16.mxu1 %v3354_v56 }
 0x389   : > { %3357 = vmatpush3.bf16.msra.mxu0 %v3354_v56  ;;  %3376 = vmatpush3.bf16.msra.mxu1 %v3354_v56 }
 0x38a   : > { %3359 = vmatprep.subr.bf16.mxu0 %v3358_v46  ;;  %3369 = vmatprep.subr.bf16.mxu1 %v3358_v46 }
 0x38d   : > { %3361 = vmatpush3.bf16.msra.mxu0 %v3358_v46  ;;  %3377 = vmatpush3.bf16.msra.mxu1 %v3358_v46 }
 0x39e   : > { %v3144_v53 = vpop.f32.mrb[8].mxu0 }
 0x39f   : > { %v2250_v44 = vpop.f32.mrb[9].mxu0  ;;  %v2388_v58 = vmul.f32 %v3543_v7, %v3144_v53 }
 0x3a0   : > { %v2386_v36 = vmul.f32 %v3545_v49, %v2250_v44 }
 0x3a2   : > { %3198 = vmatprep.mubr.f32.mxu1 %v2386_v36 }
 0x3a3   : > { %3199 = vmatmul.mubr.f32.gmra.mrb[8].mxu1 %v2388_v58 }
 0x3e1   : > { %v3147_v30 = vpop.f32.mrb[10].mxu0 }
 0x3e2   : > { %v2260_v33 = vpop.f32.mrb[11].mxu0  ;;  %v2392_v59 = vmul.f32 %v3547_v13, %v3147_v30 }
 0x3e3   : > { %v2390_v29 = vmul.f32 %v3549_v1, %v2260_v33 }
 0x3e5   : > { %3201 = vmatprep.mubr.f32.mxu1 %v2390_v29 }
 0x3e6   : > { %3202 = vmatmul.mubr.f32.gmra.mrb[10].mxu1 %v2392_v59 }
 0x415   : > { %v3150_v60 = vpop.f32.mrb[12].mxu0 }
 0x416   : > { %v2270_v27 = vpop.f32.mrb[13].mxu0  ;;  %v2396_v31 = vmul.f32 %v3553_v48, %v3150_v60 }
 0x417   : > { %v2394_v37 = vmul.f32 %v3551_v15, %v2270_v27 }
 0x419   : > { %3204 = vmatprep.mubr.f32.mxu1 %v2394_v37 }
 0x41a   : > { %3205 = vmatmul.mubr.f32.gmra.mrb[12].mxu1 %v2396_v31 }
 0x42c   : > { %v3153_v10 = vpop.f32.mrb[14].mxu0 }
 0x42d   : > { %v2280_v35 = vpop.f32.mrb[15].mxu0  ;;  %v2400_v45 = vmul.f32 %v3557_v9, %v3153_v10 }
 0x42e   : > { %v2398_v11 = vmul.f32 %v3555_v55, %v2280_v35 }
 0x430   : > { %3207 = vmatprep.mubr.f32.mxu1 %v2398_v11 }
 0x431   : > { %3208 = vmatmul.mubr.f32.gmra.mrb[14].mxu1 %v2400_v45 }
 0x43d   : > { %v3188_v24 = vpop.f32.mrb[0].mxu1 }
 0x43e   : > { %v2496_v47 = vadd.f32 %v3188_v24, %v2994_v39  ;;  %v2490_v14 = vpop.f32.mrb[1].mxu1 }
 0x43f   : > { %v2491_v40 = vadd.f32 %v2994_v39, %v2490_v14 }
 0x440   : > { %v2570_v51 = vmax.f32 %v2496_v47, 0.0 }
 0x441   : > { %v2569_v18 = vmax.f32 %v2491_v40, 0.0  ;;  %v3191_v8 = vpop.f32.mrb[2].mxu1 }
 0x442   : > { %v2506_v6 = vadd.f32 %v3191_v8, %v2994_v39  ;;  %v2500_v25 = vpop.f32.mrb[3].mxu1 }
 0x443   : > { %v2501_v23 = vadd.f32 %v2994_v39, %v2500_v25  ;;  %3242 = vmatprep.mubr.f32.mxu0 %v2569_v18 }
 0x444   : > { %3243 = vmatmul.mubr.f32.vlgmr.msra.gmra.mrb[16].mxu0 %v2570_v51  ;;  %v2572_v41 = vmax.f32 %v2506_v6, 0.0 }
 0x445   : > { %v2571_v52 = vmax.f32 %v2501_v23, 0.0  ;;  %v3194_v0 = vpop.f32.mrb[4].mxu1 }
 0x446   : > { %v2516_v54 = vadd.f32 %v3194_v0, %v2994_v39  ;;  %v2510_v20 = vpop.f32.mrb[5].mxu1 }
 0x447   : > { %v2511_v7 = vadd.f32 %v2994_v39, %v2510_v20  ;;  %3245 = vmatprep.mubr.f32.mxu0 %v2571_v52 }
 0x448   : > { %3246 = vmatmul.mubr.f32.gmra.mrb[18].mxu0 %v2572_v41  ;;  %v2574_v44 = vmax.f32 %v2516_v54, 0.0 }
 0x449   : > { %v2573_v53 = vmax.f32 %v2511_v7, 0.0  ;;  %v3197_v49 = vpop.f32.mrb[6].mxu1 }
 0x44a   : > { %v2526_v36 = vadd.f32 %v3197_v49, %v2994_v39  ;;  %v2520_v58 = vpop.f32.mrb[7].mxu1 }
 0x44b   : > { %v2521_v5 = vadd.f32 %v2994_v39, %v2520_v58  ;;  %3248 = vmatprep.mubr.f32.mxu0 %v2573_v53 }
 0x44c   : > { %3249 = vmatmul.mubr.f32.gmra.mrb[20].mxu0 %v2574_v44  ;;  %v2576_v12 = vmax.f32 %v2526_v36, 0.0 }
 0x44d   : > { %v2575_v17 = vmax.f32 %v2521_v5, 0.0 }
 0x44f   : > { %3251 = vmatprep.mubr.f32.mxu0 %v2575_v17 }
 0x450   : > { %3252 = vmatmul.mubr.f32.gmra.mrb[22].mxu0 %v2576_v12 }
 0x476   : > { %v3200_v28 = vpop.f32.mrb[8].mxu1 }
 0x477   : > { %v2536_v42 = vadd.f32 %v3200_v28, %v2994_v39  ;;  %v2530_v50 = vpop.f32.mrb[9].mxu1 }
 0x478   : > { %v2531_v63 = vadd.f32 %v2994_v39, %v2530_v50 }
 0x479   : > { %v2578_v26 = vmax.f32 %v2536_v42, 0.0 }
 0x47a   : > { %v2577_v61 = vmax.f32 %v2531_v63, 0.0 }
 0x47c   : > { %3254 = vmatprep.mubr.f32.mxu1 %v2577_v61 }
 0x47d   : > { %3255 = vmatmul.mubr.f32.vlgmr.msra.gmra.mrb[16].mxu1 %v2578_v26 }
 0x4b9   : > { %v3203_v38 = vpop.f32.mrb[10].mxu1 }
 0x4ba   : > { %v2546_v2 = vadd.f32 %v3203_v38, %v2994_v39  ;;  %v2540_v57 = vpop.f32.mrb[11].mxu1 }
 0x4bb   : > { %v2541_v4 = vadd.f32 %v2994_v39, %v2540_v57 }
 0x4bc   : > { %v2580_v56 = vmax.f32 %v2546_v2, 0.0 }
 0x4bd   : > { %v2579_v34 = vmax.f32 %v2541_v4, 0.0 }
 0x4bf   : > { %3257 = vmatprep.mubr.f32.mxu1 %v2579_v34 }
 0x4c0   : > { %3258 = vmatmul.mubr.f32.gmra.mrb[18].mxu1 %v2580_v56 }
 0x4ed   : > { %v3206_v22 = vpop.f32.mrb[12].mxu1 }
 0x4ee   : > { %v2556_v19 = vadd.f32 %v3206_v22, %v2994_v39  ;;  %v2550_v46 = vpop.f32.mrb[13].mxu1 }
 0x4ef   : > { %v2551_v3 = vadd.f32 %v2994_v39, %v2550_v46 }
 0x4f0   : > { %v2582_v13 = vmax.f32 %v2556_v19, 0.0 }
 0x4f1   : > { %v2581_v43 = vmax.f32 %v2551_v3, 0.0 }
 0x4f3   : > { %3260 = vmatprep.mubr.f32.mxu1 %v2581_v43 }
 0x4f4   : > { %3261 = vmatmul.mubr.f32.gmra.mrb[20].mxu1 %v2582_v13 }
 0x504   : > { %v3209_v30 = vpop.f32.mrb[14].mxu1 }
 0x505   : > { %v2566_v1 = vadd.f32 %v3209_v30, %v2994_v39  ;;  %v2560_v33 = vpop.f32.mrb[15].mxu1 }
 0x506   : > { %v2561_v29 = vadd.f32 %v2994_v39, %v2560_v33 }
 0x507   : > { %v2584_v62 = vmax.f32 %v2566_v1, 0.0 }
 0x508   : > { %v2583_v59 = vmax.f32 %v2561_v29, 0.0 }
 0x50a   : > { %3263 = vmatprep.mubr.f32.mxu1 %v2583_v59 }
 0x50b   : > { %3264 = vmatmul.mubr.f32.gmra.mrb[22].mxu1 %v2584_v62 }
 0x517   : > { %v3244_v60 = vpop.f32.mrb[16].mxu0 }
 0x518   : > { %v2680_v15 = vadd.f32 %v3244_v60, %v2995_v32  ;;  %v2674_v27 = vpop.f32.mrb[17].mxu0 }
 0x519   : > { %v2675_v48 = vadd.f32 %v2995_v32, %v2674_v27 }
 0x51a   : > { %2754 = vst [vmem:[%s5670_s16 + $0x8] sm:$0xff] %v2680_v15 }
 0x51b   : > { %2753 = vst [vmem:[%s5670_s16] sm:$0xff] %v2675_v48  ;;  %v3247_v37 = vpop.f32.mrb[18].mxu0 }
 0x51c   : > { %v2690_v31 = vadd.f32 %v3247_v37, %v2995_v32  ;;  %v2684_v21 = vpop.f32.mrb[19].mxu0 }
 0x51d   : > { %v2685_v16 = vadd.f32 %v2995_v32, %v2684_v21 }
 0x51e   : > { %2756 = vst [vmem:[%s5670_s16 + $0x18] sm:$0xff] %v2690_v31 }
 0x51f   : > { %2755 = vst [vmem:[%s5670_s16 + $0x10] sm:$0xff] %v2685_v16  ;;  %v3250_v10 = vpop.f32.mrb[20].mxu0 }
 0x520   : > { %v2700_v55 = vadd.f32 %v3250_v10, %v2995_v32  ;;  %v2694_v35 = vpop.f32.mrb[21].mxu0 }
 0x521   : > { %v2695_v9 = vadd.f32 %v2995_v32, %v2694_v35 }
 0x522   : > { %2758 = vst [vmem:[%s5670_s16 + $0x28] sm:$0xff] %v2700_v55 }
 0x523   : > { %2757 = vst [vmem:[%s5670_s16 + $0x20] sm:$0xff] %v2695_v9  ;;  %v3253_v11 = vpop.f32.mrb[22].mxu0 }
 0x524   : > { %v2710_v45 = vadd.f32 %v3253_v11, %v2995_v32  ;;  %v2704_v39 = vpop.f32.mrb[23].mxu0 }
 0x525   : > { %v2705_v24 = vadd.f32 %v2995_v32, %v2704_v39 }
 0x526   : > { %2760 = vst [vmem:[%s5670_s16 + $0x38] sm:$0xff] %v2710_v45 }
 0x527   : > { %2759 = vst [vmem:[%s5670_s16 + $0x30] sm:$0xff] %v2705_v24 }
 0x550   : > { %v3256_v47 = vpop.f32.mrb[16].mxu1 }
 0x551   : > { %v2720_v14 = vadd.f32 %v3256_v47, %v2995_v32  ;;  %v2714_v40 = vpop.f32.mrb[17].mxu1 }
 0x552   : > { %v2715_v18 = vadd.f32 %v2995_v32, %v2714_v40 }
 0x553   : > { %2762 = vst [vmem:[%s5670_s16 + $0x48] sm:$0xff] %v2720_v14 }
 0x554   : > { %2761 = vst [vmem:[%s5670_s16 + $0x40] sm:$0xff] %v2715_v18 }
 0x593   : > { %v3259_v8 = vpop.f32.mrb[18].mxu1 }
 0x594   : > { %v2730_v51 = vadd.f32 %v3259_v8, %v2995_v32  ;;  %v2724_v6 = vpop.f32.mrb[19].mxu1 }
 0x595   : > { %v2725_v25 = vadd.f32 %v2995_v32, %v2724_v6 }
 0x596   : > { %2764 = vst [vmem:[%s5670_s16 + $0x58] sm:$0xff] %v2730_v51 }
 0x597   : > { %2763 = vst [vmem:[%s5670_s16 + $0x50] sm:$0xff] %v2725_v25 }
 0x5c7   : > { %v3262_v23 = vpop.f32.mrb[20].mxu1 }
 0x5c8   : > { %v2740_v52 = vadd.f32 %v3262_v23, %v2995_v32  ;;  %v2734_v0 = vpop.f32.mrb[21].mxu1 }
 0x5c9   : > { %v2735_v41 = vadd.f32 %v2995_v32, %v2734_v0 }
 0x5ca   : > { %2766 = vst [vmem:[%s5670_s16 + $0x68] sm:$0xff] %v2740_v52 }
 0x5cb   : > { %2765 = vst [vmem:[%s5670_s16 + $0x60] sm:$0xff] %v2735_v41 }
 0x5de   : > { %v3265_v54 = vpop.f32.mrb[22].mxu1 }
 0x5df   : > { %v2750_v20 = vadd.f32 %v3265_v54, %v2995_v32  ;;  %v2744_v7 = vpop.f32.mrb[23].mxu1 }
 0x5e0   : > { %v2745_v53 = vadd.f32 %v2995_v32, %v2744_v7 }
 0x5e1   : > { %2768 = vst [vmem:[%s5670_s16 + $0x78] sm:$0xff] %v2750_v20 }
 0x5e2   : > { %2767 = vst [vmem:[%s5670_s16 + $0x70] sm:$0xff] %v2745_v53 }
 0x5e3   : > { %3607 = shalt.err (!%p3604_p3)
}
 0x5e4   : > { %s3608_s13 = scalar_lea.hbm %s5691_s22, 2048  ;;  %s3612_s15 = scalar_lea.hbm %s5747_s7, 4096 }
 0x5e5   : > { %p3609_p4 = scmp.ne.s32.totalorder %s5691_s22, %s3608_s13  ;;  %p3613_p9 = scmp.lt.u32.totalorder %s5691_s22, %s5747_s7 }
 0x5e6   : > { %p3614_p10 = scmp.lt.u32.totalorder %s3612_s15, %s3608_s13  ;;  %p3616_p12 = scmp.lt.u32.totalorder %s3608_s13, %s5691_s22 }
 0x5e7   : > { %p3610_p7 = pnand %p3609_p4, %p3748_p5 }
 0x5e8   : > { %p3615_p11 = por %p3614_p10, %p3613_p9 }
 0x5e9   : > { %p3611_p8 = pneg %p3610_p7 }
 0x5ea   : > { %p3617_p13 = por %p3616_p12, %p3615_p11 }
 0x5ec   : > { %p3618_p0 = pnand %p3617_p13, %p3611_p8 }
 0x5ee   : > { %3621 = shalt.err (!%p3618_p0)
}
 0x5ef   : > { %s3668_s21 = smov 128   ;;  %s3669_s20 = smov 8  }
 0x5f0   : > { %3378 = dma.vmem_to_hbm [thread:$0]  (%p3748_p5), %s5693_s19, 2048, %s5691_s22, %s5699_s23, %s3668_s21, %s3668_s21, %s3669_s20  }
 0x5f1 PF: > { %p3384_p1 = scmp.ge.s32.totalorder %s3656_s27, 2  ;;  %s2798_s28 = sand.u32 1, %s3644_s24  }
 0x5f2   : > { %s2799_s29 = scalar_lea.sflag [#allocation3], %s2798_s28 }
 0x5f3   : > { %p3381_p2 = pnand %p3384_p1, %p3752_p6 }
 0x5f5   : > { %3639 = dma.done.wait (!%p3381_p2), %s2799_s29, 2048  }
 0x5f6   : > { %3641 = vsyncadd (!%p3381_p2), %s2799_s29, 4294965248  ;;  %p17_p3 = scmp.ge.s32.totalorder %s3735_s30, 4   ;;  %s6005_s24 = smov %s3648_s25 }
 0x5f7   : > { %s6006_s25 = smov %s3652_s26  ;;  %s6007_s26 = smov %s3746_s10 }
 0x5f8   : > { %s6008_s27 = smov %s3735_s30  ;;  %19 = sbr.rel (!%p17_p3) target bundleno = 3 (0x3), region = 86 }
 0x5ff   :  { %2804 = vsyncpa [#allocation3], 1 }
 0x600   :  { %2806 = vsyncpa [#allocation3 + $0x1], 1 }

// kernel: tpu_custom_call.1
= control target key start
LH: loop header
LB: loop body
LE: loop exit
PB: predicated region body
PF: predicated region fallthrough
CT: control target
= control target key end

     0   :  { %12 = vsyncpa [#allocation3], 0  ;;  %s5740_s0 = inlined_call_operand.vmem [shape: s32[256,8], index: 0, kind: input, shape index: {}]   ;;  %s5741_s1 = inlined_call_operand.vmem [shape: f32[256,1], index: 1, kind: input, shape index: {}]   ;;  %s5742_s2 = inlined_call_operand.vmem [shape: f32[128,128], index: 2, kind: input, shape index: {}]   ;;  %s5743_s3 = inlined_call_operand.vmem [shape: f32[128,128], index: 3, kind: input, shape index: {}]   ;;  %s5744_s4 = inlined_call_operand.vmem [shape: f32[1,128], index: 4, kind: input, shape index: {}]   ;;  %s5745_s5 = inlined_call_operand.vmem [shape: f32[128,128], index: 5, kind: input, shape index: {}]   ;;  %s5746_s6 = inlined_call_operand.vmem [shape: f32[1,128], index: 6, kind: input, shape index: {}]   ;;  %s5747_s7 = inlined_call_operand.hbm [shape: f32[256,128], index: 7, kind: output, shape index: {}]  }
   0x1   :  { %14 = vsyncpa [#allocation3 + $0x1], 0  ;;  %s3710_s24 = smov 0   ;;  %s3712_s25 = smov 0  }
   0x2   :  { %s3714_s26 = smov 0   ;;  %s3716_s27 = smov 0  }
   0x3 LB: > { %s3731_s28 = sadd.s32 4294967295, %s3656_s27   ;;  %s2857_s29 = sadd.s32 4294967294, %s3656_s27   ;;  %s3656_s27 = sphi %s3716_s27, %s6008_s27   ;;  %s3652_s26 = sphi %s3714_s26, %s6007_s26   ;;  %s3648_s25 = sphi %s3712_s25, %s6006_s25   ;;  %s3644_s24 = sphi %s3710_s24, %s6005_s24  }
   0x4   : > { %s3735_s30 = sadd.s32 1, %s3656_s27   ;;  %s184_s8 = sadd.s32 1, %s3652_s26 }
   0x5   : > { %s181_s9 = ssub.s32 %s3656_s27, %s3735_s30  ;;  %p194_p0 = scmp.ne.s32.totalorder %s3652_s26, %s3648_s25 }
   0x6   : > { %p182_p1 = scmp.eq.s32.totalorder %s181_s9, 0  ;;  %p195_p2 = scmp.eq.s32.totalorder %s3731_s28, 1 }
   0x7   : > { %p200_p3 = scmp.ne.s32.totalorder %s3648_s25, %s3644_s24  ;;  %p201_p4 = scmp.eq.s32.totalorder %s2857_s29, 1 }
   0x8   : > { %s3746_s10 = scalar_select %p182_p1, %s3652_s26, %s184_s8  }
   0x9   : > { %p3748_p5 = por %p195_p2, %p194_p0  ;;  %p3752_p6 = por %p201_p4, %p200_p3 }
   0xa   : > { %p2860_p7 = scmp.ge.s32.totalorder %s3656_s27, 1  ;;  %p252_p8 = scmp.lt.s32.totalorder %s3656_s27, 3 }
   0xc   : > { %p253_p9 = pnand %p2860_p7, %p252_p8 }
   0xe   : > { %256 = sbr.rel (%p253_p9) target bundleno = 1521 (0x5f1), region = 48 }
  0x15   : > { %s2862_s13 = sshll.u32 %s3731_s28, 4  ;;  %v3658_v0 = vmov 1   ;;  %v3659_v1 = vmov 0   ;;  %v3660_v15 = vmov 2   ;;  %v5750_v29 = vmov 3   ;;  %s3001_s18 = sshll.u32 %s3731_s28, 11 }
  0x16   : > { %3429 = vset.pattern.permute.xlu0 %v3658_v0  ;;  %3428 = vset.pattern.permute.xlu1 %v3659_v1  ;;  %p290_p10 = scmp.lt.s32.totalorder %s2862_s13, 31  ;;  %v5754_v30 = vmov 4   ;;  %v5752_v40 = vmov 6   ;;  %v5756_v43 = vmov 5   ;;  %s5691_s22 = scalar_lea.hbm %s5747_s7, %s3001_s18 }
  0x17   : > { %s3667_s29 = smov [#allocation2]  }
  0x18   : > { %s6010_s13 = smov (!%p290_p10, %s2862_s13), 31  ;;  %s3598_s8 = sshll.u32 %s3667_s29, 4  ;;  %s3599_s8 = int_to_ptr.vmem [resolvable:$false] %s3598_s8 }
  0x19   : > { %s2863_s14 = sshll.u32 %s6010_s13, 3  ;;  %s286_s13 = sand.u32 1, %s3648_s25  }
  0x1a   : > { %s3764_s17 = scalar_lea.vmem %s5740_s0, %s2863_s14  ;;  %s3800_s20 = scalar_lea.vmem %s5741_s1, %s2863_s14 }
  0x1b   : > { %v3767_v2 = vld [vmem:[%s3764_s17 + $0x10] sm:$0xff]  ;;  %v3770_v3 = vld [vmem:[%s3764_s17] sm:$0xff]  ;;  %v3775_v4 = vld [vmem:[%s3764_s17 + $0x18] sm:$0xff]  ;;  %s2861_s14 = sshll.u32 %s286_s13, 7  ;;  %s5699_s23 = scalar_lea.sflag [#allocation3], %s286_s13 }
  0x1c   : > { %359 = vperm.xlu1 %3428, %v3767_v2   ;;  %577 = vperm.xlu0 %3429, %v3770_v3   ;;  %v3780_v5 = vld [vmem:[%s3764_s17 + $0x28] sm:$0xff]  ;;  %v3785_v6 = vld [vmem:[%s3764_s17 + $0x38] sm:$0xff]  ;;  %v3868_v31 = vld [vmem:[%s3764_s17 + $0x20] sm:$0xff]  ;;  %s5670_s16 = scalar_lea.vmem [#allocation2], %s2861_s14  ;;  %s3600_s9 = scalar_lea.vmem %s3599_s8, 4096 }
  0x1d   : > { %v3790_v7 = vld [vmem:[%s3764_s17 + $0x48] sm:$0xff]  ;;  %v3795_v8 = vld [vmem:[%s3764_s17 + $0x58] sm:$0xff]  ;;  %v3873_v32 = vld [vmem:[%s3764_s17 + $0x30] sm:$0xff]  ;;  %s2783_s19 = sshll.u32 %s5670_s16, 4  ;;  %s5693_s19 = int_to_ptr.vmem [resolvable:$true] %s2783_s19 }
  0x1e   : > { %v3805_v9 = vld [vmem:[%s3764_s17 + $0x68] sm:$0xff]  ;;  %v317_v11 = vld [vmem:[%s3764_s17 + $0x78] sm:$0xff]  ;;  %v3878_v33 = vld [vmem:[%s3764_s17 + $0x40] sm:$0xff]  ;;  %s3594_s28 = scalar_lea.vmem %s5693_s19, 2048  ;;  %p3601_p0 = scmp.lt.s32.totalorder %s5693_s19, %s3599_s8 }
  0x1f   : > { %v3808_v10 = vld [vmem:[%s3800_s20 + $0x8] sm:$0xff]  ;;  %v3815_v12 = vld [vmem:[%s3800_s20 + $0x18] sm:$0xff]  ;;  %v3883_v34 = vld [vmem:[%s3764_s17 + $0x50] sm:$0xff]  ;;  %p3595_p11 = scmp.ne.s32.totalorder %s5693_s19, %s3594_s28  ;;  %p3602_p1 = scmp.lt.s32.totalorder %s3600_s9, %s3594_s28 }
  0x20   : > { %362 = vperm.xlu1 %3428, %v3775_v4   ;;  %586 = vperm.xlu0 %3429, %v3775_v4   ;;  %vm337_vm0 = vcmp.gt.f32.partialorder %v3808_v10, 0.0  ;;  %vm339_vm1 = vcmp.gt.f32.partialorder %v3815_v12, 0.0  ;;  %v3820_v14 = vld [vmem:[%s3800_s20 + $0x28] sm:$0xff]  ;;  %v3827_v17 = vld [vmem:[%s3800_s20 + $0x38] sm:$0xff]  ;;  %v3888_v35 = vld [vmem:[%s3764_s17 + $0x60] sm:$0xff]  ;;  %vm563_vm10 = vcmp.gt.f32.partialorder %v3815_v12, 1.0 }
  0x21   : > { %v417_v13 = vsel %vm337_vm0, 1, %v3659_v1  ;;  %v419_v16 = vsel %vm339_vm1, 1, %v3659_v1  ;;  %vm341_vm2 = vcmp.gt.f32.partialorder %v3820_v14, 0.0  ;;  %vm343_vm3 = vcmp.gt.f32.partialorder %v3827_v17, 0.0  ;;  %v3833_v19 = vld [vmem:[%s3800_s20 + $0x48] sm:$0xff]  ;;  %v3839_v21 = vld [vmem:[%s3800_s20 + $0x58] sm:$0xff]  ;;  %p3596_p12 = pnand %p3595_p11, %p3748_p5  ;;  %p3603_p2 = por %p3602_p1, %p3601_p0 }
  0x22   : > { %v421_v18 = vsel %vm341_vm2, 1, %v3659_v1  ;;  %v423_v20 = vsel %vm343_vm3, 1, %v3659_v1  ;;  %vm345_vm4 = vcmp.gt.f32.partialorder %v3833_v19, 0.0  ;;  %vm347_vm5 = vcmp.gt.f32.partialorder %v3839_v21, 0.0  ;;  %v3845_v23 = vld [vmem:[%s3800_s20 + $0x68] sm:$0xff]  ;;  %v3851_v25 = vld [vmem:[%s3800_s20 + $0x78] sm:$0xff] }
  0x23   : > { %v425_v22 = vsel %vm345_vm4, 1, %v3659_v1  ;;  %v427_v24 = vsel %vm347_vm5, 1, %v3659_v1  ;;  %vm349_vm6 = vcmp.gt.f32.partialorder %v3845_v23, 0.0  ;;  %vm351_vm7 = vcmp.gt.f32.partialorder %v3851_v25, 0.0  ;;  %v3859_v28 = vld [vmem:[%s3764_s17 + $0x8] sm:$0xff]  ;;  %v3893_v36 = vld [vmem:[%s3800_s20] sm:$0xff]  ;;  %p3597_p13 = pneg %p3596_p12 }
  0x24   : > { %368 = vperm.xlu1 %3428, %v3780_v5   ;;  %592 = vperm.xlu0 %3429, %v3780_v5   ;;  %v429_v26 = vsel %vm349_vm6, 1, %v3659_v1  ;;  %v431_v27 = vsel %vm351_vm7, 1, %v3659_v1  ;;  %v3896_v37 = vld [vmem:[%s3764_s17 + $0x70] sm:$0xff]  ;;  %vm560_vm8 = vcmp.gt.f32.partialorder %v3893_v36, 1.0  ;;  %v643_v42 = vsel %vm563_vm10, 1, %v3659_v1 }
  0x25   : > { %v3902_v38 = vld [vmem:[%s3800_s20 + $0x10] sm:$0xff]  ;;  %v640_v39 = vsel %vm560_vm8, 1, %v3659_v1  ;;  %vm565_vm11 = vcmp.gt.f32.partialorder %v3820_v14, 1.0  ;;  %vm567_vm12 = vcmp.gt.f32.partialorder %v3827_v17, 1.0  ;;  %vm569_vm13 = vcmp.gt.f32.partialorder %v3833_v19, 1.0  ;;  %p3604_p3 = pnand %p3603_p2, %p3597_p13 }
  0x26   : > { %vm562_vm9 = vcmp.gt.f32.partialorder %v3902_v38, 1.0  ;;  %v645_v44 = vsel %vm565_vm11, 1, %v3659_v1  ;;  %v647_v45 = vsel %vm567_vm12, 1, %v3659_v1  ;;  %v649_v46 = vsel %vm569_vm13, 1, %v3659_v1 }
  0x27   : > { %v642_v41 = vsel %vm562_vm9, 1, %v3659_v1  ;;  %vm571_vm14 = vcmp.gt.f32.partialorder %v3839_v21, 1.0  ;;  %vm573_vm15 = vcmp.gt.f32.partialorder %v3845_v23, 1.0  ;;  %vm575_vm0 = vcmp.gt.f32.partialorder %v3851_v25, 1.0 }
  0x28   : > { %374 = vperm.xlu1 %3428, %v3785_v6   ;;  %598 = vperm.xlu0 %3429, %v3785_v6   ;;  %v651_v47 = vsel %vm571_vm14, 1, %v3659_v1  ;;  %v653_v48 = vsel %vm573_vm15, 1, %v3659_v1  ;;  %v655_v50 = vsel %vm575_vm0, 1, %v3659_v1  ;;  %vm784_vm1 = vcmp.gt.f32.partialorder %v3893_v36, 2.0 }
  0x29   : > { %vm786_vm2 = vcmp.gt.f32.partialorder %v3902_v38, 2.0  ;;  %vm787_vm3 = vcmp.gt.f32.partialorder %v3815_v12, 2.0  ;;  %vm1233_vm4 = vcmp.gt.f32.partialorder %v3808_v10, 4.0  ;;  %vm336_vm5 = vcmp.gt.f32.partialorder %v3893_v36, 0.0 }
  0x2a   : > { %v866_v19 = vsel %vm786_vm2, 1, %v3659_v1  ;;  %vm338_vm6 = vcmp.gt.f32.partialorder %v3902_v38, 0.0  ;;  %vm1456_vm8 = vcmp.gt.f32.partialorder %v3893_v36, 5.0  ;;  %vm1011_vm10 = vcmp.gt.f32.partialorder %v3815_v12, 3.0 }
  0x2b   : > { %vm561_vm0 = vcmp.gt.f32.partialorder %v3808_v10, 1.0  ;;  %vm789_vm2 = vcmp.gt.f32.partialorder %v3820_v14, 2.0 }
  0x2c   : > { %380 = vperm.xlu1 %3428, %v3790_v7   ;;  %604 = vperm.xlu0 %3429, %v3790_v7  }
  0x30   : > { %386 = vperm.xlu1 %3428, %v3795_v8   ;;  %610 = vperm.xlu0 %3429, %v3795_v8  }
  0x34   : > { %392 = vperm.xlu1 %3428, %v3805_v9   ;;  %616 = vperm.xlu0 %3429, %v3805_v9  }
  0x38   : > { %398 = vperm.xlu1 %3428, %v317_v11   ;;  %622 = vperm.xlu0 %3429, %v317_v11  }
  0x3c   : > { %436 = vperm.xlu1 %3428, %v417_v13   ;;  %3432 = vset.pattern.permute.xlu0 %v3660_v15 }
  0x3d   : > { %801 = vperm.xlu0 %3432, %v3770_v3  }
  0x40   : > { %442 = vperm.xlu1 %3428, %v419_v16   ;;  %v864_v16 = vsel %vm784_vm1, 1, %v3659_v1 }
  0x41   : > { %810 = vperm.xlu0 %3432, %v3775_v4  }
  0x44   : > { %448 = vperm.xlu1 %3428, %v421_v18  }
  0x45   : > { %816 = vperm.xlu0 %3432, %v3780_v5  }
  0x48   : > { %454 = vperm.xlu1 %3428, %v423_v20  }
  0x49   : > { %822 = vperm.xlu0 %3432, %v3785_v6  }
  0x4c   : > { %460 = vperm.xlu1 %3428, %v425_v22  }
  0x4d   : > { %828 = vperm.xlu0 %3432, %v3790_v7  }
  0x50   : > { %466 = vperm.xlu1 %3428, %v427_v24  }
  0x51   : > { %834 = vperm.xlu0 %3432, %v3795_v8  }
  0x54   : > { %472 = vperm.xlu1 %3428, %v429_v26  }
  0x55   : > { %840 = vperm.xlu0 %3432, %v3805_v9  }
  0x58   : > { %478 = vperm.xlu1 %3428, %v431_v27  }
  0x59   : > { %846 = vperm.xlu0 %3432, %v317_v11  }
  0x5c   : > { %3430 = vset.pattern.permute.xlu1 %v3658_v0 }
  0x5d   : > { %580 = vperm.xlu1 %3430, %v3859_v28   ;;  %3441 = vset.pattern.permute.xlu0 %v5750_v29 }
  0x5e   : > { %1034 = vperm.xlu0 %3441, %v3775_v4  }
  0x61   : > { %583 = vperm.xlu1 %3430, %v3767_v2  }
  0x62   : > { %3442 = vset.pattern.permute.xlu0 %v5754_v30 }
  0x63   : > { %1252 = vperm.xlu0 %3442, %v3859_v28  }
  0x65   : > { %589 = vperm.xlu1 %3430, %v3868_v31  }
  0x67   : > { %1258 = vperm.xlu0 %3442, %v3775_v4  }
  0x69   : > { %595 = vperm.xlu1 %3430, %v3873_v32  }
  0x6b   : > { %1264 = vperm.xlu0 %3442, %v3780_v5  }
  0x6d   : > { %601 = vperm.xlu1 %3430, %v3878_v33  }
  0x6f   : > { %1270 = vperm.xlu0 %3442, %v3785_v6  }
  0x71   : > { %607 = vperm.xlu1 %3430, %v3883_v34  }
  0x73   : > { %1276 = vperm.xlu0 %3442, %v3790_v7  }
  0x75   : > { %613 = vperm.xlu1 %3430, %v3888_v35  }
  0x77   : > { %1282 = vperm.xlu0 %3442, %v3795_v8  }
  0x79   : > { %619 = vperm.xlu1 %3430, %v3896_v37  }
  0x7b   : > { %1288 = vperm.xlu0 %3442, %v3805_v9  }
  0x7d   : > { %3431 = vset.pattern.permute.xlu1 %v3659_v1 }
  0x7e   : > { %657 = vperm.xlu1 %3431, %v640_v39  }
  0x7f   : > { %3512 = vset.pattern.permute.xlu0 %v5752_v40 }
  0x80   : > { %1733 = vperm.xlu0 %3512, %v3888_v35  }
  0x82   : > { %663 = vperm.xlu1 %3431, %v642_v41   ;;  %v867_v41 = vsel %vm787_vm3, 1, %v3659_v1 }
  0x84   : > { %3513 = vset.pattern.permute.xlu0 %v5756_v43 }
  0x85   : > { %1479 = vperm.xlu0 %3513, %v3767_v2  }
  0x86   : > { %666 = vperm.xlu1 %3431, %v643_v42  }
  0x89   : > { %1482 = vperm.xlu0 %3513, %v3775_v4  }
  0x8a   : > { %672 = vperm.xlu1 %3431, %v645_v44   ;;  %v1313_v44 = vsel %vm1233_vm4, 1, %v3659_v1  ;;  %vm1235_vm4 = vcmp.gt.f32.partialorder %v3815_v12, 4.0 }
  0x8d   : > { %1485 = vperm.xlu0 %3513, %v3868_v31  }
  0x8e   : > { %678 = vperm.xlu1 %3431, %v647_v45  }
  0x91   : > { %1488 = vperm.xlu0 %3513, %v3780_v5  }
  0x92   : > { %684 = vperm.xlu1 %3431, %v649_v46   ;;  %v416_v46 = vsel %vm336_vm5, 1, %v3659_v1 }
  0x95   : > { %1491 = vperm.xlu0 %3513, %v3873_v32  }
  0x96   : > { %690 = vperm.xlu1 %3431, %v651_v47  }
  0x99   : > { %1494 = vperm.xlu0 %3513, %v3785_v6  }
  0x9a   : > { %696 = vperm.xlu1 %3431, %v653_v48  }
  0x9b   : > { %v3931_v49 = vpop.permute.xlu1 %359  ;;  %v3934_v51 = vpop.permute.xlu0 %577 }
  0x9d   : > { %1497 = vperm.xlu0 %3513, %v3878_v33  }
  0x9e   : > { %702 = vperm.xlu1 %3431, %v655_v50  }
  0x9f   : > { %v3937_v52 = vpop.permute.xlu1 %362  ;;  %v3939_v53 = vpop.permute.xlu0 %586 }
  0xa1   : > { %1500 = vperm.xlu0 %3513, %v3790_v7   ;;  %v5748_v7 = vmov 7  }
  0xa2   : > { %3433 = vset.pattern.permute.xlu1 %v3660_v15 }
  0xa3   : > { %v3943_v54 = vpop.permute.xlu1 %368  ;;  %804 = vperm.xlu1 %3433, %v3859_v28   ;;  %v3946_v55 = vpop.permute.xlu0 %592 }
  0xa4   : > { %5767 = vst [vmem:[#allocation5_spill] sm:$0xff] %v3943_v54  ;;  %5768 = vst [vmem:[#allocation6_spill] sm:$0xff] %v3946_v55 }
  0xa5   : > { %1503 = vperm.xlu0 %3513, %v3883_v34  }
  0xa7   : > { %v3949_v56 = vpop.permute.xlu1 %374  ;;  %807 = vperm.xlu1 %3433, %v3767_v2   ;;  %v3952_v57 = vpop.permute.xlu0 %598 }
  0xa8   : > { %5769 = vst [vmem:[#allocation7_spill] sm:$0xff] %v3949_v56  ;;  %5770 = vst [vmem:[#allocation8_spill] sm:$0xff] %v3952_v57 }
  0xa9   : > { %1506 = vperm.xlu0 %3513, %v3795_v8  }
  0xab   : > { %v3955_v58 = vpop.permute.xlu1 %380  ;;  %813 = vperm.xlu1 %3433, %v3868_v31   ;;  %v3958_v59 = vpop.permute.xlu0 %604 }
  0xac   : > { %5771 = vst [vmem:[#allocation9_spill] sm:$0xff] %v3955_v58  ;;  %5772 = vst [vmem:[#allocation10_spill] sm:$0xff] %v3958_v59  ;;  %v869_v59 = vsel %vm789_vm2, 1, %v3659_v1  ;;  %vm1459_vm2 = vcmp.gt.f32.partialorder %v3815_v12, 5.0 }
  0xad   : > { %1509 = vperm.xlu0 %3513, %v3888_v35   ;;  %v1539_v57 = vsel %vm1459_vm2, 1, %v3659_v1 }
  0xaf   : > { %v3961_v60 = vpop.permute.xlu1 %386  ;;  %819 = vperm.xlu1 %3433, %v3873_v32   ;;  %v3964_v61 = vpop.permute.xlu0 %610 }
  0xb0   : > { %5773 = vst [vmem:[#allocation11_spill] sm:$0xff] %v3961_v60  ;;  %5774 = vst [vmem:[#allocation12_spill] sm:$0xff] %v3964_v61 }
  0xb1   : > { %1512 = vperm.xlu0 %3513, %v3805_v9  }
  0xb3   : > { %v3967_v62 = vpop.permute.xlu1 %392  ;;  %825 = vperm.xlu1 %3433, %v3878_v33   ;;  %v3970_v63 = vpop.permute.xlu0 %616 }
  0xb4   : > { %5775 = vst [vmem:[#allocation13_spill] sm:$0xff] %v3967_v62  ;;  %5776 = vst [vmem:[#allocation14_spill] sm:$0xff] %v3970_v63  ;;  %v4107_v62 = vld [vmem:[%s3800_s20 + $0x70] sm:$0xff] }
  0xb5   : > { %1515 = vperm.xlu0 %3513, %v3896_v37   ;;  %vm350_vm15 = vcmp.gt.f32.partialorder %v4107_v62, 0.0 }
  0xb7   : > { %v3973_v0 = vpop.permute.xlu1 %398  ;;  %831 = vperm.xlu1 %3433, %v3883_v34   ;;  %v3976_v6 = vpop.permute.xlu0 %622 }
  0xb8   : > { %5777 = vst [vmem:[#allocation15_spill] sm:$0xff] %v3973_v0  ;;  %5778 = vst [vmem:[#allocation16_spill] sm:$0xff] %v3976_v6 }
  0xb9   : > { %3520 = vset.pattern.permute.xlu0 %v5748_v7 }
  0xba   : > { %1960 = vperm.xlu0 %3520, %v3805_v9  }
  0xbb   : > { %v3980_v8 = vpop.permute.xlu1 %436  ;;  %837 = vperm.xlu1 %3433, %v3888_v35  }
  0xbc   : > { %v3983_v11 = vpop.permute.xlu0 %801 }
  0xbe   : > { %1963 = vperm.xlu0 %3520, %v3896_v37  }
  0xbf   : > { %v3987_v13 = vpop.permute.xlu1 %442  ;;  %843 = vperm.xlu1 %3433, %v3896_v37  }
  0xc0   : > { %v3990_v15 = vpop.permute.xlu0 %810 }
  0xc2   : > { %3523 = vset.pattern.permute.xlu0 %v3659_v1 }
  0xc3   : > { %v3995_v9 = vpop.permute.xlu1 %448  ;;  %3434 = vset.pattern.permute.xlu1 %v3659_v1  ;;  %353 = vperm.xlu0 %3523, %v3770_v3  }
  0xc4   : > { %5779 = vst [vmem:[#allocation17_spill] sm:$0xff] %v3995_v9  ;;  %881 = vperm.xlu1 %3434, %v864_v16   ;;  %v3999_v18 = vpop.permute.xlu0 %816  ;;  %v4062_v16 = vld [vmem:[%s3800_s20 + $0x30] sm:$0xff] }
  0xc5   : > { %5780 = vst [vmem:[#allocation18_spill] sm:$0xff] %v3999_v18  ;;  %vm342_vm9 = vcmp.gt.f32.partialorder %v4062_v16, 0.0  ;;  %vm566_vm3 = vcmp.gt.f32.partialorder %v4062_v16, 1.0 }
  0xc7   : > { %v4002_v20 = vpop.permute.xlu1 %454  ;;  %356 = vperm.xlu0 %3523, %v3859_v28  }
  0xc8   : > { %5781 = vst [vmem:[#allocation19_spill] sm:$0xff] %v4002_v20  ;;  %887 = vperm.xlu1 %3434, %v866_v19   ;;  %v4005_v21 = vpop.permute.xlu0 %822 }
  0xc9   : > { %5782 = vst [vmem:[#allocation20_spill] sm:$0xff] %v4005_v21 }
  0xcb   : > { %v4007_v22 = vpop.permute.xlu1 %460  ;;  %365 = vperm.xlu0 %3523, %v3868_v31  }
  0xcc   : > { %5783 = vst [vmem:[#allocation21_spill] sm:$0xff] %v4007_v22  ;;  %3435 = vset.pattern.permute.xlu1 %v5750_v29  ;;  %v4011_v23 = vpop.permute.xlu0 %828 }
  0xcd   : > { %5784 = vst [vmem:[#allocation22_spill] sm:$0xff] %v4011_v23  ;;  %1025 = vperm.xlu1 %3435, %v3770_v3   ;;  %v641_v23 = vsel %vm561_vm0, 1, %v3659_v1  ;;  %vm1013_vm0 = vcmp.gt.f32.partialorder %v3820_v14, 3.0 }
  0xcf   : > { %v4014_v24 = vpop.permute.xlu1 %466  ;;  %371 = vperm.xlu0 %3523, %v3873_v32  }
  0xd0   : > { %5785 = vst [vmem:[#allocation23_spill] sm:$0xff] %v4014_v24  ;;  %v4017_v25 = vpop.permute.xlu0 %834 }
  0xd1   : > { %5786 = vst [vmem:[#allocation24_spill] sm:$0xff] %v4017_v25  ;;  %1028 = vperm.xlu1 %3435, %v3859_v28  }
  0xd3   : > { %v4020_v26 = vpop.permute.xlu1 %472  ;;  %377 = vperm.xlu0 %3523, %v3878_v33  }
  0xd4   : > { %5787 = vst [vmem:[#allocation25_spill] sm:$0xff] %v4020_v26  ;;  %v4023_v27 = vpop.permute.xlu0 %840 }
  0xd5   : > { %5788 = vst [vmem:[#allocation26_spill] sm:$0xff] %v4023_v27  ;;  %3436 = vset.pattern.permute.xlu1 %v5754_v30  ;;  %v4086_v30 = vld [vmem:[%s3800_s20 + $0x50] sm:$0xff] }
  0xd6   : > { %1249 = vperm.xlu1 %3436, %v3770_v3   ;;  %vm346_vm12 = vcmp.gt.f32.partialorder %v4086_v30, 0.0 }
  0xd7   : > { %v4028_v39 = vpop.permute.xlu1 %478  ;;  %383 = vperm.xlu0 %3523, %v3883_v34   ;;  %v426_v6 = vsel %vm346_vm12, 1, %v3659_v1  ;;  %vm1008_vm12 = vcmp.gt.f32.partialorder %v3893_v36, 3.0 }
  0xd8   : > { %5789 = vst [vmem:[#allocation27_spill] sm:$0xff] %v4028_v39  ;;  %v4032_v42 = vpop.permute.xlu0 %846  ;;  %v4096_v39 = vld [vmem:[%s3800_s20 + $0x60] sm:$0xff] }
  0xd9   : > { %5790 = vst [vmem:[#allocation28_spill] sm:$0xff] %v4032_v42  ;;  %vm348_vm13 = vcmp.gt.f32.partialorder %v4096_v39, 0.0 }
  0xda   : > { %3437 = vset.pattern.permute.xlu1 %v3659_v1 }
  0xdb   : > { %890 = vperm.xlu1 %3437, %v867_v41   ;;  %389 = vperm.xlu0 %3523, %v3888_v35   ;;  %v4051_v35 = vld [vmem:[%s3800_s20 + $0x20] sm:$0xff] }
  0xdc   : > { %v4037_v33 = vpop.permute.xlu1 %580  ;;  %vm340_vm7 = vcmp.gt.f32.partialorder %v4051_v35, 0.0  ;;  %vm788_vm14 = vcmp.gt.f32.partialorder %v4051_v35, 2.0  ;;  %vm564_vm1 = vcmp.gt.f32.partialorder %v4051_v35, 1.0  ;;  %vm1684_vm2 = vcmp.gt.f32.partialorder %v4051_v35, 6.0 }
  0xdd   : > { %v4040_v45 = vpop.permute.xlu0 %1034  ;;  %v420_v41 = vsel %vm340_vm7, 1, %v3659_v1  ;;  %v868_v26 = vsel %vm788_vm14, 1, %v3659_v1  ;;  %vm572_vm7 = vcmp.gt.f32.partialorder %v4096_v39, 1.0  ;;  %vm1232_vm14 = vcmp.gt.f32.partialorder %v3893_v36, 4.0 }
  0xde   : > { %5791 = vst [vmem:[#allocation29_spill] sm:$0xff] %v4040_v45  ;;  %v1312_v21 = vsel %vm1232_vm14, 1, %v3659_v1  ;;  %vm1906_vm14 = vcmp.gt.f32.partialorder %v3902_v38, 7.0 }
  0xdf   : > { %1332 = vperm.xlu1 %3437, %v1313_v44   ;;  %395 = vperm.xlu0 %3523, %v3896_v37   ;;  %v418_v37 = vsel %vm338_vm6, 1, %v3659_v1  ;;  %vm570_vm6 = vcmp.gt.f32.partialorder %v4086_v30, 1.0 }
  0xe0   : > { %v4044_v34 = vpop.permute.xlu1 %583  ;;  %v650_v22 = vsel %vm570_vm6, 1, %v3659_v1  ;;  %vm1681_vm6 = vcmp.gt.f32.partialorder %v3808_v10, 6.0 }
  0xe2   : > { %v4048_v47 = vpop.permute.xlu0 %1252 }
  0xe3   : > { %3438 = vset.pattern.permute.xlu1 %v5750_v29  ;;  %433 = vperm.xlu0 %3523, %v416_v46   ;;  %v4074_v46 = vld [vmem:[%s3800_s20 + $0x40] sm:$0xff]  ;;  %v422_v29 = vsel %vm342_vm9, 1, %v3659_v1  ;;  %vm1012_vm9 = vcmp.gt.f32.partialorder %v4051_v35, 3.0 }
  0xe4   : > { %v4054_v48 = vpop.permute.xlu1 %589  ;;  %1031 = vperm.xlu1 %3438, %v3767_v2   ;;  %vm344_vm11 = vcmp.gt.f32.partialorder %v4074_v46, 0.0  ;;  %vm568_vm5 = vcmp.gt.f32.partialorder %v4074_v46, 1.0 }
  0xe5   : > { %5792 = vst [vmem:[#allocation30_spill] sm:$0xff] %v4054_v48  ;;  %v424_v42 = vsel %vm344_vm11, 1, %v3659_v1  ;;  %v648_v24 = vsel %vm568_vm5, 1, %v3659_v1  ;;  %vm1458_vm11 = vcmp.gt.f32.partialorder %v3902_v38, 5.0  ;;  %vm790_vm5 = vcmp.gt.f32.partialorder %v4062_v16, 2.0 }
  0xe6   : > { %v4059_v50 = vpop.permute.xlu0 %1258 }
  0xe7   : > { %5793 = vst [vmem:[#allocation31_spill] sm:$0xff] %v4059_v50  ;;  %439 = vperm.xlu0 %3523, %v418_v37   ;;  %v1536_v37 = vsel %vm1456_vm8, 1, %v3659_v1  ;;  %vm574_vm8 = vcmp.gt.f32.partialorder %v4107_v62, 1.0  ;;  %v4516_v50 = vld [vmem:[%s3800_s20 + $0x78] sm:$0xff] }
  0xe8   : > { %v4064_v19 = vpop.permute.xlu1 %595  ;;  %3439 = vset.pattern.permute.xlu1 %v5756_v43 }
  0xe9   : > { %5794 = vst [vmem:[#allocation32_spill] sm:$0xff] %v4064_v19  ;;  %1473 = vperm.xlu1 %3439, %v3770_v3  }
  0xea   : > { %v4071_v44 = vpop.permute.xlu0 %1264 }
  0xeb   : > { %5795 = vst [vmem:[#allocation33_spill] sm:$0xff] %v4071_v44  ;;  %445 = vperm.xlu0 %3523, %v420_v41   ;;  %v1091_v41 = vsel %vm1011_vm10, 1, %v3659_v1  ;;  %vm785_vm10 = vcmp.gt.f32.partialorder %v3808_v10, 2.0 }
  0xec   : > { %v4077_v7 = vpop.permute.xlu1 %601 }
  0xed   : > { %5796 = vst [vmem:[#allocation34_spill] sm:$0xff] %v4077_v7  ;;  %3440 = vset.pattern.permute.xlu1 %v3659_v1 }
  0xee   : > { %1553 = vperm.xlu1 %3440, %v1536_v37   ;;  %v4083_v40 = vpop.permute.xlu0 %1270 }
  0xef   : > { %5797 = vst [vmem:[#allocation35_spill] sm:$0xff] %v4083_v40  ;;  %451 = vperm.xlu0 %3523, %v422_v29   ;;  %v5801_v29 = vmov 5  }
  0xf0   : > { %v4089_v43 = vpop.permute.xlu1 %607 }
  0xf1   : > { %5798 = vst [vmem:[#allocation36_spill] sm:$0xff] %v4089_v43 }
  0xf2   : > { %1114 = vperm.xlu1 %3440, %v1091_v41   ;;  %v4093_v0 = vpop.permute.xlu0 %1276 }
  0xf3   : > { %5799 = vst [vmem:[#allocation37_spill] sm:$0xff] %v4093_v0  ;;  %457 = vperm.xlu0 %3523, %v424_v42   ;;  %v428_v42 = vsel %vm348_vm13, 1, %v3659_v1  ;;  %v430_v0 = vsel %vm350_vm15, 1, %v3659_v1  ;;  %vm1009_vm13 = vcmp.gt.f32.partialorder %v3808_v10, 3.0  ;;  %vm1010_vm15 = vcmp.gt.f32.partialorder %v3902_v38, 3.0 }
  0xf4   : > { %v4098_v37 = vpop.permute.xlu1 %613 }
  0xf5   : > { %5800 = vst [vmem:[#allocation38_spill] sm:$0xff] %v4098_v37 }
  0xf6   : > { %3443 = vset.pattern.permute.xlu1 %v5801_v29  ;;  %v4103_v27 = vpop.permute.xlu0 %1282 }
  0xf7   : > { %5802 = vst [vmem:[#allocation39_spill] sm:$0xff] %v4103_v27  ;;  %1476 = vperm.xlu1 %3443, %v3859_v28   ;;  %463 = vperm.xlu0 %3523, %v426_v6  }
  0xf8   : > { %v4110_v41 = vpop.permute.xlu1 %619 }
  0xf9   : > { %5803 = vst [vmem:[#allocation40_spill] sm:$0xff] %v4110_v41  ;;  %v5806_v41 = vmov 4  }
  0xfa   : > { %v4115_v63 = vpop.permute.xlu0 %1288 }
  0xfb   : > { %5804 = vst [vmem:[#allocation41_spill] sm:$0xff] %v4115_v63  ;;  %3444 = vset.pattern.permute.xlu1 %v3659_v1  ;;  %469 = vperm.xlu0 %3523, %v428_v42   ;;  %v644_v42 = vsel %vm564_vm1, 1, %v3659_v1  ;;  %vm1457_vm1 = vcmp.gt.f32.partialorder %v3808_v10, 5.0 }
  0xfc   : > { %893 = vperm.xlu1 %3444, %v868_v26  }
  0xfd   : > { %v4119_v27 = vpop.permute.xlu1 %657 }
  0xff   : > { %475 = vperm.xlu0 %3523, %v430_v0   ;;  %v4122_v6 = vpop.permute.xlu0 %1733  ;;  %v5807_v0 = vmov 6  }
 0x100   : > { %5805 = vst [vmem:[#allocation42_spill] sm:$0xff] %v4122_v6  ;;  %3445 = vset.pattern.permute.xlu1 %v5806_v41 }
 0x101   : > { %v4126_v25 = vpop.permute.xlu1 %663  ;;  %1255 = vperm.xlu1 %3445, %v3767_v2  }
 0x103   : > { %660 = vperm.xlu0 %3523, %v641_v23   ;;  %v646_v23 = vsel %vm566_vm3, 1, %v3659_v1  ;;  %vm1234_vm3 = vcmp.gt.f32.partialorder %v3902_v38, 4.0 }
 0x104   : > { %v4130_v26 = vpop.permute.xlu0 %1479 }
 0x105   : > { %v4133_v63 = vpop.permute.xlu1 %666  ;;  %3446 = vset.pattern.permute.xlu1 %v5807_v0 }
 0x106   : > { %1697 = vperm.xlu1 %3446, %v3770_v3  }
 0x107   : > { %669 = vperm.xlu0 %3523, %v644_v42   ;;  %v1315_v42 = vsel %vm1235_vm4, 1, %v3659_v1  ;;  %vm1680_vm4 = vcmp.gt.f32.partialorder %v3893_v36, 6.0 }
 0x108   : > { %v4139_v6 = vpop.permute.xlu0 %1482 }
 0x109   : > { %5808 = vst [vmem:[#allocation43_spill] sm:$0xff] %v4139_v6  ;;  %v4143_v60 = vpop.permute.xlu1 %672 }
 0x10a   : > { %5809 = vst [vmem:[#allocation44_spill] sm:$0xff] %v4143_v60  ;;  %3447 = vset.pattern.permute.xlu1 %v3659_v1 }
 0x10b   : > { %896 = vperm.xlu1 %3447, %v869_v59   ;;  %675 = vperm.xlu0 %3523, %v646_v23   ;;  %v652_v23 = vsel %vm572_vm7, 1, %v3659_v1  ;;  %vm1904_vm7 = vcmp.gt.f32.partialorder %v3893_v36, 7.0 }
 0x10c   : > { %v4148_v29 = vpop.permute.xlu0 %1485 }
 0x10d   : > { %5810 = vst [vmem:[#allocation45_spill] sm:$0xff] %v4148_v29  ;;  %v4152_v61 = vpop.permute.xlu1 %678  ;;  %v4442_v29 = vld [vmem:[%s3800_s20 + $0x48] sm:$0xff] }
 0x10e   : > { %5811 = vst [vmem:[#allocation46_spill] sm:$0xff] %v4152_v61  ;;  %v1093_v61 = vsel %vm1013_vm0, 1, %v3659_v1  ;;  %vm1238_vm0 = vcmp.gt.f32.partialorder %v4062_v16, 4.0 }
 0x10f   : > { %1338 = vperm.xlu1 %3447, %v1315_v42   ;;  %681 = vperm.xlu0 %3523, %v648_v24   ;;  %v5816_v24 = vmov 3  }
 0x110   : > { %v4155_v58 = vpop.permute.xlu0 %1488 }
 0x111   : > { %5812 = vst [vmem:[#allocation47_spill] sm:$0xff] %v4155_v58  ;;  %v4158_v37 = vpop.permute.xlu1 %684  ;;  %v4389_v58 = vld [vmem:[%s3764_s17 + $0x38] sm:$0xff] }
 0x112   : > { %5813 = vst [vmem:[#allocation48_spill] sm:$0xff] %v4158_v37  ;;  %v654_v37 = vsel %vm574_vm8, 1, %v3659_v1  ;;  %vm1905_vm8 = vcmp.gt.f32.partialorder %v3808_v10, 7.0 }
 0x113   : > { %3448 = vset.pattern.permute.xlu1 %v5807_v0  ;;  %687 = vperm.xlu0 %3523, %v650_v22   ;;  %v1985_v10 = vsel %vm1905_vm8, 1, %v3659_v1  ;;  %vm1015_vm8 = vcmp.gt.f32.partialorder %v3827_v17, 3.0 }
 0x114   : > { %1700 = vperm.xlu1 %3448, %v3859_v28   ;;  %v4163_v59 = vpop.permute.xlu0 %1491  ;;  %v1095_v44 = vsel %vm1015_vm8, 1, %v3659_v1 }
 0x115   : > { %5814 = vst [vmem:[#allocation49_spill] sm:$0xff] %v4163_v59  ;;  %v4166_v43 = vpop.permute.xlu1 %690  ;;  %v1986_v59 = vsel %vm1906_vm14, 1, %v3659_v1 }
 0x116   : > { %5815 = vst [vmem:[#allocation50_spill] sm:$0xff] %v4166_v43  ;;  %v1092_v43 = vsel %vm1012_vm9, 1, %v3659_v1  ;;  %vm1236_vm9 = vcmp.gt.f32.partialorder %v4051_v35, 4.0 }
 0x117   : > { %693 = vperm.xlu0 %3523, %v652_v23   ;;  %v865_v23 = vsel %vm785_vm10, 1, %v3659_v1  ;;  %vm791_vm10 = vcmp.gt.f32.partialorder %v3827_v17, 2.0 }
 0x118   : > { %3449 = vset.pattern.permute.xlu1 %v5816_v24  ;;  %v4170_v42 = vpop.permute.xlu0 %1494 }
 0x119   : > { %5817 = vst [vmem:[#allocation51_spill] sm:$0xff] %v4170_v42  ;;  %v4174_v22 = vpop.permute.xlu1 %696  ;;  %1037 = vperm.xlu1 %3449, %v3868_v31  }
 0x11a   : > { %5818 = vst [vmem:[#allocation52_spill] sm:$0xff] %v4174_v22  ;;  %v1538_v22 = vsel %vm1458_vm11, 1, %v3659_v1  ;;  %vm1682_vm11 = vcmp.gt.f32.partialorder %v3902_v38, 6.0 }
 0x11b   : > { %699 = vperm.xlu0 %3523, %v654_v37   ;;  %v1088_v37 = vsel %vm1008_vm12, 1, %v3659_v1  ;;  %vm1237_vm12 = vcmp.gt.f32.partialorder %v3820_v14, 4.0 }
 0x11c   : > { %v4179_v7 = vpop.permute.xlu0 %1497 }
 0x11d   : > { %5819 = vst [vmem:[#allocation53_spill] sm:$0xff] %v4179_v7  ;;  %v4183_v42 = vpop.permute.xlu1 %702  ;;  %3450 = vset.pattern.permute.xlu1 %v3659_v1 }
 0x11e   : > { %5820 = vst [vmem:[#allocation54_spill] sm:$0xff] %v4183_v42  ;;  %1117 = vperm.xlu1 %3450, %v1092_v43   ;;  %v1089_v42 = vsel %vm1009_vm13, 1, %v3659_v1  ;;  %vm1683_vm13 = vcmp.gt.f32.partialorder %v3815_v12, 6.0 }
 0x11f   : > { %884 = vperm.xlu0 %3523, %v865_v23   ;;  %v5823_v23 = vmov 7  }
 0x120   : > { %v4188_v40 = vpop.permute.xlu0 %1500 }
 0x121   : > { %5821 = vst [vmem:[#allocation55_spill] sm:$0xff] %v4188_v40 }
 0x122   : > { %v4192_v7 = vpop.permute.xlu1 %804  ;;  %1559 = vperm.xlu1 %3450, %v1538_v22  }
 0x123   : > { %1105 = vperm.xlu0 %3523, %v1088_v37   ;;  %v2128_v37 = vld [vmem:[%s5742_s2] sm:$0xff] }
 0x124   : > { %v4194_v56 = vpop.permute.xlu0 %1503 }
 0x125   : > { %5822 = vst [vmem:[#allocation56_spill] sm:$0xff] %v4194_v56  ;;  %v2129_v56 = vld [vmem:[%s5742_s2 + $0x8] sm:$0xff] }
 0x126   : > { %v4198_v43 = vpop.permute.xlu1 %807  ;;  %3451 = vset.pattern.permute.xlu1 %v5823_v23 }
 0x127   : > { %1921 = vperm.xlu1 %3451, %v3770_v3   ;;  %1108 = vperm.xlu0 %3523, %v1089_v42   ;;  %v3266_v3 = vpack.c.bf16 %v2129_v56, %v2128_v37 }
 0x128   : > { %v4202_v40 = vpop.permute.xlu0 %1506 }
 0x129   : > { %5824 = vst [vmem:[#allocation57_spill] sm:$0xff] %v4202_v40  ;;  %v1090_v40 = vsel %vm1010_vm15, 1, %v3659_v1  ;;  %3267 = vmatprep.subr.bf16.mxu0 %v3266_v3  ;;  %vm1907_vm15 = vcmp.gt.f32.partialorder %v3815_v12, 7.0  ;;  %v1318_v12 = vsel %vm1238_vm0, 1, %v3659_v1  ;;  %vm1688_vm0 = vcmp.gt.f32.partialorder %v4074_v46, 6.0 }
 0x12a   : > { %v4206_v22 = vpop.permute.xlu1 %813  ;;  %3269 = vmatpush3.bf16.msra.mxu0 %v3266_v3 }
 0x12b   : > { %5825 = vst [vmem:[#allocation58_spill] sm:$0xff] %v4206_v22  ;;  %3452 = vset.pattern.permute.xlu1 %v5816_v24  ;;  %1329 = vperm.xlu0 %3523, %v1312_v21   ;;  %v2130_v21 = vld [vmem:[%s5742_s2 + $0x10] sm:$0xff] }
 0x12c   : > { %1040 = vperm.xlu1 %3452, %v3780_v5   ;;  %v4217_v42 = vpop.permute.xlu0 %1509  ;;  %v2131_v5 = vld [vmem:[%s5742_s2 + $0x18] sm:$0xff] }
 0x12d   : > { %5826 = vst [vmem:[#allocation59_spill] sm:$0xff] %v4217_v42  ;;  %v3270_v56 = vpack.c.bf16 %v2131_v5, %v2130_v21  ;;  %v1537_v42 = vsel %vm1457_vm1, 1, %v3659_v1  ;;  %v2133_v21 = vld [vmem:[%s5742_s2 + $0x28] sm:$0xff]  ;;  %vm1014_vm1 = vcmp.gt.f32.partialorder %v4062_v16, 3.0 }
 0x12e   : > { %v4221_v20 = vpop.permute.xlu1 %819 }
 0x12f   : > { %5827 = vst [vmem:[#allocation60_spill] sm:$0xff] %v4221_v20  ;;  %1111 = vperm.xlu0 %3523, %v1090_v40   ;;  %3271 = vmatprep.subr.bf16.mxu0 %v3270_v56  ;;  %v2132_v40 = vld [vmem:[%s5742_s2 + $0x20] sm:$0xff] }
 0x130   : > { %3453 = vset.pattern.permute.xlu1 %v3659_v1  ;;  %v4232_v37 = vpop.permute.xlu0 %1512  ;;  %3273 = vmatpush3.bf16.msra.mxu0 %v3270_v56  ;;  %v3274_v5 = vpack.c.bf16 %v2133_v21, %v2132_v40  ;;  %v2134_v56 = vld [vmem:[%s5742_s2 + $0x30] sm:$0xff]  ;;  %v1760_v21 = vsel %vm1680_vm4, 1, %v3659_v1  ;;  %vm1685_vm4 = vcmp.gt.f32.partialorder %v3820_v14, 6.0 }
 0x131   : > { %5828 = vst [vmem:[#allocation61_spill] sm:$0xff] %v4232_v37  ;;  %1120 = vperm.xlu1 %3453, %v1093_v61   ;;  %v1314_v61 = vsel %vm1234_vm3, 1, %v3659_v1  ;;  %vm1460_vm3 = vcmp.gt.f32.partialorder %v4051_v35, 5.0 }
 0x132   : > { %v4236_v3 = vpop.permute.xlu1 %825  ;;  %3275 = vmatprep.subr.bf16.mxu0 %v3274_v5 }
 0x133   : > { %5829 = vst [vmem:[#allocation62_spill] sm:$0xff] %v4236_v3  ;;  %1556 = vperm.xlu0 %3523, %v1537_v42   ;;  %v2135_v42 = vld [vmem:[%s5742_s2 + $0x38] sm:$0xff] }
 0x134   : > { %v4245_v37 = vpop.permute.xlu0 %1515  ;;  %3277 = vmatpush3.bf16.msra.mxu0 %v3274_v5  ;;  %v3278_v40 = vpack.c.bf16 %v2135_v42, %v2134_v56  ;;  %v2137_v56 = vld [vmem:[%s5742_s2 + $0x48] sm:$0xff] }
 0x135   : > { %5830 = vst [vmem:[#allocation63_spill] sm:$0xff] %v4245_v37  ;;  %1562 = vperm.xlu1 %3453, %v1539_v57   ;;  %v870_v37 = vsel %vm790_vm5, 1, %v3659_v1  ;;  %vm1908_vm5 = vcmp.gt.f32.partialorder %v4051_v35, 7.0 }
 0x136   : > { %v4249_v3 = vpop.permute.xlu1 %831  ;;  %3279 = vmatprep.subr.bf16.mxu0 %v3278_v40 }
 0x137   : > { %5831 = vst [vmem:[#allocation64_spill] sm:$0xff] %v4249_v3  ;;  %1335 = vperm.xlu0 %3523, %v1314_v61   ;;  %v2136_v61 = vld [vmem:[%s5742_s2 + $0x40] sm:$0xff] }
 0x138   : > { %3281 = vmatpush3.bf16.msra.mxu0 %v3278_v40  ;;  %v3282_v42 = vpack.c.bf16 %v2137_v56, %v2136_v61  ;;  %v2138_v40 = vld [vmem:[%s5742_s2 + $0x50] sm:$0xff]  ;;  %v1984_v56 = vsel %vm1904_vm7, 1, %v3659_v1  ;;  %vm1240_vm7 = vcmp.gt.f32.partialorder %v4074_v46, 4.0 }
 0x139   : > { %3454 = vset.pattern.permute.xlu1 %v5823_v23  ;;  %v4259_v57 = vpop.permute.xlu0 %1960 }
 0x13a   : > { %5832 = vst [vmem:[#allocation65_spill] sm:$0xff] %v4259_v57  ;;  %v4263_v5 = vpop.permute.xlu1 %837  ;;  %1924 = vperm.xlu1 %3454, %v3859_v28   ;;  %v1761_v57 = vsel %vm1681_vm6, 1, %v3659_v1  ;;  %3283 = vmatprep.subr.bf16.mxu0 %v3282_v42  ;;  %vm1909_vm6 = vcmp.gt.f32.partialorder %v3820_v14, 7.0 }
 0x13b   : > { %5833 = vst [vmem:[#allocation66_spill] sm:$0xff] %v4263_v5  ;;  %1777 = vperm.xlu0 %3523, %v1760_v21   ;;  %v2139_v21 = vld [vmem:[%s5742_s2 + $0x58] sm:$0xff] }
 0x13c   : > { %3285 = vmatpush3.bf16.msra.mxu0 %v3282_v42  ;;  %v3286_v61 = vpack.c.bf16 %v2139_v21, %v2138_v40  ;;  %v2140_v42 = vld [vmem:[%s5742_s2 + $0x60] sm:$0xff]  ;;  %v2142_v40 = vld [vmem:[%s5742_s2 + $0x70] sm:$0xff]  ;;  %v2143_v21 = vld [vmem:[%s5742_s2 + $0x78] sm:$0xff] }
 0x13d   : > { %v4274_v3 = vpop.permute.xlu0 %1963 }
 0x13e   : > { %5834 = vst [vmem:[#allocation67_spill] sm:$0xff] %v4274_v3  ;;  %v4277_v28 = vpop.permute.xlu1 %843  ;;  %3455 = vset.pattern.permute.xlu1 %v3659_v1  ;;  %3287 = vmatprep.subr.bf16.mxu0 %v3286_v61  ;;  %v2141_v3 = vld [vmem:[%s5742_s2 + $0x68] sm:$0xff] }
 0x13f   : > { %5835 = vst [vmem:[#allocation68_spill] sm:$0xff] %v4277_v28  ;;  %899 = vperm.xlu1 %3455, %v870_v37   ;;  %1780 = vperm.xlu0 %3523, %v1761_v57   ;;  %v3290_v37 = vpack.c.bf16 %v2141_v3, %v2140_v42  ;;  %v3294_v3 = vpack.c.bf16 %v2143_v21, %v2142_v40  ;;  %v1317_v40 = vsel %vm1237_vm12, 1, %v3659_v1  ;;  %vm1910_vm12 = vcmp.gt.f32.partialorder %v4062_v16, 7.0 }
 0x140   : > { %3289 = vmatpush3.bf16.msra.mxu0 %v3286_v61 }
 0x141   : > { %3291 = vmatprep.subr.bf16.mxu0 %v3290_v37 }
 0x142   : > { %v4288_v36 = vpop.permute.xlu0 %353 }
 0x143   : > { %v4296_v28 = vpop.permute.xlu1 %881  ;;  %3456 = vset.pattern.permute.xlu1 %v5806_v41  ;;  %2001 = vperm.xlu0 %3523, %v1984_v56   ;;  %v1316_v56 = vsel %vm1236_vm9, 1, %v3659_v1  ;;  %vm1686_vm9 = vcmp.gt.f32.partialorder %v4062_v16, 6.0 }
 0x144   : > { %1261 = vperm.xlu1 %3456, %v3868_v31   ;;  %3293 = vmatpush3.bf16.msra.mxu0 %v3290_v37  ;;  %v871_v37 = vsel %vm791_vm10, 1, %v3659_v1  ;;  %vm1461_vm10 = vcmp.gt.f32.partialorder %v3820_v14, 5.0 }
 0x145   : > { %3295 = vmatprep.subr.bf16.mxu0 %v3294_v3 }
 0x146   : > { %v4302_v57 = vpop.permute.xlu0 %356 }
 0x147   : > { %v4310_v61 = vpop.permute.xlu1 %887  ;;  %2004 = vperm.xlu0 %3523, %v1985_v10   ;;  %v1762_v10 = vsel %vm1682_vm11, 1, %v3659_v1  ;;  %vm1687_vm11 = vcmp.gt.f32.partialorder %v3827_v17, 6.0  ;;  %v1990_v17 = vsel %vm1910_vm12, 1, %v3659_v1 }
 0x148   : > { %3457 = vset.pattern.permute.xlu1 %v5807_v0  ;;  %3297 = vmatpush3.bf16.msra.mxu0 %v3294_v3  ;;  %v1763_v3 = vsel %vm1683_vm13, 1, %v3659_v1  ;;  %v1767_v14 = vsel %vm1687_vm11, 1, %v3659_v1  ;;  %vm792_vm13 = vcmp.gt.f32.partialorder %v4074_v46, 2.0  ;;  %vm1462_vm11 = vcmp.gt.f32.partialorder %v4062_v16, 5.0 }
 0x149   : > { %1703 = vperm.xlu1 %3457, %v3767_v2  }
 0x14a   : > { %v4317_v42 = vpop.permute.xlu0 %365 }
 0x14b   : > { %5836 = vst [vmem:[#allocation69_spill] sm:$0xff] %v4317_v42  ;;  %1341 = vperm.xlu0 %3523, %v1316_v56  }
 0x14c   : > { %v4320_v5 = vpop.permute.xlu1 %1025 }
 0x14d   : > { %3458 = vset.pattern.permute.xlu1 %v3659_v1 }
 0x14e   : > { %902 = vperm.xlu1 %3458, %v871_v37   ;;  %v4326_v2 = vpop.permute.xlu0 %371 }
 0x14f   : > { %5837 = vst [vmem:[#allocation70_spill] sm:$0xff] %v4326_v2  ;;  %1783 = vperm.xlu0 %3523, %v1762_v10   ;;  %v1987_v10 = vsel %vm1907_vm15, 1, %v3659_v1  ;;  %v3558_v2 = vld [vmem:[%s3764_s17 + $0x10] sm:$0xff]  ;;  %vm1242_vm15 = vcmp.gt.f32.partialorder %v4086_v30, 4.0 }
 0x150   : > { %v4329_v21 = vpop.permute.xlu1 %1028  ;;  %v1322_v60 = vsel %vm1242_vm15, 1, %v3659_v1 }
 0x152   : > { %1344 = vperm.xlu1 %3458, %v1317_v40   ;;  %v4333_v56 = vpop.permute.xlu0 %377 }
 0x153   : > { %5838 = vst [vmem:[#allocation71_spill] sm:$0xff] %v4333_v56  ;;  %1786 = vperm.xlu0 %3523, %v1763_v3   ;;  %v1094_v3 = vsel %vm1014_vm1, 1, %v3659_v1  ;;  %vm1689_vm1 = vcmp.gt.f32.partialorder %v4442_v29, 6.0 }
 0x155   : > { %v4336_v20 = vpop.permute.xlu1 %1249 }
 0x156   : > { %3459 = vset.pattern.permute.xlu1 %v5807_v0  ;;  %v4340_v37 = vpop.permute.xlu0 %383 }
 0x157   : > { %5839 = vst [vmem:[#allocation72_spill] sm:$0xff] %v4340_v37  ;;  %1706 = vperm.xlu1 %3459, %v3775_v4   ;;  %2007 = vperm.xlu0 %3523, %v1986_v59   ;;  %v1540_v37 = vsel %vm1460_vm3, 1, %v3659_v1  ;;  %vm1912_vm3 = vcmp.gt.f32.partialorder %v4074_v46, 7.0 }
 0x15a   : > { %v4345_v38 = vpop.permute.xlu1 %890  ;;  %v4347_v40 = vpop.permute.xlu0 %389 }
 0x15b   : > { %5840 = vst [vmem:[#allocation73_spill] sm:$0xff] %v4347_v40  ;;  %3460 = vset.pattern.permute.xlu1 %v5816_v24  ;;  %2010 = vperm.xlu0 %3523, %v1987_v10   ;;  %v1764_v10 = vsel %vm1684_vm2, 1, %v3659_v1  ;;  %vm793_vm2 = vcmp.gt.f32.partialorder %v4442_v29, 2.0 }
 0x15c   : > { %1043 = vperm.xlu1 %3460, %v3873_v32  }
 0x15e   : > { %v4354_v4 = vpop.permute.xlu1 %1332  ;;  %v4356_v59 = vpop.permute.xlu0 %395 }
 0x15f   : > { %5841 = vst [vmem:[#allocation74_spill] sm:$0xff] %v4356_v59  ;;  %1347 = vperm.xlu0 %3523, %v1318_v12   ;;  %v1765_v59 = vsel %vm1685_vm4, 1, %v3659_v1 }
 0x160   : > { %3461 = vset.pattern.permute.xlu1 %v3659_v1 }
 0x161   : > { %1123 = vperm.xlu1 %3461, %v1094_v3   ;;  %v1988_v3 = vsel %vm1908_vm5, 1, %v3659_v1  ;;  %vm1913_vm5 = vcmp.gt.f32.partialorder %v4442_v29, 7.0 }
 0x162   : > { %v4363_v40 = vpop.permute.xlu0 %433 }
 0x163   : > { %v4366_v56 = vpop.permute.xlu1 %1031  ;;  %1789 = vperm.xlu0 %3523, %v1764_v10   ;;  %vm480_vm15 = vcmp.eq.s32.totalorder %v4363_v40, 1 }
 0x165   : > { %1565 = vperm.xlu1 %3461, %v1540_v37   ;;  %v1989_v37 = vsel %vm1909_vm6, 1, %v3659_v1  ;;  %vm1244_vm6 = vcmp.gt.f32.partialorder %v4096_v39, 4.0 }
 0x166   : > { %v4370_v12 = vpop.permute.xlu0 %439  ;;  %v1324_v48 = vsel %vm1244_vm6, 1, %v3659_v1 }
 0x167   : > { %1792 = vperm.xlu0 %3523, %v1765_v59  }
 0x168   : > { %v4372_v19 = vpop.permute.xlu1 %1473 }
 0x169   : > { %3462 = vset.pattern.permute.xlu1 %v5823_v23 }
 0x16a   : > { %1927 = vperm.xlu1 %3462, %v3558_v2   ;;  %v4378_v10 = vpop.permute.xlu0 %445  ;;  %v1320_v2 = vsel %vm1240_vm7, 1, %v3659_v1  ;;  %vm1690_vm7 = vcmp.gt.f32.partialorder %v4086_v30, 6.0 }
 0x16b   : > { %5842 = vst [vmem:[#allocation75_spill] sm:$0xff] %v4378_v10  ;;  %2013 = vperm.xlu0 %3523, %v1988_v3  }
 0x16d   : > { %v4381_v35 = vpop.permute.xlu1 %1553 }
 0x16e   : > { %3463 = vset.pattern.permute.xlu1 %v5816_v24  ;;  %v4385_v59 = vpop.permute.xlu0 %451 }
 0x16f   : > { %5843 = vst [vmem:[#allocation76_spill] sm:$0xff] %v4385_v59  ;;  %1046 = vperm.xlu1 %3463, %v4389_v58   ;;  %2016 = vperm.xlu0 %3523, %v1989_v37   ;;  %v1766_v59 = vsel %vm1686_vm9, 1, %v3659_v1  ;;  %v1541_v37 = vsel %vm1461_vm10, 1, %v3659_v1  ;;  %vm1016_vm9 = vcmp.gt.f32.partialorder %v4074_v46, 3.0  ;;  %vm1914_vm10 = vcmp.gt.f32.partialorder %v4086_v30, 7.0 }
 0x170   : > { %v1994_v46 = vsel %vm1914_vm10, 1, %v3659_v1 }
 0x171   : > { %v4393_v3 = vpop.permute.xlu1 %1114 }
 0x172   : > { %5844 = vst [vmem:[#allocation77_spill] sm:$0xff] %v4393_v3  ;;  %v4397_v54 = vpop.permute.xlu0 %457 }
 0x173   : > { %5845 = vst [vmem:[#allocation78_spill] sm:$0xff] %v4397_v54  ;;  %3464 = vset.pattern.permute.xlu1 %v3659_v1  ;;  %1353 = vperm.xlu0 %3523, %v1320_v2   ;;  %v3560_v54 = vld [vmem:[%s3764_s17 + $0x18] sm:$0xff] }
 0x174   : > { %1126 = vperm.xlu1 %3464, %v1095_v44  }
 0x176   : > { %v4404_v18 = vpop.permute.xlu1 %1476  ;;  %v4406_v9 = vpop.permute.xlu0 %463 }
 0x177   : > { %5846 = vst [vmem:[#allocation79_spill] sm:$0xff] %v4406_v9  ;;  %1795 = vperm.xlu0 %3523, %v1766_v59   ;;  %v4419_v9 = vld [vmem:[%s3800_s20 + $0x38] sm:$0xff] }
 0x178   : > { %1568 = vperm.xlu1 %3464, %v1541_v37   ;;  %vm1911_vm14 = vcmp.gt.f32.partialorder %v4419_v9, 7.0  ;;  %v872_v37 = vsel %vm792_vm13, 1, %v3659_v1  ;;  %vm1239_vm4 = vcmp.gt.f32.partialorder %v4419_v9, 4.0  ;;  %vm1247_vm13 = vcmp.gt.f32.partialorder %v4516_v50, 4.0 }
 0x179   : > { %v1327_v45 = vsel %vm1247_vm13, 1, %v3659_v1 }
 0x17a   : > { %v4410_v2 = vpop.permute.xlu0 %469 }
 0x17b   : > { %5847 = vst [vmem:[#allocation80_spill] sm:$0xff] %v4410_v2  ;;  %v4412_v44 = vpop.permute.xlu1 %893  ;;  %1798 = vperm.xlu0 %3523, %v1767_v14   ;;  %v1991_v14 = vsel %vm1911_vm14, 1, %v3659_v1 }
 0x17c   : > { %5848 = vst [vmem:[#allocation81_spill] sm:$0xff] %v4412_v44  ;;  %3465 = vset.pattern.permute.xlu1 %v5823_v23  ;;  %v873_v44 = vsel %vm793_vm2, 1, %v3659_v1  ;;  %vm704_vm2 = vcmp.eq.s32.totalorder %v4119_v27, 1  ;;  %v4556_v27 = vld [vmem:[%s3764_s17 + $0x48] sm:$0xff] }
 0x17d   : > { %1930 = vperm.xlu1 %3465, %v3560_v54  }
 0x17e   : > { %v4422_v59 = vpop.permute.xlu0 %475 }
 0x17f   : > { %5849 = vst [vmem:[#allocation82_spill] sm:$0xff] %v4422_v59  ;;  %2019 = vperm.xlu0 %3523, %v1990_v17   ;;  %v1768_v59 = vsel %vm1688_vm0, 1, %v3659_v1  ;;  %vm1916_vm0 = vcmp.gt.f32.partialorder %v4096_v39, 7.0 }
 0x180   : > { %v4425_v2 = vpop.permute.xlu1 %1255  ;;  %v1996_v39 = vsel %vm1916_vm0, 1, %v3659_v1 }
 0x181   : > { %3466 = vset.pattern.permute.xlu1 %v3659_v1 }
 0x182   : > { %905 = vperm.xlu1 %3466, %v872_v37   ;;  %v4430_v54 = vpop.permute.xlu0 %660 }
 0x183   : > { %2022 = vperm.xlu0 %3523, %v1991_v14   ;;  %vm705_vm10 = vcmp.eq.s32.totalorder %v4430_v54, 1 }
 0x185   : > { %v4433_v55 = vpop.permute.xlu1 %1697 }
 0x186   : > { %3467 = vset.pattern.permute.xlu1 %v5806_v41  ;;  %v4437_v17 = vpop.permute.xlu0 %669 }
 0x187   : > { %5850 = vst [vmem:[#allocation83_spill] sm:$0xff] %v4437_v17  ;;  %1267 = vperm.xlu1 %3467, %v3873_v32   ;;  %1359 = vperm.xlu0 %3523, %v1322_v60   ;;  %v1769_v32 = vsel %vm1689_vm1, 1, %v3659_v1  ;;  %v4495_v17 = vld [vmem:[%s3764_s17 + $0x40] sm:$0xff] }
 0x18a   : > { %v4445_v37 = vpop.permute.xlu1 %896  ;;  %v4447_v14 = vpop.permute.xlu0 %675 }
 0x18b   : > { %5851 = vst [vmem:[#allocation84_spill] sm:$0xff] %v4445_v37  ;;  %5852 = vst [vmem:[#allocation85_spill] sm:$0xff] %v4447_v14  ;;  %3468 = vset.pattern.permute.xlu1 %v5807_v0  ;;  %1801 = vperm.xlu0 %3523, %v1768_v59   ;;  %v1992_v59 = vsel %vm1912_vm3, 1, %v3659_v1  ;;  %v1319_v14 = vsel %vm1239_vm4, 1, %v3659_v1  ;;  %vm928_vm4 = vcmp.eq.s32.totalorder %v4296_v28, 1 }
 0x18c   : > { %1709 = vperm.xlu1 %3468, %v3868_v31  }
 0x18e   : > { %v4454_v60 = vpop.permute.xlu1 %1338  ;;  %v4456_v22 = vpop.permute.xlu0 %681 }
 0x18f   : > { %5853 = vst [vmem:[#allocation86_spill] sm:$0xff] %v4454_v60  ;;  %5854 = vst [vmem:[#allocation87_spill] sm:$0xff] %v4456_v22  ;;  %1804 = vperm.xlu0 %3523, %v1769_v32   ;;  %v1993_v32 = vsel %vm1913_vm5, 1, %v3659_v1  ;;  %v334_v60 = vlaneseq }
 0x190   : > { %3469 = vset.pattern.permute.xlu1 %v3659_v1 }
 0x191   : > { %908 = vperm.xlu1 %3469, %v873_v44  }
 0x192   : > { %v4463_v31 = vpop.permute.xlu0 %687 }
 0x193   : > { %5855 = vst [vmem:[#allocation88_spill] sm:$0xff] %v4463_v31  ;;  %v4466_v37 = vpop.permute.xlu1 %1700  ;;  %2025 = vperm.xlu0 %3523, %v1992_v59   ;;  %v4478_v31 = vld [vmem:[%s3764_s17 + $0x28] sm:$0xff] }
 0x195   : > { %1350 = vperm.xlu1 %3469, %v1319_v14   ;;  %v1770_v14 = vsel %vm1690_vm7, 1, %v3659_v1 }
 0x196   : > { %v4470_v22 = vpop.permute.xlu0 %693 }
 0x197   : > { %5856 = vst [vmem:[#allocation89_spill] sm:$0xff] %v4470_v22  ;;  %2028 = vperm.xlu0 %3523, %v1993_v32   ;;  %v4487_v32 = vld [vmem:[%s3800_s20 + $0x58] sm:$0xff] }
 0x198   : > { %v4472_v44 = vpop.permute.xlu1 %1037  ;;  %vm1691_vm8 = vcmp.gt.f32.partialorder %v4487_v32, 6.0  ;;  %vm1915_vm12 = vcmp.gt.f32.partialorder %v4487_v32, 7.0 }
 0x199   : > { %5857 = vst [vmem:[#allocation90_spill] sm:$0xff] %v4472_v44  ;;  %3470 = vset.pattern.permute.xlu1 %v5807_v0  ;;  %v1995_v16 = vsel %vm1915_vm12, 1, %v3659_v1 }
 0x19a   : > { %1712 = vperm.xlu1 %3470, %v4478_v31   ;;  %v4481_v59 = vpop.permute.xlu0 %699 }
 0x19b   : > { %5858 = vst [vmem:[#allocation91_spill] sm:$0xff] %v4481_v59  ;;  %1365 = vperm.xlu0 %3523, %v1324_v48   ;;  %v1771_v48 = vsel %vm1691_vm8, 1, %v3659_v1  ;;  %vm1017_vm8 = vcmp.gt.f32.partialorder %v4442_v29, 3.0 }
 0x19c   : > { %v1097_v28 = vsel %vm1017_vm8, 1, %v3659_v1 }
 0x19d   : > { %v4484_v22 = vpop.permute.xlu1 %1117 }
 0x19e   : > { %5859 = vst [vmem:[#allocation92_spill] sm:$0xff] %v4484_v22  ;;  %3471 = vset.pattern.permute.xlu1 %v5816_v24  ;;  %v4491_v44 = vpop.permute.xlu0 %884  ;;  %v1096_v22 = vsel %vm1016_vm9, 1, %v3659_v1  ;;  %vm1694_vm9 = vcmp.gt.f32.partialorder %v4107_v62, 6.0 }
 0x19f   : > { %1049 = vperm.xlu1 %3471, %v4495_v17   ;;  %1807 = vperm.xlu0 %3523, %v1770_v14   ;;  %v1542_v14 = vsel %vm1462_vm11, 1, %v3659_v1  ;;  %vm481_vm11 = vcmp.eq.s32.totalorder %v3980_v8, 1  ;;  %vm929_vm0 = vcmp.eq.s32.totalorder %v4491_v44, 1 }
 0x1a1   : > { %v4499_v59 = vpop.permute.xlu1 %1559 }
 0x1a2   : > { %v4503_v10 = vpop.permute.xlu0 %1105 }
 0x1a3   : > { %3472 = vset.pattern.permute.xlu1 %v3659_v1  ;;  %1810 = vperm.xlu0 %3523, %v1771_v48   ;;  %v4519_v48 = vand.u32 127, %v334_v60 }
 0x1a4   : > { %1129 = vperm.xlu1 %3472, %v1096_v22  }
 0x1a5   : > { %vm400_vm14 = vcmp.eq.s32.totalorder %v4519_v48, %v4288_v36  ;;  %vm624_vm1 = vcmp.eq.s32.totalorder %v4519_v48, %v3934_v51  ;;  %vm848_vm3 = vcmp.eq.s32.totalorder %v4519_v48, %v3983_v11  ;;  %vm401_vm7 = vcmp.eq.s32.totalorder %v4519_v48, %v4302_v57 }
 0x1a6   : > { %v4510_v42 = vpop.permute.xlu1 %1921  ;;  %v4512_v6 = vpop.permute.xlu0 %1108  ;;  %vm4538_vm5 = vmand %vm400_vm14, %vm480_vm15  ;;  %vm625_vm12 = vcmp.eq.s32.totalorder %v4519_v48, %v4037_v33  ;;  %vm1152_vm14 = vcmp.eq.s32.totalorder %v4503_v10, 1  ;;  %v1774_v36 = vsel %vm1694_vm9, 1, %v3659_v1  ;;  %vm1296_vm8 = vcmp.eq.s32.totalorder %v4519_v48, %v4336_v20 }
 0x1a7   : > { %2031 = vperm.xlu0 %3523, %v1994_v46   ;;  %v3567_v46 = vld [vmem:[%s3764_s17 + $0x20] sm:$0xff]  ;;  %vm4545_vm6 = vmand %vm624_vm1, %vm704_vm2  ;;  %vm1072_vm1 = vcmp.eq.s32.totalorder %v4519_v48, %v4320_v5 }
 0x1a8   : > { %1571 = vperm.xlu1 %3472, %v1542_v14   ;;  %vm4569_vm13 = vmand %vm848_vm3, %vm928_vm4  ;;  %vm1463_vm4 = vcmp.gt.f32.partialorder %v4419_v9, 5.0 }
 0x1a9   : > { %vm4583_vm15 = vmand %vm401_vm7, %vm481_vm11 }
 0x1aa   : > { %v1330_v22 = vpop.permute.xlu0 %1329  ;;  %vm4600_vm2 = vmand %vm625_vm12, %vm705_vm10  ;;  %vm1153_vm10 = vcmp.eq.s32.totalorder %v4512_v6, 1  ;;  %vm1073_vm12 = vcmp.eq.s32.totalorder %v4519_v48, %v4329_v21 }
 0x1ab   : > { %v4521_v3 = vpop.permute.xlu1 %1040  ;;  %2034 = vperm.xlu0 %3523, %v1995_v16   ;;  %v3666_v16 = vmov 0.0   ;;  %vm1376_vm3 = vcmp.eq.s32.totalorder %v1330_v22, 1  ;;  %vm1168_vm7 = vmand %vm1072_vm1, %vm1152_vm14  ;;  %vm1297_vm14 = vcmp.eq.s32.totalorder %v4519_v48, %v4048_v47 }
 0x1ac   : > { %3473 = vset.pattern.permute.xlu1 %v5823_v23  ;;  %v2882_v8 = vsel %vm4545_vm6, 1.0, %v3666_v16  ;;  %vm849_vm6 = vcmp.eq.s32.totalorder %v4519_v48, %v4192_v7  ;;  %vm1392_vm11 = vmand %vm1296_vm8, %vm1376_vm3  ;;  %v1543_v7 = vsel %vm1463_vm4, 1, %v3659_v1  ;;  %v2898_v10 = vsel %vm4569_vm13, 1.0, %v3666_v16 }
 0x1ad   : > { %1933 = vperm.xlu1 %3473, %v3567_v46   ;;  %v2866_v46 = vsel %vm4538_vm5, 1.0, %v3666_v16  ;;  %vm1919_vm5 = vcmp.gt.f32.partialorder %v4516_v50, 7.0  ;;  %vm4617_vm9 = vmand %vm849_vm6, %vm929_vm0  ;;  %v2883_v20 = vsel %vm4600_vm2, 1.0, %v3666_v16  ;;  %v2914_v6 = vsel %vm1168_vm7, 1.0, %v3666_v16 }
 0x1ae   : > { %v4533_v60 = vpop.permute.xlu0 %1111  ;;  %v1999_v5 = vsel %vm1919_vm5, 1, %v3659_v1  ;;  %vm1600_vm0 = vcmp.eq.s32.totalorder %v4381_v35, 1  ;;  %vm1169_vm1 = vmand %vm1073_vm12, %vm1153_vm10  ;;  %v2867_v21 = vsel %vm4583_vm15, 1.0, %v3666_v16  ;;  %v2899_v51 = vsel %vm4617_vm9, 1.0, %v3666_v16 }
 0x1af   : > { %1374 = vperm.xlu0 %3523, %v1327_v45   ;;  %v2930_v14 = vsel %vm1392_vm11, 1.0, %v3666_v16  ;;  %vm1377_vm2 = vcmp.eq.s32.totalorder %v4354_v4, 1  ;;  %vm1520_vm3 = vcmp.eq.s32.totalorder %v4519_v48, %v4372_v19  ;;  %v769_v35 = vadd.f32 %v2883_v20, %v2867_v21 }
 0x1b0   : > { %v4542_v40 = vpop.permute.xlu1 %1120  ;;  %vm4648_vm4 = vmand %vm1520_vm3, %vm1600_vm0  ;;  %vm1744_vm15 = vcmp.eq.s32.totalorder %v4519_v48, %v4433_v55  ;;  %v2915_v11 = vsel %vm1169_vm1, 1.0, %v3666_v16  ;;  %vm1521_vm8 = vcmp.eq.s32.totalorder %v4519_v48, %v4404_v18  ;;  %v3569_v55 = vld [vmem:[%s3800_s20 + $0x10] sm:$0xff]  ;;  %vm794_vm10 = vcmp.gt.f32.partialorder %v4086_v30, 2.0 }
 0x1b1   : > { %3474 = vset.pattern.permute.xlu1 %v5816_v24  ;;  %vm4661_vm7 = vmand %vm1297_vm14, %vm1377_vm2  ;;  %v2946_v47 = vsel %vm4648_vm4, 1.0, %v3666_v16  ;;  %vm1745_vm12 = vcmp.eq.s32.totalorder %v4519_v48, %v4466_v37  ;;  %v874_v9 = vsel %vm794_vm10, 1, %v3659_v1  ;;  %vm1968_vm0 = vcmp.eq.s32.totalorder %v4519_v48, %v4510_v42  ;;  %v3570_v37 = vld [vmem:[%s3800_s20 + $0x20] sm:$0xff] }
 0x1b2   : > { %1052 = vperm.xlu1 %3474, %v4556_v27   ;;  %v4559_v45 = vpop.permute.xlu0 %1556  ;;  %v2931_v30 = vsel %vm4661_vm7, 1.0, %v3666_v16  ;;  %vm402_vm7 = vcmp.eq.s32.totalorder %v4519_v48, %v3931_v49  ;;  %vm626_vm10 = vcmp.eq.s32.totalorder %v4519_v48, %v4044_v34 }
 0x1b3   : > { %2037 = vperm.xlu0 %3523, %v1996_v39   ;;  %v768_v39 = vadd.f32 %v2882_v8, %v2866_v46  ;;  %vm1601_vm5 = vcmp.eq.s32.totalorder %v4559_v45, 1 }
 0x1b4   : > { %v4588_v33 = vpop.permute.xlu1 %1562  ;;  %vm1617_vm11 = vmand %vm1521_vm8, %vm1601_vm5  ;;  %vm1241_vm5 = vcmp.gt.f32.partialorder %v4442_v29, 4.0  ;;  %vm706_vm8 = vcmp.eq.s32.totalorder %v4126_v25, 1 }
 0x1b5   : > { %v992_v44 = vadd.f32 %v2898_v10, %v768_v39 }
 0x1b6   : > { %3475 = vset.pattern.permute.xlu1 %v3659_v1  ;;  %v4611_v62 = vpop.permute.xlu0 %1335 }
 0x1b7   : > { %1132 = vperm.xlu1 %3475, %v1097_v28   ;;  %1819 = vperm.xlu0 %3523, %v1774_v36   ;;  %v1216_v46 = vadd.f32 %v2914_v6, %v992_v44  ;;  %v993_v28 = vadd.f32 %v2899_v51, %v769_v35  ;;  %v3571_v51 = vld [vmem:[%s3800_s20 + $0x30] sm:$0xff] }
 0x1b9   : > { %v4633_v54 = vpop.permute.xlu1 %1924  ;;  %v1440_v36 = vadd.f32 %v2930_v14, %v1216_v46  ;;  %v1217_v45 = vadd.f32 %v2915_v11, %v993_v28  ;;  %v4699_v11 = vld [vmem:[%s3800_s20 + $0x40] sm:$0xff]  ;;  %v4707_v28 = vld [vmem:[%s3764_s17 + $0x30] sm:$0xff] }
 0x1ba   : > { %v1778_v22 = vpop.permute.xlu0 %1777  ;;  %vm1969_vm2 = vcmp.eq.s32.totalorder %v4519_v48, %v4633_v54 }
 0x1bb   : > { %vm1824_vm13 = vcmp.eq.s32.totalorder %v1778_v22, 1  ;;  %1574 = vperm.xlu1 %3475, %v1543_v7   ;;  %2046 = vperm.xlu0 %3523, %v1999_v5   ;;  %v1664_v7 = vadd.f32 %v2946_v47, %v1440_v36  ;;  %v1441_v10 = vadd.f32 %v2931_v30, %v1217_v45  ;;  %v4711_v36 = vld [vmem:[%s3800_s20 + $0x50] sm:$0xff]  ;;  %v1321_v45 = vsel %vm1241_vm5, 1, %v3659_v1 }
 0x1bc   : > { %vm1840_vm6 = vmand %vm1744_vm15, %vm1824_vm13  ;;  %vm795_vm15 = vcmp.gt.f32.partialorder %v4487_v32, 2.0  ;;  %vm1522_vm5 = vcmp.eq.s32.totalorder %v4519_v48, %v4130_v26 }
 0x1bd   : > { %v2962_v18 = vsel %vm1840_vm6, 1.0, %v3666_v16  ;;  %v875_v57 = vsel %vm795_vm15, 1, %v3659_v1  ;;  %vm482_vm6 = vcmp.eq.s32.totalorder %v4370_v12, 1 }
 0x1be   : > { %v4656_v4 = vpop.permute.xlu1 %899  ;;  %v1781_v19 = vpop.permute.xlu0 %1780  ;;  %v1888_v20 = vadd.f32 %v2962_v18, %v1664_v7  ;;  %v4766_v7 = vld [vmem:[%s3764_s17 + $0x50] sm:$0xff] }
 0x1bf   : > { %vm1825_vm9 = vcmp.eq.s32.totalorder %v1781_v19, 1  ;;  %3476 = vset.pattern.permute.xlu1 %v5823_v23  ;;  %2301 = vperm.xlu0 %3523, %v3569_v55   ;;  %v4720_v55 = vld [vmem:[%s3800_s20 + $0x60] sm:$0xff] }
 0x1c0   : > { %1936 = vperm.xlu1 %3476, %v4478_v31   ;;  %vm1841_vm14 = vmand %vm1745_vm12, %vm1825_vm9  ;;  %v2947_v31 = vsel %vm1617_vm11, 1.0, %v3666_v16  ;;  %vm930_vm12 = vcmp.eq.s32.totalorder %v4310_v61, 1 }
 0x1c1   : > { %v2963_v6 = vsel %vm1841_vm14, 1.0, %v3666_v16  ;;  %v1665_v42 = vadd.f32 %v2947_v31, %v1441_v10  ;;  %vm498_vm9 = vmand %vm402_vm7, %vm482_vm6  ;;  %vm1154_vm14 = vcmp.eq.s32.totalorder %v4533_v60, 1  ;;  %vm1602_vm6 = vcmp.eq.s32.totalorder %v4499_v59, 1 }
 0x1c2   : > { %v2002_v39 = vpop.permute.xlu0 %2001  ;;  %vm722_vm11 = vmand %vm626_vm10, %vm706_vm8  ;;  %v2868_v49 = vsel %vm498_vm9, 1.0, %v3666_v16  ;;  %vm1018_vm7 = vcmp.gt.f32.partialorder %v4711_v36, 3.0 }
 0x1c3   : > { %vm2048_vm1 = vcmp.eq.s32.totalorder %v2002_v39, 1  ;;  %v4684_v5 = vpop.permute.xlu1 %1261  ;;  %2311 = vperm.xlu0 %3523, %v3570_v37   ;;  %v1889_v14 = vadd.f32 %v2963_v6, %v1665_v42  ;;  %v4733_v39 = vld [vmem:[%s3800_s20 + $0x70] sm:$0xff]  ;;  %v2884_v12 = vsel %vm722_vm11, 1.0, %v3666_v16  ;;  %vm1618_vm9 = vmand %vm1522_vm5, %vm1602_vm6  ;;  %v1098_v59 = vsel %vm1018_vm7, 1, %v3659_v1 }
 0x1c4   : > { %vm2064_vm13 = vmand %vm1968_vm0, %vm2048_vm1  ;;  %3477 = vset.pattern.permute.xlu1 %v3659_v1  ;;  %vm850_vm0 = vcmp.eq.s32.totalorder %v4519_v48, %v4198_v43  ;;  %v770_v34 = vadd.f32 %v2884_v12, %v2868_v49  ;;  %v2948_v10 = vsel %vm1618_vm9, 1.0, %v3666_v16  ;;  %vm403_vm5 = vcmp.eq.s32.totalorder %v4519_v48, %v3937_v52 }
 0x1c5   : > { %911 = vperm.xlu1 %3477, %v874_v9   ;;  %v2978_v44 = vsel %vm2064_vm13, 1.0, %v3666_v16  ;;  %vm946_vm1 = vmand %vm850_vm0, %vm930_vm12  ;;  %vm1074_vm13 = vcmp.eq.s32.totalorder %v4519_v48, %v4366_v56  ;;  %vm1464_vm12 = vcmp.gt.f32.partialorder %v4699_v11, 5.0 }
 0x1c6   : > { %v2005_v22 = vpop.permute.xlu0 %2004  ;;  %v2112_v21 = vadd.f32 %v2978_v44, %v1888_v20  ;;  %v2900_v43 = vsel %vm946_vm1, 1.0, %v3666_v16  ;;  %v1544_v6 = vsel %vm1464_vm12, 1, %v3659_v1  ;;  %vm627_vm1 = vcmp.eq.s32.totalorder %v4519_v48, %v3939_v53 }
 0x1c7   : > { %vm2049_vm3 = vcmp.eq.s32.totalorder %v2005_v22, 1  ;;  %2321 = vperm.xlu0 %3523, %v3571_v51   ;;  %v994_v56 = vadd.f32 %v2900_v43, %v770_v34 }
 0x1c8   : > { %vm2065_vm4 = vmand %vm1969_vm2, %vm2049_vm3  ;;  %v4693_v35 = vpop.permute.xlu1 %1703  ;;  %3130 = vmatprep.mubr.f32.mxu0 %v2112_v21  ;;  %vm1378_vm2 = vcmp.eq.s32.totalorder %v4611_v62, 1 }
 0x1c9   : > { %v2979_v46 = vsel %vm2065_vm4, 1.0, %v3666_v16  ;;  %3478 = vset.pattern.permute.xlu1 %v5806_v41  ;;  %vm1170_vm3 = vmand %vm1074_vm13, %vm1154_vm14  ;;  %vm1298_vm4 = vcmp.eq.s32.totalorder %v4519_v48, %v4425_v2  ;;  %vm1746_vm10 = vcmp.eq.s32.totalorder %v4519_v48, %v4693_v35  ;;  %vm707_vm13 = vcmp.eq.s32.totalorder %v4133_v63, 1  ;;  %v5876_v63 = vld [vmem:[#allocation29_spill] sm:$0xff]  ;;  %v5880_v35 = vld [vmem:[#allocation43_spill] sm:$0xff] }
 0x1ca   : > { %v2113_v8 = vadd.f32 %v2979_v46, %v1889_v14  ;;  %1273 = vperm.xlu1 %3478, %v4495_v17   ;;  %v4730_v18 = vpop.permute.xlu0 %1341  ;;  %vm1394_vm15 = vmand %vm1298_vm4, %vm1378_vm2  ;;  %v2916_v60 = vsel %vm1170_vm3, 1.0, %v3666_v16  ;;  %vm483_vm3 = vcmp.eq.s32.totalorder %v3987_v13, 1  ;;  %vm851_vm4 = vcmp.eq.s32.totalorder %v4519_v48, %v3990_v15  ;;  %v5877_v14 = vld [vmem:[#allocation77_spill] sm:$0xff]  ;;  %v5878_v13 = vld [vmem:[#allocation31_spill] sm:$0xff] }
 0x1cb   : > { %2331 = vperm.xlu0 %3523, %v4699_v11   ;;  %v2932_v2 = vsel %vm1394_vm15, 1.0, %v3666_v16  ;;  %v1218_v30 = vadd.f32 %v2916_v60, %v994_v56  ;;  %vm931_vm15 = vcmp.eq.s32.totalorder %v4345_v38, 1  ;;  %vm723_vm6 = vmand %vm627_vm1, %vm707_vm13  ;;  %vm1155_vm9 = vcmp.eq.s32.totalorder %v5877_v14, 1  ;;  %v5879_v15 = vld [vmem:[#allocation86_spill] sm:$0xff]  ;;  %v5883_v14 = vld [vmem:[#allocation83_spill] sm:$0xff] }
 0x1cc   : > { %3131 = vmatmul.mubr.f32.vlgmr.msra.gmra.mrb[0].mxu0 %v2113_v8  ;;  %vm499_vm7 = vmand %vm403_vm5, %vm483_vm3  ;;  %v2885_v52 = vsel %vm723_vm6, 1.0, %v3666_v16  ;;  %vm1379_vm12 = vcmp.eq.s32.totalorder %v5879_v15, 1  ;;  %vm1603_vm1 = vcmp.eq.s32.totalorder %v4588_v33, 1  ;;  %vm1465_vm6 = vcmp.gt.f32.partialorder %v4442_v29, 5.0  ;;  %v5885_v15 = vld [vmem:[#allocation81_spill] sm:$0xff] }
 0x1cd   : > { %v4702_v54 = vpop.permute.xlu1 %902  ;;  %v1442_v31 = vadd.f32 %v2932_v2, %v1218_v30  ;;  %v2869_v38 = vsel %vm499_vm7, 1.0, %v3666_v16  ;;  %v1545_v56 = vsel %vm1465_vm6, 1, %v3659_v1 }
 0x1ce   : > { %3479 = vset.pattern.permute.xlu1 %v5807_v0  ;;  %v1784_v61 = vpop.permute.xlu0 %1783  ;;  %v771_v11 = vadd.f32 %v2885_v52, %v2869_v38  ;;  %v5884_v52 = vld [vmem:[#allocation30_spill] sm:$0xff] }
 0x1cf   : > { %1715 = vperm.xlu1 %3479, %v4707_v28   ;;  %2341 = vperm.xlu0 %3523, %v4711_v36   ;;  %vm1826_vm8 = vcmp.eq.s32.totalorder %v1784_v61, 1  ;;  %v1666_v44 = vadd.f32 %v2948_v10, %v1442_v31 }
 0x1d0   : > { %vm1842_vm11 = vmand %vm1746_vm10, %vm1826_vm8  ;;  %vm1075_vm8 = vcmp.eq.s32.totalorder %v4519_v48, %v5876_v63 }
 0x1d1   : > { %v4714_v19 = vpop.permute.xlu1 %1344  ;;  %v2964_v20 = vsel %vm1842_vm11, 1.0, %v3666_v16  ;;  %vm947_vm10 = vmand %vm851_vm4, %vm931_vm15  ;;  %vm1299_vm11 = vcmp.eq.s32.totalorder %v4519_v48, %v5878_v13 }
 0x1d2   : > { %v4760_v62 = vpop.permute.xlu0 %1786  ;;  %v1890_v22 = vadd.f32 %v2964_v20, %v1666_v44  ;;  %v2901_v46 = vsel %vm947_vm10, 1.0, %v3666_v16  ;;  %vm1395_vm13 = vmand %vm1299_vm11, %vm1379_vm12  ;;  %vm796_vm10 = vcmp.gt.f32.partialorder %v4720_v55, 2.0  ;;  %v4844_v44 = vld [vmem:[%s3800_s20 + $0x68] sm:$0xff]  ;;  %vm1243_vm12 = vcmp.gt.f32.partialorder %v4487_v32, 4.0 }
 0x1d3   : > { %3480 = vset.pattern.permute.xlu1 %v3659_v1  ;;  %2351 = vperm.xlu0 %3523, %v4720_v55   ;;  %vm1827_vm4 = vcmp.eq.s32.totalorder %v4760_v62, 1  ;;  %v995_v33 = vadd.f32 %v2901_v46, %v771_v11  ;;  %vm797_vm11 = vcmp.gt.f32.partialorder %v4844_v44, 2.0  ;;  %v1323_v63 = vsel %vm1243_vm12, 1, %v3659_v1 }
 0x1d4   : > { %914 = vperm.xlu1 %3480, %v875_v57   ;;  %v4815_v57 = vld [vmem:[%s3764_s17 + $0x58] sm:$0xff] }
 0x1d6   : > { %v4728_v47 = vpop.permute.xlu1 %1706  ;;  %v2008_v37 = vpop.permute.xlu0 %2007 }
 0x1d7   : > { %2361 = vperm.xlu0 %3523, %v4733_v39   ;;  %vm2050_vm14 = vcmp.eq.s32.totalorder %v2008_v37, 1  ;;  %vm1747_vm3 = vcmp.eq.s32.totalorder %v4519_v48, %v4728_v47  ;;  %v876_v37 = vsel %vm796_vm10, 1, %v3659_v1 }
 0x1d8   : > { %1356 = vperm.xlu1 %3480, %v1321_v45   ;;  %v2933_v45 = vsel %vm1395_vm13, 1.0, %v3666_v16  ;;  %vm1843_vm5 = vmand %vm1747_vm3, %vm1827_vm4  ;;  %vm628_vm13 = vcmp.eq.s32.totalorder %v4519_v48, %v5884_v52  ;;  %vm932_vm4 = vcmp.eq.s32.totalorder %v5885_v15, 1  ;;  %v5893_v15 = vld [vmem:[#allocation18_spill] sm:$0xff] }
 0x1d9   : > { %v2965_v60 = vsel %vm1843_vm5, 1.0, %v3666_v16 }
 0x1da   : > { %v2011_v43 = vpop.permute.xlu0 %2010 }
 0x1db   : > { %v4743_v25 = vpop.permute.xlu1 %1043  ;;  %vm2051_vm7 = vcmp.eq.s32.totalorder %v2011_v43, 1 }
 0x1dc   : > { %3481 = vset.pattern.permute.xlu1 %v5807_v0 }
 0x1dd   : > { %1718 = vperm.xlu1 %3481, %v4389_v58  }
 0x1e0   : > { %v4755_v9 = vpop.permute.xlu1 %1123 }
 0x1e1   : > { %3482 = vset.pattern.permute.xlu1 %v5816_v24 }
 0x1e2   : > { %1055 = vperm.xlu1 %3482, %v4766_v7  }
 0x1e4   : > { %v4771_v26 = vpop.permute.xlu1 %1565 }
 0x1e5   : > { %vm1604_vm12 = vcmp.eq.s32.totalorder %v4771_v26, 1 }
 0x1e6   : > { %3483 = vset.pattern.permute.xlu1 %v3659_v1 }
 0x1e7   : > { %1135 = vperm.xlu1 %3483, %v1098_v59  }
 0x1e9   : > { %v1928_v42 = vpop.permute.xlu1 %1927 }
 0x1ea   : > { %vm1970_vm0 = vcmp.eq.s32.totalorder %v4519_v48, %v1928_v42  ;;  %v877_v42 = vsel %vm797_vm11, 1, %v3659_v1  ;;  %vm1300_vm11 = vcmp.eq.s32.totalorder %v4519_v48, %v4684_v5 }
 0x1eb   : > { %vm2066_vm2 = vmand %vm1970_vm0, %vm2050_vm14  ;;  %1577 = vperm.xlu1 %3483, %v1544_v6   ;;  %vm1523_vm0 = vcmp.eq.s32.totalorder %v4519_v48, %v5880_v35 }
 0x1ec   : > { %v2980_v21 = vsel %vm2066_vm2, 1.0, %v3666_v16  ;;  %vm1171_vm14 = vmand %vm1075_vm8, %vm1155_vm9  ;;  %vm1019_vm2 = vcmp.gt.f32.partialorder %v4487_v32, 3.0 }
 0x1ed   : > { %v2114_v51 = vadd.f32 %v2980_v21, %v1890_v22  ;;  %vm1619_vm15 = vmand %vm1523_vm0, %vm1603_vm1  ;;  %v1099_v12 = vsel %vm1019_vm2, 1, %v3659_v1  ;;  %v5881_v22 = vld [vmem:[#allocation69_spill] sm:$0xff]  ;;  %v5882_v21 = vld [vmem:[#allocation75_spill] sm:$0xff]  ;;  %vm708_vm1 = vcmp.eq.s32.totalorder %v5883_v14, 1 }
 0x1ee   : > { %v4790_v53 = vpop.permute.xlu1 %1046  ;;  %v2949_v47 = vsel %vm1619_vm15, 1.0, %v3666_v16  ;;  %vm484_vm0 = vcmp.eq.s32.totalorder %v5882_v21, 1  ;;  %vm724_vm3 = vmand %vm628_vm13, %vm708_vm1  ;;  %v5890_v21 = vld [vmem:[#allocation6_spill] sm:$0xff]  ;;  %v5892_v14 = vld [vmem:[#allocation17_spill] sm:$0xff] }
 0x1ef   : > { %3484 = vset.pattern.permute.xlu1 %v5823_v23  ;;  %3133 = vmatprep.mubr.f32.mxu0 %v2114_v51  ;;  %v4856_v51 = vpop.permute.xlu0 %1347  ;;  %v2886_v11 = vsel %vm724_vm3, 1.0, %v3666_v16 }
 0x1f0   : > { %1939 = vperm.xlu1 %3484, %v4707_v28   ;;  %v2917_v28 = vsel %vm1171_vm14, 1.0, %v3666_v16  ;;  %vm404_vm14 = vcmp.eq.s32.totalorder %v4519_v48, %v5881_v22 }
 0x1f1   : > { %v1219_v34 = vadd.f32 %v2917_v28, %v995_v33  ;;  %vm500_vm2 = vmand %vm404_vm14, %vm484_vm0  ;;  %v5886_v28 = vld [vmem:[#allocation92_spill] sm:$0xff]  ;;  %v5887_v33 = vld [vmem:[#allocation58_spill] sm:$0xff]  ;;  %vm1020_vm0 = vcmp.gt.f32.partialorder %v4720_v55, 3.0 }
 0x1f2   : > { %v2870_v46 = vsel %vm500_vm2, 1.0, %v3666_v16  ;;  %vm1156_vm15 = vcmp.eq.s32.totalorder %v5886_v28, 1  ;;  %vm852_vm5 = vcmp.eq.s32.totalorder %v4519_v48, %v5887_v33  ;;  %v5896_v33 = vld [vmem:[#allocation33_spill] sm:$0xff] }
 0x1f3   : > { %v4806_v8 = vpop.permute.xlu1 %1126  ;;  %v1443_v61 = vadd.f32 %v2933_v45, %v1219_v34  ;;  %v1790_v38 = vpop.permute.xlu0 %1789  ;;  %vm948_vm6 = vmand %vm852_vm5, %vm932_vm4  ;;  %v5888_v45 = vld [vmem:[#allocation90_spill] sm:$0xff]  ;;  %v5889_v34 = vld [vmem:[#allocation45_spill] sm:$0xff]  ;;  %vm1466_vm4 = vcmp.gt.f32.partialorder %v4711_v36, 5.0 }
 0x1f4   : > { %3485 = vset.pattern.permute.xlu1 %v5816_v24  ;;  %vm1524_vm10 = vcmp.eq.s32.totalorder %v4519_v48, %v5889_v34  ;;  %vm1828_vm1 = vcmp.eq.s32.totalorder %v1790_v38, 1  ;;  %v5891_v36 = vld [vmem:[#allocation44_spill] sm:$0xff] }
 0x1f5   : > { %1058 = vperm.xlu1 %3485, %v4815_v57   ;;  %v1667_v62 = vadd.f32 %v2949_v47, %v1443_v61  ;;  %vm1620_vm2 = vmand %vm1524_vm10, %vm1604_vm12  ;;  %vm853_vm10 = vcmp.eq.s32.totalorder %v4519_v48, %v5893_v15  ;;  %v5894_v38 = vld [vmem:[#allocation84_spill] sm:$0xff] }
 0x1f7   : > { %v4819_v49 = vpop.permute.xlu1 %1568  ;;  %v1891_v30 = vadd.f32 %v2965_v60, %v1667_v62  ;;  %v4884_v61 = vpop.permute.xlu0 %1792  ;;  %v4892_v60 = vld [vmem:[%s3764_s17 + $0x60] sm:$0xff]  ;;  %v1100_v62 = vsel %vm1020_vm0, 1, %v3659_v1 }
 0x1f9   : > { %3486 = vset.pattern.permute.xlu1 %v3659_v1 }
 0x1fa   : > { %1138 = vperm.xlu1 %3486, %v1099_v12   ;;  %v772_v12 = vadd.f32 %v2886_v11, %v2870_v46  ;;  %v5895_v11 = vld [vmem:[#allocation5_spill] sm:$0xff] }
 0x1fb   : > { %vm405_vm12 = vcmp.eq.s32.totalorder %v4519_v48, %v5895_v11  ;;  %v5899_v11 = vld [vmem:[#allocation76_spill] sm:$0xff] }
 0x1fc   : > { %v1931_v2 = vpop.permute.xlu1 %1930 }
 0x1fd   : > { %vm1971_vm8 = vcmp.eq.s32.totalorder %v4519_v48, %v1931_v2 }
 0x1fe   : > { %vm2067_vm9 = vmand %vm1971_vm8, %vm2051_vm7  ;;  %1580 = vperm.xlu1 %3486, %v1545_v56   ;;  %vm1076_vm7 = vcmp.eq.s32.totalorder %v4519_v48, %v5888_v45  ;;  %vm1380_vm8 = vcmp.eq.s32.totalorder %v4730_v18, 1  ;;  %v2902_v18 = vsel %vm948_vm6, 1.0, %v3666_v16  ;;  %vm629_vm6 = vcmp.eq.s32.totalorder %v4519_v48, %v5890_v21 }
 0x1ff   : > { %v2981_v29 = vsel %vm2067_vm9, 1.0, %v3666_v16  ;;  %vm1172_vm9 = vmand %vm1076_vm7, %vm1156_vm15  ;;  %v996_v5 = vadd.f32 %v2902_v18, %v772_v12  ;;  %vm709_vm7 = vcmp.eq.s32.totalorder %v5891_v36, 1  ;;  %v5897_v12 = vld [vmem:[#allocation47_spill] sm:$0xff] }
 0x200   : > { %v2115_v59 = vadd.f32 %v2981_v29, %v1891_v30  ;;  %vm1396_vm14 = vmand %vm1300_vm11, %vm1380_vm8  ;;  %v2918_v43 = vsel %vm1172_vm9, 1.0, %v3666_v16  ;;  %v2950_v30 = vsel %vm1620_vm2, 1.0, %v3666_v16  ;;  %vm485_vm9 = vcmp.eq.s32.totalorder %v5892_v14, 1 }
 0x201   : > { %v4829_v31 = vpop.permute.xlu1 %905  ;;  %v2934_v26 = vsel %vm1396_vm14, 1.0, %v3666_v16  ;;  %v1220_v2 = vadd.f32 %v2918_v43, %v996_v5  ;;  %vm933_vm11 = vcmp.eq.s32.totalorder %v5894_v38, 1  ;;  %vm725_vm14 = vmand %vm629_vm6, %vm709_vm7  ;;  %vm1301_vm2 = vcmp.eq.s32.totalorder %v4519_v48, %v5896_v33 }
 0x202   : > { %3487 = vset.pattern.permute.xlu1 %v5823_v23  ;;  %3134 = vmatmul.mubr.f32.gmra.mrb[2].mxu0 %v2115_v59  ;;  %v2014_v59 = vpop.permute.xlu0 %2013  ;;  %vm501_vm0 = vmand %vm405_vm12, %vm485_vm9  ;;  %v2887_v45 = vsel %vm725_vm14, 1.0, %v3666_v16  ;;  %vm1605_vm6 = vcmp.eq.s32.totalorder %v4819_v49, 1  ;;  %vm1829_vm9 = vcmp.eq.s32.totalorder %v4884_v61, 1  ;;  %vm1467_vm14 = vcmp.gt.f32.partialorder %v4487_v32, 5.0 }
 0x203   : > { %1942 = vperm.xlu1 %3487, %v4389_v58   ;;  %v1444_v29 = vadd.f32 %v2934_v26, %v1220_v2  ;;  %vm2052_vm15 = vcmp.eq.s32.totalorder %v2014_v59, 1 }
 0x206   : > { %v4835_v10 = vpop.permute.xlu1 %1267  ;;  %v2017_v2 = vpop.permute.xlu0 %2016 }
 0x207   : > { %3488 = vset.pattern.permute.xlu1 %v3659_v1 }
 0x208   : > { %917 = vperm.xlu1 %3488, %v876_v37  }
 0x20a   : > { %v4984_v33 = vpop.permute.xlu0 %1353 }
 0x20b   : > { %v1710_v20 = vpop.permute.xlu1 %1709 }
 0x20c   : > { %3489 = vset.pattern.permute.xlu1 %v5806_v41  ;;  %vm1748_vm13 = vcmp.eq.s32.totalorder %v4519_v48, %v1710_v20  ;;  %v1546_v20 = vsel %vm1466_vm4, 1, %v3659_v1  ;;  %vm1381_vm4 = vcmp.eq.s32.totalorder %v4714_v19, 1  ;;  %v4943_v19 = vld [vmem:[%s3764_s17 + $0x68] sm:$0xff] }
 0x20d   : > { %1279 = vperm.xlu1 %3489, %v4766_v7   ;;  %vm1844_vm3 = vmand %vm1748_vm13, %vm1828_vm1  ;;  %vm1157_vm1 = vcmp.eq.s32.totalorder %v4542_v40, 1  ;;  %v2871_v40 = vsel %vm501_vm0, 1.0, %v3666_v16  ;;  %vm2053_vm0 = vcmp.eq.s32.totalorder %v2017_v2, 1 }
 0x20e   : > { %v2966_v37 = vsel %vm1844_vm3, 1.0, %v3666_v16  ;;  %vm949_vm13 = vmand %vm853_vm10, %vm933_vm11  ;;  %vm1077_vm3 = vcmp.eq.s32.totalorder %v4519_v48, %v4521_v3  ;;  %v773_v18 = vadd.f32 %v2887_v45, %v2871_v40  ;;  %v5900_v45 = vld [vmem:[#allocation85_spill] sm:$0xff]  ;;  %v5901_v40 = vld [vmem:[#allocation32_spill] sm:$0xff] }
 0x20f   : > { %v2903_v34 = vsel %vm949_vm13, 1.0, %v3666_v16  ;;  %vm1397_vm7 = vmand %vm1301_vm2, %vm1381_vm4  ;;  %vm798_vm2 = vcmp.gt.f32.partialorder %v4733_v39, 2.0  ;;  %vm1245_vm4 = vcmp.gt.f32.partialorder %v4844_v44, 4.0 }
 0x210   : > { %v4840_v6 = vpop.permute.xlu1 %908  ;;  %v997_v49 = vadd.f32 %v2903_v34, %v773_v18  ;;  %v2935_v43 = vsel %vm1397_vm7, 1.0, %v3666_v16  ;;  %v878_v21 = vsel %vm798_vm2, 1, %v3659_v1  ;;  %v1325_v15 = vsel %vm1245_vm4, 1, %v3659_v1  ;;  %v5902_v34 = vld [vmem:[#allocation60_spill] sm:$0xff] }
 0x211   : > { %3490 = vset.pattern.permute.xlu1 %v5807_v0  ;;  %vm630_vm7 = vcmp.eq.s32.totalorder %v4519_v48, %v5901_v40  ;;  %v5908_v40 = vld [vmem:[#allocation7_spill] sm:$0xff] }
 0x212   : > { %1721 = vperm.xlu1 %3490, %v4495_v17  }
 0x214   : > { %v4848_v58 = vpop.permute.xlu1 %1350 }
 0x216   : > { %3491 = vset.pattern.permute.xlu1 %v3659_v1 }
 0x217   : > { %920 = vperm.xlu1 %3491, %v877_v42   ;;  %v1668_v42 = vadd.f32 %v2950_v30, %v1444_v29  ;;  %v1547_v29 = vsel %vm1467_vm14, 1, %v3659_v1 }
 0x219   : > { %v4860_v13 = vpop.permute.xlu1 %1712 }
 0x21a   : > { %vm1749_vm10 = vcmp.eq.s32.totalorder %v4519_v48, %v4860_v13 }
 0x21b   : > { %1362 = vperm.xlu1 %3491, %v1323_v63   ;;  %v1892_v63 = vadd.f32 %v2966_v37, %v1668_v42  ;;  %vm1845_vm12 = vmand %vm1749_vm10, %vm1829_vm9  ;;  %vm934_vm9 = vcmp.eq.s32.totalorder %v4656_v4, 1 }
 0x21c   : > { %v2967_v30 = vsel %vm1845_vm12, 1.0, %v3666_v16  ;;  %vm1158_vm12 = vcmp.eq.s32.totalorder %v4755_v9, 1 }
 0x21e   : > { %v4865_v35 = vpop.permute.xlu1 %1049 }
 0x21f   : > { %3492 = vset.pattern.permute.xlu1 %v5807_v0 }
 0x220   : > { %1724 = vperm.xlu1 %3492, %v4556_v27  }
 0x223   : > { %v4882_v47 = vpop.permute.xlu1 %1129 }
 0x224   : > { %3493 = vset.pattern.permute.xlu1 %v5816_v24 }
 0x225   : > { %1061 = vperm.xlu1 %3493, %v4892_v60  }
 0x227   : > { %v4899_v56 = vpop.permute.xlu1 %1571 }
 0x229   : > { %3494 = vset.pattern.permute.xlu1 %v3659_v1 }
 0x22a   : > { %1141 = vperm.xlu1 %3494, %v1100_v62  }
 0x22c   : > { %v1934_v22 = vpop.permute.xlu1 %1933 }
 0x22d   : > { %vm1972_vm5 = vcmp.eq.s32.totalorder %v4519_v48, %v1934_v22 }
 0x22e   : > { %vm2068_vm8 = vmand %vm1972_vm5, %vm2052_vm15  ;;  %1583 = vperm.xlu1 %3494, %v1546_v20   ;;  %vm1525_vm5 = vcmp.eq.s32.totalorder %v4519_v48, %v5897_v12 }
 0x22f   : > { %v2982_v52 = vsel %vm2068_vm8, 1.0, %v3666_v16  ;;  %vm1173_vm15 = vmand %vm1077_vm3, %vm1157_vm1  ;;  %vm1021_vm8 = vcmp.gt.f32.partialorder %v4844_v44, 3.0  ;;  %vm799_vm3 = vcmp.gt.f32.partialorder %v4516_v50, 2.0 }
 0x230   : > { %v2116_v46 = vadd.f32 %v2982_v52, %v1892_v63  ;;  %v2919_v3 = vsel %vm1173_vm15, 1.0, %v3666_v16  ;;  %vm1621_vm11 = vmand %vm1525_vm5, %vm1605_vm6  ;;  %v1101_v26 = vsel %vm1021_vm8, 1, %v3659_v1  ;;  %v879_v52 = vsel %vm799_vm3, 1, %v3659_v1 }
 0x231   : > { %v4918_v28 = vpop.permute.xlu1 %1052  ;;  %v1221_v62 = vadd.f32 %v2919_v3, %v997_v49  ;;  %v2951_v61 = vsel %vm1621_vm11, 1.0, %v3666_v16  ;;  %vm486_vm5 = vcmp.eq.s32.totalorder %v5899_v11, 1  ;;  %vm710_vm6 = vcmp.eq.s32.totalorder %v5900_v45, 1  ;;  %v1796_v3 = vpop.permute.xlu0 %1795  ;;  %v5907_v11 = vld [vmem:[#allocation20_spill] sm:$0xff] }
 0x232   : > { %3495 = vset.pattern.permute.xlu1 %v5823_v23  ;;  %3136 = vmatprep.mubr.f32.mxu0 %v2116_v46  ;;  %v5898_v46 = vld [vmem:[#allocation70_spill] sm:$0xff]  ;;  %vm726_vm10 = vmand %vm630_vm7, %vm710_vm6  ;;  %vm854_vm11 = vcmp.eq.s32.totalorder %v4519_v48, %v5902_v34  ;;  %vm1606_vm3 = vcmp.eq.s32.totalorder %v4899_v56, 1  ;;  %vm1830_vm6 = vcmp.eq.s32.totalorder %v1796_v3, 1  ;;  %v5909_v3 = vld [vmem:[#allocation35_spill] sm:$0xff] }
 0x233   : > { %1945 = vperm.xlu1 %3495, %v4495_v17   ;;  %v1445_v13 = vadd.f32 %v2935_v43, %v1221_v62  ;;  %vm406_vm15 = vcmp.eq.s32.totalorder %v4519_v48, %v5898_v46  ;;  %vm950_vm14 = vmand %vm854_vm11, %vm934_vm9  ;;  %v2888_v49 = vsel %vm726_vm10, 1.0, %v3666_v16  ;;  %vm1468_vm10 = vcmp.gt.f32.partialorder %v4720_v55, 5.0 }
 0x234   : > { %vm502_vm8 = vmand %vm406_vm15, %vm486_vm5  ;;  %v2904_v4 = vsel %vm950_vm14, 1.0, %v3666_v16  ;;  %vm1022_vm15 = vcmp.gt.f32.partialorder %v4733_v39, 3.0 }
 0x235   : > { %v1669_v59 = vadd.f32 %v2951_v61, %v1445_v13  ;;  %v2872_v18 = vsel %vm502_vm8, 1.0, %v3666_v16  ;;  %v5018_v56 = vpop.permute.xlu0 %1798  ;;  %v1102_v13 = vsel %vm1022_vm15, 1, %v3659_v1 }
 0x236   : > { %v4934_v17 = vpop.permute.xlu1 %1132  ;;  %v774_v43 = vadd.f32 %v2888_v49, %v2872_v18 }
 0x237   : > { %3496 = vset.pattern.permute.xlu1 %v5816_v24  ;;  %v1893_v20 = vadd.f32 %v2967_v30, %v1669_v59 }
 0x238   : > { %1064 = vperm.xlu1 %3496, %v4943_v19  }
 0x23a   : > { %v4947_v5 = vpop.permute.xlu1 %1574 }
 0x23c   : > { %3497 = vset.pattern.permute.xlu1 %v3659_v1 }
 0x23d   : > { %1144 = vperm.xlu1 %3497, %v1101_v26   ;;  %v5903_v26 = vld [vmem:[#allocation49_spill] sm:$0xff] }
 0x23e   : > { %vm1526_vm5 = vcmp.eq.s32.totalorder %v4519_v48, %v5903_v26 }
 0x23f   : > { %v1937_v37 = vpop.permute.xlu1 %1936  ;;  %vm1622_vm8 = vmand %vm1526_vm5, %vm1606_vm3  ;;  %vm935_vm3 = vcmp.eq.s32.totalorder %v4702_v54, 1 }
 0x240   : > { %vm1973_vm1 = vcmp.eq.s32.totalorder %v4519_v48, %v1937_v37  ;;  %v2952_v30 = vsel %vm1622_vm8, 1.0, %v3666_v16  ;;  %v1548_v37 = vsel %vm1468_vm10, 1, %v3659_v1  ;;  %vm1079_vm8 = vcmp.eq.s32.totalorder %v4519_v48, %v4790_v53  ;;  %v5910_v53 = vld [vmem:[#allocation51_spill] sm:$0xff] }
 0x241   : > { %vm2069_vm13 = vmand %vm1973_vm1, %vm2053_vm0  ;;  %1586 = vperm.xlu1 %3497, %v1547_v29   ;;  %vm1078_vm0 = vcmp.eq.s32.totalorder %v4519_v48, %v4743_v25  ;;  %vm1382_vm1 = vcmp.eq.s32.totalorder %v4856_v51, 1  ;;  %v998_v51 = vadd.f32 %v2904_v4, %v774_v43  ;;  %v5065_v4 = vld [vmem:[%s3764_s17 + $0x78] sm:$0xff] }
 0x242   : > { %v2983_v32 = vsel %vm2069_vm13, 1.0, %v3666_v16  ;;  %vm1302_vm13 = vcmp.eq.s32.totalorder %v4519_v48, %v4835_v10  ;;  %vm1174_vm2 = vmand %vm1078_vm0, %vm1158_vm12  ;;  %v5015_v10 = vld [vmem:[%s3764_s17 + $0x70] sm:$0xff] }
 0x243   : > { %v2117_v42 = vadd.f32 %v2983_v32, %v1893_v20  ;;  %vm1398_vm4 = vmand %vm1302_vm13, %vm1382_vm1  ;;  %v2920_v25 = vsel %vm1174_vm2, 1.0, %v3666_v16  ;;  %v2020_v20 = vpop.permute.xlu0 %2019  ;;  %vm855_vm2 = vcmp.eq.s32.totalorder %v4519_v48, %v5907_v11  ;;  %v5915_v11 = vld [vmem:[#allocation73_spill] sm:$0xff] }
 0x244   : > { %v4957_v22 = vpop.permute.xlu1 %911  ;;  %v2936_v62 = vsel %vm1398_vm4, 1.0, %v3666_v16  ;;  %v1222_v2 = vadd.f32 %v2920_v25, %v998_v51  ;;  %vm2054_vm11 = vcmp.eq.s32.totalorder %v2020_v20, 1  ;;  %vm407_vm4 = vcmp.eq.s32.totalorder %v4519_v48, %v5908_v40 }
 0x245   : > { %3498 = vset.pattern.permute.xlu1 %v5823_v23  ;;  %3137 = vmatmul.mubr.f32.gmra.mrb[4].mxu0 %v2117_v42 }
 0x246   : > { %1948 = vperm.xlu1 %3498, %v4556_v27   ;;  %v1446_v29 = vadd.f32 %v2936_v62, %v1222_v2 }
 0x247   : > { %v2023_v62 = vpop.permute.xlu0 %2022 }
 0x248   : > { %v1670_v32 = vadd.f32 %v2952_v30, %v1446_v29 }
 0x249   : > { %v4963_v36 = vpop.permute.xlu1 %1273 }
 0x24a   : > { %3499 = vset.pattern.permute.xlu1 %v3659_v1 }
 0x24b   : > { %923 = vperm.xlu1 %3499, %v878_v21   ;;  %v5904_v21 = vld [vmem:[#allocation8_spill] sm:$0xff] }
 0x24c   : > { %vm631_vm14 = vcmp.eq.s32.totalorder %v4519_v48, %v5904_v21 }
 0x24e   : > { %v1716_v63 = vpop.permute.xlu1 %1715 }
 0x24f   : > { %3500 = vset.pattern.permute.xlu1 %v5806_v41  ;;  %vm1750_vm7 = vcmp.eq.s32.totalorder %v4519_v48, %v1716_v63  ;;  %v5905_v63 = vld [vmem:[#allocation46_spill] sm:$0xff] }
 0x250   : > { %1285 = vperm.xlu1 %3500, %v4892_v60   ;;  %vm1846_vm9 = vmand %vm1750_vm7, %vm1830_vm6  ;;  %vm711_vm0 = vcmp.eq.s32.totalorder %v5905_v63, 1  ;;  %vm1159_vm6 = vcmp.eq.s32.totalorder %v4806_v8, 1 }
 0x251   : > { %v2968_v59 = vsel %vm1846_vm9, 1.0, %v3666_v16  ;;  %vm727_vm15 = vmand %vm631_vm14, %vm711_vm0  ;;  %vm1383_vm9 = vcmp.eq.s32.totalorder %v4848_v58, 1  ;;  %vm1023_vm0 = vcmp.gt.f32.partialorder %v4516_v50, 3.0 }
 0x252   : > { %vm951_vm7 = vmand %vm855_vm2, %vm935_vm3  ;;  %v2889_v18 = vsel %vm727_vm15, 1.0, %v3666_v16  ;;  %v1103_v50 = vsel %vm1023_vm0, 1, %v3659_v1  ;;  %vm1469_vm15 = vcmp.gt.f32.partialorder %v4844_v44, 5.0  ;;  %vm412_vm0 = vcmp.eq.s32.totalorder %v4519_v48, %v5915_v11 }
 0x253   : > { %v4968_v14 = vpop.permute.xlu1 %914  ;;  %vm1175_vm10 = vmand %vm1079_vm8, %vm1159_vm6  ;;  %v2905_v8 = vsel %vm951_vm7, 1.0, %v3666_v16  ;;  %vm1246_vm8 = vcmp.gt.f32.partialorder %v4733_v39, 4.0 }
 0x254   : > { %3501 = vset.pattern.permute.xlu1 %v5807_v0  ;;  %v2921_v58 = vsel %vm1175_vm10, 1.0, %v3666_v16 }
 0x255   : > { %1727 = vperm.xlu1 %3501, %v4766_v7  }
 0x257   : > { %v4973_v27 = vpop.permute.xlu1 %1356 }
 0x259   : > { %3502 = vset.pattern.permute.xlu1 %v3659_v1 }
 0x25a   : > { %926 = vperm.xlu1 %3502, %v879_v52   ;;  %v1894_v52 = vadd.f32 %v2968_v59, %v1670_v32  ;;  %v1326_v32 = vsel %vm1246_vm8, 1, %v3659_v1 }
 0x25c   : > { %v4979_v38 = vpop.permute.xlu1 %1718 }
 0x25d   : > { %vm1751_vm2 = vcmp.eq.s32.totalorder %v4519_v48, %v4979_v38 }
 0x25e   : > { %1368 = vperm.xlu1 %3502, %v1325_v15   ;;  %v5906_v15 = vld [vmem:[#allocation19_spill] sm:$0xff] }
 0x25f   : > { %vm487_vm13 = vcmp.eq.s32.totalorder %v5906_v15, 1  ;;  %v5912_v15 = vld [vmem:[#allocation78_spill] sm:$0xff] }
 0x260   : > { %vm503_vm5 = vmand %vm407_vm4, %vm487_vm13  ;;  %vm1831_vm13 = vcmp.eq.s32.totalorder %v5018_v56, 1  ;;  %v1549_v56 = vsel %vm1469_vm15, 1, %v3659_v1 }
 0x261   : > { %v4990_v12 = vpop.permute.xlu1 %1055  ;;  %v2873_v54 = vsel %vm503_vm5, 1.0, %v3666_v16  ;;  %vm1847_vm4 = vmand %vm1751_vm2, %vm1831_vm13  ;;  %vm2055_vm5 = vcmp.eq.s32.totalorder %v2023_v62, 1  ;;  %v5937_v62 = vld [vmem:[#allocation66_spill] sm:$0xff] }
 0x262   : > { %3503 = vset.pattern.permute.xlu1 %v5807_v0  ;;  %v2969_v51 = vsel %vm1847_vm4, 1.0, %v3666_v16 }
 0x263   : > { %1730 = vperm.xlu1 %3503, %v4815_v57  }
 0x266   : > { %v5006_v9 = vpop.permute.xlu1 %1135 }
 0x267   : > { %3504 = vset.pattern.permute.xlu1 %v5816_v24 }
 0x268   : > { %1067 = vperm.xlu1 %3504, %v5015_v10  }
 0x26a   : > { %v5021_v61 = vpop.permute.xlu1 %1577 }
 0x26c   : > { %3505 = vset.pattern.permute.xlu1 %v3659_v1 }
 0x26d   : > { %1147 = vperm.xlu1 %3505, %v1102_v13  }
 0x26f   : > { %v1940_v42 = vpop.permute.xlu1 %1939 }
 0x270   : > { %vm1974_vm12 = vcmp.eq.s32.totalorder %v4519_v48, %v1940_v42 }
 0x271   : > { %vm2070_vm1 = vmand %vm1974_vm12, %vm2054_vm11  ;;  %1589 = vperm.xlu1 %3505, %v1548_v37   ;;  %vm1303_vm11 = vcmp.eq.s32.totalorder %v4519_v48, %v5909_v3  ;;  %vm1607_vm12 = vcmp.eq.s32.totalorder %v4947_v5, 1 }
 0x272   : > { %v2984_v46 = vsel %vm2070_vm1, 1.0, %v3666_v16  ;;  %vm1399_vm14 = vmand %vm1303_vm11, %vm1383_vm9  ;;  %vm1527_vm1 = vcmp.eq.s32.totalorder %v4519_v48, %v5910_v53  ;;  %vm1692_vm9 = vcmp.gt.f32.partialorder %v4720_v55, 6.0  ;;  %vm488_vm11 = vcmp.eq.s32.totalorder %v5912_v15, 1  ;;  %v5914_v55 = vld [vmem:[#allocation79_spill] sm:$0xff] }
 0x273   : > { %v2118_v45 = vadd.f32 %v2984_v46, %v1894_v52  ;;  %vm1623_vm3 = vmand %vm1527_vm1, %vm1607_vm12  ;;  %v1772_v21 = vsel %vm1692_vm9, 1, %v3659_v1  ;;  %v5911_v52 = vld [vmem:[#allocation71_spill] sm:$0xff]  ;;  %v5913_v46 = vld [vmem:[#allocation72_spill] sm:$0xff] }
 0x274   : > { %v5040_v34 = vpop.permute.xlu1 %1058  ;;  %v2953_v25 = vsel %vm1623_vm3, 1.0, %v3666_v16  ;;  %vm408_vm10 = vcmp.eq.s32.totalorder %v4519_v48, %v5911_v52  ;;  %vm410_vm12 = vcmp.eq.s32.totalorder %v4519_v48, %v5913_v46 }
 0x275   : > { %3506 = vset.pattern.permute.xlu1 %v5823_v23  ;;  %3139 = vmatprep.mubr.f32.mxu0 %v2118_v45  ;;  %v5916_v45 = vld [vmem:[#allocation80_spill] sm:$0xff]  ;;  %vm5107_vm13 = vmand %vm408_vm10, %vm488_vm11  ;;  %vm938_vm10 = vcmp.eq.s32.totalorder %v4957_v22, 1  ;;  %v5952_v22 = vld [vmem:[#allocation21_spill] sm:$0xff] }
 0x276   : > { %1951 = vperm.xlu1 %3506, %v4766_v7   ;;  %v775_v7 = vadd.f32 %v2889_v18, %v2873_v54  ;;  %vm492_vm1 = vcmp.eq.s32.totalorder %v5916_v45, 1  ;;  %v5919_v18 = vld [vmem:[#allocation87_spill] sm:$0xff]  ;;  %v5922_v54 = vld [vmem:[#allocation88_spill] sm:$0xff] }
 0x277   : > { %vm712_vm2 = vcmp.eq.s32.totalorder %v5919_v18, 1  ;;  %vm714_vm4 = vcmp.eq.s32.totalorder %v5922_v54, 1 }
 0x278   : > { %v999_v5 = vadd.f32 %v2905_v8, %v775_v7  ;;  %v5923_v7 = vld [vmem:[#allocation34_spill] sm:$0xff] }
 0x279   : > { %v5054_v49 = vpop.permute.xlu1 %1138  ;;  %vm632_vm15 = vcmp.eq.s32.totalorder %v4519_v48, %v5923_v7 }
 0x27a   : > { %3507 = vset.pattern.permute.xlu1 %v5816_v24  ;;  %v2937_v24 = vsel %vm1399_vm14, 1.0, %v3666_v16  ;;  %v1223_v26 = vadd.f32 %v2921_v58, %v999_v5  ;;  %vm490_vm14 = vcmp.eq.s32.totalorder %v5914_v55, 1  ;;  %v5926_v58 = vld [vmem:[#allocation89_spill] sm:$0xff]  ;;  %v1360_v5 = vpop.permute.xlu0 %1359  ;;  %vm5134_vm9 = vmand %vm632_vm15, %vm712_vm2  ;;  %vm936_vm15 = vcmp.eq.s32.totalorder %v4829_v31, 1  ;;  %v5960_v31 = vld [vmem:[#allocation11_spill] sm:$0xff] }
 0x27b   : > { %1070 = vperm.xlu1 %3507, %v5065_v4   ;;  %vm5112_vm3 = vmand %vm410_vm12, %vm490_vm14  ;;  %v5946_v55 = vld [vmem:[#allocation53_spill] sm:$0xff] }
 0x27c   : > { %v1447_v38 = vadd.f32 %v2937_v24, %v1223_v26 }
 0x27d   : > { %v5069_v43 = vpop.permute.xlu1 %1580 }
 0x27e   : > { %v1671_v13 = vadd.f32 %v2953_v25, %v1447_v38  ;;  %v5930_v25 = vld [vmem:[#allocation38_spill] sm:$0xff]  ;;  %v1802_v46 = vpop.permute.xlu0 %1801 }
 0x27f   : > { %3508 = vset.pattern.permute.xlu1 %v3659_v1  ;;  %vm636_vm11 = vcmp.eq.s32.totalorder %v4519_v48, %v5930_v25 }
 0x280   : > { %1150 = vperm.xlu1 %3508, %v1103_v50   ;;  %v1895_v30 = vadd.f32 %v2969_v51, %v1671_v13  ;;  %v5927_v50 = vld [vmem:[#allocation36_spill] sm:$0xff]  ;;  %v5933_v51 = vld [vmem:[#allocation62_spill] sm:$0xff]  ;;  %v2874_v13 = vsel %vm5107_vm13, 1.0, %v3666_v16  ;;  %vm1160_vm13 = vcmp.eq.s32.totalorder %v4882_v47, 1 }
 0x281   : > { %vm634_vm8 = vcmp.eq.s32.totalorder %v4519_v48, %v5927_v50  ;;  %v5965_v47 = vld [vmem:[#allocation24_spill] sm:$0xff] }
 0x282   : > { %v1943_v2 = vpop.permute.xlu1 %1942  ;;  %vm5144_vm12 = vmand %vm634_vm8, %vm714_vm4  ;;  %vm860_vm4 = vcmp.eq.s32.totalorder %v4519_v48, %v5937_v62 }
 0x283   : > { %vm1975_vm6 = vcmp.eq.s32.totalorder %v4519_v48, %v1943_v2  ;;  %v2892_v52 = vsel %vm5144_vm12, 1.0, %v3666_v16  ;;  %vm1080_vm12 = vcmp.eq.s32.totalorder %v4519_v48, %v4865_v35 }
 0x284   : > { %vm2071_vm7 = vmand %vm1975_vm6, %vm2055_vm5  ;;  %1592 = vperm.xlu1 %3508, %v1549_v56   ;;  %vm716_vm6 = vcmp.eq.s32.totalorder %v5926_v58, 1  ;;  %v5934_v56 = vld [vmem:[#allocation64_spill] sm:$0xff] }
 0x285   : > { %v2985_v29 = vsel %vm2071_vm7, 1.0, %v3666_v16  ;;  %vm5123_vm5 = vmand %vm412_vm0, %vm492_vm1  ;;  %vm1693_vm7 = vcmp.gt.f32.partialorder %v4844_v44, 6.0  ;;  %vm856_vm0 = vcmp.eq.s32.totalorder %v4519_v48, %v5933_v51  ;;  %vm858_vm1 = vcmp.eq.s32.totalorder %v4519_v48, %v5934_v56 }
 0x286   : > { %v2119_v59 = vadd.f32 %v2985_v29, %v1895_v30  ;;  %vm5152_vm2 = vmand %vm636_vm11, %vm716_vm6  ;;  %vm1162_vm6 = vcmp.eq.s32.totalorder %v5006_v9, 1  ;;  %vm1470_vm11 = vcmp.gt.f32.partialorder %v4733_v39, 5.0  ;;  %v2876_v29 = vsel %vm5112_vm3, 1.0, %v3666_v16 }
 0x287   : > { %v918_v37 = vpop.permute.xlu1 %917  ;;  %vm5163_vm8 = vmand %vm858_vm1, %vm938_vm10  ;;  %v2894_v15 = vsel %vm5152_vm2, 1.0, %v3666_v16  ;;  %vm1384_vm10 = vcmp.eq.s32.totalorder %v4984_v33, 1  ;;  %vm1528_vm1 = vcmp.eq.s32.totalorder %v4519_v48, %v5946_v55  ;;  %vm1386_vm2 = vcmp.eq.s32.totalorder %v1360_v5, 1  ;;  %v5255_v33 = vpop.permute.xlu0 %1804  ;;  %v5962_v55 = vld [vmem:[#allocation48_spill] sm:$0xff] }
 0x288   : > { %3509 = vset.pattern.permute.xlu1 %v5823_v23  ;;  %3140 = vmatmul.mubr.f32.gmra.mrb[6].mxu0 %v2119_v59  ;;  %vm940_vm14 = vcmp.eq.s32.totalorder %v918_v37, 1  ;;  %v2878_v59 = vsel %vm5123_vm5, 1.0, %v3666_v16  ;;  %vm5196_vm3 = vmand %vm856_vm0, %vm936_vm15  ;;  %vm1082_vm5 = vcmp.eq.s32.totalorder %v4519_v48, %v4990_v12  ;;  %v1550_v12 = vsel %vm1470_vm11, 1, %v3659_v1 }
 0x289   : > { %1954 = vperm.xlu1 %3509, %v4815_v57   ;;  %vm5211_vm0 = vmand %vm1082_vm5, %vm1162_vm6  ;;  %v2908_v35 = vsel %vm5163_vm8, 1.0, %v3666_v16  ;;  %v778_v11 = vadd.f32 %v2892_v52, %v2876_v29  ;;  %v780_v45 = vadd.f32 %v2894_v15, %v2878_v59  ;;  %v2906_v39 = vsel %vm5196_vm3, 1.0, %v3666_v16  ;;  %v5954_v29 = vld [vmem:[#allocation12_spill] sm:$0xff]  ;;  %v5955_v59 = vld [vmem:[#allocation23_spill] sm:$0xff] }
 0x28a   : > { %vm1176_vm15 = vmand %vm1080_vm12, %vm1160_vm13  ;;  %v2924_v54 = vsel %vm5211_vm0, 1.0, %v3666_v16  ;;  %v5958_v15 = vld [vmem:[#allocation50_spill] sm:$0xff]  ;;  %v5959_v37 = vmov 5  }
 0x28b   : > { %v1002_v7 = vadd.f32 %v2908_v35, %v778_v11 }
 0x28c   : > { %v5081_v20 = vpop.permute.xlu1 %1279 }
 0x28d   : > { %3510 = vset.pattern.permute.xlu1 %v5806_v41  ;;  %v1226_v50 = vadd.f32 %v2924_v54, %v1002_v7 }
 0x28e   : > { %1291 = vperm.xlu1 %3510, %v5015_v10  }
 0x291   : > { %v5087_v42 = vpop.permute.xlu1 %1721 }
 0x292   : > { %3511 = vset.pattern.permute.xlu1 %v3659_v1 }
 0x293   : > { %1371 = vperm.xlu1 %3511, %v1326_v32   ;;  %v2890_v32 = vsel %vm5134_vm9, 1.0, %v3666_v16  ;;  %vm1306_vm9 = vcmp.eq.s32.totalorder %v4519_v48, %v5081_v20  ;;  %v2922_v20 = vsel %vm1176_vm15, 1.0, %v3666_v16  ;;  %vm635_vm15 = vcmp.eq.s32.totalorder %v4519_v48, %v5954_v29  ;;  %v5983_v29 = vld [vmem:[#allocation91_spill] sm:$0xff] }
 0x294   : > { %vm5235_vm6 = vmand %vm1306_vm9, %vm1386_vm2  ;;  %v776_v18 = vadd.f32 %v2890_v32, %v2874_v13  ;;  %vm1832_vm9 = vcmp.eq.s32.totalorder %v1802_v46, 1  ;;  %v2026_v32 = vpop.permute.xlu0 %2025  ;;  %v5294_v46 = vld [vmem:[%s3800_s20 + $0x78] sm:$0xff] }
 0x295   : > { %v2940_v58 = vsel %vm5235_vm6, 1.0, %v3666_v16 }
 0x296   : > { %v5092_v57 = vpop.permute.xlu1 %920  ;;  %v1450_v56 = vadd.f32 %v2940_v58, %v1226_v50 }
 0x297   : > { %1813 = vperm.xlu1 %3511, %v1772_v21  }
 0x29a   : > { %v5094_v63 = vpop.permute.xlu1 %1362 }
 0x29b   : > { %3514 = vset.pattern.permute.xlu1 %v5806_v41 }
 0x29c   : > { %1294 = vperm.xlu1 %3514, %v5065_v4  }
 0x29f   : > { %v5117_v3 = vpop.permute.xlu1 %1724  ;;  %v5119_v8 = vpop.f32.mrb[0].mxu0 }
 0x2a0   : > { %3515 = vset.pattern.permute.xlu1 %v5807_v0  ;;  %v5129_v24 = vpop.f32.mrb[1].mxu0 }
 0x2a1   : > { %1736 = vperm.xlu1 %3515, %v4943_v19   ;;  %v1773_v19 = vsel %vm1693_vm7, 1, %v3659_v1  ;;  %vm5180_vm7 = vmand %vm860_vm4, %vm940_vm14  ;;  %vm1304_vm14 = vcmp.eq.s32.totalorder %v4519_v48, %v4963_v36  ;;  %vm1608_vm4 = vcmp.eq.s32.totalorder %v5021_v61, 1  ;;  %v1000_v36 = vadd.f32 %v2906_v39, %v776_v18  ;;  %v5951_v61 = vld [vmem:[#allocation56_spill] sm:$0xff] }
 0x2a2   : > { %v2910_v9 = vsel %vm5180_vm7, 1.0, %v3666_v16  ;;  %vm5244_vm8 = vmand %vm1304_vm14, %vm1384_vm10  ;;  %vm1752_vm7 = vcmp.eq.s32.totalorder %v4519_v48, %v5087_v42  ;;  %vm1530_vm10 = vcmp.eq.s32.totalorder %v4519_v48, %v5951_v61  ;;  %v5987_v18 = vld [vmem:[#allocation68_spill] sm:$0xff] }
 0x2a3   : > { %v1004_v53 = vadd.f32 %v2910_v9, %v780_v45  ;;  %vm1624_vm5 = vmand %vm1528_vm1, %vm1608_vm4  ;;  %v2938_v42 = vsel %vm5244_vm8, 1.0, %v3666_v16  ;;  %v1224_v38 = vadd.f32 %v2922_v20, %v1000_v36  ;;  %vm489_vm1 = vcmp.eq.s32.totalorder %v5952_v22, 1  ;;  %v2404_v20 = vld [vmem:[%s5743_s3 + $0x18] sm:$0xff] }
 0x2a4   : > { %v1062_v30 = vpop.permute.xlu1 %1061  ;;  %vm1848_vm12 = vmand %vm1752_vm7, %vm1832_vm9  ;;  %v2954_v51 = vsel %vm1624_vm5, 1.0, %v3666_v16  ;;  %vm491_vm4 = vcmp.eq.s32.totalorder %v5955_v59, 1  ;;  %vm715_vm8 = vcmp.eq.s32.totalorder %v5958_v15, 1  ;;  %vm1471_vm7 = vcmp.gt.f32.partialorder %v5294_v46, 5.0  ;;  %v2029_v15 = vpop.permute.xlu0 %2028 }
 0x2a5   : > { %3516 = vset.pattern.permute.xlu1 %v3659_v1  ;;  %vm1084_vm11 = vcmp.eq.s32.totalorder %v4519_v48, %v1062_v30  ;;  %v2970_v13 = vsel %vm1848_vm12, 1.0, %v3666_v16  ;;  %v5953_v30 = vld [vmem:[#allocation9_spill] sm:$0xff]  ;;  %vm713_vm9 = vcmp.eq.s32.totalorder %v5962_v55, 1  ;;  %v1551_v39 = vsel %vm1471_vm7, 1, %v3659_v1 }
 0x2a6   : > { %1816 = vperm.xlu1 %3516, %v1773_v19   ;;  %v1448_v19 = vadd.f32 %v2938_v42, %v1224_v38  ;;  %vm409_vm2 = vcmp.eq.s32.totalorder %v4519_v48, %v5953_v30  ;;  %vm1083_vm7 = vcmp.eq.s32.totalorder %v4519_v48, %v5040_v34 }
 0x2a7   : > { %vm5286_vm6 = vmand %vm409_vm2, %vm489_vm1  ;;  %vm937_vm1 = vcmp.eq.s32.totalorder %v4840_v6, 1  ;;  %vm859_vm2 = vcmp.eq.s32.totalorder %v4519_v48, %v5965_v47 }
 0x2a8   : > { %v2875_v7 = vsel %vm5286_vm6, 1.0, %v3666_v16  ;;  %vm1609_vm6 = vcmp.eq.s32.totalorder %v5069_v43, 1  ;;  %v5981_v43 = vld [vmem:[#allocation74_spill] sm:$0xff] }
 0x2a9   : > { %v1142_v40 = vpop.permute.xlu1 %1141 }
 0x2aa   : > { %vm1164_vm13 = vcmp.eq.s32.totalorder %v1142_v40, 1  ;;  %1595 = vperm.xlu1 %3516, %v1550_v12   ;;  %v5961_v12 = vld [vmem:[#allocation10_spill] sm:$0xff] }
 0x2ab   : > { %vm1180_vm3 = vmand %vm1084_vm11, %vm1164_vm13  ;;  %vm2056_vm11 = vcmp.eq.s32.totalorder %v2026_v32, 1  ;;  %vm633_vm5 = vcmp.eq.s32.totalorder %v4519_v48, %v5961_v12  ;;  %v5966_v40 = vld [vmem:[#allocation22_spill] sm:$0xff] }
 0x2ac   : > { %v2926_v5 = vsel %vm1180_vm3, 1.0, %v3666_v16  ;;  %vm411_vm3 = vcmp.eq.s32.totalorder %v4519_v48, %v5960_v31  ;;  %v2402_v12 = vld [vmem:[%s5743_s3 + $0x8] sm:$0xff] }
 0x2ad   : > { %v5269_v26 = vadd.f32 %v2926_v5, %v1004_v53  ;;  %v1584_v25 = vpop.permute.xlu1 %1583  ;;  %vm5305_vm12 = vmand %vm411_vm3, %vm491_vm4  ;;  %vm857_vm3 = vcmp.eq.s32.totalorder %v4519_v48, %v5966_v40  ;;  %v5973_v53 = vld [vmem:[#allocation39_spill] sm:$0xff]  ;;  %v5988_v5 = vld [vmem:[#allocation14_spill] sm:$0xff] }
 0x2ae   : > { %vm1610_vm14 = vcmp.eq.s32.totalorder %v1584_v25, 1  ;;  %3517 = vset.pattern.permute.xlu1 %v5823_v23  ;;  %vm729_vm4 = vmand %vm633_vm5, %vm713_vm9  ;;  %vm1387_vm5 = vcmp.eq.s32.totalorder %v5094_v63, 1  ;;  %vm1081_vm9 = vcmp.eq.s32.totalorder %v4519_v48, %v4918_v28  ;;  %v2877_v28 = vsel %vm5305_vm12, 1.0, %v3666_v16  ;;  %v5977_v25 = vld [vmem:[#allocation55_spill] sm:$0xff] }
 0x2af   : > { %vm1626_vm0 = vmand %vm1530_vm10, %vm1610_vm14  ;;  %1957 = vperm.xlu1 %3517, %v4892_v60   ;;  %v1672_v60 = vadd.f32 %v2954_v51, %v1448_v19  ;;  %vm939_vm14 = vcmp.eq.s32.totalorder %v4968_v14, 1  ;;  %v2891_v54 = vsel %vm729_vm4, 1.0, %v3666_v16 }
 0x2b0   : > { %v2956_v62 = vsel %vm1626_vm0, 1.0, %v3666_v16  ;;  %vm731_vm0 = vmand %vm635_vm15, %vm715_vm8  ;;  %v777_v42 = vadd.f32 %v2891_v54, %v2875_v7  ;;  %v2403_v54 = vld [vmem:[%s5743_s3 + $0x10] sm:$0xff] }
 0x2b1   : > { %v5279_v2 = vadd.f32 %v2956_v62, %v1450_v56  ;;  %v1896_v35 = vadd.f32 %v2970_v13, %v1672_v60  ;;  %vm5325_vm15 = vmand %vm859_vm2, %vm939_vm14  ;;  %v2893_v6 = vsel %vm731_vm0, 1.0, %v3666_v16  ;;  %vm1385_vm14 = vcmp.eq.s32.totalorder %v4973_v27, 1  ;;  %v5980_v62 = vld [vmem:[#allocation57_spill] sm:$0xff]  ;;  %v5982_v13 = vld [vmem:[#allocation82_spill] sm:$0xff] }
 0x2b2   : > { %v1946_v21 = vpop.permute.xlu1 %1945  ;;  %vm5331_vm8 = vmand %vm857_vm3, %vm937_vm1  ;;  %vm1307_vm1 = vcmp.eq.s32.totalorder %v4519_v48, %v5973_v53  ;;  %v779_v36 = vadd.f32 %v2893_v6, %v2877_v28  ;;  %v3302_v7 = vpack.c.bf16 %v2404_v20, %v2403_v54  ;;  %v1366_v53 = vpop.permute.xlu0 %1365 }
 0x2b3   : > { %vm1976_vm13 = vcmp.eq.s32.totalorder %v4519_v48, %v1946_v21  ;;  %3518 = vset.pattern.permute.xlu1 %v5959_v37  ;;  %v2907_v58 = vsel %vm5331_vm8, 1.0, %v3666_v16  ;;  %vm5372_vm12 = vmand %vm1307_vm1, %vm1387_vm5  ;;  %vm1833_vm5 = vcmp.eq.s32.totalorder %v5255_v33, 1  ;;  %vm414_vm1 = vcmp.eq.s32.totalorder %v4519_v48, %v5981_v43 }
 0x2b4   : > { %vm2072_vm10 = vmand %vm1976_vm13, %vm2056_vm11  ;;  %1518 = vperm.xlu1 %3518, %v5065_v4   ;;  %vm1163_vm11 = vcmp.eq.s32.totalorder %v5054_v49, 1  ;;  %vm1917_vm13 = vcmp.gt.f32.partialorder %v4844_v44, 7.0  ;;  %v2909_v49 = vsel %vm5325_vm15, 1.0, %v3666_v16  ;;  %v5974_v44 = vld [vmem:[#allocation37_spill] sm:$0xff]  ;;  %vm1753_vm15 = vcmp.eq.s32.totalorder %v4519_v48, %v5117_v3 }
 0x2b5   : > { %v2986_v11 = vsel %vm2072_vm10, 1.0, %v3666_v16  ;;  %vm1161_vm10 = vcmp.eq.s32.totalorder %v4934_v17, 1  ;;  %vm5344_vm0 = vmand %vm1083_vm7, %vm1163_vm11  ;;  %v1997_v34 = vsel %vm1917_vm13, 1, %v3659_v1  ;;  %vm1305_vm4 = vcmp.eq.s32.totalorder %v4519_v48, %v5974_v44  ;;  %v2405_v44 = vld [vmem:[%s5743_s3 + $0x20] sm:$0xff] }
 0x2b6   : > { %v2120_v45 = vadd.f32 %v2986_v11, %v1896_v35  ;;  %vm1177_vm2 = vmand %vm1081_vm9, %vm1161_vm10  ;;  %v2925_v50 = vsel %vm5344_vm0, 1.0, %v3666_v16  ;;  %vm1529_vm10 = vcmp.eq.s32.totalorder %v4519_v48, %v5977_v25  ;;  %v1003_v61 = vadd.f32 %v2909_v49, %v779_v36  ;;  %v2406_v36 = vld [vmem:[%s5743_s3 + $0x28] sm:$0xff] }
 0x2b7   : > { %v1065_v14 = vpop.permute.xlu1 %1064  ;;  %vm1401_vm11 = vmand %vm1305_vm4, %vm1385_vm14  ;;  %v2923_v63 = vsel %vm1177_vm2, 1.0, %v3666_v16  ;;  %v1001_v38 = vadd.f32 %v2907_v58, %v777_v42  ;;  %v2941_v51 = vsel %vm5372_vm12, 1.0, %v3666_v16  ;;  %vm1531_vm9 = vcmp.eq.s32.totalorder %v4519_v48, %v5980_v62  ;;  %v3586_v62 = vld [vmem:[%s3800_s20] sm:$0xff] }
 0x2b8   : > { %3519 = vset.pattern.permute.xlu1 %v3659_v1  ;;  %3142 = vmatprep.mubr.f32.mxu0 %v2120_v45  ;;  %vm1085_vm13 = vcmp.eq.s32.totalorder %v4519_v48, %v1065_v14  ;;  %vm1625_vm7 = vmand %vm1529_vm10, %vm1609_vm6  ;;  %v2939_v56 = vsel %vm1401_vm11, 1.0, %v3666_v16  ;;  %v1227_v22 = vadd.f32 %v2925_v50, %v1003_v61  ;;  %vm494_vm2 = vcmp.eq.s32.totalorder %v5982_v13, 1  ;;  %v3585_v14 = vld [vmem:[%s3800_s20 + $0x70] sm:$0xff]  ;;  %v5990_v50 = vld [vmem:[#allocation25_spill] sm:$0xff] }
 0x2b9   : > { %1598 = vperm.xlu1 %3519, %v1551_v39   ;;  %v1225_v3 = vadd.f32 %v2923_v63, %v1001_v38  ;;  %vm1849_vm14 = vmand %vm1753_vm15, %vm1833_vm5  ;;  %v2955_v30 = vsel %vm1625_vm7, 1.0, %v3666_v16  ;;  %vm718_vm6 = vcmp.eq.s32.totalorder %v5983_v29, 1  ;;  %vm2057_vm10 = vcmp.eq.s32.totalorder %v2029_v15, 1  ;;  %v2407_v61 = vld [vmem:[%s5743_s3 + $0x30] sm:$0xff]  ;;  %v5991_v38 = vld [vmem:[#allocation13_spill] sm:$0xff] }
 0x2ba   : > { %v1451_v33 = vadd.f32 %v2941_v51, %v1227_v22  ;;  %v2971_v60 = vsel %vm1849_vm14, 1.0, %v3666_v16  ;;  %vm5413_vm11 = vmand %vm414_vm1, %vm494_vm2  ;;  %vm1918_vm5 = vcmp.gt.f32.partialorder %v3585_v14, 7.0  ;;  %vm1388_vm1 = vcmp.eq.s32.totalorder %v1366_v53, 1  ;;  %v2409_v22 = vld [vmem:[%s5743_s3 + $0x40] sm:$0xff]  ;;  %v2411_v29 = vld [vmem:[%s5743_s3 + $0x50] sm:$0xff] }
 0x2bb   : > { %v1449_v59 = vadd.f32 %v2939_v56, %v1225_v3  ;;  %v2880_v45 = vsel %vm5413_vm11, 1.0, %v3666_v16  ;;  %v1998_v41 = vsel %vm1918_vm5, 1, %v3659_v1  ;;  %v3306_v58 = vpack.c.bf16 %v2406_v36, %v2405_v44  ;;  %v5993_v15 = vld [vmem:[#allocation41_spill] sm:$0xff]  ;;  %v3592_v53 = vld [vmem:[%s3800_s20 + $0x58] sm:$0xff] }
 0x2bc   : > { %v1145_v17 = vpop.permute.xlu1 %1144  ;;  %vm493_vm11 = vcmp.eq.s32.totalorder %v5990_v50, 1 }
 0x2bd   : > { %vm1165_vm3 = vcmp.eq.s32.totalorder %v1145_v17, 1  ;;  %2040 = vperm.xlu1 %3519, %v1997_v34   ;;  %v1673_v37 = vadd.f32 %v2955_v30, %v1449_v59  ;;  %v5989_v17 = vld [vmem:[#allocation52_spill] sm:$0xff] }
 0x2be   : > { %vm5387_vm8 = vmand %vm1085_vm13, %vm1165_vm3  ;;  %vm1695_vm13 = vcmp.gt.f32.partialorder %v5294_v46, 6.0  ;;  %v2412_v59 = vld [vmem:[%s5743_s3 + $0x58] sm:$0xff] }
 0x2bf   : > { %v1897_v55 = vadd.f32 %v2971_v60, %v1673_v37  ;;  %v1775_v11 = vsel %vm1695_vm13, 1, %v3659_v1  ;;  %vm941_vm13 = vcmp.eq.s32.totalorder %v5092_v57, 1  ;;  %v3587_v60 = vld [vmem:[%s3800_s20 + $0x8] sm:$0xff]  ;;  %v3318_v52 = vpack.c.bf16 %v2412_v59, %v2411_v29 }
 0x2c0   : > { %v1587_v19 = vpop.permute.xlu1 %1586 }
 0x2c1   : > { %vm1611_vm0 = vcmp.eq.s32.totalorder %v1587_v19, 1  ;;  %3521 = vset.pattern.permute.xlu1 %v5807_v0  ;;  %v5984_v0 = vld [vmem:[#allocation40_spill] sm:$0xff]  ;;  %v2410_v19 = vld [vmem:[%s5743_s3 + $0x48] sm:$0xff] }
 0x2c2   : > { %vm1627_vm4 = vmand %vm1531_vm9, %vm1611_vm0  ;;  %1739 = vperm.xlu1 %3521, %v5015_v10   ;;  %vm638_vm12 = vcmp.eq.s32.totalorder %v4519_v48, %v5984_v0  ;;  %v2401_v10 = vld [vmem:[%s5743_s3] sm:$0xff]  ;;  %vm862_vm9 = vcmp.eq.s32.totalorder %v4519_v48, %v5987_v18  ;;  %v3314_v43 = vpack.c.bf16 %v2410_v19, %v2409_v22  ;;  %v3590_v18 = vld [vmem:[%s3800_s20 + $0x38] sm:$0xff] }
 0x2c3   : > { %v2957_v32 = vsel %vm1627_vm4, 1.0, %v3666_v16  ;;  %vm734_vm3 = vmand %vm638_vm12, %vm718_vm6  ;;  %v3298_v35 = vpack.c.bf16 %v2402_v12, %v2401_v10  ;;  %vm637_vm6 = vcmp.eq.s32.totalorder %v4519_v48, %v5988_v5  ;;  %vm717_vm12 = vcmp.eq.s32.totalorder %v5989_v17, 1  ;;  %v2414_v10 = vld [vmem:[%s5743_s3 + $0x68] sm:$0xff]  ;;  %v5994_v5 = vld [vmem:[#allocation16_spill] sm:$0xff] }
 0x2c4   : > { %v5409_v21 = vadd.f32 %v2957_v32, %v1451_v33  ;;  %v2896_v39 = vsel %vm734_vm3, 1.0, %v3666_v16  ;;  %vm413_vm3 = vcmp.eq.s32.totalorder %v4519_v48, %v5991_v38  ;;  %v2927_v33 = vsel %vm5387_vm8, 1.0, %v3666_v16  ;;  %v5995_v17 = vld [vmem:[#allocation54_spill] sm:$0xff] }
 0x2c5   : > { %v1949_v31 = vpop.permute.xlu1 %1948  ;;  %3299 = vmatprep.subr.bf16.mxu1 %v3298_v35  ;;  %v782_v6 = vadd.f32 %v2896_v39, %v2880_v45  ;;  %v2416_v45 = vld [vmem:[%s5743_s3 + $0x78] sm:$0xff]  ;;  %v3589_v39 = vld [vmem:[%s3800_s20 + $0x28] sm:$0xff] }
 0x2c6   : > { %vm1977_vm15 = vcmp.eq.s32.totalorder %v4519_v48, %v1949_v31  ;;  %1742 = vperm.xlu1 %3521, %v5065_v4   ;;  %3301 = vmatpush3.bf16.msra.mxu1 %v3298_v35  ;;  %v2413_v31 = vld [vmem:[%s5743_s3 + $0x60] sm:$0xff] }
 0x2c7   : > { %vm2073_vm7 = vmand %vm1977_vm15, %vm2057_vm10  ;;  %3303 = vmatprep.subr.bf16.mxu1 %v3302_v7  ;;  %v3322_v35 = vpack.c.bf16 %v2414_v10, %v2413_v31  ;;  %v5999_v31 = vld [vmem:[#allocation59_spill] sm:$0xff]  ;;  %v6000_v10 = vld [vmem:[#allocation42_spill] sm:$0xff] }
 0x2c8   : > { %v2987_v9 = vsel %vm2073_vm7, 1.0, %v3666_v16  ;;  %vm733_vm10 = vmand %vm637_vm6, %vm717_vm12 }
 0x2c9   : > { %v2121_v47 = vadd.f32 %v2987_v9, %v1897_v55  ;;  %vm509_vm15 = vmand %vm413_vm3, %vm493_vm11  ;;  %v2895_v56 = vsel %vm733_vm10, 1.0, %v3666_v16  ;;  %v3588_v55 = vld [vmem:[%s3800_s20 + $0x18] sm:$0xff]  ;;  %vm639_vm11 = vcmp.eq.s32.totalorder %v4519_v48, %v5994_v5 }
 0x2ca   : > { %3522 = vset.pattern.permute.xlu1 %v3659_v1  ;;  %v924_v40 = vpop.permute.xlu1 %923  ;;  %3305 = vmatpush3.bf16.msra.mxu1 %v3302_v7  ;;  %v2879_v13 = vsel %vm509_vm15, 1.0, %v3666_v16 }
 0x2cb   : > { %vm942_vm14 = vcmp.eq.s32.totalorder %v924_v40, 1  ;;  %1822 = vperm.xlu1 %3522, %v1775_v11   ;;  %3143 = vmatmul.mubr.f32.gmra.mrb[8].mxu0 %v2121_v47  ;;  %v2415_v11 = vld [vmem:[%s5743_s3 + $0x70] sm:$0xff]  ;;  %v1808_v40 = vpop.permute.xlu0 %1807 }
 0x2cc   : > { %vm958_vm0 = vmand %vm862_vm9, %vm942_vm14  ;;  %3307 = vmatprep.subr.bf16.mxu1 %v3306_v58  ;;  %vm1309_vm9 = vcmp.eq.s32.totalorder %v4519_v48, %v5993_v15  ;;  %v3326_v47 = vpack.c.bf16 %v2416_v45, %v2415_v11  ;;  %vm1834_vm6 = vcmp.eq.s32.totalorder %v1808_v40, 1 }
 0x2cd   : > { %v2912_v34 = vsel %vm958_vm0, 1.0, %v3666_v16 }
 0x2ce   : > { %v5444_v28 = vadd.f32 %v2912_v34, %v782_v6  ;;  %3309 = vmatpush3.bf16.msra.mxu1 %v3306_v58  ;;  %v3593_v58 = vld [vmem:[%s3800_s20 + $0x68] sm:$0xff] }
 0x2cf   : > { %2043 = vperm.xlu1 %3522, %v1998_v41   ;;  %v1286_v49 = vpop.permute.xlu1 %1285  ;;  %v3591_v41 = vld [vmem:[%s3800_s20 + $0x48] sm:$0xff]  ;;  %v1811_v54 = vpop.permute.xlu0 %1810 }
 0x2d0   : > { %vm1308_vm2 = vcmp.eq.s32.totalorder %v4519_v48, %v1286_v49 }
 0x2d1   : > { %vm1404_vm4 = vmand %vm1308_vm2, %vm1388_vm1 }
 0x2d2   : > { %v2942_v42 = vsel %vm1404_vm4, 1.0, %v3666_v16 }
 0x2d3   : > { %v5459_v25 = vadd.f32 %v2942_v42, %v5269_v26  ;;  %3524 = vset.pattern.permute.xlu1 %v5823_v23  ;;  %v2408_v26 = vld [vmem:[%s5743_s3 + $0x38] sm:$0xff]  ;;  %v2032_v44 = vpop.permute.xlu0 %2031 }
 0x2d4   : > { %1966 = vperm.xlu1 %3524, %v5065_v4   ;;  %v5464_v63 = vpop.permute.xlu1 %1727  ;;  %v3310_v57 = vpack.c.bf16 %v2408_v26, %v2407_v61  ;;  %v5992_v4 = vld [vmem:[#allocation26_spill] sm:$0xff]  ;;  %vm2058_vm3 = vcmp.eq.s32.totalorder %v2032_v44, 1  ;;  %v5998_v26 = vld [vmem:[#allocation28_spill] sm:$0xff] }
 0x2d5   : > { %v5474_v23 = vpop.f32.mrb[2].mxu0  ;;  %vm861_vm7 = vcmp.eq.s32.totalorder %v4519_v48, %v5992_v4  ;;  %vm1754_vm2 = vcmp.eq.s32.totalorder %v4519_v48, %v5464_v63  ;;  %v5997_v63 = vld [vmem:[#allocation15_spill] sm:$0xff] }
 0x2d6   : > { %v5478_v51 = vpop.f32.mrb[3].mxu0  ;;  %vm957_vm5 = vmand %vm861_vm7, %vm941_vm13  ;;  %3311 = vmatprep.subr.bf16.mxu1 %v3310_v57  ;;  %vm719_vm13 = vcmp.eq.s32.totalorder %v5995_v17, 1  ;;  %v6003_v17 = vld [vmem:[#allocation63_spill] sm:$0xff] }
 0x2d7   : > { %3313 = vmatpush3.bf16.msra.mxu1 %v3310_v57  ;;  %v2911_v30 = vsel %vm957_vm5, 1.0, %v3666_v16  ;;  %vm1850_vm12 = vmand %vm1754_vm2, %vm1834_vm6 }
 0x2d8   : > { %3525 = vset.pattern.permute.xlu1 %v3659_v1  ;;  %v781_v1 = vadd.f32 %v2895_v56, %v2879_v13  ;;  %3315 = vmatprep.subr.bf16.mxu1 %v3314_v43  ;;  %v2972_v49 = vsel %vm1850_vm12, 1.0, %v3666_v16  ;;  %v2035_v13 = vpop.permute.xlu0 %2034 }
 0x2d9   : > { %2291 = vperm.xlu1 %3525, %v3586_v62   ;;  %v5489_v3 = vpop.permute.xlu1 %926  ;;  %v1898_v42 = vadd.f32 %v2972_v49, %v5279_v2 }
 0x2da   : > { %v1005_v32 = vadd.f32 %v2911_v30, %v781_v1  ;;  %vm943_vm5 = vcmp.eq.s32.totalorder %v5489_v3, 1 }
 0x2db   : > { %3317 = vmatpush3.bf16.msra.mxu1 %v3314_v43 }
 0x2dc   : > { %v1229_v27 = vadd.f32 %v2927_v33, %v1005_v32  ;;  %3319 = vmatprep.subr.bf16.mxu1 %v3318_v52 }
 0x2dd   : > { %2296 = vperm.xlu1 %3525, %v3587_v60   ;;  %v1369_v0 = vpop.permute.xlu1 %1368 }
 0x2de   : > { %vm1389_vm14 = vcmp.eq.s32.totalorder %v1369_v0, 1 }
 0x2df   : > { %vm1405_vm8 = vmand %vm1309_vm9, %vm1389_vm14  ;;  %3321 = vmatpush3.bf16.msra.mxu1 %v3318_v52  ;;  %vm415_vm9 = vcmp.eq.s32.totalorder %v4519_v48, %v5997_v63 }
 0x2e0   : > { %v2943_v37 = vsel %vm1405_vm8, 1.0, %v3666_v16  ;;  %3323 = vmatprep.subr.bf16.mxu1 %v3322_v35  ;;  %vm735_vm14 = vmand %vm639_vm11, %vm719_vm13  ;;  %vm1835_vm11 = vcmp.eq.s32.totalorder %v1811_v54, 1 }
 0x2e1   : > { %v5512_v12 = vadd.f32 %v2943_v37, %v1229_v27  ;;  %2306 = vperm.xlu1 %3525, %v3588_v55   ;;  %v2897_v2 = vsel %vm735_vm14, 1.0, %v3666_v16 }
 0x2e2   : > { %v5515_v9 = vpop.permute.xlu1 %1730 }
 0x2e3   : > { %3325 = vmatpush3.bf16.msra.mxu1 %v3322_v35  ;;  %vm1755_vm6 = vcmp.eq.s32.totalorder %v4519_v48, %v5515_v9 }
 0x2e4   : > { %3327 = vmatprep.subr.bf16.mxu1 %v3326_v47  ;;  %vm1851_vm13 = vmand %vm1755_vm6, %vm1835_vm11 }
 0x2e5   : > { %2316 = vperm.xlu1 %3525, %v3589_v39   ;;  %v2973_v43 = vsel %vm1851_vm13, 1.0, %v3666_v16 }
 0x2e6   : > { %v1899_v1 = vadd.f32 %v2973_v43, %v5409_v21  ;;  %v1375_v21 = vpop.permute.xlu0 %1374 }
 0x2e7   : > { %v1068_v14 = vpop.permute.xlu1 %1067  ;;  %3329 = vmatpush3.bf16.msra.mxu1 %v3326_v47 }
 0x2e8   : > { %vm1086_vm0 = vcmp.eq.s32.totalorder %v4519_v48, %v1068_v14 }
 0x2e9   : > { %2326 = vperm.xlu1 %3525, %v3590_v18  }
 0x2ea   : > { %v2038_v11 = vpop.permute.xlu0 %2037 }
 0x2ec   : > { %v1148_v6 = vpop.permute.xlu1 %1147 }
 0x2ed   : > { %vm1166_vm1 = vcmp.eq.s32.totalorder %v1148_v6, 1  ;;  %2336 = vperm.xlu1 %3525, %v3591_v41   ;;  %v6001_v6 = vld [vmem:[#allocation61_spill] sm:$0xff] }
 0x2ee   : > { %vm1182_vm4 = vmand %vm1086_vm0, %vm1166_vm1  ;;  %vm863_vm0 = vcmp.eq.s32.totalorder %v4519_v48, %v5998_v26 }
 0x2ef   : > { %v2928_v20 = vsel %vm1182_vm4, 1.0, %v3666_v16  ;;  %vm959_vm1 = vmand %vm863_vm0, %vm943_vm5  ;;  %vm1532_vm5 = vcmp.eq.s32.totalorder %v4519_v48, %v5999_v31 }
 0x2f0   : > { %v5531_v34 = vadd.f32 %v2928_v20, %v5444_v28  ;;  %v5533_v7 = vpop.permute.xlu1 %1589  ;;  %v5996_v28 = vld [vmem:[#allocation27_spill] sm:$0xff]  ;;  %v2913_v4 = vsel %vm959_vm1, 1.0, %v3666_v16  ;;  %vm2060_vm1 = vcmp.eq.s32.totalorder %v2038_v11, 1 }
 0x2f1   : > { %2346 = vperm.xlu1 %3525, %v3592_v53   ;;  %vm495_vm15 = vcmp.eq.s32.totalorder %v5996_v28, 1  ;;  %v6002_v53 = vld [vmem:[#allocation65_spill] sm:$0xff] }
 0x2f2   : > { %vm511_vm8 = vmand %vm415_vm9, %vm495_vm15 }
 0x2f3   : > { %v2881_v57 = vsel %vm511_vm8, 1.0, %v3666_v16  ;;  %vm1756_vm8 = vcmp.eq.s32.totalorder %v4519_v48, %v6000_v10 }
 0x2f4   : > { %v783_v56 = vadd.f32 %v2897_v2, %v2881_v57  ;;  %v6004_v57 = vld [vmem:[#allocation67_spill] sm:$0xff] }
 0x2f5   : > { %v1952_v36 = vpop.permute.xlu1 %1951  ;;  %2356 = vperm.xlu1 %3525, %v3593_v58  }
 0x2f6   : > { %vm1978_vm10 = vcmp.eq.s32.totalorder %v4519_v48, %v1952_v36  ;;  %v1007_v19 = vadd.f32 %v2913_v4, %v783_v56 }
 0x2f7   : > { %vm2074_vm7 = vmand %vm1978_vm10, %vm2058_vm3  ;;  %vm2059_vm3 = vcmp.eq.s32.totalorder %v2035_v13, 1 }
 0x2f8   : > { %v2988_v50 = vsel %vm2074_vm7, 1.0, %v3666_v16  ;;  %vm1612_vm7 = vcmp.eq.s32.totalorder %v5533_v7, 1 }
 0x2f9   : > { %v2122_v61 = vadd.f32 %v2988_v50, %v1898_v42  ;;  %2366 = vperm.xlu1 %3525, %v5294_v46   ;;  %vm1628_vm14 = vmand %vm1532_vm5, %vm1612_vm7 }
 0x2fa   : > { %v1071_v38 = vpop.permute.xlu1 %1070  ;;  %v2958_v35 = vsel %vm1628_vm14, 1.0, %v3666_v16 }
 0x2fb   : > { %3145 = vmatprep.mubr.f32.mxu0 %v2122_v61  ;;  %vm1087_vm2 = vcmp.eq.s32.totalorder %v4519_v48, %v1071_v38  ;;  %v1676_v45 = vadd.f32 %v2958_v35, %v5459_v25 }
 0x2ff   : > { %v1151_v22 = vpop.permute.xlu1 %1150 }
 0x300   : > { %vm1167_vm4 = vcmp.eq.s32.totalorder %v1151_v22, 1 }
 0x301   : > { %vm1183_vm12 = vmand %vm1087_vm2, %vm1167_vm4 }
 0x302   : > { %v2929_v46 = vsel %vm1183_vm12, 1.0, %v3666_v16  ;;  %vm1533_vm12 = vcmp.eq.s32.totalorder %v4519_v48, %v6001_v6 }
 0x303   : > { %v5558_v62 = vadd.f32 %v2929_v46, %v1007_v19  ;;  %v1593_v3 = vpop.permute.xlu1 %1592 }
 0x304   : > { %vm1613_vm6 = vcmp.eq.s32.totalorder %v1593_v3, 1 }
 0x305   : > { %vm1629_vm13 = vmand %vm1533_vm12, %vm1613_vm6 }
 0x306   : > { %v2959_v41 = vsel %vm1629_vm13, 1.0, %v3666_v16 }
 0x307   : > { %v1677_v20 = vadd.f32 %v2959_v41, %v5512_v12  ;;  %v1820_v12 = vpop.permute.xlu0 %1819 }
 0x308   : > { %v1955_v30 = vpop.permute.xlu1 %1954  ;;  %vm1838_vm12 = vcmp.eq.s32.totalorder %v1820_v12, 1 }
 0x309   : > { %vm1979_vm10 = vcmp.eq.s32.totalorder %v4519_v48, %v1955_v30 }
 0x30a   : > { %vm2075_vm15 = vmand %vm1979_vm10, %vm2059_vm3 }
 0x30b   : > { %v2989_v33 = vsel %vm2075_vm15, 1.0, %v3666_v16  ;;  %vm1981_vm15 = vcmp.eq.s32.totalorder %v4519_v48, %v6002_v53  ;;  %v2047_v3 = vpop.permute.xlu0 %2046 }
 0x30c   : > { %v2123_v29 = vadd.f32 %v2989_v33, %v1899_v1 }
 0x30d   : > { %v1292_v59 = vpop.permute.xlu1 %1291 }
 0x30e   : > { %3146 = vmatmul.mubr.f32.gmra.mrb[10].mxu0 %v2123_v29  ;;  %vm1310_vm14 = vcmp.eq.s32.totalorder %v4519_v48, %v1292_v59 }
 0x30f   : > { %v2302_v59 = vpop.permute.xlu0 %2301 }
 0x312   : > { %v1372_v32 = vpop.permute.xlu1 %1371 }
 0x316   : > { %v1814_v60 = vpop.permute.xlu1 %1813 }
 0x317   : > { %vm1836_vm9 = vcmp.eq.s32.totalorder %v1814_v60, 1 }
 0x318   : > { %v5564_v0 = vpop.f32.mrb[4].mxu0  ;;  %vm1852_vm0 = vmand %vm1756_vm8, %vm1836_vm9  ;;  %vm1390_vm9 = vcmp.eq.s32.totalorder %v1372_v32, 1 }
 0x319   : > { %v5566_v52 = vpop.f32.mrb[5].mxu0  ;;  %v2974_v9 = vsel %vm1852_vm0, 1.0, %v3666_v16  ;;  %vm1406_vm0 = vmand %vm1310_vm14, %vm1390_vm9  ;;  %vm1982_vm14 = vcmp.eq.s32.totalorder %v4519_v48, %v6004_v57 }
 0x31a   : > { %v1900_v47 = vadd.f32 %v2974_v9, %v1676_v45  ;;  %v2944_v28 = vsel %vm1406_vm0, 1.0, %v3666_v16 }
 0x31b   : > { %v1295_v15 = vpop.permute.xlu1 %1294  ;;  %v1454_v63 = vadd.f32 %v2944_v28, %v5531_v34  ;;  %v2591_v28 = vld [vmem:[%s5745_s5 + $0x30] sm:$0xff] }
 0x320   : > { %v1737_v27 = vpop.permute.xlu1 %1736 }
 0x321   : > { %vm1757_vm3 = vcmp.eq.s32.totalorder %v4519_v48, %v1737_v27 }
 0x325   : > { %v1817_v37 = vpop.permute.xlu1 %1816 }
 0x326   : > { %vm1837_vm11 = vcmp.eq.s32.totalorder %v1817_v37, 1 }
 0x327   : > { %vm1853_vm10 = vmand %vm1757_vm3, %vm1837_vm11  ;;  %vm1391_vm11 = vcmp.eq.s32.totalorder %v1375_v21, 1 }
 0x328   : > { %v2975_v54 = vsel %vm1853_vm10, 1.0, %v3666_v16 }
 0x329   : > { %v1596_v55 = vpop.permute.xlu1 %1595  ;;  %v1901_v49 = vadd.f32 %v2975_v54, %v1677_v20  ;;  %v2588_v54 = vld [vmem:[%s5745_s5 + $0x18] sm:$0xff] }
 0x32a   : > { %vm1614_vm8 = vcmp.eq.s32.totalorder %v1596_v55, 1 }
 0x32e   : > { %v1958_v39 = vpop.permute.xlu1 %1957 }
 0x32f   : > { %vm1980_vm2 = vcmp.eq.s32.totalorder %v4519_v48, %v1958_v39 }
 0x330   : > { %vm2076_vm4 = vmand %vm1980_vm2, %vm2060_vm1  ;;  %vm1534_vm1 = vcmp.eq.s32.totalorder %v4519_v48, %v6003_v17  ;;  %v2590_v17 = vld [vmem:[%s5745_s5 + $0x28] sm:$0xff] }
 0x331   : > { %v2990_v14 = vsel %vm2076_vm4, 1.0, %v3666_v16  ;;  %vm1311_vm4 = vcmp.eq.s32.totalorder %v4519_v48, %v1295_v15  ;;  %vm1630_vm6 = vmand %vm1534_vm1, %vm1614_vm8  ;;  %v2312_v15 = vpop.permute.xlu0 %2311 }
 0x332   : > { %v2124_v40 = vadd.f32 %v2990_v14, %v1900_v47  ;;  %vm1407_vm10 = vmand %vm1311_vm4, %vm1391_vm11  ;;  %v2960_v50 = vsel %vm1630_vm6, 1.0, %v3666_v16 }
 0x333   : > { %v1519_v18 = vpop.permute.xlu1 %1518  ;;  %v2945_v26 = vsel %vm1407_vm10, 1.0, %v3666_v16  ;;  %v1678_v38 = vadd.f32 %v2960_v50, %v1454_v63  ;;  %v2593_v63 = vld [vmem:[%s5745_s5 + $0x40] sm:$0xff] }
 0x334   : > { %3148 = vmatprep.mubr.f32.mxu0 %v2124_v40  ;;  %v1455_v56 = vadd.f32 %v2945_v26, %v5558_v62  ;;  %v2595_v26 = vld [vmem:[%s5745_s5 + $0x50] sm:$0xff] }
 0x335   : > { %v2322_v21 = vpop.permute.xlu0 %2321 }
 0x338   : > { %v1599_v25 = vpop.permute.xlu1 %1598 }
 0x339   : > { %vm1615_vm13 = vcmp.eq.s32.totalorder %v1599_v25, 1  ;;  %v2332_v25 = vpop.permute.xlu0 %2331 }
 0x33c   : > { %v2041_v7 = vpop.permute.xlu1 %2040 }
 0x33d   : > { %vm2061_vm7 = vcmp.eq.s32.totalorder %v2041_v7, 1 }
 0x33e   : > { %vm2077_vm5 = vmand %vm1981_vm15, %vm2061_vm7  ;;  %vm1535_vm15 = vcmp.eq.s32.totalorder %v4519_v48, %v1519_v18 }
 0x33f   : > { %v2991_v44 = vsel %vm2077_vm5, 1.0, %v3666_v16  ;;  %vm1631_vm5 = vmand %vm1535_vm15, %vm1615_vm13 }
 0x340   : > { %v2125_v36 = vadd.f32 %v2991_v44, %v1901_v49  ;;  %v2961_v4 = vsel %vm1631_vm5, 1.0, %v3666_v16 }
 0x341   : > { %v1740_v58 = vpop.permute.xlu1 %1739  ;;  %v1679_v43 = vadd.f32 %v2961_v4, %v1455_v56  ;;  %v2597_v4 = vld [vmem:[%s5745_s5 + $0x60] sm:$0xff] }
 0x342   : > { %3149 = vmatmul.mubr.f32.gmra.mrb[12].mxu0 %v2125_v36  ;;  %vm1758_vm2 = vcmp.eq.s32.totalorder %v4519_v48, %v1740_v58 }
 0x343   : > { %vm1854_vm3 = vmand %vm1758_vm2, %vm1838_vm12  ;;  %vm2063_vm2 = vcmp.eq.s32.totalorder %v2047_v3, 1 }
 0x344   : > { %v2976_v61 = vsel %vm1854_vm3, 1.0, %v3666_v16 }
 0x345   : > { %v1743_v5 = vpop.permute.xlu1 %1742  ;;  %v1902_v34 = vadd.f32 %v2976_v61, %v1678_v38  ;;  %v2594_v61 = vld [vmem:[%s5745_s5 + $0x48] sm:$0xff] }
 0x346   : > { %vm1759_vm9 = vcmp.eq.s32.totalorder %v4519_v48, %v1743_v5  ;;  %v2589_v5 = vld [vmem:[%s5745_s5 + $0x20] sm:$0xff]  ;;  %v3346_v38 = vpack.c.bf16 %v2594_v61, %v2593_v63 }
 0x347   : > { %v3338_v12 = vpack.c.bf16 %v2590_v17, %v2589_v5 }
 0x34a   : > { %v1823_v42 = vpop.permute.xlu1 %1822 }
 0x34b   : > { %vm1839_vm7 = vcmp.eq.s32.totalorder %v1823_v42, 1  ;;  %v2592_v42 = vld [vmem:[%s5745_s5 + $0x38] sm:$0xff] }
 0x34c   : > { %vm1855_vm8 = vmand %vm1759_vm9, %vm1839_vm7  ;;  %v3342_v50 = vpack.c.bf16 %v2592_v42, %v2591_v28 }
 0x34d   : > { %v2977_v19 = vsel %vm1855_vm8, 1.0, %v3666_v16 }
 0x34e   : > { %v2044_v2 = vpop.permute.xlu1 %2043  ;;  %v1903_v30 = vadd.f32 %v2977_v19, %v1679_v43  ;;  %v2600_v19 = vld [vmem:[%s5745_s5 + $0x78] sm:$0xff]  ;;  %v2342_v43 = vpop.permute.xlu0 %2341 }
 0x34f   : > { %vm2062_vm0 = vcmp.eq.s32.totalorder %v2044_v2, 1  ;;  %v2596_v2 = vld [vmem:[%s5745_s5 + $0x58] sm:$0xff] }
 0x350   : > { %vm2078_vm1 = vmand %vm1982_vm14, %vm2062_vm0  ;;  %v3350_v57 = vpack.c.bf16 %v2596_v2, %v2595_v26 }
 0x351   : > { %v2992_v22 = vsel %vm2078_vm1, 1.0, %v3666_v16 }
 0x352   : > { %v2126_v46 = vadd.f32 %v2992_v22, %v1902_v34  ;;  %v2598_v34 = vld [vmem:[%s5745_s5 + $0x68] sm:$0xff]  ;;  %v2599_v22 = vld [vmem:[%s5745_s5 + $0x70] sm:$0xff] }
 0x353   : > { %v1967_v13 = vpop.permute.xlu1 %1966  ;;  %v3354_v56 = vpack.c.bf16 %v2598_v34, %v2597_v4 }
 0x354   : > { %vm1983_vm4 = vcmp.eq.s32.totalorder %v4519_v48, %v1967_v13  ;;  %3151 = vmatprep.mubr.f32.mxu0 %v2126_v46  ;;  %v3358_v46 = vpack.c.bf16 %v2600_v19, %v2599_v22 }
 0x355   : > { %vm2079_vm6 = vmand %vm1983_vm4, %vm2063_vm2 }
 0x356   : > { %v2993_v1 = vsel %vm2079_vm6, 1.0, %v3666_v16 }
 0x357   : > { %v2127_v33 = vadd.f32 %v2993_v1, %v1903_v30 }
 0x358   : > { %v2292_v29 = vpop.permute.xlu1 %2291 }
 0x359   : > { %3526 = vrcp.f32 %v2292_v29  ;;  %3152 = vmatmul.mubr.f32.gmra.mrb[14].mxu0 %v2127_v33 }
 0x35b   : > { %v3141_v62 = vpop.f32.mrb[6].mxu0 }
 0x35c   : > { %v2297_v32 = vpop.permute.xlu1 %2296  ;;  %v2240_v60 = vpop.f32.mrb[7].mxu0 }
 0x35d   : > { %3528 = vrcp.f32 %v2297_v32 }
 0x35e   : > { %3530 = vrcp.f32 %v2302_v59 }
 0x360   : > { %v2307_v27 = vpop.permute.xlu1 %2306 }
 0x361   : > { %3532 = vrcp.f32 %v2307_v27 }
 0x362   : > { %3534 = vrcp.f32 %v2312_v15 }
 0x363   : > { %v3527_v48 = vpop.eup %3526 }
 0x364   : > { %v2317_v37 = vpop.permute.xlu1 %2316  ;;  %v2370_v31 = vmul.f32 %v3527_v48, %v5129_v24 }
 0x365   : > { %3536 = vrcp.f32 %v2317_v37 }
 0x366   : > { %3538 = vrcp.f32 %v2322_v21  ;;  %3186 = vmatprep.mubr.f32.mxu1 %v2370_v31 }
 0x367   : > { %v3529_v16 = vpop.eup %3528 }
 0x368   : > { %v3531_v10 = vpop.eup %3530  ;;  %v2327_v55 = vpop.permute.xlu1 %2326  ;;  %v2372_v35 = vmul.f32 %v3529_v16, %v5119_v8 }
 0x369   : > { %v2374_v9 = vmul.f32 %v3531_v10, %v5478_v51  ;;  %3540 = vrcp.f32 %v2327_v55 }
 0x36a   : > { %3187 = vmatmul.mubr.f32.vlgmr.msra.gmra.mrb[0].mxu1 %v2372_v35 }
 0x36b   : > { %v3533_v11 = vpop.eup %3532  ;;  %3189 = vmatprep.mubr.f32.mxu1 %v2374_v9 }
 0x36c   : > { %v3535_v45 = vpop.eup %3534  ;;  %v2376_v39 = vmul.f32 %v3533_v11, %v5474_v23  ;;  %v2337_v6 = vpop.permute.xlu1 %2336  ;;  %v2585_v23 = vld [vmem:[%s5745_s5] sm:$0xff] }
 0x36d   : > { %v2378_v24 = vmul.f32 %v3535_v45, %v5566_v52  ;;  %3542 = vrcp.f32 %v2337_v6  ;;  %v2586_v52 = vld [vmem:[%s5745_s5 + $0x8] sm:$0xff] }
 0x36e   : > { %3190 = vmatmul.mubr.f32.gmra.mrb[2].mxu1 %v2376_v39  ;;  %3544 = vrcp.f32 %v2332_v25  ;;  %v3330_v41 = vpack.c.bf16 %v2586_v52, %v2585_v23  ;;  %v2994_v39 = vld [vmem:[%s5744_s4] ss:$0 sm:$0xff] }
 0x36f   : > { %v3537_v47 = vpop.eup %3536  ;;  %3192 = vmatprep.mubr.f32.mxu1 %v2378_v24 }
 0x370   : > { %v3539_v14 = vpop.eup %3538  ;;  %v2380_v40 = vmul.f32 %v3537_v47, %v5564_v0  ;;  %v2587_v0 = vld [vmem:[%s5745_s5 + $0x10] sm:$0xff]  ;;  %3331 = vmatprep.subr.bf16.mxu0 %v3330_v41  ;;  %3362 = vmatprep.subr.bf16.mxu1 %v3330_v41  ;;  %v2347_v3 = vpop.permute.xlu1 %2346 }
 0x371   : > { %v2382_v18 = vmul.f32 %v3539_v14, %v2240_v60  ;;  %v3334_v20 = vpack.c.bf16 %v2588_v54, %v2587_v0  ;;  %3333 = vmatpush3.bf16.msra.mxu0 %v3330_v41  ;;  %3370 = vmatpush3.bf16.msra.mxu1 %v3330_v41  ;;  %3546 = vrcp.f32 %v2347_v3 }
 0x372   : > { %3193 = vmatmul.mubr.f32.gmra.mrb[4].mxu1 %v2380_v40  ;;  %3548 = vrcp.f32 %v2342_v43 }
 0x373   : > { %v3541_v8 = vpop.eup %3540  ;;  %3195 = vmatprep.mubr.f32.mxu1 %v2382_v18  ;;  %3335 = vmatprep.subr.bf16.mxu0 %v3334_v20 }
 0x374   : > { %v2384_v51 = vmul.f32 %v3541_v8, %v3141_v62  ;;  %3363 = vmatprep.subr.bf16.mxu1 %v3334_v20  ;;  %v2352_v62 = vpop.permute.xlu0 %2351  ;;  %v2357_v32 = vpop.permute.xlu1 %2356 }
 0x375   : > { %3337 = vmatpush3.bf16.msra.mxu0 %v3334_v20  ;;  %3371 = vmatpush3.bf16.msra.mxu1 %v3334_v20  ;;  %3550 = vrcp.f32 %v2352_v62 }
 0x376   : > { %3196 = vmatmul.mubr.f32.gmra.mrb[6].mxu1 %v2384_v51  ;;  %3339 = vmatprep.subr.bf16.mxu0 %v3338_v12  ;;  %3552 = vrcp.f32 %v2357_v32  ;;  %v2995_v32 = vld [vmem:[%s5746_s6] ss:$0 sm:$0xff] }
 0x377   : > { %v3543_v7 = vpop.eup %3542  ;;  %3364 = vmatprep.subr.bf16.mxu1 %v3338_v12 }
 0x378   : > { %v3545_v49 = vpop.eup %3544  ;;  %v2362_v21 = vpop.permute.xlu0 %2361 }
 0x379   : > { %3341 = vmatpush3.bf16.msra.mxu0 %v3338_v12  ;;  %3372 = vmatpush3.bf16.msra.mxu1 %v3338_v12  ;;  %v2367_v16 = vpop.permute.xlu1 %2366  ;;  %3554 = vrcp.f32 %v2362_v21 }
 0x37a   : > { %3343 = vmatprep.subr.bf16.mxu0 %v3342_v50  ;;  %3365 = vmatprep.subr.bf16.mxu1 %v3342_v50  ;;  %3556 = vrcp.f32 %v2367_v16 }
 0x37b   : > { %v3547_v13 = vpop.eup %3546 }
 0x37c   : > { %v3549_v1 = vpop.eup %3548 }
 0x37d   : > { %3345 = vmatpush3.bf16.msra.mxu0 %v3342_v50  ;;  %3373 = vmatpush3.bf16.msra.mxu1 %v3342_v50 }
 0x37e   : > { %3347 = vmatprep.subr.bf16.mxu0 %v3346_v38  ;;  %3366 = vmatprep.subr.bf16.mxu1 %v3346_v38 }
 0x37f   : > { %v3551_v15 = vpop.eup %3550 }
 0x380   : > { %v3553_v48 = vpop.eup %3552 }
 0x381   : > { %3349 = vmatpush3.bf16.msra.mxu0 %v3346_v38  ;;  %3374 = vmatpush3.bf16.msra.mxu1 %v3346_v38 }
 0x382   : > { %3351 = vmatprep.subr.bf16.mxu0 %v3350_v57  ;;  %3367 = vmatprep.subr.bf16.mxu1 %v3350_v57 }
 0x383   : > { %v3555_v55 = vpop.eup %3554 }
 0x384   : > { %v3557_v9 = vpop.eup %3556 }
 0x385   : > { %3353 = vmatpush3.bf16.msra.mxu0 %v3350_v57  ;;  %3375 = vmatpush3.bf16.msra.mxu1 %v3350_v57 }
 0x386   : > { %3355 = vmatprep.subr.bf16.mxu0 %v3354_v56  ;;  %3368 = vmatprep.subr.bf16.mxu1 %v3354_v56 }
 0x389   : > { %3357 = vmatpush3.bf16.msra.mxu0 %v3354_v56  ;;  %3376 = vmatpush3.bf16.msra.mxu1 %v3354_v56 }
 0x38a   : > { %3359 = vmatprep.subr.bf16.mxu0 %v3358_v46  ;;  %3369 = vmatprep.subr.bf16.mxu1 %v3358_v46 }
 0x38d   : > { %3361 = vmatpush3.bf16.msra.mxu0 %v3358_v46  ;;  %3377 = vmatpush3.bf16.msra.mxu1 %v3358_v46 }
 0x39e   : > { %v3144_v53 = vpop.f32.mrb[8].mxu0 }
 0x39f   : > { %v2250_v44 = vpop.f32.mrb[9].mxu0  ;;  %v2388_v58 = vmul.f32 %v3543_v7, %v3144_v53 }
 0x3a0   : > { %v2386_v36 = vmul.f32 %v3545_v49, %v2250_v44 }
 0x3a2   : > { %3198 = vmatprep.mubr.f32.mxu1 %v2386_v36 }
 0x3a3   : > { %3199 = vmatmul.mubr.f32.gmra.mrb[8].mxu1 %v2388_v58 }
 0x3e1   : > { %v3147_v30 = vpop.f32.mrb[10].mxu0 }
 0x3e2   : > { %v2260_v33 = vpop.f32.mrb[11].mxu0  ;;  %v2392_v59 = vmul.f32 %v3547_v13, %v3147_v30 }
 0x3e3   : > { %v2390_v29 = vmul.f32 %v3549_v1, %v2260_v33 }
 0x3e5   : > { %3201 = vmatprep.mubr.f32.mxu1 %v2390_v29 }
 0x3e6   : > { %3202 = vmatmul.mubr.f32.gmra.mrb[10].mxu1 %v2392_v59 }
 0x415   : > { %v3150_v60 = vpop.f32.mrb[12].mxu0 }
 0x416   : > { %v2270_v27 = vpop.f32.mrb[13].mxu0  ;;  %v2396_v31 = vmul.f32 %v3553_v48, %v3150_v60 }
 0x417   : > { %v2394_v37 = vmul.f32 %v3551_v15, %v2270_v27 }
 0x419   : > { %3204 = vmatprep.mubr.f32.mxu1 %v2394_v37 }
 0x41a   : > { %3205 = vmatmul.mubr.f32.gmra.mrb[12].mxu1 %v2396_v31 }
 0x42c   : > { %v3153_v10 = vpop.f32.mrb[14].mxu0 }
 0x42d   : > { %v2280_v35 = vpop.f32.mrb[15].mxu0  ;;  %v2400_v45 = vmul.f32 %v3557_v9, %v3153_v10 }
 0x42e   : > { %v2398_v11 = vmul.f32 %v3555_v55, %v2280_v35 }
 0x430   : > { %3207 = vmatprep.mubr.f32.mxu1 %v2398_v11 }
 0x431   : > { %3208 = vmatmul.mubr.f32.gmra.mrb[14].mxu1 %v2400_v45 }
 0x43d   : > { %v3188_v24 = vpop.f32.mrb[0].mxu1 }
 0x43e   : > { %v2496_v47 = vadd.f32 %v3188_v24, %v2994_v39  ;;  %v2490_v14 = vpop.f32.mrb[1].mxu1 }
 0x43f   : > { %v2491_v40 = vadd.f32 %v2994_v39, %v2490_v14 }
 0x440   : > { %v2570_v51 = vmax.f32 %v2496_v47, 0.0 }
 0x441   : > { %v2569_v18 = vmax.f32 %v2491_v40, 0.0  ;;  %v3191_v8 = vpop.f32.mrb[2].mxu1 }
 0x442   : > { %v2506_v6 = vadd.f32 %v3191_v8, %v2994_v39  ;;  %v2500_v25 = vpop.f32.mrb[3].mxu1 }
 0x443   : > { %v2501_v23 = vadd.f32 %v2994_v39, %v2500_v25  ;;  %3242 = vmatprep.mubr.f32.mxu0 %v2569_v18 }
 0x444   : > { %3243 = vmatmul.mubr.f32.vlgmr.msra.gmra.mrb[16].mxu0 %v2570_v51  ;;  %v2572_v41 = vmax.f32 %v2506_v6, 0.0 }
 0x445   : > { %v2571_v52 = vmax.f32 %v2501_v23, 0.0  ;;  %v3194_v0 = vpop.f32.mrb[4].mxu1 }
 0x446   : > { %v2516_v54 = vadd.f32 %v3194_v0, %v2994_v39  ;;  %v2510_v20 = vpop.f32.mrb[5].mxu1 }
 0x447   : > { %v2511_v7 = vadd.f32 %v2994_v39, %v2510_v20  ;;  %3245 = vmatprep.mubr.f32.mxu0 %v2571_v52 }
 0x448   : > { %3246 = vmatmul.mubr.f32.gmra.mrb[18].mxu0 %v2572_v41  ;;  %v2574_v44 = vmax.f32 %v2516_v54, 0.0 }
 0x449   : > { %v2573_v53 = vmax.f32 %v2511_v7, 0.0  ;;  %v3197_v49 = vpop.f32.mrb[6].mxu1 }
 0x44a   : > { %v2526_v36 = vadd.f32 %v3197_v49, %v2994_v39  ;;  %v2520_v58 = vpop.f32.mrb[7].mxu1 }
 0x44b   : > { %v2521_v5 = vadd.f32 %v2994_v39, %v2520_v58  ;;  %3248 = vmatprep.mubr.f32.mxu0 %v2573_v53 }
 0x44c   : > { %3249 = vmatmul.mubr.f32.gmra.mrb[20].mxu0 %v2574_v44  ;;  %v2576_v12 = vmax.f32 %v2526_v36, 0.0 }
 0x44d   : > { %v2575_v17 = vmax.f32 %v2521_v5, 0.0 }
 0x44f   : > { %3251 = vmatprep.mubr.f32.mxu0 %v2575_v17 }
 0x450   : > { %3252 = vmatmul.mubr.f32.gmra.mrb[22].mxu0 %v2576_v12 }
 0x476   : > { %v3200_v28 = vpop.f32.mrb[8].mxu1 }
 0x477   : > { %v2536_v42 = vadd.f32 %v3200_v28, %v2994_v39  ;;  %v2530_v50 = vpop.f32.mrb[9].mxu1 }
 0x478   : > { %v2531_v63 = vadd.f32 %v2994_v39, %v2530_v50 }
 0x479   : > { %v2578_v26 = vmax.f32 %v2536_v42, 0.0 }
 0x47a   : > { %v2577_v61 = vmax.f32 %v2531_v63, 0.0 }
 0x47c   : > { %3254 = vmatprep.mubr.f32.mxu1 %v2577_v61 }
 0x47d   : > { %3255 = vmatmul.mubr.f32.vlgmr.msra.gmra.mrb[16].mxu1 %v2578_v26 }
 0x4b9   : > { %v3203_v38 = vpop.f32.mrb[10].mxu1 }
 0x4ba   : > { %v2546_v2 = vadd.f32 %v3203_v38, %v2994_v39  ;;  %v2540_v57 = vpop.f32.mrb[11].mxu1 }
 0x4bb   : > { %v2541_v4 = vadd.f32 %v2994_v39, %v2540_v57 }
 0x4bc   : > { %v2580_v56 = vmax.f32 %v2546_v2, 0.0 }
 0x4bd   : > { %v2579_v34 = vmax.f32 %v2541_v4, 0.0 }
 0x4bf   : > { %3257 = vmatprep.mubr.f32.mxu1 %v2579_v34 }
 0x4c0   : > { %3258 = vmatmul.mubr.f32.gmra.mrb[18].mxu1 %v2580_v56 }
 0x4ed   : > { %v3206_v22 = vpop.f32.mrb[12].mxu1 }
 0x4ee   : > { %v2556_v19 = vadd.f32 %v3206_v22, %v2994_v39  ;;  %v2550_v46 = vpop.f32.mrb[13].mxu1 }
 0x4ef   : > { %v2551_v3 = vadd.f32 %v2994_v39, %v2550_v46 }
 0x4f0   : > { %v2582_v13 = vmax.f32 %v2556_v19, 0.0 }
 0x4f1   : > { %v2581_v43 = vmax.f32 %v2551_v3, 0.0 }
 0x4f3   : > { %3260 = vmatprep.mubr.f32.mxu1 %v2581_v43 }
 0x4f4   : > { %3261 = vmatmul.mubr.f32.gmra.mrb[20].mxu1 %v2582_v13 }
 0x504   : > { %v3209_v30 = vpop.f32.mrb[14].mxu1 }
 0x505   : > { %v2566_v1 = vadd.f32 %v3209_v30, %v2994_v39  ;;  %v2560_v33 = vpop.f32.mrb[15].mxu1 }
 0x506   : > { %v2561_v29 = vadd.f32 %v2994_v39, %v2560_v33 }
 0x507   : > { %v2584_v62 = vmax.f32 %v2566_v1, 0.0 }
 0x508   : > { %v2583_v59 = vmax.f32 %v2561_v29, 0.0 }
 0x50a   : > { %3263 = vmatprep.mubr.f32.mxu1 %v2583_v59 }
 0x50b   : > { %3264 = vmatmul.mubr.f32.gmra.mrb[22].mxu1 %v2584_v62 }
 0x517   : > { %v3244_v60 = vpop.f32.mrb[16].mxu0 }
 0x518   : > { %v2680_v15 = vadd.f32 %v3244_v60, %v2995_v32  ;;  %v2674_v27 = vpop.f32.mrb[17].mxu0 }
 0x519   : > { %v2675_v48 = vadd.f32 %v2995_v32, %v2674_v27 }
 0x51a   : > { %2754 = vst [vmem:[%s5670_s16 + $0x8] sm:$0xff] %v2680_v15 }
 0x51b   : > { %2753 = vst [vmem:[%s5670_s16] sm:$0xff] %v2675_v48  ;;  %v3247_v37 = vpop.f32.mrb[18].mxu0 }
 0x51c   : > { %v2690_v31 = vadd.f32 %v3247_v37, %v2995_v32  ;;  %v2684_v21 = vpop.f32.mrb[19].mxu0 }
 0x51d   : > { %v2685_v16 = vadd.f32 %v2995_v32, %v2684_v21 }
 0x51e   : > { %2756 = vst [vmem:[%s5670_s16 + $0x18] sm:$0xff] %v2690_v31 }
 0x51f   : > { %2755 = vst [vmem:[%s5670_s16 + $0x10] sm:$0xff] %v2685_v16  ;;  %v3250_v10 = vpop.f32.mrb[20].mxu0 }
 0x520   : > { %v2700_v55 = vadd.f32 %v3250_v10, %v2995_v32  ;;  %v2694_v35 = vpop.f32.mrb[21].mxu0 }
 0x521   : > { %v2695_v9 = vadd.f32 %v2995_v32, %v2694_v35 }
 0x522   : > { %2758 = vst [vmem:[%s5670_s16 + $0x28] sm:$0xff] %v2700_v55 }
 0x523   : > { %2757 = vst [vmem:[%s5670_s16 + $0x20] sm:$0xff] %v2695_v9  ;;  %v3253_v11 = vpop.f32.mrb[22].mxu0 }
 0x524   : > { %v2710_v45 = vadd.f32 %v3253_v11, %v2995_v32  ;;  %v2704_v39 = vpop.f32.mrb[23].mxu0 }
 0x525   : > { %v2705_v24 = vadd.f32 %v2995_v32, %v2704_v39 }
 0x526   : > { %2760 = vst [vmem:[%s5670_s16 + $0x38] sm:$0xff] %v2710_v45 }
 0x527   : > { %2759 = vst [vmem:[%s5670_s16 + $0x30] sm:$0xff] %v2705_v24 }
 0x550   : > { %v3256_v47 = vpop.f32.mrb[16].mxu1 }
 0x551   : > { %v2720_v14 = vadd.f32 %v3256_v47, %v2995_v32  ;;  %v2714_v40 = vpop.f32.mrb[17].mxu1 }
 0x552   : > { %v2715_v18 = vadd.f32 %v2995_v32, %v2714_v40 }
 0x553   : > { %2762 = vst [vmem:[%s5670_s16 + $0x48] sm:$0xff] %v2720_v14 }
 0x554   : > { %2761 = vst [vmem:[%s5670_s16 + $0x40] sm:$0xff] %v2715_v18 }
 0x593   : > { %v3259_v8 = vpop.f32.mrb[18].mxu1 }
 0x594   : > { %v2730_v51 = vadd.f32 %v3259_v8, %v2995_v32  ;;  %v2724_v6 = vpop.f32.mrb[19].mxu1 }
 0x595   : > { %v2725_v25 = vadd.f32 %v2995_v32, %v2724_v6 }
 0x596   : > { %2764 = vst [vmem:[%s5670_s16 + $0x58] sm:$0xff] %v2730_v51 }
 0x597   : > { %2763 = vst [vmem:[%s5670_s16 + $0x50] sm:$0xff] %v2725_v25 }
 0x5c7   : > { %v3262_v23 = vpop.f32.mrb[20].mxu1 }
 0x5c8   : > { %v2740_v52 = vadd.f32 %v3262_v23, %v2995_v32  ;;  %v2734_v0 = vpop.f32.mrb[21].mxu1 }
 0x5c9   : > { %v2735_v41 = vadd.f32 %v2995_v32, %v2734_v0 }
 0x5ca   : > { %2766 = vst [vmem:[%s5670_s16 + $0x68] sm:$0xff] %v2740_v52 }
 0x5cb   : > { %2765 = vst [vmem:[%s5670_s16 + $0x60] sm:$0xff] %v2735_v41 }
 0x5de   : > { %v3265_v54 = vpop.f32.mrb[22].mxu1 }
 0x5df   : > { %v2750_v20 = vadd.f32 %v3265_v54, %v2995_v32  ;;  %v2744_v7 = vpop.f32.mrb[23].mxu1 }
 0x5e0   : > { %v2745_v53 = vadd.f32 %v2995_v32, %v2744_v7 }
 0x5e1   : > { %2768 = vst [vmem:[%s5670_s16 + $0x78] sm:$0xff] %v2750_v20 }
 0x5e2   : > { %2767 = vst [vmem:[%s5670_s16 + $0x70] sm:$0xff] %v2745_v53 }
 0x5e3   : > { %3607 = shalt.err (!%p3604_p3)
}
 0x5e4   : > { %s3608_s13 = scalar_lea.hbm %s5691_s22, 2048  ;;  %s3612_s15 = scalar_lea.hbm %s5747_s7, 4096 }
 0x5e5   : > { %p3609_p4 = scmp.ne.s32.totalorder %s5691_s22, %s3608_s13  ;;  %p3613_p9 = scmp.lt.u32.totalorder %s5691_s22, %s5747_s7 }
 0x5e6   : > { %p3614_p10 = scmp.lt.u32.totalorder %s3612_s15, %s3608_s13  ;;  %p3616_p12 = scmp.lt.u32.totalorder %s3608_s13, %s5691_s22 }
 0x5e7   : > { %p3610_p7 = pnand %p3609_p4, %p3748_p5 }
 0x5e8   : > { %p3615_p11 = por %p3614_p10, %p3613_p9 }
 0x5e9   : > { %p3611_p8 = pneg %p3610_p7 }
 0x5ea   : > { %p3617_p13 = por %p3616_p12, %p3615_p11 }
 0x5ec   : > { %p3618_p0 = pnand %p3617_p13, %p3611_p8 }
 0x5ee   : > { %3621 = shalt.err (!%p3618_p0)
}
 0x5ef   : > { %s3668_s21 = smov 128   ;;  %s3669_s20 = smov 8  }
 0x5f0   : > { %3378 = dma.vmem_to_hbm [thread:$0]  (%p3748_p5), %s5693_s19, 2048, %s5691_s22, %s5699_s23, %s3668_s21, %s3668_s21, %s3669_s20  }
 0x5f1 PF: > { %p3384_p1 = scmp.ge.s32.totalorder %s3656_s27, 2  ;;  %s2798_s28 = sand.u32 1, %s3644_s24  }
 0x5f2   : > { %s2799_s29 = scalar_lea.sflag [#allocation3], %s2798_s28 }
 0x5f3   : > { %p3381_p2 = pnand %p3384_p1, %p3752_p6 }
 0x5f5   : > { %3639 = dma.done.wait (!%p3381_p2), %s2799_s29, 2048  }
 0x5f6   : > { %3641 = vsyncadd (!%p3381_p2), %s2799_s29, 4294965248  ;;  %p17_p3 = scmp.ge.s32.totalorder %s3735_s30, 4   ;;  %s6005_s24 = smov %s3648_s25 }
 0x5f7   : > { %s6006_s25 = smov %s3652_s26  ;;  %s6007_s26 = smov %s3746_s10 }
 0x5f8   : > { %s6008_s27 = smov %s3735_s30  ;;  %19 = sbr.rel (!%p17_p3) target bundleno = 3 (0x3), region = 86 }
 0x5ff   :  { %2804 = vsyncpa [#allocation3], 1 }
 0x600   :  { %2806 = vsyncpa [#allocation3 + $0x1], 1 }

</bundles_post_ra>
